<compile_context>
chip_gen: v7x
topology: tpu7x:2x2x1
jax: 0.10.0
libtpu: 0.0.40
codegen_flags: <defaults>
</compile_context>

<pallas_src>
import math

import jax
import jax.numpy as jnp
from jax.experimental import pallas as pl
from jax.experimental.pallas import tpu as pltpu


# Kernel weight order. All weights are pre-transposed to (in, out) so the
# kernel computes y = x @ W + b.  w_d1/b_d1 is the fused
# [item_fc_l1 | emb_fc_l1] first decoder layer, shape (32, 2048).
PARAM_ORDER = ("w_fc1", "b_fc1", "w_fc2", "b_fc2", "w_fc3", "b_fc3",
               "w_s1", "b_s1", "w_s2", "b_s2",
               "w_d1", "b_d1",
               "w_i2", "b_i2", "w_i3", "b_i3",
               "w_e2", "b_e2", "w_e3", "b_e3")


# --------------------------------------------------------------------------
# Kernel
# --------------------------------------------------------------------------
def _linear(x, w_ref, b_ref, relu):
    # bf16 operands on the MXU, f32 accumulation; bias/ReLU stay f32 (VPU).
    y = jnp.dot(x.astype(w_ref.dtype), w_ref[...],
                preferred_element_type=jnp.float32) + b_ref[...]
    return jnp.maximum(y, 0.0) if relu else y


def uae_kernel(user_ref, emb_ref,
               w_fc1, b_fc1, w_fc2, b_fc2, w_fc3, b_fc3,
               w_s1, b_s1, w_s2, b_s2,
               w_d1, b_d1,
               w_i2, b_i2, w_i3, b_i3,
               w_e2, b_e2, w_e3, b_e3,
               uvec_ref, uhat_ref, ehat_ref):
    # Inputs already arrive in bf16 (cast in the wrapper); they are consumed
    # only by bf16 MXU dots, so no f32 round-trip is performed here.

    # Encoder: item branch + social (embedding) branch.
    h_u = _linear(user_ref[...], w_fc1, b_fc1, relu=True)   # relu(fc_l1(user))
    user_vec = _linear(h_u, w_fc2, b_fc2, relu=True)        # relu(fc_l2(.))
    h_e = _linear(emb_ref[...], w_s1, b_s1, relu=True)      # relu(side_fc_l1)
    emb_vec = _linear(h_e, w_s2, b_s2, relu=True)           # relu(side_fc_l2)

    # Fuse branches and project to the 32-d code.
    uv = _linear(user_vec + emb_vec, w_fc3, b_fc3, relu=True)  # relu(fc_l3(.))
    uvec_ref[...] = uv

    # Both decoder heads share the same (tile_m, 32) LHS with K=32, far below
    # the MXU depth — one fused (32, 2048) dot, then slice the halves.
    hd = _linear(uv, w_d1, b_d1, relu=True)                  # (tile_m, 2048)

    # Item-rating decoder (user_hat) — no ReLU on the last layer.
    hi = _linear(hd[:, :1024], w_i2, b_i2, relu=True)
    uhat_ref[...] = _linear(hi, w_i3, b_i3, relu=False)

    # Social-embedding decoder (emb_hat) — no ReLU on the last layer.
    he = _linear(hd[:, 1024:], w_e2, b_e2, relu=True)
    ehat_ref[...] = _linear(he, w_e3, b_e3, relu=False)


# --------------------------------------------------------------------------
# Wrapper helpers
# --------------------------------------------------------------------------
def _cdiv(a, b):
    return -(-a // b)


def _round_up(x, m):
    return _cdiv(x, m) * m


def _nbytes(shape, dtype):
    return int(math.prod(shape)) * jnp.dtype(dtype).itemsize


def _tpu_vmem_cap_and_cores():
    """3/4 of physical VMEM (conservative budget) and TensorCores per chip."""
    cap, cores = 48 << 20, 1
    try:
        info = pltpu.get_tpu_info()
        cap = int(getattr(info, "vmem_capacity_bytes", 64 << 20)) * 3 // 4
        for attr in ("num_cores", "num_tensorcores", "tensorcore_count",
                     "cores_per_chip"):
            v = getattr(info, attr, None)
            if v:
                cores = max(1, int(v))
                break
    except Exception:
        pass
    return cap, cores


# --------------------------------------------------------------------------
# Wrapper
# --------------------------------------------------------------------------
def user_autoencoder_forward(user, user_emb, params):
    B, item_size = user.shape
    user_size = user_emb.shape[1]
    code_dim = params["w_fc3"].shape[1]          # 32

    # Kernel-side parameters: bf16 weights (halve HBM->VMEM weight traffic),
    # f32 biases, decoder first layers fused into (32, 2048).
    kp = {}
    for k, v in params.items():
        if k in ("w_i1", "b_i1", "w_e1", "b_e1"):
            continue
        kp[k] = v.astype(jnp.bfloat16) if k.startswith("w_") else v.astype(jnp.float32)
    kp["w_d1"] = jnp.concatenate([params["w_i1"], params["w_e1"]],
                                 axis=1).astype(jnp.bfloat16)
    kp["b_d1"] = jnp.concatenate([params["b_i1"], params["b_e1"]],
                                 axis=1).astype(jnp.float32)

    param_bytes = sum(_nbytes(v.shape, v.dtype) for v in kp.values())

    # ---- generation-aware batch tiling ------------------------------------
    vmem_cap, n_cores = _tpu_vmem_cap_and_cores()
    max_tile_m = 512 if vmem_cap >= (64 << 20) else 256   # v5e/v6e vs v7x

    # Per-row VMEM cost: bf16 input tiles + f32 output tiles (double-buffered)
    # plus an estimate of live f32 activations within one grid step.
    in_row = 2 * (item_size + user_size) * 2                      # bf16, x2 buf
    out_row = 2 * (code_dim + item_size + user_size) * 4          # f32,  x2 buf
    act_row = 6144 * 4                                            # live activations
    row_bytes = in_row + out_row + act_row
    slack = 6 << 20                                               # compiler temps

    row_budget = vmem_cap - param_bytes - slack
    if row_budget >= 16 * row_bytes:
        feasible = (row_budget // row_bytes) // 16 * 16
        max_tile_m = max(16, min(max_tile_m, feasible))
    # else: resident weights (nearly) exhaust VMEM at this size.
    # TODO(synk): switch to the K/N-tiled weight path (see file header) when
    #             item/user sizes push resident weights past the VMEM budget.

    # Balanced, 16-aligned tiles; at least n_cores grid steps (when the batch
    # is large enough) so "parallel" can shard across TensorCores on v7x.
    min_tiles = n_cores if B >= 16 * n_cores else 1
    n_tiles = max(min_tiles, _cdiv(B, max_tile_m))
    tile_m = max(16, _round_up(_cdiv(B, n_tiles), 16))
    b_pad = _round_up(B, tile_m)
    grid = (b_pad // tile_m,)

    # bf16 inputs (consumed only by bf16 MXU dots).
    user_b = user.astype(jnp.bfloat16)
    emb_b = user_emb.astype(jnp.bfloat16)
    if b_pad != B:
        user_b = jnp.pad(user_b, ((0, b_pad - B), (0, 0)))
        emb_b = jnp.pad(emb_b, ((0, b_pad - B), (0, 0)))

    def batch_spec(feat):
        return pl.BlockSpec((tile_m, feat), lambda i: (i, 0))

    def const_spec(arr):
        # Whole weight resident in VMEM; constant block index => fetched once.
        # Single-buffered: a second pipeline buffer would only double VMEM use.
        return pl.BlockSpec(arr.shape, lambda i: (0, 0),
                            pipeline_mode=pl.Buffered(1))

    in_specs = [batch_spec(item_size), batch_spec(user_size)]
    in_specs += [const_spec(kp[k]) for k in PARAM_ORDER]

    out_shape = (
        jax.ShapeDtypeStruct((b_pad, code_dim), jnp.float32),   # user_vec
        jax.ShapeDtypeStruct((b_pad, item_size), jnp.float32),  # user_hat
        jax.ShapeDtypeStruct((b_pad, user_size), jnp.float32),  # emb_hat
    )
    out_specs = (batch_spec(code_dim), batch_spec(item_size),
                 batch_spec(user_size))

    # Advisory cost estimate + VMEM budget derived from the actual footprint.
    layer_dims = [(item_size, 1024), (1024, 256), (user_size, 1024),
                  (1024, 256), (256, 32), (32, 2048),
                  (1024, 1024), (1024, item_size),
                  (1024, 1024), (1024, user_size)]
    flops = 2 * b_pad * sum(fi * fo for fi, fo in layer_dims)
    bytes_accessed = (param_bytes
                      + b_pad * (item_size + user_size) * 2          # bf16 in
                      + b_pad * (code_dim + item_size + user_size) * 4)  # f32 out

    need = param_bytes + tile_m * row_bytes + slack
    vmem_limit = int(min(max(need, 16 << 20), vmem_cap))

    outs = pl.pallas_call(
        uae_kernel,
        out_shape=out_shape,
        grid=grid,
        in_specs=in_specs,
        out_specs=out_specs,
        cost_estimate=pl.CostEstimate(
            flops=flops, transcendentals=0, bytes_accessed=bytes_accessed),
        compiler_params=pltpu.CompilerParams(
            dimension_semantics=("parallel",),
            vmem_limit_bytes=vmem_limit),
    )(user_b, emb_b, *[kp[k] for k in PARAM_ORDER])

    user_vec, user_hat, emb_hat = outs
    if b_pad != B:
        user_vec, user_hat, emb_hat = (user_vec[:B], user_hat[:B], emb_hat[:B])
    return user_vec, user_hat, emb_hat


# --------------------------------------------------------------------------
# Deterministic parameter init (mirrors var_init / torch defaults)
# --------------------------------------------------------------------------
def _xavier_normal_t(key, out_f, in_f):
    # torch.nn.init.xavier_normal_ on a (out, in) weight; return transpose so
    # the kernel computes x @ W.
    std = (2.0 / (in_f + out_f)) ** 0.5
    w = jax.random.normal(key, (out_f, in_f), jnp.float32) * std
    return jnp.transpose(w)                      # (in, out)


def _bias(key, out_f, in_f):
    # torch Linear default bias init: U(-1/sqrt(fan_in), 1/sqrt(fan_in)).
    bound = 1.0 / (in_f ** 0.5)
    return jax.random.uniform(key, (1, out_f), jnp.float32, -bound, bound)


def make_params(key, user_size, item_size):
    layer_dims = {
        "s1": (user_size, 1024), "s2": (1024, 256),
        "fc1": (item_size, 1024), "fc2": (1024, 256), "fc3": (256, 32),
        "i1": (32, 1024), "i2": (1024, 1024), "i3": (1024, item_size),
        "e1": (32, 1024), "e2": (1024, 1024), "e3": (1024, user_size),
    }
    params = {}
    keys = jax.random.split(key, 2 * len(layer_dims))
    for idx, (name, (fin, fout)) in enumerate(layer_dims.items()):
        kw, kb = keys[2 * idx], keys[2 * idx + 1]
        params["w_" + name] = _xavier_normal_t(kw, fout, fin)
        params["b_" + name] = _bias(kb, fout, fin)
    return params


# --------------------------------------------------------------------------
# Pure-JAX reference using the SAME bf16-operand / f32-accumulate numerics.
# --------------------------------------------------------------------------
def reference_forward(user, user_emb, p):
    def lin(x, w, b, relu=False):
        y = jnp.dot(x.astype(jnp.bfloat16), w.astype(jnp.bfloat16),
                    preferred_element_type=jnp.float32) + b
        return jnp.maximum(y, 0.0) if relu else y

    u = user.astype(jnp.bfloat16)
    e = user_emb.astype(jnp.bfloat16)
    user_vec = lin(lin(u, p["w_fc1"], p["b_fc1"], True),
                   p["w_fc2"], p["b_fc2"], True)
    emb_vec = lin(lin(e, p["w_s1"], p["b_s1"], True),
                  p["w_s2"], p["b_s2"], True)
    uv = lin(user_vec + emb_vec, p["w_fc3"], p["b_fc3"], True)
    user_hat = lin(lin(lin(uv, p["w_i1"], p["b_i1"], True),
                       p["w_i2"], p["b_i2"], True),
                   p["w_i3"], p["b_i3"])
    emb_hat = lin(lin(lin(uv, p["w_e1"], p["b_e1"], True),
                      p["w_e2"], p["b_e2"], True),
                  p["w_e3"], p["b_e3"])
    return uv, user_hat, emb_hat


# --------------------------------------------------------------------------
if __name__ == "__main__":
    USER_SIZE = 128   # opts.user_size (small synthetic size)
    ITEM_SIZE = 256   # opts.item_size (small synthetic size)
    BATCH = 8

    key = jax.random.PRNGKey(0)
    k_params, k_user, k_emb = jax.random.split(key, 3)

    params = make_params(k_params, USER_SIZE, ITEM_SIZE)
    user = jax.random.uniform(k_user, (BATCH, ITEM_SIZE), jnp.float32, 0.0, 5.0)
    user_emb = jax.random.normal(k_emb, (BATCH, USER_SIZE), jnp.float32)

    user_vec, user_hat, emb_hat = user_autoencoder_forward(user, user_emb, params)
    jax.block_until_ready((user_vec, user_hat, emb_hat))

    ref_uv, ref_uh, ref_eh = reference_forward(user, user_emb, params)
    assert user_vec.shape == (BATCH, 32)
    assert user_hat.shape == (BATCH, ITEM_SIZE)
    assert emb_hat.shape == (BATCH, USER_SIZE)
    assert jnp.allclose(user_vec, ref_uv, atol=2e-2, rtol=2e-2)
    assert jnp.allclose(user_hat, ref_uh, atol=2e-2, rtol=2e-2)
    assert jnp.allclose(emb_hat, ref_eh, atol=2e-2, rtol=2e-2)

    print("KERNEL_OK")
</pallas_src>

<mosaic_0001>
module attributes {stable_mosaic.version = 11 : i64} {
  func.func @uae_kernel(%arg0: i32, %arg1: memref<16x256xbf16, #tpu.memory_space<vmem>>, %arg2: memref<16x128xbf16, #tpu.memory_space<vmem>>, %arg3: memref<256x1024xbf16, #tpu.memory_space<vmem>>, %arg4: memref<1x1024xf32, #tpu.memory_space<vmem>>, %arg5: memref<1024x256xbf16, #tpu.memory_space<vmem>>, %arg6: memref<1x256xf32, #tpu.memory_space<vmem>>, %arg7: memref<256x32xbf16, #tpu.memory_space<vmem>>, %arg8: memref<1x32xf32, #tpu.memory_space<vmem>>, %arg9: memref<128x1024xbf16, #tpu.memory_space<vmem>>, %arg10: memref<1x1024xf32, #tpu.memory_space<vmem>>, %arg11: memref<1024x256xbf16, #tpu.memory_space<vmem>>, %arg12: memref<1x256xf32, #tpu.memory_space<vmem>>, %arg13: memref<32x2048xbf16, #tpu.memory_space<vmem>>, %arg14: memref<1x2048xf32, #tpu.memory_space<vmem>>, %arg15: memref<1024x1024xbf16, #tpu.memory_space<vmem>>, %arg16: memref<1x1024xf32, #tpu.memory_space<vmem>>, %arg17: memref<1024x256xbf16, #tpu.memory_space<vmem>>, %arg18: memref<1x256xf32, #tpu.memory_space<vmem>>, %arg19: memref<1024x1024xbf16, #tpu.memory_space<vmem>>, %arg20: memref<1x1024xf32, #tpu.memory_space<vmem>>, %arg21: memref<1024x128xbf16, #tpu.memory_space<vmem>>, %arg22: memref<1x128xf32, #tpu.memory_space<vmem>>, %arg23: memref<16x32xf32, #tpu.memory_space<vmem>>, %arg24: memref<16x256xf32, #tpu.memory_space<vmem>>, %arg25: memref<16x128xf32, #tpu.memory_space<vmem>>) attributes {dimension_semantics = [#tpu.dimension_semantics<parallel>], iteration_bounds = array<i64: 1>, scalar_prefetch = 0 : i64, scratch_operands = 0 : i64, tpu.core_type = #tpu.core_type<tc>, window_params = [{transform_indices = @transform_0, window_bounds = array<i64: 16, 256>}, {transform_indices = @transform_1, window_bounds = array<i64: 16, 128>}, {pipeline_mode = #tpu.pipeline_mode<synchronous>, transform_indices = @transform_2, window_bounds = array<i64: 256, 1024>}, {pipeline_mode = #tpu.pipeline_mode<synchronous>, transform_indices = @transform_3, window_bounds = array<i64: 1, 1024>}, {pipeline_mode = #tpu.pipeline_mode<synchronous>, transform_indices = @transform_4, window_bounds = array<i64: 1024, 256>}, {pipeline_mode = #tpu.pipeline_mode<synchronous>, transform_indices = @transform_5, window_bounds = array<i64: 1, 256>}, {pipeline_mode = #tpu.pipeline_mode<synchronous>, transform_indices = @transform_6, window_bounds = array<i64: 256, 32>}, {pipeline_mode = #tpu.pipeline_mode<synchronous>, transform_indices = @transform_7, window_bounds = array<i64: 1, 32>}, {pipeline_mode = #tpu.pipeline_mode<synchronous>, transform_indices = @transform_8, window_bounds = array<i64: 128, 1024>}, {pipeline_mode = #tpu.pipeline_mode<synchronous>, transform_indices = @transform_9, window_bounds = array<i64: 1, 1024>}, {pipeline_mode = #tpu.pipeline_mode<synchronous>, transform_indices = @transform_10, window_bounds = array<i64: 1024, 256>}, {pipeline_mode = #tpu.pipeline_mode<synchronous>, transform_indices = @transform_11, window_bounds = array<i64: 1, 256>}, {pipeline_mode = #tpu.pipeline_mode<synchronous>, transform_indices = @transform_12, window_bounds = array<i64: 32, 2048>}, {pipeline_mode = #tpu.pipeline_mode<synchronous>, transform_indices = @transform_13, window_bounds = array<i64: 1, 2048>}, {pipeline_mode = #tpu.pipeline_mode<synchronous>, transform_indices = @transform_14, window_bounds = array<i64: 1024, 1024>}, {pipeline_mode = #tpu.pipeline_mode<synchronous>, transform_indices = @transform_15, window_bounds = array<i64: 1, 1024>}, {pipeline_mode = #tpu.pipeline_mode<synchronous>, transform_indices = @transform_16, window_bounds = array<i64: 1024, 256>}, {pipeline_mode = #tpu.pipeline_mode<synchronous>, transform_indices = @transform_17, window_bounds = array<i64: 1, 256>}, {pipeline_mode = #tpu.pipeline_mode<synchronous>, transform_indices = @transform_18, window_bounds = array<i64: 1024, 1024>}, {pipeline_mode = #tpu.pipeline_mode<synchronous>, transform_indices = @transform_19, window_bounds = array<i64: 1, 1024>}, {pipeline_mode = #tpu.pipeline_mode<synchronous>, transform_indices = @transform_20, window_bounds = array<i64: 1024, 128>}, {pipeline_mode = #tpu.pipeline_mode<synchronous>, transform_indices = @transform_21, window_bounds = array<i64: 1, 128>}, {transform_indices = @transform_22, window_bounds = array<i64: 16, 32>}, {transform_indices = @transform_23, window_bounds = array<i64: 16, 256>}, {transform_indices = @transform_24, window_bounds = array<i64: 16, 128>}]} {
    %c0 = arith.constant 0 : index
    %c0_0 = arith.constant 0 : index
    %0 = vector.load %arg1[%c0, %c0_0] : memref<16x256xbf16, #tpu.memory_space<vmem>>, vector<16x256xbf16>
    %c0_1 = arith.constant 0 : index
    %c0_2 = arith.constant 0 : index
    %1 = vector.load %arg3[%c0_1, %c0_2] : memref<256x1024xbf16, #tpu.memory_space<vmem>>, vector<256x1024xbf16>
    %cst = arith.constant dense<0.000000e+00> : vector<16x1024xf32>
    %2 = tpu.matmul %0, %1, %cst {dimension_numbers = #tpu.dot_dimension_numbers<[1], [0], [0], [1], [0, 0, 1, 1], [], []>} : vector<16x256xbf16>, vector<256x1024xbf16>, vector<16x1024xf32> -> vector<16x1024xf32>
    %c0_3 = arith.constant 0 : index
    %c0_4 = arith.constant 0 : index
    %3 = vector.load %arg4[%c0_3, %c0_4] : memref<1x1024xf32, #tpu.memory_space<vmem>>, vector<1x1024xf32>
    %4 = vector.broadcast %3 : vector<1x1024xf32> to vector<16x1024xf32>
    %5 = arith.addf %2, %4 : vector<16x1024xf32>
    %cst_5 = arith.constant 0.000000e+00 : f32
    %6 = vector.broadcast %cst_5 : f32 to vector<16x1024xf32>
    %7 = arith.maximumf %5, %6 : vector<16x1024xf32>
    %8 = arith.truncf %7 : vector<16x1024xf32> to vector<16x1024xbf16>
    %c0_6 = arith.constant 0 : index
    %c0_7 = arith.constant 0 : index
    %9 = vector.load %arg5[%c0_6, %c0_7] : memref<1024x256xbf16, #tpu.memory_space<vmem>>, vector<1024x256xbf16>
    %cst_8 = arith.constant dense<0.000000e+00> : vector<16x256xf32>
    %10 = tpu.matmul %8, %9, %cst_8 {dimension_numbers = #tpu.dot_dimension_numbers<[1], [0], [0], [1], [0, 0, 1, 1], [], []>} : vector<16x1024xbf16>, vector<1024x256xbf16>, vector<16x256xf32> -> vector<16x256xf32>
    %c0_9 = arith.constant 0 : index
    %c0_10 = arith.constant 0 : index
    %11 = vector.load %arg6[%c0_9, %c0_10] : memref<1x256xf32, #tpu.memory_space<vmem>>, vector<1x256xf32>
    %12 = vector.broadcast %11 : vector<1x256xf32> to vector<16x256xf32>
    %13 = arith.addf %10, %12 : vector<16x256xf32>
    %cst_11 = arith.constant 0.000000e+00 : f32
    %14 = vector.broadcast %cst_11 : f32 to vector<16x256xf32>
    %15 = arith.maximumf %13, %14 : vector<16x256xf32>
    %c0_12 = arith.constant 0 : index
    %c0_13 = arith.constant 0 : index
    %16 = vector.load %arg2[%c0_12, %c0_13] : memref<16x128xbf16, #tpu.memory_space<vmem>>, vector<16x128xbf16>
    %c0_14 = arith.constant 0 : index
    %c0_15 = arith.constant 0 : index
    %17 = vector.load %arg9[%c0_14, %c0_15] : memref<128x1024xbf16, #tpu.memory_space<vmem>>, vector<128x1024xbf16>
    %cst_16 = arith.constant dense<0.000000e+00> : vector<16x1024xf32>
    %18 = tpu.matmul %16, %17, %cst_16 {dimension_numbers = #tpu.dot_dimension_numbers<[1], [0], [0], [1], [0, 0, 1, 1], [], []>} : vector<16x128xbf16>, vector<128x1024xbf16>, vector<16x1024xf32> -> vector<16x1024xf32>
    %c0_17 = arith.constant 0 : index
    %c0_18 = arith.constant 0 : index
    %19 = vector.load %arg10[%c0_17, %c0_18] : memref<1x1024xf32, #tpu.memory_space<vmem>>, vector<1x1024xf32>
    %20 = vector.broadcast %19 : vector<1x1024xf32> to vector<16x1024xf32>
    %21 = arith.addf %18, %20 : vector<16x1024xf32>
    %cst_19 = arith.constant 0.000000e+00 : f32
    %22 = vector.broadcast %cst_19 : f32 to vector<16x1024xf32>
    %23 = arith.maximumf %21, %22 : vector<16x1024xf32>
    %24 = arith.truncf %23 : vector<16x1024xf32> to vector<16x1024xbf16>
    %c0_20 = arith.constant 0 : index
    %c0_21 = arith.constant 0 : index
    %25 = vector.load %arg11[%c0_20, %c0_21] : memref<1024x256xbf16, #tpu.memory_space<vmem>>, vector<1024x256xbf16>
    %cst_22 = arith.constant dense<0.000000e+00> : vector<16x256xf32>
    %26 = tpu.matmul %24, %25, %cst_22 {dimension_numbers = #tpu.dot_dimension_numbers<[1], [0], [0], [1], [0, 0, 1, 1], [], []>} : vector<16x1024xbf16>, vector<1024x256xbf16>, vector<16x256xf32> -> vector<16x256xf32>
    %c0_23 = arith.constant 0 : index
    %c0_24 = arith.constant 0 : index
    %27 = vector.load %arg12[%c0_23, %c0_24] : memref<1x256xf32, #tpu.memory_space<vmem>>, vector<1x256xf32>
    %28 = vector.broadcast %27 : vector<1x256xf32> to vector<16x256xf32>
    %29 = arith.addf %26, %28 : vector<16x256xf32>
    %cst_25 = arith.constant 0.000000e+00 : f32
    %30 = vector.broadcast %cst_25 : f32 to vector<16x256xf32>
    %31 = arith.maximumf %29, %30 : vector<16x256xf32>
    %32 = arith.addf %15, %31 : vector<16x256xf32>
    %33 = arith.truncf %32 : vector<16x256xf32> to vector<16x256xbf16>
    %c0_26 = arith.constant 0 : index
    %c0_27 = arith.constant 0 : index
    %34 = vector.load %arg7[%c0_26, %c0_27] : memref<256x32xbf16, #tpu.memory_space<vmem>>, vector<256x32xbf16>
    %cst_28 = arith.constant dense<0.000000e+00> : vector<16x32xf32>
    %35 = tpu.matmul %33, %34, %cst_28 {dimension_numbers = #tpu.dot_dimension_numbers<[1], [0], [0], [1], [0, 0, 1, 1], [], []>} : vector<16x256xbf16>, vector<256x32xbf16>, vector<16x32xf32> -> vector<16x32xf32>
    %c0_29 = arith.constant 0 : index
    %c0_30 = arith.constant 0 : index
    %36 = vector.load %arg8[%c0_29, %c0_30] : memref<1x32xf32, #tpu.memory_space<vmem>>, vector<1x32xf32>
    %37 = vector.broadcast %36 : vector<1x32xf32> to vector<16x32xf32>
    %38 = arith.addf %35, %37 : vector<16x32xf32>
    %cst_31 = arith.constant 0.000000e+00 : f32
    %39 = vector.broadcast %cst_31 : f32 to vector<16x32xf32>
    %40 = arith.maximumf %38, %39 : vector<16x32xf32>
    %c0_32 = arith.constant 0 : index
    %c0_33 = arith.constant 0 : index
    %41 = vector.load %arg23[%c0_32, %c0_33] : memref<16x32xf32, #tpu.memory_space<vmem>>, vector<16x32xf32>
    tpu.vector_store %arg23[%c0_32, %c0_33], %40 {strides = array<i32>} : memref<16x32xf32, #tpu.memory_space<vmem>>, vector<16x32xf32>,
    %42 = arith.truncf %40 : vector<16x32xf32> to vector<16x32xbf16>
    %c0_34 = arith.constant 0 : index
    %c0_35 = arith.constant 0 : index
    %43 = vector.load %arg13[%c0_34, %c0_35] : memref<32x2048xbf16, #tpu.memory_space<vmem>>, vector<32x2048xbf16>
    %cst_36 = arith.constant dense<0.000000e+00> : vector<16x2048xf32>
    %44 = tpu.matmul %42, %43, %cst_36 {dimension_numbers = #tpu.dot_dimension_numbers<[1], [0], [0], [1], [0, 0, 1, 1], [], []>} : vector<16x32xbf16>, vector<32x2048xbf16>, vector<16x2048xf32> -> vector<16x2048xf32>
    %c0_37 = arith.constant 0 : index
    %c0_38 = arith.constant 0 : index
    %45 = vector.load %arg14[%c0_37, %c0_38] : memref<1x2048xf32, #tpu.memory_space<vmem>>, vector<1x2048xf32>
    %46 = vector.broadcast %45 : vector<1x2048xf32> to vector<16x2048xf32>
    %47 = arith.addf %44, %46 : vector<16x2048xf32>
    %cst_39 = arith.constant 0.000000e+00 : f32
    %48 = vector.broadcast %cst_39 : f32 to vector<16x2048xf32>
    %49 = arith.maximumf %47, %48 : vector<16x2048xf32>
    %50 = vector.extract_strided_slice %49 {offsets = [0, 0], sizes = [16, 1024], strides = [1, 1]} : vector<16x2048xf32> to vector<16x1024xf32>
    %51 = arith.truncf %50 : vector<16x1024xf32> to vector<16x1024xbf16>
    %c0_40 = arith.constant 0 : index
    %c0_41 = arith.constant 0 : index
    %52 = vector.load %arg15[%c0_40, %c0_41] : memref<1024x1024xbf16, #tpu.memory_space<vmem>>, vector<1024x1024xbf16>
    %cst_42 = arith.constant dense<0.000000e+00> : vector<16x1024xf32>
    %53 = tpu.matmul %51, %52, %cst_42 {dimension_numbers = #tpu.dot_dimension_numbers<[1], [0], [0], [1], [0, 0, 1, 1], [], []>} : vector<16x1024xbf16>, vector<1024x1024xbf16>, vector<16x1024xf32> -> vector<16x1024xf32>
    %c0_43 = arith.constant 0 : index
    %c0_44 = arith.constant 0 : index
    %54 = vector.load %arg16[%c0_43, %c0_44] : memref<1x1024xf32, #tpu.memory_space<vmem>>, vector<1x1024xf32>
    %55 = vector.broadcast %54 : vector<1x1024xf32> to vector<16x1024xf32>
    %56 = arith.addf %53, %55 : vector<16x1024xf32>
    %cst_45 = arith.constant 0.000000e+00 : f32
    %57 = vector.broadcast %cst_45 : f32 to vector<16x1024xf32>
    %58 = arith.maximumf %56, %57 : vector<16x1024xf32>
    %59 = arith.truncf %58 : vector<16x1024xf32> to vector<16x1024xbf16>
    %c0_46 = arith.constant 0 : index
    %c0_47 = arith.constant 0 : index
    %60 = vector.load %arg17[%c0_46, %c0_47] : memref<1024x256xbf16, #tpu.memory_space<vmem>>, vector<1024x256xbf16>
    %cst_48 = arith.constant dense<0.000000e+00> : vector<16x256xf32>
    %61 = tpu.matmul %59, %60, %cst_48 {dimension_numbers = #tpu.dot_dimension_numbers<[1], [0], [0], [1], [0, 0, 1, 1], [], []>} : vector<16x1024xbf16>, vector<1024x256xbf16>, vector<16x256xf32> -> vector<16x256xf32>
    %c0_49 = arith.constant 0 : index
    %c0_50 = arith.constant 0 : index
    %62 = vector.load %arg18[%c0_49, %c0_50] : memref<1x256xf32, #tpu.memory_space<vmem>>, vector<1x256xf32>
    %63 = vector.broadcast %62 : vector<1x256xf32> to vector<16x256xf32>
    %64 = arith.addf %61, %63 : vector<16x256xf32>
    %c0_51 = arith.constant 0 : index
    %c0_52 = arith.constant 0 : index
    %65 = vector.load %arg24[%c0_51, %c0_52] : memref<16x256xf32, #tpu.memory_space<vmem>>, vector<16x256xf32>
    tpu.vector_store %arg24[%c0_51, %c0_52], %64 {strides = array<i32>} : memref<16x256xf32, #tpu.memory_space<vmem>>, vector<16x256xf32>,
    %66 = vector.extract_strided_slice %49 {offsets = [0, 1024], sizes = [16, 1024], strides = [1, 1]} : vector<16x2048xf32> to vector<16x1024xf32>
    %67 = arith.truncf %66 : vector<16x1024xf32> to vector<16x1024xbf16>
    %c0_53 = arith.constant 0 : index
    %c0_54 = arith.constant 0 : index
    %68 = vector.load %arg19[%c0_53, %c0_54] : memref<1024x1024xbf16, #tpu.memory_space<vmem>>, vector<1024x1024xbf16>
    %cst_55 = arith.constant dense<0.000000e+00> : vector<16x1024xf32>
    %69 = tpu.matmul %67, %68, %cst_55 {dimension_numbers = #tpu.dot_dimension_numbers<[1], [0], [0], [1], [0, 0, 1, 1], [], []>} : vector<16x1024xbf16>, vector<1024x1024xbf16>, vector<16x1024xf32> -> vector<16x1024xf32>
    %c0_56 = arith.constant 0 : index
    %c0_57 = arith.constant 0 : index
    %70 = vector.load %arg20[%c0_56, %c0_57] : memref<1x1024xf32, #tpu.memory_space<vmem>>, vector<1x1024xf32>
    %71 = vector.broadcast %70 : vector<1x1024xf32> to vector<16x1024xf32>
    %72 = arith.addf %69, %71 : vector<16x1024xf32>
    %cst_58 = arith.constant 0.000000e+00 : f32
    %73 = vector.broadcast %cst_58 : f32 to vector<16x1024xf32>
    %74 = arith.maximumf %72, %73 : vector<16x1024xf32>
    %75 = arith.truncf %74 : vector<16x1024xf32> to vector<16x1024xbf16>
    %c0_59 = arith.constant 0 : index
    %c0_60 = arith.constant 0 : index
    %76 = vector.load %arg21[%c0_59, %c0_60] : memref<1024x128xbf16, #tpu.memory_space<vmem>>, vector<1024x128xbf16>
    %cst_61 = arith.constant dense<0.000000e+00> : vector<16x128xf32>
    %77 = tpu.matmul %75, %76, %cst_61 {dimension_numbers = #tpu.dot_dimension_numbers<[1], [0], [0], [1], [0, 0, 1, 1], [], []>} : vector<16x1024xbf16>, vector<1024x128xbf16>, vector<16x128xf32> -> vector<16x128xf32>
    %c0_62 = arith.constant 0 : index
    %c0_63 = arith.constant 0 : index
    %78 = vector.load %arg22[%c0_62, %c0_63] : memref<1x128xf32, #tpu.memory_space<vmem>>, vector<1x128xf32>
    %79 = vector.broadcast %78 : vector<1x128xf32> to vector<16x128xf32>
    %80 = arith.addf %77, %79 : vector<16x128xf32>
    %c0_64 = arith.constant 0 : index
    %c0_65 = arith.constant 0 : index
    %81 = vector.load %arg25[%c0_64, %c0_65] : memref<16x128xf32, #tpu.memory_space<vmem>>, vector<16x128xf32>
    tpu.vector_store %arg25[%c0_64, %c0_65], %80 {strides = array<i32>} : memref<16x128xf32, #tpu.memory_space<vmem>>, vector<16x128xf32>,
    return
  }
  func.func @transform_0(%arg0: i32) -> (i32, i32) {
    %c0_i32 = arith.constant 0 : i32
    %c0_i32_0 = arith.constant 0 : i32
    return %arg0, %c0_i32 : i32, i32
  }
  func.func @transform_1(%arg0: i32) -> (i32, i32) {
    %c0_i32 = arith.constant 0 : i32
    %c0_i32_0 = arith.constant 0 : i32
    return %arg0, %c0_i32 : i32, i32
  }
  func.func @transform_2(%arg0: i32) -> (i32, i32) {
    %c0_i32 = arith.constant 0 : i32
    %c0_i32_0 = arith.constant 0 : i32
    %c0_i32_1 = arith.constant 0 : i32
    return %c0_i32, %c0_i32_0 : i32, i32
  }
  func.func @transform_3(%arg0: i32) -> (i32, i32) {
    %c0_i32 = arith.constant 0 : i32
    %c0_i32_0 = arith.constant 0 : i32
    %c0_i32_1 = arith.constant 0 : i32
    return %c0_i32, %c0_i32_0 : i32, i32
  }
  func.func @transform_4(%arg0: i32) -> (i32, i32) {
    %c0_i32 = arith.constant 0 : i32
    %c0_i32_0 = arith.constant 0 : i32
    %c0_i32_1 = arith.constant 0 : i32
    return %c0_i32, %c0_i32_0 : i32, i32
  }
  func.func @transform_5(%arg0: i32) -> (i32, i32) {
    %c0_i32 = arith.constant 0 : i32
    %c0_i32_0 = arith.constant 0 : i32
    %c0_i32_1 = arith.constant 0 : i32
    return %c0_i32, %c0_i32_0 : i32, i32
  }
  func.func @transform_6(%arg0: i32) -> (i32, i32) {
    %c0_i32 = arith.constant 0 : i32
    %c0_i32_0 = arith.constant 0 : i32
    %c0_i32_1 = arith.constant 0 : i32
    return %c0_i32, %c0_i32_0 : i32, i32
  }
  func.func @transform_7(%arg0: i32) -> (i32, i32) {
    %c0_i32 = arith.constant 0 : i32
    %c0_i32_0 = arith.constant 0 : i32
    %c0_i32_1 = arith.constant 0 : i32
    return %c0_i32, %c0_i32_0 : i32, i32
  }
  func.func @transform_8(%arg0: i32) -> (i32, i32) {
    %c0_i32 = arith.constant 0 : i32
    %c0_i32_0 = arith.constant 0 : i32
    %c0_i32_1 = arith.constant 0 : i32
    return %c0_i32, %c0_i32_0 : i32, i32
  }
  func.func @transform_9(%arg0: i32) -> (i32, i32) {
    %c0_i32 = arith.constant 0 : i32
    %c0_i32_0 = arith.constant 0 : i32
    %c0_i32_1 = arith.constant 0 : i32
    return %c0_i32, %c0_i32_0 : i32, i32
  }
  func.func @transform_10(%arg0: i32) -> (i32, i32) {
    %c0_i32 = arith.constant 0 : i32
    %c0_i32_0 = arith.constant 0 : i32
    %c0_i32_1 = arith.constant 0 : i32
    return %c0_i32, %c0_i32_0 : i32, i32
  }
  func.func @transform_11(%arg0: i32) -> (i32, i32) {
    %c0_i32 = arith.constant 0 : i32
    %c0_i32_0 = arith.constant 0 : i32
    %c0_i32_1 = arith.constant 0 : i32
    return %c0_i32, %c0_i32_0 : i32, i32
  }
  func.func @transform_12(%arg0: i32) -> (i32, i32) {
    %c0_i32 = arith.constant 0 : i32
    %c0_i32_0 = arith.constant 0 : i32
    %c0_i32_1 = arith.constant 0 : i32
    return %c0_i32, %c0_i32_0 : i32, i32
  }
  func.func @transform_13(%arg0: i32) -> (i32, i32) {
    %c0_i32 = arith.constant 0 : i32
    %c0_i32_0 = arith.constant 0 : i32
    %c0_i32_1 = arith.constant 0 : i32
    return %c0_i32, %c0_i32_0 : i32, i32
  }
  func.func @transform_14(%arg0: i32) -> (i32, i32) {
    %c0_i32 = arith.constant 0 : i32
    %c0_i32_0 = arith.constant 0 : i32
    %c0_i32_1 = arith.constant 0 : i32
    return %c0_i32, %c0_i32_0 : i32, i32
  }
  func.func @transform_15(%arg0: i32) -> (i32, i32) {
    %c0_i32 = arith.constant 0 : i32
    %c0_i32_0 = arith.constant 0 : i32
    %c0_i32_1 = arith.constant 0 : i32
    return %c0_i32, %c0_i32_0 : i32, i32
  }
  func.func @transform_16(%arg0: i32) -> (i32, i32) {
    %c0_i32 = arith.constant 0 : i32
    %c0_i32_0 = arith.constant 0 : i32
    %c0_i32_1 = arith.constant 0 : i32
    return %c0_i32, %c0_i32_0 : i32, i32
  }
  func.func @transform_17(%arg0: i32) -> (i32, i32) {
    %c0_i32 = arith.constant 0 : i32
    %c0_i32_0 = arith.constant 0 : i32
    %c0_i32_1 = arith.constant 0 : i32
    return %c0_i32, %c0_i32_0 : i32, i32
  }
  func.func @transform_18(%arg0: i32) -> (i32, i32) {
    %c0_i32 = arith.constant 0 : i32
    %c0_i32_0 = arith.constant 0 : i32
    %c0_i32_1 = arith.constant 0 : i32
    return %c0_i32, %c0_i32_0 : i32, i32
  }
  func.func @transform_19(%arg0: i32) -> (i32, i32) {
    %c0_i32 = arith.constant 0 : i32
    %c0_i32_0 = arith.constant 0 : i32
    %c0_i32_1 = arith.constant 0 : i32
    return %c0_i32, %c0_i32_0 : i32, i32
  }
  func.func @transform_20(%arg0: i32) -> (i32, i32) {
    %c0_i32 = arith.constant 0 : i32
    %c0_i32_0 = arith.constant 0 : i32
    %c0_i32_1 = arith.constant 0 : i32
    return %c0_i32, %c0_i32_0 : i32, i32
  }
  func.func @transform_21(%arg0: i32) -> (i32, i32) {
    %c0_i32 = arith.constant 0 : i32
    %c0_i32_0 = arith.constant 0 : i32
    %c0_i32_1 = arith.constant 0 : i32
    return %c0_i32, %c0_i32_0 : i32, i32
  }
  func.func @transform_22(%arg0: i32) -> (i32, i32) {
    %c0_i32 = arith.constant 0 : i32
    %c0_i32_0 = arith.constant 0 : i32
    return %arg0, %c0_i32 : i32, i32
  }
  func.func @transform_23(%arg0: i32) -> (i32, i32) {
    %c0_i32 = arith.constant 0 : i32
    %c0_i32_0 = arith.constant 0 : i32
    return %arg0, %c0_i32 : i32, i32
  }
  func.func @transform_24(%arg0: i32) -> (i32, i32) {
    %c0_i32 = arith.constant 0 : i32
    %c0_i32_0 = arith.constant 0 : i32
    return %arg0, %c0_i32 : i32, i32
  }
}

</mosaic_0001>

<bundles_post_ra>
// kernel: tpu_custom_call.1
= control target key start
LH: loop header
LB: loop body
LE: loop exit
PB: predicated region body
PF: predicated region fallthrough
CT: control target
= control target key end

     0   :  { %s18266_s0 = inlined_call_operand.hbm [shape: bf16[16,256], index: 0, kind: input, shape index: {}]   ;;  %s18267_s1 = inlined_call_operand.hbm [shape: bf16[16,128], index: 1, kind: input, shape index: {}]   ;;  %s18268_s2 = inlined_call_operand.hbm [shape: bf16[256,1024], index: 2, kind: input, shape index: {}]   ;;  %s18269_s3 = inlined_call_operand.hbm [shape: f32[1,1024], index: 3, kind: input, shape index: {}]   ;;  %s18270_s4 = inlined_call_operand.hbm [shape: bf16[1024,256], index: 4, kind: input, shape index: {}]   ;;  %s18271_s5 = inlined_call_operand.hbm [shape: f32[1,256], index: 5, kind: input, shape index: {}]   ;;  %s18272_s6 = inlined_call_operand.vmem [shape: bf16[256,32], index: 6, kind: input, shape index: {}]   ;;  %s18273_s7 = inlined_call_operand.hbm [shape: f32[1,32], index: 7, kind: input, shape index: {}]   ;;  %s18274_s8 = inlined_call_operand.hbm [shape: bf16[128,1024], index: 8, kind: input, shape index: {}]   ;;  %s18275_s9 = inlined_call_operand.hbm [shape: f32[1,1024], index: 9, kind: input, shape index: {}]   ;;  %s18276_s10 = inlined_call_operand.hbm [shape: bf16[1024,256], index: 10, kind: input, shape index: {}]   ;;  %s18277_s11 = inlined_call_operand.hbm [shape: f32[1,256], index: 11, kind: input, shape index: {}]   ;;  %s18278_s12 = inlined_call_operand.hbm [shape: bf16[32,2048], index: 12, kind: input, shape index: {}]   ;;  %s18279_s13 = inlined_call_operand.hbm [shape: f32[1,2048], index: 13, kind: input, shape index: {}]   ;;  %s18280_s14 = inlined_call_operand.hbm [shape: bf16[1024,1024], index: 14, kind: input, shape index: {}]   ;;  %s18281_s15 = inlined_call_operand.hbm [shape: f32[1,1024], index: 15, kind: input, shape index: {}]   ;;  %s18282_s16 = inlined_call_operand.hbm [shape: bf16[1024,256], index: 16, kind: input, shape index: {}]   ;;  %s18283_s17 = inlined_call_operand.hbm [shape: f32[1,256], index: 17, kind: input, shape index: {}]   ;;  %s18284_s18 = inlined_call_operand.hbm [shape: bf16[1024,1024], index: 18, kind: input, shape index: {}]   ;;  %s18285_s19 = inlined_call_operand.hbm [shape: f32[1,1024], index: 19, kind: input, shape index: {}]   ;;  %s18286_s20 = inlined_call_operand.hbm [shape: bf16[1024,128], index: 20, kind: input, shape index: {}]   ;;  %s18287_s21 = inlined_call_operand.hbm [shape: f32[1,128], index: 21, kind: input, shape index: {}]   ;;  %s18288_s22 = inlined_call_operand.hbm [shape: f32[16,32], index: 22, kind: output, shape index: {0}]   ;;  %s18289_s23 = inlined_call_operand.hbm [shape: f32[16,256], index: 23, kind: output, shape index: {1}]   ;;  %s18290_s24 = inlined_call_operand.hbm [shape: f32[16,128], index: 24, kind: output, shape index: {2}]  }
   0x1   :  { %18306 = sst [smem:[#allocation52_spill]] %s18266_s0 }
   0x2   :  { %18307 = sst [smem:[#allocation53_spill]] %s18267_s1 }
   0x3   :  { %18308 = sst [smem:[#allocation54_spill]] %s18268_s2 }
   0x4   :  { %18309 = sst [smem:[#allocation55_spill]] %s18269_s3 }
   0x5   :  { %18310 = sst [smem:[#allocation56_spill]] %s18270_s4 }
   0x6   :  { %18311 = sst [smem:[#allocation57_spill]] %s18271_s5 }
   0x7   :  { %18312 = sst [smem:[#allocation58_spill]] %s18272_s6 }
   0x8   :  { %18313 = sst [smem:[#allocation59_spill]] %s18273_s7 }
   0x9   :  { %18314 = sst [smem:[#allocation60_spill]] %s18274_s8 }
   0xa   :  { %18315 = sst [smem:[#allocation61_spill]] %s18288_s22 }
   0xb   :  { %18316 = sst [smem:[#allocation62_spill]] %s18289_s23 }
   0xc   :  { %18317 = sst [smem:[#allocation63_spill]] %s18290_s24 }
   0xd   :  { %30 = vsyncpa [#allocation3], 0 }
   0xe   :  { %31 = vsyncpa [#allocation6], 0 }
   0xf   :  { %32 = vsyncpa [#allocation9], 0 }
  0x10   :  { %33 = vsyncpa [#allocation12], 0 }
  0x11   :  { %34 = vsyncpa [#allocation15], 0 }
  0x12   :  { %35 = vsyncpa [#allocation18], 0 }
  0x13   :  { %36 = vsyncpa [#allocation21], 0 }
  0x14   :  { %37 = vsyncpa [#allocation24], 0 }
  0x15   :  { %38 = vsyncpa [#allocation27], 0 }
  0x16   :  { %39 = vsyncpa [#allocation30], 0 }
  0x17   :  { %40 = vsyncpa [#allocation33], 0 }
  0x18   :  { %41 = vsyncpa [#allocation4], 0 }
  0x19   :  { %42 = vsyncpa [#allocation37], 0  ;;  %s17374_s5 = smov [#allocation5]   ;;  %s18318_s6 = sld [smem:[#allocation53_spill]] }
  0x1a   :  { %s60_s26 = sshll.u32 %s17374_s5, 4  ;;  %s61_s26 = int_to_ptr.vmem [resolvable:$true] %s60_s26 }
  0x1f   :  { %s16820_s2 = scalar_lea.hbm %s18318_s6, 128 }
  0x20   :  { %p16821_p0 = scmp.ne.s32.totalorder %s18318_s6, %s16820_s2  ;;  %p16824_p1 = scmp.lt.u32.totalorder %s16820_s2, %s18318_s6 }
  0x22   :  { %p16826_p2 = pnand %p16824_p1, %p16821_p0 }
  0x24   :  { %16829 = shalt.err (!%p16826_p2)
}
  0x25   :  { %s16830_s3 = scalar_lea.vmem %s61_s26, 128  ;;  %p16835_p4 = scmp.lt.s32.totalorder %s61_s26, %s61_s26 }
  0x26   :  { %p16831_p3 = scmp.ne.s32.totalorder %s61_s26, %s16830_s3  ;;  %p16836_p5 = scmp.lt.s32.totalorder %s16830_s3, %s16830_s3 }
  0x28   :  { %p16837_p6 = por %p16836_p5, %p16835_p4 }
  0x2a   :  { %p16838_p7 = pnand %p16837_p6, %p16831_p3 }
  0x2c   :  { %16841 = shalt.err (!%p16838_p7)
}
  0x2d   :  { %s17375_s25 = smov 64   ;;  %s18303_s8 = smov 4  }
  0x2e   :  { %66 = dma.hbm_to_vmem [thread:$0]  %s18318_s6, 128, %s61_s26, [#allocation6], %s17375_s25, %s17375_s25, %s18303_s8  }
  0x2f   :  { %s17377_s5 = smov [#allocation8]   ;;  %s17378_s28 = smov [#allocation11]  }
  0x30   :  { %s85_s27 = sshll.u32 %s17377_s5, 4  ;;  %s107_s2 = sshll.u32 %s17378_s28, 4  ;;  %s86_s27 = int_to_ptr.vmem [resolvable:$true] %s85_s27  ;;  %s108_s2 = int_to_ptr.vmem [resolvable:$true] %s107_s2 }
  0x31   :  { %s18319_s7 = sld [smem:[#allocation55_spill]] }
  0x37   :  { %s16842_s30 = scalar_lea.hbm %s18319_s7, 128 }
  0x38   :  { %p16843_p8 = scmp.ne.s32.totalorder %s18319_s7, %s16842_s30  ;;  %p16846_p9 = scmp.lt.u32.totalorder %s16842_s30, %s18319_s7 }
  0x3a   :  { %p16848_p10 = pnand %p16846_p9, %p16843_p8 }
  0x3c   :  { %16851 = shalt.err (!%p16848_p10)
}
  0x3d   :  { %s16852_s26 = scalar_lea.vmem %s86_s27, 128  ;;  %p16857_p12 = scmp.lt.s32.totalorder %s86_s27, %s86_s27 }
  0x3e   :  { %p16853_p11 = scmp.ne.s32.totalorder %s86_s27, %s16852_s26  ;;  %p16858_p13 = scmp.lt.s32.totalorder %s16852_s26, %s16852_s26 }
  0x40   :  { %p16859_p0 = por %p16858_p13, %p16857_p12 }
  0x42   :  { %p16860_p1 = pnand %p16859_p0, %p16853_p11 }
  0x44   :  { %16863 = shalt.err (!%p16860_p1)
}
  0x45   :  { %88 = dma.hbm_to_vmem [thread:$0]  %s18319_s7, 128, %s86_s27, [#allocation9]  }
  0x46   :  { %s18320_s5 = sld [smem:[#allocation57_spill]] }
  0x4c   :  { %s16864_s28 = scalar_lea.hbm %s18320_s5, 32 }
  0x4d   :  { %p16865_p2 = scmp.ne.s32.totalorder %s18320_s5, %s16864_s28  ;;  %p16868_p3 = scmp.lt.u32.totalorder %s16864_s28, %s18320_s5 }
  0x4f   :  { %p16870_p4 = pnand %p16868_p3, %p16865_p2 }
  0x51   :  { %16873 = shalt.err (!%p16870_p4)
}
  0x52   :  { %s16874_s30 = scalar_lea.vmem %s108_s2, 32  ;;  %p16879_p6 = scmp.lt.s32.totalorder %s108_s2, %s108_s2 }
  0x53   :  { %p16875_p5 = scmp.ne.s32.totalorder %s108_s2, %s16874_s30  ;;  %p16880_p7 = scmp.lt.s32.totalorder %s16874_s30, %s16874_s30 }
  0x55   :  { %p16881_p8 = por %p16880_p7, %p16879_p6 }
  0x57   :  { %p16882_p9 = pnand %p16881_p8, %p16875_p5 }
  0x59   :  { %16885 = shalt.err (!%p16882_p9)
}
  0x5a   :  { %110 = dma.hbm_to_vmem [thread:$0]  %s18320_s5, 32, %s108_s2, [#allocation12]  }
  0x5b   :  { %s17379_s3 = smov [#allocation14]   ;;  %s18321_s24 = sld [smem:[#allocation60_spill]] }
  0x5c   :  { %s128_s26 = sshll.u32 %s17379_s3, 4  ;;  %s129_s26 = int_to_ptr.vmem [resolvable:$true] %s128_s26 }
  0x61   :  { %s16886_s1 = scalar_lea.hbm %s18321_s24, 8192 }
  0x62   :  { %p16887_p10 = scmp.ne.s32.totalorder %s18321_s24, %s16886_s1  ;;  %p16890_p11 = scmp.lt.u32.totalorder %s16886_s1, %s18321_s24 }
  0x64   :  { %p16892_p12 = pnand %p16890_p11, %p16887_p10 }
  0x66   :  { %16895 = shalt.err (!%p16892_p12)
}
  0x67   :  { %s16896_s0 = scalar_lea.vmem %s129_s26, 8192  ;;  %p16901_p0 = scmp.lt.s32.totalorder %s129_s26, %s129_s26 }
  0x68   :  { %p16897_p13 = scmp.ne.s32.totalorder %s129_s26, %s16896_s0  ;;  %p16902_p1 = scmp.lt.s32.totalorder %s16896_s0, %s16896_s0 }
  0x6a   :  { %p16903_p2 = por %p16902_p1, %p16901_p0 }
  0x6c   :  { %p16904_p3 = pnand %p16903_p2, %p16897_p13 }
  0x6e   :  { %16907 = shalt.err (!%p16904_p3)
}
  0x6f   :  { %s17380_s2 = smov 512   ;;  %s17381_s5 = smov 32  }
  0x70   :  { %134 = dma.hbm_to_vmem [thread:$0]  %s18321_s24, 8192, %s129_s26, [#allocation15], %s17380_s2, %s17380_s2, %s17381_s5  }
  0x71   :  { %s17382_s7 = smov [#allocation17]   ;;  %s17383_s6 = smov [#allocation20]  }
  0x72   :  { %s150_s3 = sshll.u32 %s17382_s7, 4  ;;  %s172_s4 = sshll.u32 %s17383_s6, 4  ;;  %s151_s3 = int_to_ptr.vmem [resolvable:$true] %s150_s3  ;;  %s17587_s4 = int_to_ptr.vmem [resolvable:$true] %s172_s4 }
  0x73   :  { %s16908_s22 = scalar_lea.hbm %s18276_s10, 16384 }
  0x74   :  { %p16909_p4 = scmp.ne.s32.totalorder %s18276_s10, %s16908_s22  ;;  %p16912_p5 = scmp.lt.u32.totalorder %s16908_s22, %s18276_s10 }
  0x76   :  { %p16914_p6 = pnand %p16912_p5, %p16909_p4 }
  0x78   :  { %16917 = shalt.err (!%p16914_p6)
}
  0x79   :  { %s16918_s26 = scalar_lea.vmem %s151_s3, 16384  ;;  %p16923_p8 = scmp.lt.s32.totalorder %s151_s3, %s151_s3 }
  0x7a   :  { %p16919_p7 = scmp.ne.s32.totalorder %s151_s3, %s16918_s26  ;;  %p16924_p9 = scmp.lt.s32.totalorder %s16918_s26, %s16918_s26 }
  0x7c   :  { %p16925_p10 = por %p16924_p9, %p16923_p8 }
  0x7e   :  { %p16926_p11 = pnand %p16925_p10, %p16919_p7 }
  0x80   :  { %16929 = shalt.err (!%p16926_p11)
}
  0x81   :  { %s18304_s24 = smov 128   ;;  %s17385_s30 = smov 8  }
  0x82   :  { %156 = dma.hbm_to_vmem [thread:$0]  %s18276_s10, 16384, %s151_s3, [#allocation18], %s18304_s24, %s18304_s24, %s17385_s30  }
  0x83   :  { %s16930_s1 = scalar_lea.hbm %s18278_s12, 4096 }
  0x84   :  { %p16931_p12 = scmp.ne.s32.totalorder %s18278_s12, %s16930_s1  ;;  %p16934_p13 = scmp.lt.u32.totalorder %s16930_s1, %s18278_s12 }
  0x86   :  { %p16936_p0 = pnand %p16934_p13, %p16931_p12 }
  0x88   :  { %16939 = shalt.err (!%p16936_p0)
}
  0x89   :  { %s16940_s0 = scalar_lea.vmem %s17587_s4, 4096  ;;  %p16945_p2 = scmp.lt.s32.totalorder %s17587_s4, %s17587_s4 }
  0x8a   :  { %p16941_p1 = scmp.ne.s32.totalorder %s17587_s4, %s16940_s0  ;;  %p16946_p3 = scmp.lt.s32.totalorder %s16940_s0, %s16940_s0 }
  0x8c   :  { %p16947_p4 = por %p16946_p3, %p16945_p2 }
  0x8e   :  { %p16948_p5 = pnand %p16947_p4, %p16941_p1 }
  0x90   :  { %16951 = shalt.err (!%p16948_p5)
}
  0x91   :  { %s17386_s10 = smov 1024   ;;  %s17387_s27 = smov [#allocation23]  }
  0x92   :  { %178 = dma.hbm_to_vmem [thread:$0]  %s18278_s12, 4096, %s17587_s4, [#allocation21], %s17386_s10, %s17386_s10, %s17375_s25  }
  0x93   :  { %s194_s7 = sshll.u32 %s17387_s27, 4  ;;  %s17388_s8 = smov [#allocation26]   ;;  %s195_s7 = int_to_ptr.vmem [resolvable:$true] %s194_s7 }
  0x94   :  { %s216_s6 = sshll.u32 %s17388_s8, 4  ;;  %s16952_s22 = scalar_lea.hbm %s18280_s14, 65536  ;;  %s217_s6 = int_to_ptr.vmem [resolvable:$true] %s216_s6 }
  0x95   :  { %p16953_p6 = scmp.ne.s32.totalorder %s18280_s14, %s16952_s22  ;;  %p16956_p7 = scmp.lt.u32.totalorder %s16952_s22, %s18280_s14 }
  0x97   :  { %p16958_p8 = pnand %p16956_p7, %p16953_p6 }
  0x99   :  { %16961 = shalt.err (!%p16958_p8)
}
  0x9a   :  { %s16962_s12 = scalar_lea.vmem %s195_s7, 65536  ;;  %p16967_p10 = scmp.lt.s32.totalorder %s195_s7, %s195_s7 }
  0x9b   :  { %p16963_p9 = scmp.ne.s32.totalorder %s195_s7, %s16962_s12  ;;  %p16968_p11 = scmp.lt.s32.totalorder %s16962_s12, %s16962_s12 }
  0x9d   :  { %p16969_p12 = por %p16968_p11, %p16967_p10 }
  0x9f   :  { %p16970_p13 = pnand %p16969_p12, %p16963_p9 }
  0xa1   :  { %16973 = shalt.err (!%p16970_p13)
}
  0xa2   :  { %200 = dma.hbm_to_vmem [thread:$0]  %s18280_s14, 65536, %s195_s7, [#allocation24], %s17380_s2, %s17380_s2, %s17381_s5  }
  0xa3   :  { %s16974_s26 = scalar_lea.hbm %s18282_s16, 16384 }
  0xa4   :  { %p16975_p0 = scmp.ne.s32.totalorder %s18282_s16, %s16974_s26  ;;  %p16978_p1 = scmp.lt.u32.totalorder %s16974_s26, %s18282_s16 }
  0xa6   :  { %p16980_p2 = pnand %p16978_p1, %p16975_p0 }
  0xa8   :  { %16983 = shalt.err (!%p16980_p2)
}
  0xa9   :  { %s16984_s22 = scalar_lea.vmem %s217_s6, 16384  ;;  %p16989_p4 = scmp.lt.s32.totalorder %s217_s6, %s217_s6 }
  0xaa   :  { %p16985_p3 = scmp.ne.s32.totalorder %s217_s6, %s16984_s22  ;;  %p16990_p5 = scmp.lt.s32.totalorder %s16984_s22, %s16984_s22 }
  0xac   :  { %p16991_p6 = por %p16990_p5, %p16989_p4 }
  0xae   :  { %p16992_p7 = pnand %p16991_p6, %p16985_p3 }
  0xb0   :  { %16995 = shalt.err (!%p16992_p7)
}
  0xb1   :  { %s18322_s14 = smov 128   ;;  %s17389_s29 = smov [#allocation29]  }
  0xb2   :  { %222 = dma.hbm_to_vmem [thread:$0]  %s18282_s16, 16384, %s217_s6, [#allocation27], %s18322_s14, %s18322_s14, %s17385_s30  }
  0xb3   :  { %s238_s0 = sshll.u32 %s17389_s29, 4  ;;  %s17390_s12 = smov [#allocation32]   ;;  %s239_s0 = int_to_ptr.vmem [resolvable:$true] %s238_s0 }
  0xb4   :  { %s260_s4 = sshll.u32 %s17390_s12, 4  ;;  %s16996_s24 = scalar_lea.hbm %s18284_s18, 65536  ;;  %s261_s4 = int_to_ptr.vmem [resolvable:$true] %s260_s4 }
  0xb5   :  { %p16997_p8 = scmp.ne.s32.totalorder %s18284_s18, %s16996_s24  ;;  %p17000_p9 = scmp.lt.u32.totalorder %s16996_s24, %s18284_s18 }
  0xb7   :  { %p17002_p10 = pnand %p17000_p9, %p16997_p8 }
  0xb9   :  { %17005 = shalt.err (!%p17002_p10)
}
  0xba   :  { %s17006_s16 = scalar_lea.vmem %s239_s0, 65536  ;;  %p17011_p12 = scmp.lt.s32.totalorder %s239_s0, %s239_s0 }
  0xbb   :  { %p17007_p11 = scmp.ne.s32.totalorder %s239_s0, %s17006_s16  ;;  %p17012_p13 = scmp.lt.s32.totalorder %s17006_s16, %s17006_s16 }
  0xbd   :  { %p17013_p0 = por %p17012_p13, %p17011_p12 }
  0xbf   :  { %p17014_p1 = pnand %p17013_p0, %p17007_p11 }
  0xc1   :  { %17017 = shalt.err (!%p17014_p1)
}
  0xc2   :  { %244 = dma.hbm_to_vmem [thread:$0]  %s18284_s18, 65536, %s239_s0, [#allocation30], %s17380_s2, %s17380_s2, %s17381_s5  }
  0xc3   :  { %s17018_s23 = scalar_lea.hbm %s18286_s20, 8192 }
  0xc4   :  { %p17019_p2 = scmp.ne.s32.totalorder %s18286_s20, %s17018_s23  ;;  %p17022_p3 = scmp.lt.u32.totalorder %s17018_s23, %s18286_s20 }
  0xc6   :  { %p17024_p4 = pnand %p17022_p3, %p17019_p2 }
  0xc8   :  { %17027 = shalt.err (!%p17024_p4)
}
  0xc9   :  { %s17028_s24 = scalar_lea.vmem %s261_s4, 8192  ;;  %p17033_p6 = scmp.lt.s32.totalorder %s261_s4, %s261_s4 }
  0xca   :  { %p17029_p5 = scmp.ne.s32.totalorder %s261_s4, %s17028_s24  ;;  %p17034_p7 = scmp.lt.s32.totalorder %s17028_s24, %s17028_s24 }
  0xcc   :  { %p17035_p8 = por %p17034_p7, %p17033_p6 }
  0xce   :  { %p17036_p9 = pnand %p17035_p8, %p17029_p5 }
  0xd0   :  { %17039 = shalt.err (!%p17036_p9)
}
  0xd1   :  { %s18323_s18 = smov 4   ;;  %s17391_s27 = smov [#allocation2]  }
  0xd2   :  { %266 = dma.hbm_to_vmem [thread:$0]  %s18286_s20, 8192, %s261_s4, [#allocation33], %s17375_s25, %s17375_s25, %s18323_s18  }
  0xd3   :  { %s48_s8 = sshll.u32 %s17391_s27, 4  ;;  %s17392_s1 = smov [#allocation7]   ;;  %s49_s8 = int_to_ptr.vmem [resolvable:$true] %s48_s8 }
  0xd4   :  { %s72_s16 = sshll.u32 %s17392_s1, 4  ;;  %s18324_s22 = sld [smem:[#allocation52_spill]]  ;;  %s73_s16 = int_to_ptr.vmem [resolvable:$true] %s72_s16 }
  0xda   :  { %s17040_s7 = scalar_lea.hbm %s18324_s22, 256 }
  0xdb   :  { %p17041_p10 = scmp.ne.s32.totalorder %s18324_s22, %s17040_s7  ;;  %p17044_p11 = scmp.lt.u32.totalorder %s17040_s7, %s18324_s22 }
  0xdd   :  { %p17046_p12 = pnand %p17044_p11, %p17041_p10 }
  0xdf   :  { %17049 = shalt.err (!%p17046_p12)
}
  0xe0   :  { %s17050_s20 = scalar_lea.vmem %s49_s8, 256  ;;  %p17055_p0 = scmp.lt.s32.totalorder %s49_s8, %s49_s8 }
  0xe1   :  { %p17051_p13 = scmp.ne.s32.totalorder %s49_s8, %s17050_s20  ;;  %p17056_p1 = scmp.lt.s32.totalorder %s17050_s20, %s17050_s20 }
  0xe3   :  { %p17057_p2 = por %p17056_p1, %p17055_p0 }
  0xe5   :  { %p17058_p3 = pnand %p17057_p2, %p17051_p13 }
  0xe7   :  { %17061 = shalt.err (!%p17058_p3)
}
  0xe8   :  { %54 = dma.hbm_to_vmem [thread:$0]  %s18324_s22, 256, %s49_s8, [#allocation3], %s18322_s14, %s18322_s14, %s17385_s30  }
  0xe9   :  { %s18325_s18 = sld [smem:[#allocation54_spill]] }
  0xef   :  { %s17062_s0 = scalar_lea.hbm %s18325_s18, 16384 }
  0xf0   :  { %p17063_p4 = scmp.ne.s32.totalorder %s18325_s18, %s17062_s0  ;;  %p17066_p5 = scmp.lt.u32.totalorder %s17062_s0, %s18325_s18 }
  0xf2   :  { %p17068_p6 = pnand %p17066_p5, %p17063_p4 }
  0xf4   :  { %17071 = shalt.err (!%p17068_p6)
}
  0xf5   :  { %s17072_s28 = scalar_lea.vmem %s73_s16, 16384  ;;  %p17077_p8 = scmp.lt.s32.totalorder %s73_s16, %s73_s16 }
  0xf6   :  { %p17073_p7 = scmp.ne.s32.totalorder %s73_s16, %s17072_s28  ;;  %p17078_p9 = scmp.lt.s32.totalorder %s17072_s28, %s17072_s28 }
  0xf8   :  { %p17079_p10 = por %p17078_p9, %p17077_p8 }
  0xfa   :  { %p17080_p11 = pnand %p17079_p10, %p17073_p7 }
  0xfc   :  { %17083 = shalt.err (!%p17080_p11)
}
  0xfd   :  { %78 = dma.hbm_to_vmem [thread:$0]  %s18325_s18, 16384, %s73_s16, [#allocation6], %s17380_s2, %s17380_s2, %s17381_s5  }
  0xfe   :  { %s17393_s7 = smov [#allocation10]   ;;  %s17394_s29 = smov [#allocation13]  }
  0xff   :  { %s94_s23 = sshll.u32 %s17393_s7, 4  ;;  %s119_s12 = sshll.u32 %s17394_s29, 4  ;;  %s95_s23 = int_to_ptr.vmem [resolvable:$true] %s94_s23  ;;  %s120_s12 = int_to_ptr.vmem [resolvable:$true] %s119_s12 }
 0x100   :  { %s18326_s25 = sld [smem:[#allocation56_spill]] }
 0x106   :  { %s17084_s4 = scalar_lea.hbm %s18326_s25, 16384 }
 0x107   :  { %p17085_p12 = scmp.ne.s32.totalorder %s18326_s25, %s17084_s4  ;;  %p17088_p13 = scmp.lt.u32.totalorder %s17084_s4, %s18326_s25 }
 0x109   :  { %p17090_p0 = pnand %p17088_p13, %p17085_p12 }
 0x10b   :  { %17093 = shalt.err (!%p17090_p0)
}
 0x10c   :  { %s17094_s2 = scalar_lea.vmem %s95_s23, 16384  ;;  %p17099_p2 = scmp.lt.s32.totalorder %s95_s23, %s95_s23 }
 0x10d   :  { %p17095_p1 = scmp.ne.s32.totalorder %s95_s23, %s17094_s2  ;;  %p17100_p3 = scmp.lt.s32.totalorder %s17094_s2, %s17094_s2 }
 0x10f   :  { %p17101_p4 = por %p17100_p3, %p17099_p2 }
 0x111   :  { %p17102_p5 = pnand %p17101_p4, %p17095_p1 }
 0x113   :  { %17105 = shalt.err (!%p17102_p5)
}
 0x114   :  { %100 = dma.hbm_to_vmem [thread:$0]  %s18326_s25, 16384, %s95_s23, [#allocation9], %s18322_s14, %s18322_s14, %s17385_s30  }
 0x115   :  { %s18327_s1 = sld [smem:[#allocation59_spill]] }
 0x11b   :  { %s17106_s6 = scalar_lea.hbm %s18327_s1, 16 }
 0x11c   :  { %p17107_p6 = scmp.ne.s32.totalorder %s18327_s1, %s17106_s6  ;;  %p17110_p7 = scmp.lt.u32.totalorder %s17106_s6, %s18327_s1 }
 0x11e   :  { %p17112_p8 = pnand %p17110_p7, %p17107_p6 }
 0x120   :  { %17115 = shalt.err (!%p17112_p8)
}
 0x121   :  { %s17116_s29 = scalar_lea.vmem %s120_s12, 16  ;;  %s17120_s10 = scalar_lea.vmem %s120_s12, 32 }
 0x122   :  { %p17117_p9 = scmp.ne.s32.totalorder %s120_s12, %s17116_s29  ;;  %p17121_p10 = scmp.lt.s32.totalorder %s120_s12, %s120_s12 }
 0x123   :  { %p17122_p11 = scmp.lt.s32.totalorder %s17120_s10, %s17116_s29 }
 0x125   :  { %p17123_p12 = por %p17122_p11, %p17121_p10 }
 0x127   :  { %p17124_p13 = pnand %p17123_p12, %p17117_p9 }
 0x129   :  { %17127 = shalt.err (!%p17124_p13)
}
 0x12a   :  { %122 = dma.hbm_to_vmem [thread:$0]  %s18327_s1, 16, %s120_s12, [#allocation12]  }
 0x12b   :  { %s17395_s25 = smov [#allocation16]   ;;  %s17396_s3 = smov [#allocation19]  }
 0x12c   :  { %s141_s4 = sshll.u32 %s17395_s25, 4  ;;  %s163_s24 = sshll.u32 %s17396_s3, 4  ;;  %s142_s4 = int_to_ptr.vmem [resolvable:$true] %s141_s4  ;;  %s164_s24 = int_to_ptr.vmem [resolvable:$true] %s163_s24 }
 0x12d   :  { %s17128_s2 = scalar_lea.hbm %s18275_s9, 128 }
 0x12e   :  { %p17129_p0 = scmp.ne.s32.totalorder %s18275_s9, %s17128_s2  ;;  %p17132_p1 = scmp.lt.u32.totalorder %s17128_s2, %s18275_s9 }
 0x130   :  { %p17134_p2 = pnand %p17132_p1, %p17129_p0 }
 0x132   :  { %17137 = shalt.err (!%p17134_p2)
}
 0x133   :  { %s17138_s12 = scalar_lea.vmem %s142_s4, 128  ;;  %p17143_p4 = scmp.lt.s32.totalorder %s142_s4, %s142_s4 }
 0x134   :  { %p17139_p3 = scmp.ne.s32.totalorder %s142_s4, %s17138_s12  ;;  %p17144_p5 = scmp.lt.s32.totalorder %s17138_s12, %s17138_s12 }
 0x136   :  { %p17145_p6 = por %p17144_p5, %p17143_p4 }
 0x138   :  { %p17146_p7 = pnand %p17145_p6, %p17139_p3 }
 0x13a   :  { %17149 = shalt.err (!%p17146_p7)
}
 0x13b   :  { %144 = dma.hbm_to_vmem [thread:$0]  %s18275_s9, 128, %s142_s4, [#allocation15]  }
 0x13c   :  { %s17150_s22 = scalar_lea.hbm %s18277_s11, 32 }
 0x13d   :  { %p17151_p8 = scmp.ne.s32.totalorder %s18277_s11, %s17150_s22  ;;  %p17154_p9 = scmp.lt.u32.totalorder %s17150_s22, %s18277_s11 }
 0x13f   :  { %p17156_p10 = pnand %p17154_p9, %p17151_p8 }
 0x141   :  { %17159 = shalt.err (!%p17156_p10)
}
 0x142   :  { %s17160_s20 = scalar_lea.vmem %s164_s24, 32  ;;  %p17165_p12 = scmp.lt.s32.totalorder %s164_s24, %s164_s24 }
 0x143   :  { %p17161_p11 = scmp.ne.s32.totalorder %s164_s24, %s17160_s20  ;;  %p17166_p13 = scmp.lt.s32.totalorder %s17160_s20, %s17160_s20 }
 0x145   :  { %p17167_p0 = por %p17166_p13, %p17165_p12 }
 0x147   :  { %p17168_p1 = pnand %p17167_p0, %p17161_p11 }
 0x149   :  { %17171 = shalt.err (!%p17168_p1)
}
 0x14a   :  { %166 = dma.hbm_to_vmem [thread:$0]  %s18277_s11, 32, %s164_s24, [#allocation18]  }
 0x14b   :  { %s17397_s4 = smov [#allocation22]   ;;  %s17398_s0 = smov [#allocation25]  }
 0x14c   :  { %s185_s3 = sshll.u32 %s17397_s4, 4  ;;  %s207_s26 = sshll.u32 %s17398_s0, 4  ;;  %s186_s3 = int_to_ptr.vmem [resolvable:$true] %s185_s3  ;;  %s208_s26 = int_to_ptr.vmem [resolvable:$true] %s207_s26 }
 0x14d   :  { %s17172_s16 = scalar_lea.hbm %s18279_s13, 256 }
 0x14e   :  { %p17173_p2 = scmp.ne.s32.totalorder %s18279_s13, %s17172_s16  ;;  %p17176_p3 = scmp.lt.u32.totalorder %s17172_s16, %s18279_s13 }
 0x150   :  { %p17178_p4 = pnand %p17176_p3, %p17173_p2 }
 0x152   :  { %17181 = shalt.err (!%p17178_p4)
}
 0x153   :  { %s17182_s11 = scalar_lea.vmem %s186_s3, 256  ;;  %p17187_p6 = scmp.lt.s32.totalorder %s186_s3, %s186_s3 }
 0x154   :  { %p17183_p5 = scmp.ne.s32.totalorder %s186_s3, %s17182_s11  ;;  %p17188_p7 = scmp.lt.s32.totalorder %s17182_s11, %s17182_s11 }
 0x156   :  { %p17189_p8 = por %p17188_p7, %p17187_p6 }
 0x158   :  { %p17190_p9 = pnand %p17189_p8, %p17183_p5 }
 0x15a   :  { %17193 = shalt.err (!%p17190_p9)
}
 0x15b   :  { %188 = dma.hbm_to_vmem [thread:$0]  %s18279_s13, 256, %s186_s3, [#allocation21]  }
 0x15c   :  { %s17194_s22 = scalar_lea.hbm %s18281_s15, 128 }
 0x15d   :  { %p17195_p10 = scmp.ne.s32.totalorder %s18281_s15, %s17194_s22  ;;  %p17198_p11 = scmp.lt.u32.totalorder %s17194_s22, %s18281_s15 }
 0x15f   :  { %p17200_p12 = pnand %p17198_p11, %p17195_p10 }
 0x161   :  { %17203 = shalt.err (!%p17200_p12)
}
 0x162   :  { %s17204_s20 = scalar_lea.vmem %s208_s26, 128  ;;  %p17209_p0 = scmp.lt.s32.totalorder %s208_s26, %s208_s26 }
 0x163   :  { %p17205_p13 = scmp.ne.s32.totalorder %s208_s26, %s17204_s20  ;;  %p17210_p1 = scmp.lt.s32.totalorder %s17204_s20, %s17204_s20 }
 0x165   :  { %p17211_p2 = por %p17210_p1, %p17209_p0 }
 0x167   :  { %p17212_p3 = pnand %p17211_p2, %p17205_p13 }
 0x169   :  { %17215 = shalt.err (!%p17212_p3)
}
 0x16a   :  { %210 = dma.hbm_to_vmem [thread:$0]  %s18281_s15, 128, %s208_s26, [#allocation24]  }
 0x16b   :  { %s17399_s25 = smov [#allocation28]   ;;  %s17400_s3 = smov [#allocation31]  }
 0x16c   :  { %s229_s4 = sshll.u32 %s17399_s25, 4  ;;  %s251_s0 = sshll.u32 %s17400_s3, 4  ;;  %s230_s4 = int_to_ptr.vmem [resolvable:$true] %s229_s4  ;;  %s252_s0 = int_to_ptr.vmem [resolvable:$true] %s251_s0 }
 0x16d   :  { %s17216_s16 = scalar_lea.hbm %s18283_s17, 32 }
 0x16e   :  { %p17217_p4 = scmp.ne.s32.totalorder %s18283_s17, %s17216_s16  ;;  %p17220_p5 = scmp.lt.u32.totalorder %s17216_s16, %s18283_s17 }
 0x170   :  { %p17222_p6 = pnand %p17220_p5, %p17217_p4 }
 0x172   :  { %17225 = shalt.err (!%p17222_p6)
}
 0x173   :  { %s17226_s15 = scalar_lea.vmem %s230_s4, 32  ;;  %p17231_p8 = scmp.lt.s32.totalorder %s230_s4, %s230_s4 }
 0x174   :  { %p17227_p7 = scmp.ne.s32.totalorder %s230_s4, %s17226_s15  ;;  %p17232_p9 = scmp.lt.s32.totalorder %s17226_s15, %s17226_s15 }
 0x176   :  { %p17233_p10 = por %p17232_p9, %p17231_p8 }
 0x178   :  { %p17234_p11 = pnand %p17233_p10, %p17227_p7 }
 0x17a   :  { %17237 = shalt.err (!%p17234_p11)
}
 0x17b   :  { %232 = dma.hbm_to_vmem [thread:$0]  %s18283_s17, 32, %s230_s4, [#allocation27]  }
 0x17c   :  { %s17238_s28 = scalar_lea.hbm %s18285_s19, 128 }
 0x17d   :  { %p17239_p12 = scmp.ne.s32.totalorder %s18285_s19, %s17238_s28  ;;  %p17242_p13 = scmp.lt.u32.totalorder %s17238_s28, %s18285_s19 }
 0x17f   :  { %p17244_p0 = pnand %p17242_p13, %p17239_p12 }
 0x181   :  { %17247 = shalt.err (!%p17244_p0)
}
 0x182   :  { %s17248_s10 = scalar_lea.vmem %s252_s0, 128  ;;  %p17253_p2 = scmp.lt.s32.totalorder %s252_s0, %s252_s0 }
 0x183   :  { %p17249_p1 = scmp.ne.s32.totalorder %s252_s0, %s17248_s10  ;;  %p17254_p3 = scmp.lt.s32.totalorder %s17248_s10, %s17248_s10 }
 0x185   :  { %p17255_p4 = por %p17254_p3, %p17253_p2 }
 0x187   :  { %p17256_p5 = pnand %p17255_p4, %p17249_p1 }
 0x189   :  { %17259 = shalt.err (!%p17256_p5)
}
 0x18a   :  { %254 = dma.hbm_to_vmem [thread:$0]  %s18285_s19, 128, %s252_s0, [#allocation30]  }
 0x18b   :  { %s17401_s20 = smov [#allocation34]   ;;  %s17260_s4 = scalar_lea.hbm %s18287_s21, 16 }
 0x18c   :  { %s273_s13 = sshll.u32 %s17401_s20, 4  ;;  %p17261_p6 = scmp.ne.s32.totalorder %s18287_s21, %s17260_s4  ;;  %s274_s13 = int_to_ptr.vmem [resolvable:$true] %s273_s13 }
 0x18d   :  { %p17264_p7 = scmp.lt.u32.totalorder %s17260_s4, %s18287_s21 }
 0x18f   :  { %p17266_p8 = pnand %p17264_p7, %p17261_p6 }
 0x191   :  { %17269 = shalt.err (!%p17266_p8)
}
 0x192   :  { %s17270_s18 = scalar_lea.vmem %s274_s13, 16  ;;  %s17274_s19 = scalar_lea.vmem %s274_s13, 32 }
 0x193   :  { %p17271_p9 = scmp.ne.s32.totalorder %s274_s13, %s17270_s18  ;;  %p17275_p10 = scmp.lt.s32.totalorder %s274_s13, %s274_s13 }
 0x194   :  { %p17276_p11 = scmp.lt.s32.totalorder %s17274_s19, %s17270_s18 }
 0x196   :  { %p17277_p12 = por %p17276_p11, %p17275_p10 }
 0x198   :  { %p17278_p13 = pnand %p17277_p12, %p17271_p9 }
 0x19a   :  { %17281 = shalt.err (!%p17278_p13)
}
 0x19b   :  { %276 = dma.hbm_to_vmem [thread:$0]  %s18287_s21, 16, %s274_s13, [#allocation33]  }
 0x19c   :  { %17348 = dma.done.wait [#allocation3], 256  }
 0x19d   :  { %17349 = vsyncadd [#allocation3], 4294967040 }
 0x19e   :  { %17350 = dma.done.wait [#allocation6], 16512  }
 0x19f   :  { %17351 = vsyncadd [#allocation6], 4294950784 }
 0x1a0   :  { %17352 = dma.done.wait [#allocation9], 16512  }
 0x1a1   :  { %17353 = vsyncadd [#allocation9], 4294950784 }
 0x1a2   :  { %17354 = dma.done.wait [#allocation12], 48  }
 0x1a3   :  { %17355 = vsyncadd [#allocation12], 4294967248 }
 0x1a4   :  { %17356 = dma.done.wait [#allocation15], 8320  }
 0x1a5   :  { %17357 = vsyncadd [#allocation15], 4294958976 }
 0x1a6   :  { %17358 = dma.done.wait [#allocation18], 16416  }
 0x1a7   :  { %17359 = vsyncadd [#allocation18], 4294950880 }
 0x1a8   :  { %17360 = dma.done.wait [#allocation21], 4352  }
 0x1a9   :  { %17361 = vsyncadd [#allocation21], 4294962944 }
 0x1aa   :  { %17362 = dma.done.wait [#allocation24], 65664  }
 0x1ab   :  { %17363 = vsyncadd [#allocation24], 4294901632 }
 0x1ac   :  { %17364 = dma.done.wait [#allocation27], 16416  }
 0x1ad   :  { %17365 = vsyncadd [#allocation27], 4294950880 }
 0x1ae   :  { %17366 = dma.done.wait [#allocation30], 65664  }
 0x1af   :  { %17367 = vsyncadd [#allocation30], 4294901632 }
 0x1b0   :  { %17368 = dma.done.wait [#allocation33], 8208  }
 0x1b1   :  { %17369 = vsyncadd [#allocation33], 4294959088  ;;  %v343_v0 = vld [vmem:[#allocation7] sm:$0xff]  ;;  %v17823_v17 = vld [vmem:[#allocation2 + $0x4] ss:$8 sps:$4 sm:$0xff]   ;;  %s18328_s1 = sld [smem:[#allocation58_spill]] }
 0x1b2   :  { %v347_v1 = vld [vmem:[#allocation7 + $0x20] sm:$0xff]  ;;  %1195 = vmatprep.mubr.bf16.mxu1 %v17823_v17  ;;  %1281 = vmatprep.mubr.bf16.mxu0 %v17823_v17  ;;  %v345_v30 = vld [vmem:[#allocation7 + $0x10] sm:$0xff]  ;;  %vm4085_vm0 = vcmask 261120   ;;  %s17404_s24 = smov [#allocation35]  }
 0x1b3   :  { %v351_v2 = vld [vmem:[#allocation7 + $0x40] sm:$0xff]  ;;  %v14114_v3 = vcombine.high %v343_v0, %v347_v1  ;;  %v14113_v4 = vcombine.low %v343_v0, %v347_v1  ;;  %v349_v31 = vld [vmem:[#allocation7 + $0x30] sm:$0xff]  ;;  %s14058_s6 = sshll.u32 %s17404_s24, 4  ;;  %s14059_s6 = int_to_ptr.vmem [resolvable:$true] %s14058_s6 }
 0x1b4   :  { %v355_v5 = vld [vmem:[#allocation7 + $0x60] sm:$0xff]  ;;  %v14118_v33 = vcombine.high %v345_v30, %v349_v31  ;;  %v14117_v34 = vcombine.low %v345_v30, %v349_v31  ;;  %v353_v35 = vld [vmem:[#allocation7 + $0x50] sm:$0xff] }
 0x1b5   :  { %v14122_v6 = vcombine.high %v351_v2, %v355_v5  ;;  %v359_v7 = vld [vmem:[#allocation7 + $0x80] sm:$0xff]  ;;  %1163 = vmatprep.subr.bf16.mxu1 %v14114_v3  ;;  %v14121_v9 = vcombine.low %v351_v2, %v355_v5  ;;  %v357_v36 = vld [vmem:[#allocation7 + $0x70] sm:$0xff] }
 0x1b6   :  { %v363_v8 = vld [vmem:[#allocation7 + $0xa0] sm:$0xff]  ;;  %1164 = vmatpush1.bf16.msra.mxu1 %v14113_v4  ;;  %v14126_v38 = vcombine.high %v353_v35, %v357_v36  ;;  %v361_v39 = vld [vmem:[#allocation7 + $0x90] sm:$0xff]  ;;  %1249 = vmatprep.subr.bf16.mxu0 %v14118_v33  ;;  %v14125_v43 = vcombine.low %v353_v35, %v357_v36 }
 0x1b7   :  { %1165 = vmatprep.subr.bf16.mxu1 %v14122_v6  ;;  %v14130_v10 = vcombine.high %v359_v7, %v363_v8  ;;  %v367_v11 = vld [vmem:[#allocation7 + $0xc0] sm:$0xff]  ;;  %v14129_v13 = vcombine.low %v359_v7, %v363_v8  ;;  %v365_v40 = vld [vmem:[#allocation7 + $0xb0] sm:$0xff]  ;;  %1250 = vmatpush1.bf16.msra.mxu0 %v14117_v34 }
 0x1b8   :  { %v371_v12 = vld [vmem:[#allocation7 + $0xe0] sm:$0xff]  ;;  %1251 = vmatprep.subr.bf16.mxu0 %v14126_v38  ;;  %v14134_v45 = vcombine.high %v361_v39, %v365_v40  ;;  %v369_v47 = vld [vmem:[#allocation7 + $0xd0] sm:$0xff]  ;;  %v14133_v51 = vcombine.low %v361_v39, %v365_v40  ;;  %v344_v38 = vld [vmem:[#allocation7 + $0x8] sm:$0xff] }
 0x1b9   :  { %v14138_v14 = vcombine.high %v367_v11, %v371_v12  ;;  %v375_v15 = vld [vmem:[#allocation7 + $0x100] sm:$0xff]  ;;  %v14137_v18 = vcombine.low %v367_v11, %v371_v12  ;;  %v373_v48 = vld [vmem:[#allocation7 + $0xf0] sm:$0xff]  ;;  %v348_v39 = vld [vmem:[#allocation7 + $0x28] sm:$0xff] }
 0x1ba   :  { %1166 = vmatpush1.bf16.msra.mxu1 %v14121_v9  ;;  %v379_v16 = vld [vmem:[#allocation7 + $0x120] sm:$0xff]  ;;  %v14142_v53 = vcombine.high %v369_v47, %v373_v48  ;;  %v377_v55 = vld [vmem:[#allocation7 + $0x110] sm:$0xff]  ;;  %v14141_v59 = vcombine.low %v369_v47, %v373_v48  ;;  %v356_v47 = vld [vmem:[#allocation7 + $0x68] sm:$0xff] }
 0x1bb   :  { %1167 = vmatprep.subr.bf16.mxu1 %v14130_v10  ;;  %v14146_v19 = vcombine.high %v375_v15, %v379_v16  ;;  %v383_v20 = vld [vmem:[#allocation7 + $0x140] sm:$0xff]  ;;  %v14145_v22 = vcombine.low %v375_v15, %v379_v16  ;;  %1252 = vmatpush1.bf16.msra.mxu0 %v14125_v43  ;;  %v381_v56 = vld [vmem:[#allocation7 + $0x130] sm:$0xff] }
 0x1bc   :  { %v387_v21 = vld [vmem:[#allocation7 + $0x160] sm:$0xff]  ;;  %1253 = vmatprep.subr.bf16.mxu0 %v14134_v45  ;;  %v14150_v63 = vcombine.high %v377_v55, %v381_v56  ;;  %v385_v0 = vld [vmem:[#allocation7 + $0x150] sm:$0xff]  ;;  %v14149_v3 = vcombine.low %v377_v55, %v381_v56  ;;  %v360_v55 = vld [vmem:[#allocation7 + $0x88] sm:$0xff] }
 0x1bd   :  { %v14154_v23 = vcombine.high %v383_v20, %v387_v21  ;;  %v391_v24 = vld [vmem:[#allocation7 + $0x180] sm:$0xff]  ;;  %v14153_v26 = vcombine.low %v383_v20, %v387_v21  ;;  %v389_v1 = vld [vmem:[#allocation7 + $0x170] sm:$0xff]  ;;  %v364_v56 = vld [vmem:[#allocation7 + $0xa8] sm:$0xff] }
 0x1be   :  { %1168 = vmatpush1.bf16.msra.mxu1 %v14129_v13  ;;  %v395_v25 = vld [vmem:[#allocation7 + $0x1a0] sm:$0xff]  ;;  %v14158_v7 = vcombine.high %v385_v0, %v389_v1  ;;  %v393_v8 = vld [vmem:[#allocation7 + $0x190] sm:$0xff]  ;;  %v14157_v11 = vcombine.low %v385_v0, %v389_v1  ;;  %v372_v0 = vld [vmem:[#allocation7 + $0xe8] sm:$0xff] }
 0x1bf   :  { %1169 = vmatprep.subr.bf16.mxu1 %v14138_v14  ;;  %v14162_v27 = vcombine.high %v391_v24, %v395_v25  ;;  %v399_v28 = vld [vmem:[#allocation7 + $0x1c0] sm:$0xff]  ;;  %v14161_v32 = vcombine.low %v391_v24, %v395_v25  ;;  %1254 = vmatpush1.bf16.msra.mxu0 %v14133_v51  ;;  %v397_v9 = vld [vmem:[#allocation7 + $0x1b0] sm:$0xff] }
 0x1c0   :  { %v403_v29 = vld [vmem:[#allocation7 + $0x1e0] sm:$0xff]  ;;  %1255 = vmatprep.subr.bf16.mxu0 %v14142_v53  ;;  %v14166_v15 = vcombine.high %v393_v8, %v397_v9  ;;  %v401_v16 = vld [vmem:[#allocation7 + $0x1d0] sm:$0xff]  ;;  %v14165_v20 = vcombine.low %v393_v8, %v397_v9  ;;  %v380_v8 = vld [vmem:[#allocation7 + $0x128] sm:$0xff] }
 0x1c1   :  { %v14170_v37 = vcombine.high %v399_v28, %v403_v29  ;;  %v407_v41 = vld [vmem:[#allocation7 + $0x200] sm:$0xff]  ;;  %v14169_v44 = vcombine.low %v399_v28, %v403_v29  ;;  %v409_v25 = vld [vmem:[#allocation7 + $0x210] sm:$0xff] }
 0x1c2   :  { %1170 = vmatpush1.bf16.msra.mxu1 %v14137_v18  ;;  %v411_v42 = vld [vmem:[#allocation7 + $0x220] sm:$0xff]  ;;  %v405_v18 = vld [vmem:[#allocation7 + $0x1f0] sm:$0xff] }
 0x1c3   :  { %1171 = vmatprep.subr.bf16.mxu1 %v14146_v19  ;;  %v14178_v46 = vcombine.high %v407_v41, %v411_v42  ;;  %v415_v49 = vld [vmem:[#allocation7 + $0x240] sm:$0xff]  ;;  %v14177_v52 = vcombine.low %v407_v41, %v411_v42  ;;  %1256 = vmatpush1.bf16.msra.mxu0 %v14141_v59  ;;  %v14174_v24 = vcombine.high %v401_v16, %v405_v18  ;;  %v417_v33 = vld [vmem:[#allocation7 + $0x250] sm:$0xff] }
 0x1c4   :  { %v419_v50 = vld [vmem:[#allocation7 + $0x260] sm:$0xff]  ;;  %1257 = vmatprep.subr.bf16.mxu0 %v14150_v63  ;;  %v14173_v28 = vcombine.low %v401_v16, %v405_v18  ;;  %v421_v34 = vld [vmem:[#allocation7 + $0x270] sm:$0xff]  ;;  %v368_v63 = vld [vmem:[#allocation7 + $0xc8] sm:$0xff] }
 0x1c5   :  { %v14186_v54 = vcombine.high %v415_v49, %v419_v50  ;;  %v423_v57 = vld [vmem:[#allocation7 + $0x280] sm:$0xff]  ;;  %v14185_v60 = vcombine.low %v415_v49, %v419_v50  ;;  %v14190_v40 = vcombine.high %v417_v33, %v421_v34  ;;  %v425_v41 = vld [vmem:[#allocation7 + $0x290] sm:$0xff] }
 0x1c6   :  { %1172 = vmatpush1.bf16.msra.mxu1 %v14145_v22  ;;  %v427_v58 = vld [vmem:[#allocation7 + $0x2a0] sm:$0xff]  ;;  %v429_v42 = vld [vmem:[#allocation7 + $0x2b0] sm:$0xff] }
 0x1c7   :  { %1173 = vmatprep.subr.bf16.mxu1 %v14154_v23  ;;  %v431_v61 = vld [vmem:[#allocation7 + $0x2c0] sm:$0xff]  ;;  %v14194_v2 = vcombine.high %v423_v57, %v427_v58  ;;  %v14193_v4 = vcombine.low %v423_v57, %v427_v58  ;;  %1258 = vmatpush1.bf16.msra.mxu0 %v14149_v3  ;;  %v14198_v48 = vcombine.high %v425_v41, %v429_v42  ;;  %v433_v49 = vld [vmem:[#allocation7 + $0x2d0] sm:$0xff] }
 0x1c8   :  { %v435_v62 = vld [vmem:[#allocation7 + $0x2e0] sm:$0xff]  ;;  %1259 = vmatprep.subr.bf16.mxu0 %v14158_v7  ;;  %v437_v50 = vld [vmem:[#allocation7 + $0x2f0] sm:$0xff]  ;;  %v14197_v53 = vcombine.low %v425_v41, %v429_v42  ;;  %v376_v7 = vld [vmem:[#allocation7 + $0x108] sm:$0xff] }
 0x1c9   :  { %v439_v5 = vld [vmem:[#allocation7 + $0x300] sm:$0xff]  ;;  %v14202_v10 = vcombine.high %v431_v61, %v435_v62  ;;  %v14201_v12 = vcombine.low %v431_v61, %v435_v62  ;;  %v17827_v51 = vld [vmem:[#allocation2] ss:$8 sps:$4 sm:$0xff]   ;;  %v14205_v61 = vcombine.low %v433_v49, %v437_v50  ;;  %v16161_v41 = vld [vmem:[#allocation10 + $0x4] ss:$8 sps:$4 sm:$0xff]  }
 0x1ca   :  { %1174 = vmatpush1.bf16.msra.mxu1 %v14153_v26  ;;  %v443_v6 = vld [vmem:[#allocation7 + $0x320] sm:$0xff]  ;;  %v413_v26 = vld [vmem:[#allocation7 + $0x230] sm:$0xff] }
 0x1cb   :  { %1175 = vmatprep.subr.bf16.mxu1 %v14162_v27  ;;  %v447_v13 = vld [vmem:[#allocation7 + $0x340] sm:$0xff]  ;;  %v14210_v19 = vcombine.high %v439_v5, %v443_v6  ;;  %1260 = vmatpush1.bf16.msra.mxu0 %v14157_v11  ;;  %v14209_v21 = vcombine.low %v439_v5, %v443_v6  ;;  %v14181_v36 = vcombine.low %v409_v25, %v413_v26  ;;  %v441_v57 = vld [vmem:[#allocation7 + $0x310] sm:$0xff] }
 0x1cc   :  { %v451_v14 = vld [vmem:[#allocation7 + $0x360] sm:$0xff]  ;;  %1261 = vmatprep.subr.bf16.mxu0 %v14166_v15  ;;  %v445_v58 = vld [vmem:[#allocation7 + $0x330] sm:$0xff]  ;;  %v14131_v6 = vcombine.low %v360_v55, %v364_v56  ;;  %v388_v15 = vld [vmem:[#allocation7 + $0x168] sm:$0xff] }
 0x1cd   :  { %v455_v22 = vld [vmem:[#allocation7 + $0x380] sm:$0xff]  ;;  %v14218_v27 = vcombine.high %v447_v13, %v451_v14  ;;  %v14217_v29 = vcombine.low %v447_v13, %v451_v14  ;;  %v14214_v1 = vcombine.high %v441_v57, %v445_v58  ;;  %v453_v3 = vld [vmem:[#allocation7 + $0x370] sm:$0xff]  ;;  %v14213_v5 = vcombine.low %v441_v57, %v445_v58  ;;  %v384_v14 = vld [vmem:[#allocation7 + $0x148] sm:$0xff] }
 0x1ce   :  { %1176 = vmatpush1.bf16.msra.mxu1 %v14161_v32  ;;  %v459_v23 = vld [vmem:[#allocation7 + $0x3a0] sm:$0xff]  ;;  %v14182_v32 = vcombine.high %v409_v25, %v413_v26  ;;  %v461_v11 = vld [vmem:[#allocation7 + $0x3b0] sm:$0xff]  ;;  %v14139_v13 = vcombine.low %v368_v63, %v372_v0  ;;  %v14156_v26 = vcombine.high %v384_v14, %v388_v15 }
 0x1cf   :  { %1177 = vmatprep.subr.bf16.mxu1 %v14170_v37  ;;  %1262 = vmatpush1.bf16.msra.mxu0 %v14165_v20  ;;  %v463_v30 = vld [vmem:[#allocation7 + $0x3c0] sm:$0xff]  ;;  %v14226_v35 = vcombine.high %v455_v22, %v459_v23  ;;  %v14225_v37 = vcombine.low %v455_v22, %v459_v23  ;;  %v465_v18 = vld [vmem:[#allocation7 + $0x3d0] sm:$0xff]  ;;  %v14148_v20 = vcombine.high %v376_v7, %v380_v8  ;;  %v392_v23 = vld [vmem:[#allocation7 + $0x188] sm:$0xff] }
 0x1d0   :  { %v467_v31 = vld [vmem:[#allocation7 + $0x3e0] sm:$0xff]  ;;  %1263 = vmatprep.subr.bf16.mxu0 %v14174_v24  ;;  %v14147_v22 = vcombine.low %v376_v7, %v380_v8  ;;  %v396_v24 = vld [vmem:[#allocation7 + $0x1a8] sm:$0xff] }
 0x1d1   :  { %v14234_v43 = vcombine.high %v463_v30, %v467_v31  ;;  %v14233_v45 = vcombine.low %v463_v30, %v467_v31  ;;  %v404_v30 = vld [vmem:[#allocation7 + $0x1e8] sm:$0xff]  ;;  %v14164_v31 = vcombine.high %v392_v23, %v396_v24  ;;  %v16169_v58 = vld [vmem:[#allocation10 + $0x30] ss:$8 sps:$4 sm:$0xff]  }
 0x1d2   :  { %1178 = vmatpush1.bf16.msra.mxu1 %v14169_v44  ;;  %v14189_v44 = vcombine.low %v417_v33, %v421_v34  ;;  %v408_v33 = vld [vmem:[#allocation7 + $0x208] sm:$0xff]  ;;  %v16175_v7 = vld [vmem:[#allocation10 + $0x50] ss:$8 sps:$4 sm:$0xff]  }
 0x1d3   :  { %1179 = vmatprep.subr.bf16.mxu1 %v14178_v46  ;;  %1264 = vmatpush1.bf16.msra.mxu0 %v14173_v28  ;;  %v352_v46 = vld [vmem:[#allocation7 + $0x48] sm:$0xff]  ;;  %v14155_v28 = vcombine.low %v384_v14, %v388_v15  ;;  %v16183_v14 = vld [vmem:[#allocation10 + $0x74] ss:$8 sps:$4 sm:$0xff]   ;;  %v16181_v15 = vld [vmem:[#allocation10 + $0x70] ss:$8 sps:$4 sm:$0xff]  }
 0x1d4   :  { %1265 = vmatprep.subr.bf16.mxu0 %v14182_v32  ;;  %v14124_v59 = vcombine.high %v352_v46, %v356_v47  ;;  %v14123_v62 = vcombine.low %v352_v46, %v356_v47  ;;  %v14163_v32 = vcombine.low %v392_v23, %v396_v24  ;;  %v412_v34 = vld [vmem:[#allocation7 + $0x228] sm:$0xff]  ;;  %v16165_v46 = vld [vmem:[#allocation10 + $0x14] ss:$8 sps:$4 sm:$0xff]   ;;  %v16163_v47 = vld [vmem:[#allocation10 + $0x10] ss:$8 sps:$4 sm:$0xff]  }
 0x1d5   :  { %v14179_v42 = vcombine.low %v408_v33, %v412_v34  ;;  %v354_v24 = vld [vmem:[#allocation7 + $0x58] sm:$0xff] }
 0x1d6   :  { %1180 = vmatpush1.bf16.msra.mxu1 %v14177_v52  ;;  %v14116_v52 = vcombine.high %v344_v38, %v348_v39 }
 0x1d7   :  { %1181 = vmatprep.subr.bf16.mxu1 %v14186_v54  ;;  %1266 = vmatpush1.bf16.msra.mxu0 %v14181_v36  ;;  %v14115_v54 = vcombine.low %v344_v38, %v348_v39  ;;  %v420_v38 = vld [vmem:[#allocation7 + $0x268] sm:$0xff]  ;;  %v14180_v39 = vcombine.high %v408_v33, %v412_v34 }
 0x1d8   :  { %1267 = vmatprep.subr.bf16.mxu0 %v14190_v40  ;;  %v16159_v40 = vld [vmem:[#allocation10] ss:$8 sps:$4 sm:$0xff]  }
 0x1d9   :  { %v16190_v34 = vld [vmem:[#allocation10 + $0xa0] ss:$8 sps:$4 sm:$0xff]  }
 0x1da   :  { %1182 = vmatpush1.bf16.msra.mxu1 %v14185_v60  ;;  %v14206_v60 = vcombine.high %v433_v49, %v437_v50 }
 0x1db   :  { %1183 = vmatprep.subr.bf16.mxu1 %v14194_v2  ;;  %1268 = vmatpush1.bf16.msra.mxu0 %v14189_v44  ;;  %v449_v2 = vld [vmem:[#allocation7 + $0x350] sm:$0xff]  ;;  %v428_v44 = vld [vmem:[#allocation7 + $0x2a8] sm:$0xff] }
 0x1dc   :  { %1269 = vmatprep.subr.bf16.mxu0 %v14198_v48  ;;  %v14222_v9 = vcombine.high %v449_v2, %v453_v3  ;;  %v16168_v48 = vld [vmem:[#allocation10 + $0x24] ss:$8 sps:$4 sm:$0xff]  }
 0x1de   :  { %1184 = vmatpush1.bf16.msra.mxu1 %v14193_v4  ;;  %v14132_v4 = vcombine.high %v360_v55, %v364_v56  ;;  %v16171_v55 = vld [vmem:[#allocation10 + $0x34] ss:$8 sps:$4 sm:$0xff]  }
 0x1df   :  { %1185 = vmatprep.subr.bf16.mxu1 %v14202_v10  ;;  %1270 = vmatpush1.bf16.msra.mxu0 %v14197_v53  ;;  %v457_v10 = vld [vmem:[#allocation7 + $0x390] sm:$0xff]  ;;  %v432_v53 = vld [vmem:[#allocation7 + $0x2c8] sm:$0xff] }
 0x1e0   :  { %1271 = vmatprep.subr.bf16.mxu0 %v14206_v60  ;;  %v14230_v16 = vcombine.high %v457_v10, %v461_v11  ;;  %v444_v60 = vld [vmem:[#allocation7 + $0x328] sm:$0xff] }
 0x1e2   :  { %1186 = vmatpush1.bf16.msra.mxu1 %v14201_v12  ;;  %v14140_v12 = vcombine.high %v368_v63, %v372_v0  ;;  %v448_v63 = vld [vmem:[#allocation7 + $0x348] sm:$0xff] }
 0x1e3   :  { %1187 = vmatprep.subr.bf16.mxu1 %v14210_v19  ;;  %1272 = vmatpush1.bf16.msra.mxu0 %v14205_v61  ;;  %v469_v19 = vld [vmem:[#allocation7 + $0x3f0] sm:$0xff]  ;;  %v452_v0 = vld [vmem:[#allocation7 + $0x368] sm:$0xff] }
 0x1e4   :  { %1273 = vmatprep.subr.bf16.mxu0 %v14214_v1  ;;  %v14238_v25 = vcombine.high %v465_v18, %v469_v19  ;;  %v16174_v61 = vld [vmem:[#allocation10 + $0x44] ss:$8 sps:$4 sm:$0xff]   ;;  %v16172_v1 = vld [vmem:[#allocation10 + $0x40] ss:$8 sps:$4 sm:$0xff]   ;;  %v14220_v8 = vcombine.high %v448_v63, %v452_v0 }
 0x1e6   :  { %1188 = vmatpush1.bf16.msra.mxu1 %v14209_v21  ;;  %v14229_v21 = vcombine.low %v457_v10, %v461_v11  ;;  %v14219_v10 = vcombine.low %v448_v63, %v452_v0  ;;  %v464_v11 = vld [vmem:[#allocation7 + $0x3c8] sm:$0xff] }
 0x1e7   :  { %1189 = vmatprep.subr.bf16.mxu1 %v14218_v27  ;;  %1274 = vmatpush1.bf16.msra.mxu0 %v14213_v5  ;;  %v14237_v27 = vcombine.low %v465_v18, %v469_v19  ;;  %v456_v5 = vld [vmem:[#allocation7 + $0x388] sm:$0xff]  ;;  %v346_v18 = vld [vmem:[#allocation7 + $0x18] sm:$0xff] }
 0x1e8   :  { %1275 = vmatprep.subr.bf16.mxu0 %v14222_v9  ;;  %v16180_v9 = vld [vmem:[#allocation10 + $0x64] ss:$8 sps:$4 sm:$0xff]   ;;  %v350_v19 = vld [vmem:[#allocation7 + $0x38] sm:$0xff]  ;;  %v16202_v63 = vld [vmem:[#allocation10 + $0xe0] ss:$8 sps:$4 sm:$0xff]  }
 0x1ea   :  { %1190 = vmatpush1.bf16.msra.mxu1 %v14217_v29  ;;  %v400_v29 = vld [vmem:[#allocation7 + $0x1c8] sm:$0xff] }
 0x1eb   :  { %1191 = vmatprep.subr.bf16.mxu1 %v14226_v35  ;;  %v14172_v35 = vcombine.high %v400_v29, %v404_v30  ;;  %v14171_v36 = vcombine.low %v400_v29, %v404_v30  ;;  %v14119_v29 = vcombine.low %v346_v18, %v350_v19  ;;  %v362_v30 = vld [vmem:[#allocation7 + $0x98] sm:$0xff] }
 0x1ee   :  { %1192 = vmatpush1.bf16.msra.mxu1 %v14225_v37  ;;  %v416_v37 = vld [vmem:[#allocation7 + $0x248] sm:$0xff] }
 0x1ef   :  { %1193 = vmatprep.subr.bf16.mxu1 %v14234_v43  ;;  %v424_v43 = vld [vmem:[#allocation7 + $0x288] sm:$0xff]  ;;  %v14187_v49 = vcombine.low %v416_v37, %v420_v38 }
 0x1f0   :  { %v14196_v50 = vcombine.high %v424_v43, %v428_v44  ;;  %v14195_v56 = vcombine.low %v424_v43, %v428_v44  ;;  %v378_v43 = vld [vmem:[#allocation7 + $0x118] sm:$0xff] }
 0x1f1   :  { %v382_v44 = vld [vmem:[#allocation7 + $0x138] sm:$0xff] }
 0x1f2   :  { %1194 = vmatpush1.bf16.msra.mxu1 %v14233_v45  ;;  %v14188_v45 = vcombine.high %v416_v37, %v420_v38  ;;  %v374_v37 = vld [vmem:[#allocation7 + $0xf8] sm:$0xff]  ;;  %v16816_v38 = vld [vmem:[#allocation2 + $0x4] ss:$8 sps:$4 sm:$0xff]  }
 0x1f3   :  { %1206 = vmatprep.subr.bf16.mxu1 %v14116_v52  ;;  %v16166_v52 = vld [vmem:[#allocation10 + $0x20] ss:$8 sps:$4 sm:$0xff]  }
 0x1f5   :  { %1196 = vmatmul.mubr.bf16.vlgmr.msra.gmra.mrb[0].mxu1 %v17827_v51 }
 0x1f6   :  { %1207 = vmatpush1.bf16.msra.mxu1 %v14115_v54  ;;  %1238 = vmatprep.mubr.bf16.mxu1 %v17823_v17  ;;  %v14221_v17 = vcombine.low %v449_v2, %v453_v3  ;;  %v436_v54 = vld [vmem:[#allocation7 + $0x2e8] sm:$0xff]  ;;  %v16177_v3 = vld [vmem:[#allocation10 + $0x54] ss:$8 sps:$4 sm:$0xff]  }
 0x1f7   :  { %1208 = vmatprep.subr.bf16.mxu1 %v14124_v59  ;;  %v14204_v57 = vcombine.high %v432_v53, %v436_v54  ;;  %v440_v59 = vld [vmem:[#allocation7 + $0x308] sm:$0xff] }
 0x1f8   :  { %1276 = vmatpush1.bf16.msra.mxu0 %v14221_v17  ;;  %v14212_v2 = vcombine.high %v440_v59, %v444_v60  ;;  %v16178_v17 = vld [vmem:[#allocation10 + $0x60] ss:$8 sps:$4 sm:$0xff]  }
 0x1f9   :  { %1277 = vmatprep.subr.bf16.mxu0 %v14230_v16 }
 0x1fa   :  { %1209 = vmatpush1.bf16.msra.mxu1 %v14123_v62  ;;  %v14203_v62 = vcombine.low %v432_v53, %v436_v54  ;;  %v16199_v53 = vld [vmem:[#allocation10 + $0xd0] ss:$8 sps:$4 sm:$0xff]   ;;  %v14151_v54 = vcombine.low %v378_v43, %v382_v44 }
 0x1fb   :  { %1210 = vmatprep.subr.bf16.mxu1 %v14132_v4  ;;  %v14211_v4 = vcombine.low %v440_v59, %v444_v60  ;;  %v402_v60 = vld [vmem:[#allocation7 + $0x1d8] sm:$0xff] }
 0x1fc   :  { %1278 = vmatpush1.bf16.msra.mxu0 %v14229_v21 }
 0x1fd   :  { %1279 = vmatprep.subr.bf16.mxu0 %v14238_v25  ;;  %v358_v25 = vld [vmem:[#allocation7 + $0x78] sm:$0xff] }
 0x1fe   :  { %1211 = vmatpush1.bf16.msra.mxu1 %v14131_v6  ;;  %v460_v6 = vld [vmem:[#allocation7 + $0x3a8] sm:$0xff]  ;;  %v14128_v33 = vcombine.high %v354_v24, %v358_v25 }
 0x1ff   :  { %1212 = vmatprep.subr.bf16.mxu1 %v14140_v12  ;;  %v468_v12 = vld [vmem:[#allocation7 + $0x3e8] sm:$0xff]  ;;  %v14227_v16 = vcombine.low %v456_v5, %v460_v6 }
 0x200   :  { %1280 = vmatpush1.bf16.msra.mxu0 %v14237_v27  ;;  %v14236_v21 = vcombine.high %v464_v11, %v468_v12  ;;  %v14235_v23 = vcombine.low %v464_v11, %v468_v12  ;;  %v14120_v27 = vcombine.high %v346_v18, %v350_v19  ;;  %v438_v18 = vld [vmem:[#allocation7 + $0x2f8] sm:$0xff] }
 0x201   :  { %2139 = vmatprep.subr.bf16.mxu0 %v16161_v41  ;;  %v16193_v41 = vld [vmem:[#allocation10 + $0xb0] ss:$8 sps:$4 sm:$0xff]  }
 0x202   :  { %1213 = vmatpush1.bf16.msra.mxu1 %v14139_v13  ;;  %v14228_v13 = vcombine.high %v456_v5, %v460_v6  ;;  %v16205_v5 = vld [vmem:[#allocation10 + $0xf0] ss:$8 sps:$4 sm:$0xff]  }
 0x203   :  { %1214 = vmatprep.subr.bf16.mxu1 %v14148_v20  ;;  %1282 = vmatmul.mubr.bf16.vlgmr.msra.gmra.mrb[0].mxu0 %v17827_v51  ;;  %v16186_v20 = vld [vmem:[#allocation10 + $0x84] ss:$8 sps:$4 sm:$0xff]  }
 0x204   :  { %2140 = vmatpush1.bf16.msra.mxu0 %v16159_v40 }
 0x205   :  { %2141 = vmatprep.subr.bf16.mxu0 %v16165_v46  ;;  %v16196_v46 = vld [vmem:[#allocation10 + $0xc0] ss:$8 sps:$4 sm:$0xff]  }
 0x206   :  { %1215 = vmatpush1.bf16.msra.mxu1 %v14147_v22  ;;  %v16184_v22 = vld [vmem:[#allocation10 + $0x80] ss:$8 sps:$4 sm:$0xff]  }
 0x207   :  { %1216 = vmatprep.subr.bf16.mxu1 %v14156_v26  ;;  %v16189_v26 = vld [vmem:[#allocation10 + $0x94] ss:$8 sps:$4 sm:$0xff]  }
 0x208   :  { %2142 = vmatpush1.bf16.msra.mxu0 %v16163_v47 }
 0x209   :  { %2143 = vmatprep.subr.bf16.mxu0 %v16168_v48  ;;  %v386_v48 = vld [vmem:[#allocation7 + $0x158] sm:$0xff] }
 0x20a   :  { %1217 = vmatpush1.bf16.msra.mxu1 %v14155_v28  ;;  %v16187_v28 = vld [vmem:[#allocation10 + $0x90] ss:$8 sps:$4 sm:$0xff]  }
 0x20b   :  { %1218 = vmatprep.subr.bf16.mxu1 %v14164_v31  ;;  %v366_v31 = vld [vmem:[#allocation7 + $0xb8] sm:$0xff] }
 0x20c   :  { %2144 = vmatpush1.bf16.msra.mxu0 %v16166_v52  ;;  %v14136_v40 = vcombine.high %v362_v30, %v366_v31  ;;  %v14152_v52 = vcombine.high %v378_v43, %v382_v44 }
 0x20d   :  { %2145 = vmatprep.subr.bf16.mxu0 %v16171_v55  ;;  %v394_v55 = vld [vmem:[#allocation7 + $0x198] sm:$0xff] }
 0x20e   :  { %1219 = vmatpush1.bf16.msra.mxu1 %v14163_v32  ;;  %v16192_v32 = vld [vmem:[#allocation10 + $0xa4] ss:$8 sps:$4 sm:$0xff]  }
 0x20f   :  { %1220 = vmatprep.subr.bf16.mxu1 %v14172_v35  ;;  %v14127_v35 = vcombine.low %v354_v24, %v358_v25  ;;  %v450_v25 = vld [vmem:[#allocation7 + $0x358] sm:$0xff] }
 0x210   :  { %2146 = vmatpush1.bf16.msra.mxu0 %v16169_v58 }
 0x211   :  { %2147 = vmatprep.subr.bf16.mxu0 %v16174_v61  ;;  %v406_v61 = vld [vmem:[#allocation7 + $0x1f8] sm:$0xff] }
 0x212   :  { %1221 = vmatpush1.bf16.msra.mxu1 %v14171_v36  ;;  %v370_v36 = vld [vmem:[#allocation7 + $0xd8] sm:$0xff]  ;;  %v14175_v6 = vcombine.low %v402_v60, %v406_v61 }
 0x213   :  { %1222 = vmatprep.subr.bf16.mxu1 %v14180_v39  ;;  %v16195_v39 = vld [vmem:[#allocation10 + $0xb4] ss:$8 sps:$4 sm:$0xff]   ;;  %v14143_v47 = vcombine.low %v370_v36, %v374_v37 }
 0x214   :  { %2148 = vmatpush1.bf16.msra.mxu0 %v16172_v1  ;;  %v14176_v1 = vcombine.high %v402_v60, %v406_v61  ;;  %v2361_v60 = vld [vmem:[#allocation14 + $0x160] sm:$0xff] }
 0x215   :  { %2149 = vmatprep.subr.bf16.mxu0 %v16177_v3  ;;  %v414_v3 = vld [vmem:[#allocation7 + $0x238] sm:$0xff] }
 0x216   :  { %1223 = vmatpush1.bf16.msra.mxu1 %v14179_v42  ;;  %v14135_v42 = vcombine.low %v362_v30, %v366_v31  ;;  %v462_v30 = vld [vmem:[#allocation7 + $0x3b8] sm:$0xff] }
 0x217   :  { %1224 = vmatprep.subr.bf16.mxu1 %v14188_v45  ;;  %v16198_v45 = vld [vmem:[#allocation10 + $0xc4] ss:$8 sps:$4 sm:$0xff]  }
 0x218   :  { %2150 = vmatpush1.bf16.msra.mxu0 %v16175_v7  ;;  %v418_v7 = vld [vmem:[#allocation7 + $0x258] sm:$0xff] }
 0x219   :  { %2151 = vmatprep.subr.bf16.mxu0 %v16180_v9 }
 0x21a   :  { %1225 = vmatpush1.bf16.msra.mxu1 %v14187_v49  ;;  %v390_v49 = vld [vmem:[#allocation7 + $0x178] sm:$0xff] }
 0x21b   :  { %1226 = vmatprep.subr.bf16.mxu1 %v14196_v50  ;;  %v16201_v50 = vld [vmem:[#allocation10 + $0xd4] ss:$8 sps:$4 sm:$0xff]   ;;  %v14159_v58 = vcombine.low %v386_v48, %v390_v49 }
 0x21c   :  { %2152 = vmatpush1.bf16.msra.mxu0 %v16178_v17  ;;  %v426_v17 = vld [vmem:[#allocation7 + $0x298] sm:$0xff] }
 0x21d   :  { %2153 = vmatprep.subr.bf16.mxu0 %v16183_v14 }
 0x21e   :  { %1227 = vmatpush1.bf16.msra.mxu1 %v14195_v56  ;;  %v398_v56 = vld [vmem:[#allocation7 + $0x1b8] sm:$0xff] }
 0x21f   :  { %1228 = vmatprep.subr.bf16.mxu1 %v14204_v57  ;;  %v14160_v57 = vcombine.high %v386_v48, %v390_v49  ;;  %v14168_v59 = vcombine.high %v394_v55, %v398_v56  ;;  %v14167_v0 = vcombine.low %v394_v55, %v398_v56  ;;  %v17402_v48 = vmov 0   ;;  %v2349_v55 = vld [vmem:[#allocation14 + $0x100] sm:$0xff] }
 0x220   :  { %2154 = vmatpush1.bf16.msra.mxu0 %v16181_v15  ;;  %v2353_v56 = vld [vmem:[#allocation14 + $0x120] sm:$0xff] }
 0x221   :  { %2155 = vmatprep.subr.bf16.mxu0 %v16186_v20  ;;  %v14402_v61 = vcombine.low %v2349_v55, %v2353_v56 }
 0x222   :  { %1229 = vmatpush1.bf16.msra.mxu1 %v14203_v62  ;;  %v16204_v62 = vld [vmem:[#allocation10 + $0xe4] ss:$8 sps:$4 sm:$0xff]  }
 0x223   :  { %1230 = vmatprep.subr.bf16.mxu1 %v14212_v2  ;;  %v410_v2 = vld [vmem:[#allocation7 + $0x218] sm:$0xff] }
 0x224   :  { %2156 = vmatpush1.bf16.msra.mxu0 %v16184_v22  ;;  %v14184_v9 = vcombine.high %v410_v2, %v414_v3  ;;  %v14183_v11 = vcombine.low %v410_v2, %v414_v3  ;;  %v446_v22 = vld [vmem:[#allocation7 + $0x338] sm:$0xff]  ;;  %v2373_v2 = vld [vmem:[#allocation14 + $0x1c0] sm:$0xff] }
 0x225   :  { %2157 = vmatprep.subr.bf16.mxu0 %v16189_v26  ;;  %v454_v26 = vld [vmem:[#allocation7 + $0x378] sm:$0xff]  ;;  %v2377_v3 = vld [vmem:[#allocation14 + $0x1e0] sm:$0xff] }
 0x226   :  { %1231 = vmatpush1.bf16.msra.mxu1 %v14211_v4  ;;  %v16207_v4 = vld [vmem:[#allocation10 + $0xf4] ss:$8 sps:$4 sm:$0xff]   ;;  %v14223_v31 = vcombine.low %v450_v25, %v454_v26 }
 0x227   :  { %1232 = vmatprep.subr.bf16.mxu1 %v14220_v8  ;;  %v422_v8 = vld [vmem:[#allocation7 + $0x278] sm:$0xff] }
 0x228   :  { %2158 = vmatpush1.bf16.msra.mxu0 %v16187_v28  ;;  %v14192_v12 = vcombine.high %v418_v7, %v422_v8  ;;  %v14191_v14 = vcombine.low %v418_v7, %v422_v8  ;;  %v14224_v28 = vcombine.high %v450_v25, %v454_v26  ;;  %v2322_v7 = vld [vmem:[#allocation14 + $0x28] sm:$0xff]  ;;  %v14427_v8 = vcombine.high %v2373_v2, %v2377_v3 }
 0x229   :  { %2159 = vmatprep.subr.bf16.mxu0 %v16192_v32  ;;  %v2354_v25 = vld [vmem:[#allocation14 + $0x128] sm:$0xff] }
 0x22a   :  { %1233 = vmatpush1.bf16.msra.mxu1 %v14219_v10  ;;  %v16210_v10 = vld [vmem:[#allocation10 + $0x104] ss:$8 sps:$4 sm:$0xff]  }
 0x22b   :  { %1234 = vmatprep.subr.bf16.mxu1 %v14228_v13  ;;  %v430_v13 = vld [vmem:[#allocation7 + $0x2b8] sm:$0xff] }
 0x22c   :  { %2160 = vmatpush1.bf16.msra.mxu0 %v16190_v34  ;;  %v14200_v15 = vcombine.high %v426_v17, %v430_v13  ;;  %v14199_v19 = vcombine.low %v426_v17, %v430_v13  ;;  %v470_v34 = vld [vmem:[#allocation7 + $0x3f8] sm:$0xff] }
 0x22d   :  { %2161 = vmatprep.subr.bf16.mxu0 %v16195_v39  ;;  %v17834_v17 = vld [vmem:[#allocation5] sm:$0xff]  }
 0x22e   :  { %1235 = vmatpush1.bf16.msra.mxu1 %v14227_v16  ;;  %v434_v16 = vld [vmem:[#allocation7 + $0x2d8] sm:$0xff] }
 0x22f   :  { %1236 = vmatprep.subr.bf16.mxu1 %v14236_v21  ;;  %v14208_v20 = vcombine.high %v434_v16, %v438_v18  ;;  %v442_v21 = vld [vmem:[#allocation7 + $0x318] sm:$0xff] }
 0x230   :  { %2162 = vmatpush1.bf16.msra.mxu0 %v16193_v41  ;;  %v14216_v24 = vcombine.high %v442_v21, %v446_v22  ;;  %v2325_v41 = vld [vmem:[#allocation14 + $0x40] sm:$0xff] }
 0x231   :  { %2163 = vmatprep.subr.bf16.mxu0 %v16198_v45  ;;  %v2333_v45 = vld [vmem:[#allocation14 + $0x80] sm:$0xff] }
 0x232   :  { %1237 = vmatpush1.bf16.msra.mxu1 %v14235_v23  ;;  %v14207_v23 = vcombine.low %v434_v16, %v438_v18  ;;  %v2338_v16 = vld [vmem:[#allocation14 + $0xa8] sm:$0xff] }
 0x233   :  { %1292 = vmatprep.subr.bf16.mxu1 %v14120_v27  ;;  %v14215_v27 = vcombine.low %v442_v21, %v446_v22  ;;  %v2346_v21 = vld [vmem:[#allocation14 + $0xe8] sm:$0xff] }
 0x234   :  { %2164 = vmatpush1.bf16.msra.mxu0 %v16196_v46  ;;  %v16817_v46 = vld [vmem:[#allocation2] ss:$8 sps:$4 sm:$0xff]  }
 0x235   :  { %1239 = vmatmul.mubr.bf16.vlgmr.msra.gmra.mrb[4].mxu1 %v17827_v51  ;;  %v14144_v51 = vcombine.high %v370_v36, %v374_v37  ;;  %2165 = vmatprep.subr.bf16.mxu0 %v16201_v50  ;;  %v2317_v37 = vld [vmem:[#allocation14] sm:$0xff] }
 0x236   :  { %1293 = vmatpush1.bf16.msra.mxu1 %v14119_v29  ;;  %1324 = vmatprep.mubr.bf16.mxu1 %v16816_v38  ;;  %v458_v29 = vld [vmem:[#allocation7 + $0x398] sm:$0xff]  ;;  %v2321_v38 = vld [vmem:[#allocation14 + $0x20] sm:$0xff] }
 0x237   :  { %1294 = vmatprep.subr.bf16.mxu1 %v14128_v33  ;;  %v14232_v32 = vcombine.high %v458_v29, %v462_v30  ;;  %v466_v33 = vld [vmem:[#allocation7 + $0x3d8] sm:$0xff]  ;;  %v14370_v43 = vcombine.low %v2317_v37, %v2321_v38  ;;  %v2341_v50 = vld [vmem:[#allocation14 + $0xc0] sm:$0xff] }
 0x238   :  { %2166 = vmatpush1.bf16.msra.mxu0 %v16199_v53  ;;  %v14240_v36 = vcombine.high %v466_v33, %v470_v34  ;;  %v14239_v39 = vcombine.low %v466_v33, %v470_v34  ;;  %v2370_v33 = vld [vmem:[#allocation14 + $0x1a8] sm:$0xff] }
 0x239   :  { %2167 = vmatprep.subr.bf16.mxu0 %v16204_v62 }
 0x23a   :  { %1295 = vmatpush1.bf16.msra.mxu1 %v14127_v35  ;;  %v14231_v35 = vcombine.low %v458_v29, %v462_v30  ;;  %v2362_v29 = vld [vmem:[#allocation14 + $0x168] sm:$0xff] }
 0x23b   :  { %1296 = vmatprep.subr.bf16.mxu1 %v14136_v40  ;;  %v14371_v40 = vcombine.high %v2317_v37, %v2321_v38  ;;  %v2378_v37 = vld [vmem:[#allocation14 + $0x1e8] sm:$0xff] }
 0x23c   :  { %2168 = vmatpush1.bf16.msra.mxu0 %v16202_v63  ;;  %v2365_v63 = vld [vmem:[#allocation14 + $0x180] sm:$0xff] }
 0x23d   :  { %2169 = vmatprep.subr.bf16.mxu0 %v16207_v4 }
 0x23e   :  { %1297 = vmatpush1.bf16.msra.mxu1 %v14135_v42  ;;  %v2329_v42 = vld [vmem:[#allocation14 + $0x60] sm:$0xff] }
 0x23f   :  { %1298 = vmatprep.subr.bf16.mxu1 %v14144_v51  ;;  %v14379_v44 = vcombine.high %v2325_v41, %v2329_v42  ;;  %v2337_v51 = vld [vmem:[#allocation14 + $0xa0] sm:$0xff] }
 0x240   :  { %2170 = vmatpush1.bf16.msra.mxu0 %v16205_v5  ;;  %v14387_v49 = vcombine.high %v2333_v45, %v2337_v51  ;;  %v14386_v53 = vcombine.low %v2333_v45, %v2337_v51  ;;  %v2331_v45 = vld [vmem:[#allocation14 + $0x70] sm:$0xff] }
 0x241   :  { %2182 = vmatprep.subr.bf16.mxu0 %v16210_v10  ;;  %v2326_v10 = vld [vmem:[#allocation14 + $0x48] sm:$0xff] }
 0x242   :  { %1299 = vmatpush1.bf16.msra.mxu1 %v14143_v47  ;;  %v14378_v47 = vcombine.low %v2325_v41, %v2329_v42  ;;  %v2323_v41 = vld [vmem:[#allocation14 + $0x30] sm:$0xff] }
 0x243   :  { %1300 = vmatprep.subr.bf16.mxu1 %v14152_v52  ;;  %v2345_v52 = vld [vmem:[#allocation14 + $0xe0] sm:$0xff] }
 0x246   :  { %1301 = vmatpush1.bf16.msra.mxu1 %v14151_v54  ;;  %v14395_v54 = vcombine.high %v2341_v50, %v2345_v52 }
 0x247   :  { %1302 = vmatprep.subr.bf16.mxu1 %v14160_v57  ;;  %v14394_v57 = vcombine.low %v2341_v50, %v2345_v52 }
 0x24a   :  { %1303 = vmatpush1.bf16.msra.mxu1 %v14159_v58  ;;  %v14403_v58 = vcombine.high %v2349_v55, %v2353_v56  ;;  %v473_v55 = vlaneseq }
 0x24b   :  { %1304 = vmatprep.subr.bf16.mxu1 %v14168_v59  ;;  %v2357_v59 = vld [vmem:[#allocation14 + $0x140] sm:$0xff] }
 0x24c   :  { %v14411_v62 = vcombine.high %v2357_v59, %v2361_v60 }
 0x24e   :  { %1305 = vmatpush1.bf16.msra.mxu1 %v14167_v0  ;;  %v2369_v0 = vld [vmem:[#allocation14 + $0x1a0] sm:$0xff] }
 0x24f   :  { %1306 = vmatprep.subr.bf16.mxu1 %v14176_v1  ;;  %v14410_v1 = vcombine.low %v2357_v59, %v2361_v60  ;;  %v14419_v4 = vcombine.high %v2365_v63, %v2369_v0  ;;  %v14418_v5 = vcombine.low %v2365_v63, %v2369_v0  ;;  %v2355_v59 = vld [vmem:[#allocation14 + $0x130] sm:$0xff]  ;;  %v17840_v60 = vshrl.u32 %v473_v55, 7 }
 0x250   :  { %v2359_v63 = vld [vmem:[#allocation14 + $0x150] sm:$0xff] }
 0x251   :  { %v2363_v0 = vld [vmem:[#allocation14 + $0x170] sm:$0xff] }
 0x252   :  { %1307 = vmatpush1.bf16.msra.mxu1 %v14175_v6  ;;  %v2318_v6 = vld [vmem:[#allocation14 + $0x8] sm:$0xff] }
 0x253   :  { %1308 = vmatprep.subr.bf16.mxu1 %v14184_v9  ;;  %v14426_v9 = vcombine.low %v2373_v2, %v2377_v3  ;;  %v14372_v13 = vcombine.low %v2318_v6, %v2322_v7  ;;  %v17845_v2 = vsub.s32 0, %v17840_v60  ;;  %v17848_v3 = vsub.s32 1, %v17840_v60 }
 0x256   :  { %1309 = vmatpush1.bf16.msra.mxu1 %v14183_v11  ;;  %v2330_v11 = vld [vmem:[#allocation14 + $0x68] sm:$0xff] }
 0x257   :  { %1310 = vmatprep.subr.bf16.mxu1 %v14192_v12  ;;  %v14373_v12 = vcombine.high %v2318_v6, %v2322_v7  ;;  %v14380_v18 = vcombine.low %v2326_v10, %v2330_v11  ;;  %v2367_v6 = vld [vmem:[#allocation14 + $0x190] sm:$0xff] }
 0x258   :  { %v2371_v7 = vld [vmem:[#allocation14 + $0x1b0] sm:$0xff] }
 0x25a   :  { %1311 = vmatpush1.bf16.msra.mxu1 %v14191_v14  ;;  %v14381_v14 = vcombine.high %v2326_v10, %v2330_v11  ;;  %v14414_v10 = vcombine.low %v2359_v63, %v2363_v0  ;;  %v14423_v11 = vcombine.high %v2367_v6, %v2371_v7 }
 0x25b   :  { %1312 = vmatprep.subr.bf16.mxu1 %v14200_v15  ;;  %v2334_v15 = vld [vmem:[#allocation14 + $0x88] sm:$0xff] }
 0x25c   :  { %v14388_v22 = vcombine.low %v2334_v15, %v2338_v16 }
 0x25e   :  { %1313 = vmatpush1.bf16.msra.mxu1 %v14199_v19  ;;  %v14389_v19 = vcombine.high %v2334_v15, %v2338_v16 }
 0x25f   :  { %1314 = vmatprep.subr.bf16.mxu1 %v14208_v20  ;;  %v2342_v20 = vld [vmem:[#allocation14 + $0xc8] sm:$0xff] }
 0x260   :  { %v14396_v26 = vcombine.low %v2342_v20, %v2346_v21 }
 0x262   :  { %1315 = vmatpush1.bf16.msra.mxu1 %v14207_v23  ;;  %v14397_v23 = vcombine.high %v2342_v20, %v2346_v21  ;;  %v14422_v20 = vcombine.low %v2367_v6, %v2371_v7  ;;  %v2320_v21 = vld [vmem:[#allocation14 + $0x18] sm:$0xff] }
 0x263   :  { %1316 = vmatprep.subr.bf16.mxu1 %v14216_v24  ;;  %v2350_v24 = vld [vmem:[#allocation14 + $0x108] sm:$0xff]  ;;  %v2360_v6 = vld [vmem:[#allocation14 + $0x158] sm:$0xff] }
 0x264   :  { %v14404_v30 = vcombine.low %v2350_v24, %v2354_v25  ;;  %v2364_v7 = vld [vmem:[#allocation14 + $0x178] sm:$0xff] }
 0x266   :  { %1317 = vmatpush1.bf16.msra.mxu1 %v14215_v27  ;;  %v14405_v27 = vcombine.high %v2350_v24, %v2354_v25 }
 0x267   :  { %1318 = vmatprep.subr.bf16.mxu1 %v14224_v28  ;;  %v2358_v28 = vld [vmem:[#allocation14 + $0x148] sm:$0xff] }
 0x268   :  { %v14412_v34 = vcombine.low %v2358_v28, %v2362_v29 }
 0x26a   :  { %1319 = vmatpush1.bf16.msra.mxu1 %v14223_v31  ;;  %v14413_v31 = vcombine.high %v2358_v28, %v2362_v29 }
 0x26b   :  { %1320 = vmatprep.subr.bf16.mxu1 %v14232_v32  ;;  %v2366_v32 = vld [vmem:[#allocation14 + $0x188] sm:$0xff] }
 0x26c   :  { %v14420_v38 = vcombine.low %v2366_v32, %v2370_v33 }
 0x26e   :  { %1321 = vmatpush1.bf16.msra.mxu1 %v14231_v35  ;;  %v14421_v35 = vcombine.high %v2366_v32, %v2370_v33  ;;  %v2328_v33 = vld [vmem:[#allocation14 + $0x58] sm:$0xff] }
 0x26f   :  { %1322 = vmatprep.subr.bf16.mxu1 %v14240_v36  ;;  %v2374_v36 = vld [vmem:[#allocation14 + $0x1c8] sm:$0xff] }
 0x270   :  { %v14428_v42 = vcombine.low %v2374_v36, %v2378_v37 }
 0x272   :  { %1323 = vmatpush1.bf16.msra.mxu1 %v14239_v39  ;;  %v14429_v39 = vcombine.high %v2374_v36, %v2378_v37 }
 0x273   :  { %2749 = vmatprep.subr.bf16.mxu1 %v14371_v40  ;;  %v2319_v40 = vld [vmem:[#allocation14 + $0x10] sm:$0xff] }
 0x274   :  { %v14374_v51 = vcombine.low %v2319_v40, %v2323_v41 }
 0x275   :  { %1325 = vmatmul.mubr.bf16.vlgmr.msra.gmra.mrb[8].mxu1 %v16817_v46 }
 0x276   :  { %2750 = vmatpush1.bf16.msra.mxu1 %v14370_v43  ;;  %2781 = vmatprep.mubr.bf16.mxu1 %v17402_v48  ;;  %v14375_v43 = vcombine.high %v2319_v40, %v2323_v41  ;;  %v16211_v41 = vld [vmem:[#allocation10 + $0x110] ss:$8 sps:$4 sm:$0xff]  }
 0x277   :  { %2751 = vmatprep.subr.bf16.mxu1 %v14379_v44  ;;  %v2327_v44 = vld [vmem:[#allocation14 + $0x50] sm:$0xff] }
 0x278   :  { %v14383_v46 = vcombine.high %v2327_v44, %v2331_v45  ;;  %v14382_v50 = vcombine.low %v2327_v44, %v2331_v45  ;;  %v16216_v44 = vld [vmem:[#allocation10 + $0x124] ss:$8 sps:$4 sm:$0xff]  }
 0x27a   :  { %2752 = vmatpush1.bf16.msra.mxu1 %v14378_v47  ;;  %v2335_v47 = vld [vmem:[#allocation14 + $0x90] sm:$0xff] }
 0x27b   :  { %2753 = vmatprep.subr.bf16.mxu1 %v14387_v49  ;;  %v2339_v49 = vld [vmem:[#allocation14 + $0xb0] sm:$0xff] }
 0x27c   :  { %v14391_v52 = vcombine.high %v2335_v47, %v2339_v49  ;;  %v14390_v56 = vcombine.low %v2335_v47, %v2339_v49  ;;  %v2344_v47 = vld [vmem:[#allocation14 + $0xd8] sm:$0xff] }
 0x27d   :  { %v2348_v49 = vld [vmem:[#allocation14 + $0xf8] sm:$0xff] }
 0x27e   :  { %2754 = vmatpush1.bf16.msra.mxu1 %v14386_v53  ;;  %v2343_v53 = vld [vmem:[#allocation14 + $0xd0] sm:$0xff]  ;;  %v14401_v55 = vcombine.high %v2344_v47, %v2348_v49 }
 0x27f   :  { %2755 = vmatprep.subr.bf16.mxu1 %v14395_v54  ;;  %v2347_v54 = vld [vmem:[#allocation14 + $0xf0] sm:$0xff] }
 0x282   :  { %2756 = vmatpush1.bf16.msra.mxu1 %v14394_v57  ;;  %v14399_v57 = vcombine.high %v2343_v53, %v2347_v54 }
 0x283   :  { %2757 = vmatprep.subr.bf16.mxu1 %v14403_v58  ;;  %v2351_v58 = vld [vmem:[#allocation14 + $0x110] sm:$0xff] }
 0x286   :  { %2758 = vmatpush1.bf16.msra.mxu1 %v14402_v61  ;;  %v14398_v61 = vcombine.low %v2343_v53, %v2347_v54  ;;  %v17860_v53 = vsub.s32 5, %v17840_v60 }
 0x287   :  { %2759 = vmatprep.subr.bf16.mxu1 %v14411_v62  ;;  %v14407_v62 = vcombine.high %v2351_v58, %v2355_v59 }
 0x28a   :  { %2760 = vmatpush1.bf16.msra.mxu1 %v14410_v1  ;;  %v17842_v1 = vld [vmem:[#allocation8] sm:$0xff] }
 0x28b   :  { %2761 = vmatprep.subr.bf16.mxu1 %v14419_v4  ;;  %v14406_v4 = vcombine.low %v2351_v58, %v2355_v59  ;;  %v2356_v58 = vld [vmem:[#allocation14 + $0x138] sm:$0xff] }
 0x28e   :  { %2762 = vmatpush1.bf16.msra.mxu1 %v14418_v5  ;;  %v14415_v5 = vcombine.high %v2359_v63, %v2363_v0  ;;  %v14400_v63 = vcombine.low %v2344_v47, %v2348_v49  ;;  %v16297_v47 = vld [vmem:[#allocation17 + $0x24] ss:$8 sps:$4 sm:$0xff]   ;;  %v16238_v49 = vld [vmem:[#allocation10 + $0x1a0] ss:$8 sps:$4 sm:$0xff]  }
 0x28f   :  { %2763 = vmatprep.subr.bf16.mxu1 %v14427_v8  ;;  %v476_v8 = vrot.slane %v17842_v1, %v17845_v2 }
 0x292   :  { %2764 = vmatpush1.bf16.msra.mxu1 %v14426_v9  ;;  %v480_v9 = vrot.slane %v17842_v1, %v17848_v3 }
 0x293   :  { %2792 = vmatprep.subr.bf16.mxu1 %v14373_v12  ;;  %v2375_v12 = vld [vmem:[#allocation14 + $0x1d0] sm:$0xff] }
 0x295   :  { %2782 = vmatmul.mubr.bf16.vlgmr.msra.gmra.mrb[12].mxu1 %v17834_v17 }
 0x296   :  { %2793 = vmatpush1.bf16.msra.mxu1 %v14372_v13  ;;  %2824 = vmatprep.mubr.bf16.mxu1 %v17402_v48 }
 0x297   :  { %2794 = vmatprep.subr.bf16.mxu1 %v14381_v14  ;;  %v2379_v14 = vld [vmem:[#allocation14 + $0x1f0] sm:$0xff] }
 0x298   :  { %v14431_v25 = vcombine.high %v2375_v12, %v2379_v14  ;;  %v14430_v32 = vcombine.low %v2375_v12, %v2379_v14 }
 0x29a   :  { %2795 = vmatpush1.bf16.msra.mxu1 %v14380_v18 }
 0x29b   :  { %2796 = vmatprep.subr.bf16.mxu1 %v14389_v19 }
 0x29e   :  { %2797 = vmatpush1.bf16.msra.mxu1 %v14388_v22 }
 0x29f   :  { %2798 = vmatprep.subr.bf16.mxu1 %v14397_v23 }
 0x2a2   :  { %2799 = vmatpush1.bf16.msra.mxu1 %v14396_v26 }
 0x2a3   :  { %2800 = vmatprep.subr.bf16.mxu1 %v14405_v27  ;;  %v2324_v27 = vld [vmem:[#allocation14 + $0x38] sm:$0xff] }
 0x2a4   :  { %v14377_v36 = vcombine.high %v2320_v21, %v2324_v27 }
 0x2a6   :  { %2801 = vmatpush1.bf16.msra.mxu1 %v14404_v30 }
 0x2a7   :  { %2802 = vmatprep.subr.bf16.mxu1 %v14413_v31  ;;  %v16208_v31 = vld [vmem:[#allocation10 + $0x100] ss:$8 sps:$4 sm:$0xff]  }
 0x2aa   :  { %2803 = vmatpush1.bf16.msra.mxu1 %v14412_v34  ;;  %v2332_v34 = vld [vmem:[#allocation14 + $0x78] sm:$0xff] }
 0x2ab   :  { %2804 = vmatprep.subr.bf16.mxu1 %v14421_v35  ;;  %v14385_v40 = vcombine.high %v2328_v33, %v2332_v34  ;;  %v14384_v45 = vcombine.low %v2328_v33, %v2332_v34  ;;  %v2380_v33 = vld [vmem:[#allocation14 + $0x1f8] sm:$0xff] }
 0x2ac   :  { %v16231_v34 = vld [vmem:[#allocation10 + $0x174] ss:$8 sps:$4 sm:$0xff]  }
 0x2ae   :  { %2805 = vmatpush1.bf16.msra.mxu1 %v14420_v38  ;;  %v16213_v38 = vld [vmem:[#allocation10 + $0x114] ss:$8 sps:$4 sm:$0xff]  }
 0x2af   :  { %2806 = vmatprep.subr.bf16.mxu1 %v14429_v39  ;;  %v14376_v39 = vcombine.low %v2320_v21, %v2324_v27  ;;  %v16223_v21 = vld [vmem:[#allocation10 + $0x150] ss:$8 sps:$4 sm:$0xff]   ;;  %v14416_v27 = vcombine.low %v2360_v6, %v2364_v7 }
 0x2b2   :  { %2807 = vmatpush1.bf16.msra.mxu1 %v14428_v42  ;;  %v2336_v42 = vld [vmem:[#allocation14 + $0x98] sm:$0xff] }
 0x2b3   :  { %2835 = vmatprep.subr.bf16.mxu1 %v14375_v43  ;;  %v2340_v43 = vld [vmem:[#allocation14 + $0xb8] sm:$0xff] }
 0x2b4   :  { %v14392_v54 = vcombine.low %v2336_v42, %v2340_v43 }
 0x2b5   :  { %2825 = vmatmul.mubr.bf16.vlgmr.msra.gmra.mrb[16].mxu1 %v17834_v17 }
 0x2b6   :  { %2836 = vmatpush1.bf16.msra.mxu1 %v14374_v51  ;;  %2867 = vmatprep.mubr.bf16.mxu1 %v17402_v48  ;;  %v14393_v51 = vcombine.high %v2336_v42, %v2340_v43  ;;  %v16237_v42 = vld [vmem:[#allocation10 + $0x194] ss:$8 sps:$4 sm:$0xff]  }
 0x2b7   :  { %2837 = vmatprep.subr.bf16.mxu1 %v14383_v46  ;;  %v16214_v46 = vld [vmem:[#allocation10 + $0x120] ss:$8 sps:$4 sm:$0xff]   ;;  %v16283_v43 = vld [vmem:[#allocation17] ss:$8 sps:$4 sm:$0xff]  }
 0x2ba   :  { %2838 = vmatpush1.bf16.msra.mxu1 %v14382_v50  ;;  %v17857_v50 = vsub.s32 4, %v17840_v60 }
 0x2bb   :  { %2839 = vmatprep.subr.bf16.mxu1 %v14391_v52  ;;  %v16219_v52 = vld [vmem:[#allocation10 + $0x134] ss:$8 sps:$4 sm:$0xff]  }
 0x2bc   :  { %v492_v59 = vrot.slane %v17842_v1, %v17857_v50 }
 0x2be   :  { %2840 = vmatpush1.bf16.msra.mxu1 %v14390_v56  ;;  %v16217_v56 = vld [vmem:[#allocation10 + $0x130] ss:$8 sps:$4 sm:$0xff]  }
 0x2bf   :  { %2841 = vmatprep.subr.bf16.mxu1 %v14399_v57  ;;  %v2352_v57 = vld [vmem:[#allocation14 + $0x118] sm:$0xff] }
 0x2c0   :  { %v14409_v0 = vcombine.high %v2352_v57, %v2356_v58 }
 0x2c2   :  { %2842 = vmatpush1.bf16.msra.mxu1 %v14398_v61  ;;  %v16222_v61 = vld [vmem:[#allocation10 + $0x144] ss:$8 sps:$4 sm:$0xff]  }
 0x2c3   :  { %2843 = vmatprep.subr.bf16.mxu1 %v14407_v62  ;;  %v496_v62 = vrot.slane %v17842_v1, %v17860_v53 }
 0x2c6   :  { %2844 = vmatpush1.bf16.msra.mxu1 %v14406_v4 }
 0x2c7   :  { %2845 = vmatprep.subr.bf16.mxu1 %v14415_v5  ;;  %v16220_v5 = vld [vmem:[#allocation10 + $0x140] ss:$8 sps:$4 sm:$0xff]  }
 0x2c8   :  { %v1197_v13 = vpop.f32.mrb[0].mxu1 }
 0x2c9   :  { %v1198_v15 = vadd.f32 %v1197_v13, %v476_v8  ;;  %v1199_v16 = vpop.f32.mrb[1].mxu1  ;;  %v14408_v13 = vcombine.low %v2352_v57, %v2356_v58  ;;  %v16246_v57 = vld [vmem:[#allocation10 + $0x1c4] ss:$8 sps:$4 sm:$0xff]  }
 0x2ca   :  { %v1200_v18 = vadd.f32 %v1199_v16, %v480_v9  ;;  %v1201_v19 = vpop.f32.mrb[2].mxu1  ;;  %2846 = vmatpush1.bf16.msra.mxu1 %v14414_v10  ;;  %v16225_v10 = vld [vmem:[#allocation10 + $0x154] ss:$8 sps:$4 sm:$0xff]  }
 0x2cb   :  { %v1335_v22 = vmax.f32 %v1198_v15, 0.0  ;;  %v1202_v23 = vadd.f32 %v1201_v19, %v476_v8  ;;  %v1203_v24 = vpop.f32.mrb[3].mxu1  ;;  %2847 = vmatprep.subr.bf16.mxu1 %v14423_v11  ;;  %v16301_v58 = vld [vmem:[#allocation17 + $0x30] ss:$8 sps:$4 sm:$0xff]  }
 0x2cc   :  { %v1204_v26 = vadd.f32 %v1203_v24, %v480_v9  ;;  %v1336_v29 = vmax.f32 %v1200_v18, 0.0  ;;  %v14417_v18 = vcombine.high %v2360_v6, %v2364_v7  ;;  %v16252_v7 = vld [vmem:[#allocation10 + $0x1e4] ss:$8 sps:$4 sm:$0xff]  }
 0x2cd   :  { %v1343_v28 = vmax.f32 %v1202_v23, 0.0  ;;  %v2372_v23 = vld [vmem:[#allocation14 + $0x1b8] sm:$0xff] }
 0x2ce   :  { %v1344_v30 = vmax.f32 %v1204_v26, 0.0  ;;  %2848 = vmatpush1.bf16.msra.mxu1 %v14422_v20 }
 0x2cf   :  { %v1351_v35 = vpack.c.bf16 %v1343_v28, %v1335_v22  ;;  %2849 = vmatprep.subr.bf16.mxu1 %v14431_v25  ;;  %v2368_v22 = vld [vmem:[#allocation14 + $0x198] sm:$0xff]  ;;  %v16228_v25 = vld [vmem:[#allocation10 + $0x164] ss:$8 sps:$4 sm:$0xff]  }
 0x2d0   :  { %v1352_v37 = vpack.c.bf16 %v1344_v30, %v1336_v29  ;;  %v14425_v29 = vcombine.high %v2368_v22, %v2372_v23 }
 0x2d2   :  { %2171 = vmatprep.mubr.bf16.mxu0 %v1352_v37  ;;  %2850 = vmatpush1.bf16.msra.mxu1 %v14430_v32  ;;  %v2376_v32 = vld [vmem:[#allocation14 + $0x1d8] sm:$0xff]  ;;  %v16229_v37 = vld [vmem:[#allocation10 + $0x170] ss:$8 sps:$4 sm:$0xff]  }
 0x2d3   :  { %2172 = vmatmul.mubr.bf16.vlgmr.msra.gmra.mrb[4].mxu0 %v1351_v35  ;;  %2878 = vmatprep.subr.bf16.mxu1 %v14377_v36  ;;  %v14424_v35 = vcombine.low %v2368_v22, %v2372_v23  ;;  %v14433_v36 = vcombine.high %v2376_v32, %v2380_v33  ;;  %v16327_v23 = vld [vmem:[#allocation17 + $0x74] ss:$8 sps:$4 sm:$0xff]  }
 0x2d4   :  { %2183 = vmatpush1.bf16.msra.mxu0 %v16208_v31  ;;  %v16226_v31 = vld [vmem:[#allocation10 + $0x160] ss:$8 sps:$4 sm:$0xff]  }
 0x2d5   :  { %2184 = vmatprep.subr.bf16.mxu0 %v16213_v38  ;;  %2868 = vmatmul.mubr.bf16.vlgmr.msra.gmra.mrb[20].mxu1 %v17834_v17  ;;  %v16234_v38 = vld [vmem:[#allocation10 + $0x184] ss:$8 sps:$4 sm:$0xff]  }
 0x2d6   :  { %2879 = vmatpush1.bf16.msra.mxu1 %v14376_v39  ;;  %2910 = vmatprep.mubr.bf16.mxu1 %v17402_v48  ;;  %v1283_v4 = vpop.f32.mrb[0].mxu0  ;;  %v14432_v39 = vcombine.low %v2376_v32, %v2380_v33  ;;  %v16325_v32 = vld [vmem:[#allocation17 + $0x70] ss:$8 sps:$4 sm:$0xff]  }
 0x2d7   :  { %2880 = vmatprep.subr.bf16.mxu1 %v14385_v40  ;;  %v1284_v8 = vadd.f32 %v1283_v4, %v492_v59  ;;  %v1285_v9 = vpop.f32.mrb[1].mxu0  ;;  %v16285_v40 = vld [vmem:[#allocation17 + $0x4] ss:$8 sps:$4 sm:$0xff]   ;;  %v16315_v4 = vld [vmem:[#allocation17 + $0x54] ss:$8 sps:$4 sm:$0xff]  }
 0x2d8   :  { %2185 = vmatpush1.bf16.msra.mxu0 %v16211_v41  ;;  %v1286_v11 = vadd.f32 %v1285_v9, %v496_v62  ;;  %v1287_v12 = vpop.f32.mrb[2].mxu0  ;;  %v16232_v41 = vld [vmem:[#allocation10 + $0x180] ss:$8 sps:$4 sm:$0xff]   ;;  %v16313_v9 = vld [vmem:[#allocation17 + $0x50] ss:$8 sps:$4 sm:$0xff]  }
 0x2d9   :  { %2186 = vmatprep.subr.bf16.mxu0 %v16216_v44  ;;  %v1339_v14 = vmax.f32 %v1284_v8, 0.0  ;;  %v1288_v15 = vadd.f32 %v1287_v12, %v492_v59  ;;  %v1289_v16 = vpop.f32.mrb[3].mxu0  ;;  %v16291_v44 = vld [vmem:[#allocation17 + $0x14] ss:$8 sps:$4 sm:$0xff]  }
 0x2da   :  { %2881 = vmatpush1.bf16.msra.mxu1 %v14384_v45  ;;  %v1340_v19 = vmax.f32 %v1286_v11, 0.0  ;;  %v1290_v20 = vadd.f32 %v1289_v16, %v496_v62  ;;  %v16235_v45 = vld [vmem:[#allocation10 + $0x190] ss:$8 sps:$4 sm:$0xff]   ;;  %v16244_v59 = vld [vmem:[#allocation10 + $0x1c0] ss:$8 sps:$4 sm:$0xff]   ;;  %v17872_v62 = vsub.s32 2, %v17840_v60 }
 0x2db   :  { %2882 = vmatprep.subr.bf16.mxu1 %v14393_v51  ;;  %v1347_v24 = vmax.f32 %v1288_v15, 0.0  ;;  %v16240_v51 = vld [vmem:[#allocation10 + $0x1a4] ss:$8 sps:$4 sm:$0xff]   ;;  %v16250_v12 = vld [vmem:[#allocation10 + $0x1e0] ss:$8 sps:$4 sm:$0xff]  }
 0x2dc   :  { %2187 = vmatpush1.bf16.msra.mxu0 %v16214_v46  ;;  %v1348_v26 = vmax.f32 %v1290_v20, 0.0  ;;  %v16289_v46 = vld [vmem:[#allocation17 + $0x10] ss:$8 sps:$4 sm:$0xff]   ;;  %v484_v6 = vrot.slane %v17842_v1, %v17872_v62 }
 0x2dd   :  { %2188 = vmatprep.subr.bf16.mxu0 %v16219_v52  ;;  %v17866_v28 = vpack.c.bf16 %v1347_v24, %v1339_v14  ;;  %v16243_v52 = vld [vmem:[#allocation10 + $0x1b4] ss:$8 sps:$4 sm:$0xff]  }
 0x2de   :  { %2883 = vmatpush1.bf16.msra.mxu1 %v14392_v54  ;;  %v17868_v30 = vpack.c.bf16 %v1348_v26, %v1340_v19  ;;  %v16295_v54 = vld [vmem:[#allocation17 + $0x20] ss:$8 sps:$4 sm:$0xff]  }
 0x2df   :  { %2884 = vmatprep.subr.bf16.mxu1 %v14401_v55  ;;  %v16303_v55 = vld [vmem:[#allocation17 + $0x34] ss:$8 sps:$4 sm:$0xff]   ;;  %v16255_v15 = vld [vmem:[#allocation10 + $0x1f4] ss:$8 sps:$4 sm:$0xff]  }
 0x2e0   :  { %2189 = vmatpush1.bf16.msra.mxu0 %v16217_v56  ;;  %v16241_v56 = vld [vmem:[#allocation10 + $0x1b0] ss:$8 sps:$4 sm:$0xff]   ;;  %v16319_v19 = vld [vmem:[#allocation17 + $0x60] ss:$8 sps:$4 sm:$0xff]  }
 0x2e1   :  { %2190 = vmatprep.subr.bf16.mxu0 %v16222_v61  ;;  %v16249_v61 = vld [vmem:[#allocation10 + $0x1d4] ss:$8 sps:$4 sm:$0xff]  }
 0x2e2   :  { %2885 = vmatpush1.bf16.msra.mxu1 %v14400_v63  ;;  %v17875_v63 = vsub.s32 3, %v17840_v60 }
 0x2e3   :  { %2886 = vmatprep.subr.bf16.mxu1 %v14409_v0  ;;  %v16307_v0 = vld [vmem:[#allocation17 + $0x40] ss:$8 sps:$4 sm:$0xff]  }
 0x2e4   :  { %2191 = vmatpush1.bf16.msra.mxu0 %v16220_v5  ;;  %v16247_v5 = vld [vmem:[#allocation10 + $0x1d0] ss:$8 sps:$4 sm:$0xff]   ;;  %v488_v8 = vrot.slane %v17842_v1, %v17875_v63 }
 0x2e5   :  { %2192 = vmatprep.subr.bf16.mxu0 %v16225_v10  ;;  %v16321_v10 = vld [vmem:[#allocation17 + $0x64] ss:$8 sps:$4 sm:$0xff]  }
 0x2e6   :  { %2887 = vmatpush1.bf16.msra.mxu1 %v14408_v13 }
 0x2e7   :  { %2888 = vmatprep.subr.bf16.mxu1 %v14417_v18 }
 0x2e8   :  { %2193 = vmatpush1.bf16.msra.mxu0 %v16223_v21 }
 0x2e9   :  { %2194 = vmatprep.subr.bf16.mxu0 %v16228_v25  ;;  %v16253_v25 = vld [vmem:[#allocation10 + $0x1f0] ss:$8 sps:$4 sm:$0xff]  }
 0x2ea   :  { %2889 = vmatpush1.bf16.msra.mxu1 %v14416_v27  ;;  %v16258_v27 = vld [vmem:[#allocation10 + $0x204] ss:$8 sps:$4 sm:$0xff]  }
 0x2eb   :  { %2890 = vmatprep.subr.bf16.mxu1 %v14425_v29 }
 0x2ec   :  { %2195 = vmatpush1.bf16.msra.mxu0 %v16226_v31 }
 0x2ed   :  { %2196 = vmatprep.subr.bf16.mxu0 %v16231_v34  ;;  %v16333_v34 = vld [vmem:[#allocation17 + $0x84] ss:$8 sps:$4 sm:$0xff]  }
 0x2ee   :  { %2891 = vmatpush1.bf16.msra.mxu1 %v14424_v35 }
 0x2ef   :  { %2892 = vmatprep.subr.bf16.mxu1 %v14433_v36  ;;  %v16256_v36 = vld [vmem:[#allocation10 + $0x200] ss:$8 sps:$4 sm:$0xff]  }
 0x2f0   :  { %2197 = vmatpush1.bf16.msra.mxu0 %v16229_v37  ;;  %v16261_v37 = vld [vmem:[#allocation10 + $0x214] ss:$8 sps:$4 sm:$0xff]  }
 0x2f1   :  { %2198 = vmatprep.subr.bf16.mxu0 %v16234_v38  ;;  %v16331_v38 = vld [vmem:[#allocation17 + $0x80] ss:$8 sps:$4 sm:$0xff]  }
 0x2f2   :  { %2893 = vmatpush1.bf16.msra.mxu1 %v14432_v39  ;;  %v16339_v39 = vld [vmem:[#allocation17 + $0x94] ss:$8 sps:$4 sm:$0xff]  }
 0x2f3   :  { %3725 = vmatprep.subr.bf16.mxu1 %v16285_v40  ;;  %v16259_v40 = vld [vmem:[#allocation10 + $0x210] ss:$8 sps:$4 sm:$0xff]  }
 0x2f4   :  { %2199 = vmatpush1.bf16.msra.mxu0 %v16232_v41  ;;  %v16264_v41 = vld [vmem:[#allocation10 + $0x224] ss:$8 sps:$4 sm:$0xff]  }
 0x2f5   :  { %2200 = vmatprep.subr.bf16.mxu0 %v16237_v42  ;;  %2911 = vmatmul.mubr.bf16.vlgmr.msra.gmra.mrb[24].mxu1 %v17834_v17  ;;  %v16309_v17 = vld [vmem:[#allocation17 + $0x44] ss:$8 sps:$4 sm:$0xff]   ;;  %v16337_v42 = vld [vmem:[#allocation17 + $0x90] ss:$8 sps:$4 sm:$0xff]  }
 0x2f6   :  { %3726 = vmatpush1.bf16.msra.mxu1 %v16283_v43  ;;  %v16345_v43 = vld [vmem:[#allocation17 + $0xa4] ss:$8 sps:$4 sm:$0xff]  }
 0x2f7   :  { %3727 = vmatprep.subr.bf16.mxu1 %v16291_v44  ;;  %v16262_v44 = vld [vmem:[#allocation10 + $0x220] ss:$8 sps:$4 sm:$0xff]  }
 0x2f8   :  { %2201 = vmatpush1.bf16.msra.mxu0 %v16235_v45  ;;  %v16267_v45 = vld [vmem:[#allocation10 + $0x234] ss:$8 sps:$4 sm:$0xff]  }
 0x2f9   :  { %2202 = vmatprep.subr.bf16.mxu0 %v16240_v51  ;;  %v16343_v51 = vld [vmem:[#allocation17 + $0xa0] ss:$8 sps:$4 sm:$0xff]  }
 0x2fa   :  { %3728 = vmatpush1.bf16.msra.mxu1 %v16289_v46  ;;  %v16351_v46 = vld [vmem:[#allocation17 + $0xb4] ss:$8 sps:$4 sm:$0xff]  }
 0x2fb   :  { %3729 = vmatprep.subr.bf16.mxu1 %v16297_v47  ;;  %v16265_v47 = vld [vmem:[#allocation10 + $0x230] ss:$8 sps:$4 sm:$0xff]  }
 0x2fc   :  { %2203 = vmatpush1.bf16.msra.mxu0 %v16238_v49  ;;  %v16270_v49 = vld [vmem:[#allocation10 + $0x244] ss:$8 sps:$4 sm:$0xff]  }
 0x2fd   :  { %2204 = vmatprep.subr.bf16.mxu0 %v16243_v52  ;;  %v16357_v52 = vld [vmem:[#allocation17 + $0xc4] ss:$8 sps:$4 sm:$0xff]  }
 0x2fe   :  { %3730 = vmatpush1.bf16.msra.mxu1 %v16295_v54  ;;  %v16268_v54 = vld [vmem:[#allocation10 + $0x240] ss:$8 sps:$4 sm:$0xff]  }
 0x2ff   :  { %3731 = vmatprep.subr.bf16.mxu1 %v16303_v55  ;;  %v16273_v55 = vld [vmem:[#allocation10 + $0x254] ss:$8 sps:$4 sm:$0xff]  }
 0x300   :  { %2205 = vmatpush1.bf16.msra.mxu0 %v16241_v56  ;;  %v16355_v56 = vld [vmem:[#allocation17 + $0xc0] ss:$8 sps:$4 sm:$0xff]  }
 0x301   :  { %2206 = vmatprep.subr.bf16.mxu0 %v16246_v57  ;;  %v16363_v57 = vld [vmem:[#allocation17 + $0xd4] ss:$8 sps:$4 sm:$0xff]  }
 0x302   :  { %3732 = vmatpush1.bf16.msra.mxu1 %v16301_v58  ;;  %v16271_v58 = vld [vmem:[#allocation10 + $0x250] ss:$8 sps:$4 sm:$0xff]  }
 0x303   :  { %3733 = vmatprep.subr.bf16.mxu1 %v16309_v17  ;;  %v16276_v17 = vld [vmem:[#allocation10 + $0x264] ss:$8 sps:$4 sm:$0xff]  }
 0x304   :  { %2207 = vmatpush1.bf16.msra.mxu0 %v16244_v59  ;;  %v16361_v59 = vld [vmem:[#allocation17 + $0xd0] ss:$8 sps:$4 sm:$0xff]  }
 0x305   :  { %2208 = vmatprep.subr.bf16.mxu0 %v16249_v61  ;;  %v16369_v61 = vld [vmem:[#allocation17 + $0xe4] ss:$8 sps:$4 sm:$0xff]  }
 0x306   :  { %3734 = vmatpush1.bf16.msra.mxu1 %v16307_v0  ;;  %v16274_v0 = vld [vmem:[#allocation10 + $0x260] ss:$8 sps:$4 sm:$0xff]  }
 0x307   :  { %3735 = vmatprep.subr.bf16.mxu1 %v16315_v4  ;;  %v16279_v4 = vld [vmem:[#allocation10 + $0x274] ss:$8 sps:$4 sm:$0xff]  }
 0x308   :  { %2209 = vmatpush1.bf16.msra.mxu0 %v16247_v5  ;;  %v1240_v11 = vpop.f32.mrb[4].mxu1  ;;  %v16367_v5 = vld [vmem:[#allocation17 + $0xe0] ss:$8 sps:$4 sm:$0xff]  }
 0x309   :  { %v1241_v13 = vadd.f32 %v1240_v11, %v484_v6  ;;  %v1242_v14 = vpop.f32.mrb[5].mxu1  ;;  %2210 = vmatprep.subr.bf16.mxu0 %v16252_v7  ;;  %v16277_v7 = vld [vmem:[#allocation10 + $0x270] ss:$8 sps:$4 sm:$0xff]   ;;  %v16280_v11 = vld [vmem:[#allocation10 + $0x280] ss:$8 sps:$4 sm:$0xff]  }
 0x30a   :  { %v1243_v16 = vadd.f32 %v1242_v14, %v488_v8  ;;  %v1244_v18 = vpop.f32.mrb[6].mxu1  ;;  %3736 = vmatpush1.bf16.msra.mxu1 %v16313_v9  ;;  %v16373_v9 = vld [vmem:[#allocation17 + $0xf0] ss:$8 sps:$4 sm:$0xff]  }
 0x30b   :  { %v1337_v20 = vmax.f32 %v1241_v13, 0.0  ;;  %v1245_v21 = vadd.f32 %v1244_v18, %v484_v6  ;;  %v1246_v22 = vpop.f32.mrb[7].mxu1  ;;  %3737 = vmatprep.subr.bf16.mxu1 %v16321_v10  ;;  %v16375_v6 = vld [vmem:[#allocation17 + $0xf4] ss:$8 sps:$4 sm:$0xff]   ;;  %v16381_v10 = vld [vmem:[#allocation17 + $0x104] ss:$8 sps:$4 sm:$0xff]  }
 0x30c   :  { %v1247_v24 = vadd.f32 %v1246_v22, %v488_v8  ;;  %2211 = vmatpush1.bf16.msra.mxu0 %v16250_v12  ;;  %v1338_v29 = vmax.f32 %v1243_v16, 0.0  ;;  %v16282_v8 = vld [vmem:[#allocation10 + $0x284] ss:$8 sps:$4 sm:$0xff]   ;;  %v16288_v12 = vld [vmem:[#allocation10 + $0x294] ss:$8 sps:$4 sm:$0xff]   ;;  %v17883_v22 = vsub.s32 6, %v17840_v60 }
 0x30d   :  { %v1345_v26 = vmax.f32 %v1245_v21, 0.0  ;;  %2212 = vmatprep.subr.bf16.mxu0 %v16255_v15  ;;  %v16286_v13 = vld [vmem:[#allocation10 + $0x290] ss:$8 sps:$4 sm:$0xff]   ;;  %v16294_v14 = vld [vmem:[#allocation10 + $0x2a4] ss:$8 sps:$4 sm:$0xff]  }
 0x30e   :  { %v1346_v31 = vmax.f32 %v1247_v24, 0.0  ;;  %3738 = vmatpush1.bf16.msra.mxu1 %v16319_v19  ;;  %v16292_v15 = vld [vmem:[#allocation10 + $0x2a0] ss:$8 sps:$4 sm:$0xff]   ;;  %v16300_v16 = vld [vmem:[#allocation10 + $0x2b4] ss:$8 sps:$4 sm:$0xff]  }
 0x30f   :  { %v1353_v33 = vpack.c.bf16 %v1345_v26, %v1337_v20  ;;  %3739 = vmatprep.subr.bf16.mxu1 %v16327_v23  ;;  %v16298_v18 = vld [vmem:[#allocation10 + $0x2b0] ss:$8 sps:$4 sm:$0xff]   ;;  %v16306_v19 = vld [vmem:[#allocation10 + $0x2c4] ss:$8 sps:$4 sm:$0xff]   ;;  %v16304_v20 = vld [vmem:[#allocation10 + $0x2c0] ss:$8 sps:$4 sm:$0xff]  }
 0x310   :  { %v1354_v35 = vpack.c.bf16 %v1346_v31, %v1338_v29  ;;  %2213 = vmatpush1.bf16.msra.mxu0 %v16253_v25  ;;  %v16312_v21 = vld [vmem:[#allocation10 + $0x2d4] ss:$8 sps:$4 sm:$0xff]   ;;  %v17886_v23 = vsub.s32 7, %v17840_v60  ;;  %v16310_v24 = vld [vmem:[#allocation10 + $0x2d0] ss:$8 sps:$4 sm:$0xff]   ;;  %v500_v25 = vrot.slane %v17842_v1, %v17883_v22 }
 0x311   :  { %2225 = vmatprep.subr.bf16.mxu0 %v16258_v27  ;;  %v16318_v26 = vld [vmem:[#allocation10 + $0x2e4] ss:$8 sps:$4 sm:$0xff]   ;;  %v16316_v31 = vld [vmem:[#allocation10 + $0x2e0] ss:$8 sps:$4 sm:$0xff]  }
 0x312   :  { %2214 = vmatprep.mubr.bf16.mxu0 %v1354_v35  ;;  %3740 = vmatpush1.bf16.msra.mxu1 %v16325_v32  ;;  %v504_v27 = vrot.slane %v17842_v1, %v17886_v23 }
 0x313   :  { %2215 = vmatmul.mubr.bf16.vlgmr.msra.gmra.mrb[4].mxu0 %v1353_v33  ;;  %3741 = vmatprep.subr.bf16.mxu1 %v16333_v34  ;;  %v16324_v34 = vld [vmem:[#allocation10 + $0x2f4] ss:$8 sps:$4 sm:$0xff]  }
 0x314   :  { %2226 = vmatpush1.bf16.msra.mxu0 %v16256_v36  ;;  %2257 = vmatprep.mubr.bf16.mxu0 %v17868_v30  ;;  %v16349_v30 = vld [vmem:[#allocation17 + $0xb0] ss:$8 sps:$4 sm:$0xff]  }
 0x315   :  { %2227 = vmatprep.subr.bf16.mxu0 %v16261_v37 }
 0x316   :  { %3742 = vmatpush1.bf16.msra.mxu1 %v16331_v38 }
 0x317   :  { %3743 = vmatprep.subr.bf16.mxu1 %v16339_v39 }
 0x318   :  { %2228 = vmatpush1.bf16.msra.mxu0 %v16259_v40  ;;  %v16322_v40 = vld [vmem:[#allocation10 + $0x2f0] ss:$8 sps:$4 sm:$0xff]  }
 0x319   :  { %2229 = vmatprep.subr.bf16.mxu0 %v16264_v41 }
 0x31a   :  { %3744 = vmatpush1.bf16.msra.mxu1 %v16337_v42  ;;  %v16330_v42 = vld [vmem:[#allocation10 + $0x304] ss:$8 sps:$4 sm:$0xff]  }
 0x31b   :  { %3745 = vmatprep.subr.bf16.mxu1 %v16345_v43 }
 0x31c   :  { %2230 = vmatpush1.bf16.msra.mxu0 %v16262_v44 }
 0x31d   :  { %2231 = vmatprep.subr.bf16.mxu0 %v16267_v45 }
 0x31e   :  { %3746 = vmatpush1.bf16.msra.mxu1 %v16343_v51  ;;  %v16328_v51 = vld [vmem:[#allocation10 + $0x300] ss:$8 sps:$4 sm:$0xff]  }
 0x31f   :  { %3747 = vmatprep.subr.bf16.mxu1 %v16351_v46  ;;  %v16336_v46 = vld [vmem:[#allocation10 + $0x314] ss:$8 sps:$4 sm:$0xff]  }
 0x320   :  { %2232 = vmatpush1.bf16.msra.mxu0 %v16265_v47  ;;  %v16334_v47 = vld [vmem:[#allocation10 + $0x310] ss:$8 sps:$4 sm:$0xff]  }
 0x321   :  { %2233 = vmatprep.subr.bf16.mxu0 %v16270_v49  ;;  %v16342_v49 = vld [vmem:[#allocation10 + $0x324] ss:$8 sps:$4 sm:$0xff]  }
 0x322   :  { %3748 = vmatpush1.bf16.msra.mxu1 %v16349_v30  ;;  %v16340_v30 = vld [vmem:[#allocation10 + $0x320] ss:$8 sps:$4 sm:$0xff]  }
 0x323   :  { %3749 = vmatprep.subr.bf16.mxu1 %v16357_v52  ;;  %v16348_v52 = vld [vmem:[#allocation10 + $0x334] ss:$8 sps:$4 sm:$0xff]  }
 0x324   :  { %2234 = vmatpush1.bf16.msra.mxu0 %v16268_v54  ;;  %v16346_v54 = vld [vmem:[#allocation10 + $0x330] ss:$8 sps:$4 sm:$0xff]  }
 0x325   :  { %2235 = vmatprep.subr.bf16.mxu0 %v16273_v55  ;;  %v16354_v55 = vld [vmem:[#allocation10 + $0x344] ss:$8 sps:$4 sm:$0xff]  }
 0x326   :  { %3750 = vmatpush1.bf16.msra.mxu1 %v16355_v56  ;;  %v16352_v56 = vld [vmem:[#allocation10 + $0x340] ss:$8 sps:$4 sm:$0xff]  }
 0x327   :  { %3751 = vmatprep.subr.bf16.mxu1 %v16363_v57  ;;  %v16360_v57 = vld [vmem:[#allocation10 + $0x354] ss:$8 sps:$4 sm:$0xff]  }
 0x328   :  { %2236 = vmatpush1.bf16.msra.mxu0 %v16271_v58  ;;  %v17895_v58 = vld [vmem:[#allocation16] sm:$0xff] }
 0x329   :  { %2237 = vmatprep.subr.bf16.mxu0 %v16276_v17  ;;  %v2386_v17 = vrot.slane %v17895_v58, %v17845_v2 }
 0x32a   :  { %3752 = vmatpush1.bf16.msra.mxu1 %v16361_v59  ;;  %v16366_v59 = vld [vmem:[#allocation10 + $0x364] ss:$8 sps:$4 sm:$0xff]  }
 0x32b   :  { %3753 = vmatprep.subr.bf16.mxu1 %v16369_v61  ;;  %v2390_v61 = vrot.slane %v17895_v58, %v17848_v3 }
 0x32c   :  { %2238 = vmatpush1.bf16.msra.mxu0 %v16274_v0 }
 0x32d   :  { %2239 = vmatprep.subr.bf16.mxu0 %v16279_v4  ;;  %v16364_v4 = vld [vmem:[#allocation10 + $0x360] ss:$8 sps:$4 sm:$0xff]  }
 0x32e   :  { %3754 = vmatpush1.bf16.msra.mxu1 %v16367_v5 }
 0x32f   :  { %3755 = vmatprep.subr.bf16.mxu1 %v16375_v6 }
 0x330   :  { %2240 = vmatpush1.bf16.msra.mxu0 %v16277_v7  ;;  %v16372_v7 = vld [vmem:[#allocation10 + $0x374] ss:$8 sps:$4 sm:$0xff]  }
 0x331   :  { %2241 = vmatprep.subr.bf16.mxu0 %v16282_v8 }
 0x332   :  { %3756 = vmatpush1.bf16.msra.mxu1 %v16373_v9 }
 0x333   :  { %3768 = vmatprep.subr.bf16.mxu1 %v16381_v10 }
 0x334   :  { %2242 = vmatpush1.bf16.msra.mxu0 %v16280_v11 }
 0x335   :  { %2243 = vmatprep.subr.bf16.mxu0 %v16288_v12 }
 0x338   :  { %2244 = vmatpush1.bf16.msra.mxu0 %v16286_v13  ;;  %v16370_v13 = vld [vmem:[#allocation10 + $0x370] ss:$8 sps:$4 sm:$0xff]  }
 0x339   :  { %2245 = vmatprep.subr.bf16.mxu0 %v16294_v14 }
 0x33c   :  { %2246 = vmatpush1.bf16.msra.mxu0 %v16292_v15 }
 0x33d   :  { %2247 = vmatprep.subr.bf16.mxu0 %v16300_v16  ;;  %v16378_v16 = vld [vmem:[#allocation10 + $0x384] ss:$8 sps:$4 sm:$0xff]  }
 0x340   :  { %2248 = vmatpush1.bf16.msra.mxu0 %v16298_v18 }
 0x341   :  { %2249 = vmatprep.subr.bf16.mxu0 %v16306_v19 }
 0x344   :  { %2250 = vmatpush1.bf16.msra.mxu0 %v16304_v20 }
 0x345   :  { %2251 = vmatprep.subr.bf16.mxu0 %v16312_v21 }
 0x348   :  { %2252 = vmatpush1.bf16.msra.mxu0 %v16310_v24  ;;  %v1326_v29 = vpop.f32.mrb[8].mxu1  ;;  %v16376_v24 = vld [vmem:[#allocation10 + $0x380] ss:$8 sps:$4 sm:$0xff]  }
 0x349   :  { %v1327_v32 = vadd.f32 %v1326_v29, %v500_v25  ;;  %v1328_v33 = vpop.f32.mrb[9].mxu1  ;;  %2253 = vmatprep.subr.bf16.mxu0 %v16318_v26  ;;  %v16384_v26 = vld [vmem:[#allocation10 + $0x394] ss:$8 sps:$4 sm:$0xff]   ;;  %v16382_v29 = vld [vmem:[#allocation10 + $0x390] ss:$8 sps:$4 sm:$0xff]  }
 0x34a   :  { %v1329_v35 = vadd.f32 %v1328_v33, %v504_v27  ;;  %v1330_v60 = vpop.f32.mrb[10].mxu1  ;;  %v16393_v33 = vld [vmem:[#allocation17 + $0x124] ss:$8 sps:$4 sm:$0xff]  }
 0x34b   :  { %v1341_v36 = vmax.f32 %v1327_v32, 0.0  ;;  %v1331_v37 = vadd.f32 %v1330_v60, %v500_v25  ;;  %v1332_v38 = vpop.f32.mrb[11].mxu1  ;;  %v16379_v25 = vld [vmem:[#allocation17 + $0x100] ss:$8 sps:$4 sm:$0xff]  }
 0x34c   :  { %v1333_v39 = vadd.f32 %v1332_v38, %v504_v27  ;;  %2254 = vmatpush1.bf16.msra.mxu0 %v16316_v31  ;;  %v1342_v43 = vmax.f32 %v1329_v35, 0.0  ;;  %v16387_v27 = vld [vmem:[#allocation17 + $0x114] ss:$8 sps:$4 sm:$0xff]   ;;  %v16385_v31 = vld [vmem:[#allocation17 + $0x110] ss:$8 sps:$4 sm:$0xff]  }
 0x34d   :  { %v1349_v41 = vmax.f32 %v1331_v37, 0.0  ;;  %2255 = vmatprep.subr.bf16.mxu0 %v16324_v34  ;;  %v16390_v32 = vld [vmem:[#allocation10 + $0x3a4] ss:$8 sps:$4 sm:$0xff]   ;;  %v16388_v34 = vld [vmem:[#allocation10 + $0x3a0] ss:$8 sps:$4 sm:$0xff]  }
 0x34e   :  { %v1350_v1 = vmax.f32 %v1333_v39, 0.0  ;;  %v16391_v35 = vld [vmem:[#allocation17 + $0x120] ss:$8 sps:$4 sm:$0xff]   ;;  %v16394_v37 = vld [vmem:[#allocation10 + $0x3b0] ss:$8 sps:$4 sm:$0xff]  }
 0x34f   :  { %v17892_v44 = vpack.c.bf16 %v1349_v41, %v1341_v36  ;;  %v16396_v60 = vld [vmem:[#allocation10 + $0x3b4] ss:$8 sps:$4 sm:$0xff]   ;;  %v16399_v36 = vld [vmem:[#allocation17 + $0x134] ss:$8 sps:$4 sm:$0xff]   ;;  %v16402_v39 = vld [vmem:[#allocation10 + $0x3c4] ss:$8 sps:$4 sm:$0xff]  }
 0x350   :  { %v1358_v45 = vpack.c.bf16 %v1350_v1, %v1342_v43  ;;  %2256 = vmatpush1.bf16.msra.mxu0 %v16322_v40  ;;  %v16397_v38 = vld [vmem:[#allocation17 + $0x130] ss:$8 sps:$4 sm:$0xff]   ;;  %v16405_v40 = vld [vmem:[#allocation17 + $0x144] ss:$8 sps:$4 sm:$0xff]   ;;  %v16400_v41 = vld [vmem:[#allocation10 + $0x3c0] ss:$8 sps:$4 sm:$0xff]  }
 0x351   :  { %2268 = vmatprep.subr.bf16.mxu0 %v16330_v42  ;;  %v16403_v42 = vld [vmem:[#allocation17 + $0x140] ss:$8 sps:$4 sm:$0xff]   ;;  %v16411_v1 = vld [vmem:[#allocation17 + $0x154] ss:$8 sps:$4 sm:$0xff]  }
 0x352   :  { %v16408_v43 = vld [vmem:[#allocation10 + $0x3d4] ss:$8 sps:$4 sm:$0xff]  }
 0x353   :  { %2258 = vmatmul.mubr.bf16.vlgmr.msra.gmra.mrb[4].mxu0 %v17866_v28  ;;  %v16358_v28 = vld [vmem:[#allocation10 + $0x350] ss:$8 sps:$4 sm:$0xff]  }
 0x354   :  { %2269 = vmatpush1.bf16.msra.mxu0 %v16328_v51  ;;  %2300 = vmatprep.mubr.bf16.mxu0 %v1358_v45  ;;  %v16406_v45 = vld [vmem:[#allocation10 + $0x3d0] ss:$8 sps:$4 sm:$0xff]   ;;  %v16409_v51 = vld [vmem:[#allocation17 + $0x150] ss:$8 sps:$4 sm:$0xff]  }
 0x355   :  { %2270 = vmatprep.subr.bf16.mxu0 %v16336_v46  ;;  %v16414_v46 = vld [vmem:[#allocation10 + $0x3e4] ss:$8 sps:$4 sm:$0xff]  }
 0x358   :  { %2271 = vmatpush1.bf16.msra.mxu0 %v16334_v47  ;;  %v16417_v47 = vld [vmem:[#allocation17 + $0x164] ss:$8 sps:$4 sm:$0xff]  }
 0x359   :  { %2272 = vmatprep.subr.bf16.mxu0 %v16342_v49  ;;  %v2394_v49 = vrot.slane %v17895_v58, %v17872_v62 }
 0x35c   :  { %2273 = vmatpush1.bf16.msra.mxu0 %v16340_v30  ;;  %v2398_v30 = vrot.slane %v17895_v58, %v17875_v63 }
 0x35d   :  { %2274 = vmatprep.subr.bf16.mxu0 %v16348_v52  ;;  %v16412_v52 = vld [vmem:[#allocation10 + $0x3e0] ss:$8 sps:$4 sm:$0xff]  }
 0x360   :  { %2275 = vmatpush1.bf16.msra.mxu0 %v16346_v54  ;;  %v16415_v54 = vld [vmem:[#allocation17 + $0x160] ss:$8 sps:$4 sm:$0xff]  }
 0x361   :  { %2276 = vmatprep.subr.bf16.mxu0 %v16354_v55 }
 0x364   :  { %2277 = vmatpush1.bf16.msra.mxu0 %v16352_v56  ;;  %v16420_v56 = vld [vmem:[#allocation10 + $0x3f4] ss:$8 sps:$4 sm:$0xff]  }
 0x365   :  { %2278 = vmatprep.subr.bf16.mxu0 %v16360_v57  ;;  %v16423_v57 = vld [vmem:[#allocation17 + $0x174] ss:$8 sps:$4 sm:$0xff]  }
 0x368   :  { %2279 = vmatpush1.bf16.msra.mxu0 %v16358_v28  ;;  %v2783_v0 = vpop.f32.mrb[12].mxu1 }
 0x369   :  { %v2784_v5 = vadd.f32 %v2783_v0, %v2386_v17  ;;  %v2785_v6 = vpop.f32.mrb[13].mxu1  ;;  %2280 = vmatprep.subr.bf16.mxu0 %v16366_v59 }
 0x36a   :  { %v2786_v8 = vadd.f32 %v2785_v6, %v2390_v61  ;;  %v2787_v9 = vpop.f32.mrb[14].mxu1  ;;  %v16418_v6 = vld [vmem:[#allocation10 + $0x3f0] ss:$8 sps:$4 sm:$0xff]  }
 0x36b   :  { %v2788_v10 = vadd.f32 %v2787_v9, %v2386_v17  ;;  %v2789_v11 = vpop.f32.mrb[15].mxu1  ;;  %v2921_v14 = vmax.f32 %v2784_v5, 0.0 }
 0x36c   :  { %2281 = vmatpush1.bf16.msra.mxu0 %v16364_v4  ;;  %v2790_v12 = vadd.f32 %v2789_v11, %v2390_v61  ;;  %v2922_v18 = vmax.f32 %v2786_v8, 0.0 }
 0x36d   :  { %v2929_v15 = vmax.f32 %v2788_v10, 0.0  ;;  %2282 = vmatprep.subr.bf16.mxu0 %v16372_v7  ;;  %v16421_v7 = vld [vmem:[#allocation17 + $0x170] ss:$8 sps:$4 sm:$0xff]   ;;  %v16426_v10 = vld [vmem:[#allocation17 + $0x184] ss:$8 sps:$4 sm:$0xff]  }
 0x36e   :  { %v2930_v19 = vmax.f32 %v2790_v12, 0.0 }
 0x36f   :  { %v2937_v20 = vpack.c.bf16 %v2929_v15, %v2921_v14  ;;  %v16424_v14 = vld [vmem:[#allocation17 + $0x180] ss:$8 sps:$4 sm:$0xff]  }
 0x370   :  { %v2938_v21 = vpack.c.bf16 %v2930_v19, %v2922_v18  ;;  %2283 = vmatpush1.bf16.msra.mxu0 %v16370_v13  ;;  %v16427_v18 = vld [vmem:[#allocation17 + $0x190] ss:$8 sps:$4 sm:$0xff]   ;;  %v16432_v19 = vld [vmem:[#allocation17 + $0x1a4] ss:$8 sps:$4 sm:$0xff]  }
 0x371   :  { %2284 = vmatprep.subr.bf16.mxu0 %v16378_v16  ;;  %v16429_v16 = vld [vmem:[#allocation17 + $0x194] ss:$8 sps:$4 sm:$0xff]  }
 0x372   :  { %3757 = vmatprep.mubr.bf16.mxu1 %v2938_v21  ;;  %v16435_v21 = vld [vmem:[#allocation17 + $0x1b4] ss:$8 sps:$4 sm:$0xff]  }
 0x373   :  { %3758 = vmatmul.mubr.bf16.vlgmr.msra.gmra.mrb[28].mxu1 %v2937_v20  ;;  %v16430_v20 = vld [vmem:[#allocation17 + $0x1a0] ss:$8 sps:$4 sm:$0xff]  }
 0x374   :  { %2285 = vmatpush1.bf16.msra.mxu0 %v16376_v24  ;;  %3769 = vmatpush1.bf16.msra.mxu1 %v16379_v25  ;;  %v16433_v24 = vld [vmem:[#allocation17 + $0x1b0] ss:$8 sps:$4 sm:$0xff]   ;;  %v16438_v25 = vld [vmem:[#allocation17 + $0x1c4] ss:$8 sps:$4 sm:$0xff]  }
 0x375   :  { %2286 = vmatprep.subr.bf16.mxu0 %v16384_v26  ;;  %3770 = vmatprep.subr.bf16.mxu1 %v16387_v27  ;;  %v16436_v26 = vld [vmem:[#allocation17 + $0x1c0] ss:$8 sps:$4 sm:$0xff]   ;;  %v16441_v27 = vld [vmem:[#allocation17 + $0x1d4] ss:$8 sps:$4 sm:$0xff]  }
 0x378   :  { %2287 = vmatpush1.bf16.msra.mxu0 %v16382_v29  ;;  %3771 = vmatpush1.bf16.msra.mxu1 %v16385_v31  ;;  %v16439_v29 = vld [vmem:[#allocation17 + $0x1d0] ss:$8 sps:$4 sm:$0xff]   ;;  %v2402_v31 = vrot.slane %v17895_v58, %v17857_v50 }
 0x379   :  { %2288 = vmatprep.subr.bf16.mxu0 %v16390_v32  ;;  %3772 = vmatprep.subr.bf16.mxu1 %v16393_v33  ;;  %v2406_v32 = vrot.slane %v17895_v58, %v17860_v53  ;;  %v16442_v33 = vld [vmem:[#allocation17 + $0x1e0] ss:$8 sps:$4 sm:$0xff]  }
 0x37c   :  { %2289 = vmatpush1.bf16.msra.mxu0 %v16388_v34  ;;  %3773 = vmatpush1.bf16.msra.mxu1 %v16391_v35  ;;  %v16447_v35 = vld [vmem:[#allocation17 + $0x1f4] ss:$8 sps:$4 sm:$0xff]  }
 0x37d   :  { %2290 = vmatprep.subr.bf16.mxu0 %v16396_v60  ;;  %3774 = vmatprep.subr.bf16.mxu1 %v16399_v36 }
 0x380   :  { %2291 = vmatpush1.bf16.msra.mxu0 %v16394_v37  ;;  %3775 = vmatpush1.bf16.msra.mxu1 %v16397_v38 }
 0x381   :  { %2292 = vmatprep.subr.bf16.mxu0 %v16402_v39  ;;  %3776 = vmatprep.subr.bf16.mxu1 %v16405_v40 }
 0x384   :  { %2293 = vmatpush1.bf16.msra.mxu0 %v16400_v41  ;;  %3777 = vmatpush1.bf16.msra.mxu1 %v16403_v42  ;;  %v16445_v42 = vld [vmem:[#allocation17 + $0x1f0] ss:$8 sps:$4 sm:$0xff]  }
 0x385   :  { %2294 = vmatprep.subr.bf16.mxu0 %v16408_v43  ;;  %3778 = vmatprep.subr.bf16.mxu1 %v16411_v1 }
 0x388   :  { %2295 = vmatpush1.bf16.msra.mxu0 %v16406_v45  ;;  %3779 = vmatpush1.bf16.msra.mxu1 %v16409_v51  ;;  %v2826_v55 = vpop.f32.mrb[16].mxu1  ;;  %v16450_v45 = vld [vmem:[#allocation17 + $0x204] ss:$8 sps:$4 sm:$0xff]  }
 0x389   :  { %2296 = vmatprep.subr.bf16.mxu0 %v16414_v46  ;;  %3780 = vmatprep.subr.bf16.mxu1 %v16417_v47  ;;  %v2827_v28 = vadd.f32 %v2826_v55, %v2394_v49  ;;  %v2828_v17 = vpop.f32.mrb[17].mxu1  ;;  %v16456_v55 = vld [vmem:[#allocation17 + $0x224] ss:$8 sps:$4 sm:$0xff]  }
 0x38a   :  { %v2829_v59 = vadd.f32 %v2828_v17, %v2398_v30  ;;  %v2830_v61 = vpop.f32.mrb[18].mxu1  ;;  %v16462_v17 = vld [vmem:[#allocation17 + $0x244] ss:$8 sps:$4 sm:$0xff]  }
 0x38b   :  { %v2923_v0 = vmax.f32 %v2827_v28, 0.0  ;;  %v2831_v4 = vadd.f32 %v2830_v61, %v2394_v49  ;;  %v2832_v5 = vpop.f32.mrb[19].mxu1  ;;  %v16448_v49 = vld [vmem:[#allocation17 + $0x200] ss:$8 sps:$4 sm:$0xff]   ;;  %v16457_v28 = vld [vmem:[#allocation17 + $0x230] ss:$8 sps:$4 sm:$0xff]  }
 0x38c   :  { %2297 = vmatpush1.bf16.msra.mxu0 %v16412_v52  ;;  %3781 = vmatpush1.bf16.msra.mxu1 %v16415_v54  ;;  %v2924_v8 = vmax.f32 %v2829_v59, 0.0  ;;  %v2833_v9 = vadd.f32 %v2832_v5, %v2398_v30  ;;  %v16453_v52 = vld [vmem:[#allocation17 + $0x214] ss:$8 sps:$4 sm:$0xff]   ;;  %v16451_v54 = vld [vmem:[#allocation17 + $0x210] ss:$8 sps:$4 sm:$0xff]   ;;  %v2410_v5 = vrot.slane %v17895_v58, %v17883_v22 }
 0x38d   :  { %2298 = vmatprep.subr.bf16.mxu0 %v16420_v56  ;;  %3782 = vmatprep.subr.bf16.mxu1 %v16423_v57  ;;  %v2931_v11 = vmax.f32 %v2831_v4, 0.0  ;;  %v16454_v56 = vld [vmem:[#allocation17 + $0x220] ss:$8 sps:$4 sm:$0xff]   ;;  %v16459_v57 = vld [vmem:[#allocation17 + $0x234] ss:$8 sps:$4 sm:$0xff]  }
 0x38e   :  { %v2932_v12 = vmax.f32 %v2833_v9, 0.0  ;;  %v16460_v59 = vld [vmem:[#allocation17 + $0x240] ss:$8 sps:$4 sm:$0xff]   ;;  %v16465_v61 = vld [vmem:[#allocation17 + $0x254] ss:$8 sps:$4 sm:$0xff]  }
 0x38f   :  { %v2939_v13 = vpack.c.bf16 %v2931_v11, %v2923_v0  ;;  %v16463_v0 = vld [vmem:[#allocation17 + $0x250] ss:$8 sps:$4 sm:$0xff]   ;;  %v16468_v4 = vld [vmem:[#allocation17 + $0x264] ss:$8 sps:$4 sm:$0xff]   ;;  %v16471_v9 = vld [vmem:[#allocation17 + $0x274] ss:$8 sps:$4 sm:$0xff]  }
 0x390   :  { %2299 = vmatpush1.bf16.msra.mxu0 %v16418_v6  ;;  %3783 = vmatpush1.bf16.msra.mxu1 %v16421_v7  ;;  %v2940_v15 = vpack.c.bf16 %v2932_v12, %v2924_v8  ;;  %v2414_v6 = vrot.slane %v17895_v58, %v17886_v23  ;;  %v16466_v7 = vld [vmem:[#allocation17 + $0x260] ss:$8 sps:$4 sm:$0xff]  }
 0x391   :  { %3784 = vmatprep.subr.bf16.mxu1 %v16426_v10 }
 0x392   :  { %3800 = vmatprep.mubr.bf16.mxu1 %v2940_v15 }
 0x393   :  { %2301 = vmatmul.mubr.bf16.vlgmr.msra.gmra.mrb[4].mxu0 %v17892_v44  ;;  %v16444_v44 = vld [vmem:[#allocation17 + $0x1e4] ss:$8 sps:$4 sm:$0xff]  }
 0x394   :  { %3785 = vmatpush1.bf16.msra.mxu1 %v16424_v14 }
 0x395   :  { %3786 = vmatprep.subr.bf16.mxu1 %v16429_v16 }
 0x398   :  { %3787 = vmatpush1.bf16.msra.mxu1 %v16427_v18  ;;  %v16469_v18 = vld [vmem:[#allocation17 + $0x270] ss:$8 sps:$4 sm:$0xff]  }
 0x399   :  { %3788 = vmatprep.subr.bf16.mxu1 %v16432_v19 }
 0x39c   :  { %3789 = vmatpush1.bf16.msra.mxu1 %v16430_v20 }
 0x39d   :  { %3790 = vmatprep.subr.bf16.mxu1 %v16435_v21  ;;  %v16474_v21 = vld [vmem:[#allocation17 + $0x284] ss:$8 sps:$4 sm:$0xff]  }
 0x3a0   :  { %3791 = vmatpush1.bf16.msra.mxu1 %v16433_v24 }
 0x3a1   :  { %3792 = vmatprep.subr.bf16.mxu1 %v16438_v25 }
 0x3a4   :  { %3793 = vmatpush1.bf16.msra.mxu1 %v16436_v26  ;;  %v16472_v26 = vld [vmem:[#allocation17 + $0x280] ss:$8 sps:$4 sm:$0xff]  }
 0x3a5   :  { %3794 = vmatprep.subr.bf16.mxu1 %v16441_v27 }
 0x3a8   :  { %3795 = vmatpush1.bf16.msra.mxu1 %v16439_v29  ;;  %v2869_v34 = vpop.f32.mrb[20].mxu1  ;;  %v16477_v29 = vld [vmem:[#allocation17 + $0x294] ss:$8 sps:$4 sm:$0xff]  }
 0x3a9   :  { %3796 = vmatprep.subr.bf16.mxu1 %v16444_v44  ;;  %v2870_v60 = vadd.f32 %v2869_v34, %v2402_v31  ;;  %v2871_v36 = vpop.f32.mrb[21].mxu1  ;;  %v16475_v44 = vld [vmem:[#allocation17 + $0x290] ss:$8 sps:$4 sm:$0xff]  }
 0x3aa   :  { %v2872_v37 = vadd.f32 %v2871_v36, %v2406_v32  ;;  %v2873_v38 = vpop.f32.mrb[22].mxu1  ;;  %v16481_v34 = vld [vmem:[#allocation17 + $0x2b0] ss:$8 sps:$4 sm:$0xff]   ;;  %v16489_v36 = vld [vmem:[#allocation17 + $0x2d4] ss:$8 sps:$4 sm:$0xff]  }
 0x3ab   :  { %v2925_v39 = vmax.f32 %v2870_v60, 0.0  ;;  %v2874_v40 = vadd.f32 %v2873_v38, %v2402_v31  ;;  %v2875_v41 = vpop.f32.mrb[23].mxu1  ;;  %v16480_v31 = vld [vmem:[#allocation17 + $0x2a4] ss:$8 sps:$4 sm:$0xff]   ;;  %v16484_v60 = vld [vmem:[#allocation17 + $0x2c0] ss:$8 sps:$4 sm:$0xff]  }
 0x3ac   :  { %3797 = vmatpush1.bf16.msra.mxu1 %v16442_v33  ;;  %v2926_v43 = vmax.f32 %v2872_v37, 0.0  ;;  %v2876_v1 = vadd.f32 %v2875_v41, %v2406_v32  ;;  %v16478_v32 = vld [vmem:[#allocation17 + $0x2a0] ss:$8 sps:$4 sm:$0xff]   ;;  %v16483_v33 = vld [vmem:[#allocation17 + $0x2b4] ss:$8 sps:$4 sm:$0xff]  }
 0x3ad   :  { %3798 = vmatprep.subr.bf16.mxu1 %v16447_v35  ;;  %v2933_v51 = vmax.f32 %v2874_v40, 0.0  ;;  %v16486_v35 = vld [vmem:[#allocation17 + $0x2c4] ss:$8 sps:$4 sm:$0xff]   ;;  %v16487_v37 = vld [vmem:[#allocation17 + $0x2d0] ss:$8 sps:$4 sm:$0xff]  }
 0x3ae   :  { %v2934_v46 = vmax.f32 %v2876_v1, 0.0  ;;  %v16492_v38 = vld [vmem:[#allocation17 + $0x2e4] ss:$8 sps:$4 sm:$0xff]   ;;  %v16495_v40 = vld [vmem:[#allocation17 + $0x2f4] ss:$8 sps:$4 sm:$0xff]  }
 0x3af   :  { %v17910_v47 = vpack.c.bf16 %v2933_v51, %v2925_v39  ;;  %v16490_v39 = vld [vmem:[#allocation17 + $0x2e0] ss:$8 sps:$4 sm:$0xff]   ;;  %v16493_v41 = vld [vmem:[#allocation17 + $0x2f0] ss:$8 sps:$4 sm:$0xff]  }
 0x3b0   :  { %3799 = vmatpush1.bf16.msra.mxu1 %v16445_v42  ;;  %v2942_v30 = vpack.c.bf16 %v2934_v46, %v2926_v43  ;;  %v16544_v42 = vld [vmem:[%s18328_s1 + $0x40] sm:$0xff]   ;;  %v16546_v1 = vld [vmem:[%s18328_s1 + $0x48] sm:$0xff]  }
 0x3b1   :  { %3811 = vmatprep.subr.bf16.mxu1 %v16450_v45  ;;  %v16545_v43 = vld [vmem:[%s18328_s1] sm:$0xff]   ;;  %v16498_v45 = vld [vmem:[#allocation17 + $0x304] ss:$8 sps:$4 sm:$0xff]   ;;  %15836 = vmatprep.subr.bf16.mxu0 %v16544_v42  ;;  %v16547_v51 = vld [vmem:[%s18328_s1 + $0x8] sm:$0xff]  }
 0x3b2   :  { %15837 = vmatpush3.bf16.msra.mxu0 %v16545_v43  ;;  %v16496_v46 = vld [vmem:[#allocation17 + $0x300] ss:$8 sps:$4 sm:$0xff]  }
 0x3b3   :  { %3801 = vmatmul.mubr.bf16.vlgmr.msra.gmra.mrb[28].mxu1 %v2939_v13  ;;  %15838 = vmatprep.subr.bf16.mxu0 %v16546_v1 }
 0x3b4   :  { %3812 = vmatpush1.bf16.msra.mxu1 %v16448_v49  ;;  %3843 = vmatprep.mubr.bf16.mxu1 %v2942_v30  ;;  %v16501_v49 = vld [vmem:[#allocation17 + $0x314] ss:$8 sps:$4 sm:$0xff]   ;;  %v16548_v30 = vld [vmem:[%s18328_s1 + $0x50] sm:$0xff]  }
 0x3b5   :  { %3813 = vmatprep.subr.bf16.mxu1 %v16453_v52  ;;  %v16549_v52 = vld [vmem:[%s18328_s1 + $0x10] sm:$0xff]  }
 0x3b6   :  { %15839 = vmatpush3.bf16.msra.mxu0 %v16547_v51 }
 0x3b7   :  { %15840 = vmatprep.subr.bf16.mxu0 %v16548_v30 }
 0x3b8   :  { %3814 = vmatpush1.bf16.msra.mxu1 %v16451_v54  ;;  %v16499_v54 = vld [vmem:[#allocation17 + $0x310] ss:$8 sps:$4 sm:$0xff]  }
 0x3b9   :  { %3815 = vmatprep.subr.bf16.mxu1 %v16456_v55  ;;  %v16550_v55 = vld [vmem:[%s18328_s1 + $0x58] sm:$0xff]  }
 0x3ba   :  { %15841 = vmatpush3.bf16.msra.mxu0 %v16549_v52 }
 0x3bb   :  { %15842 = vmatprep.subr.bf16.mxu0 %v16550_v55 }
 0x3bc   :  { %3816 = vmatpush1.bf16.msra.mxu1 %v16454_v56  ;;  %v16504_v56 = vld [vmem:[#allocation17 + $0x324] ss:$8 sps:$4 sm:$0xff]  }
 0x3bd   :  { %3817 = vmatprep.subr.bf16.mxu1 %v16459_v57  ;;  %v16502_v57 = vld [vmem:[#allocation17 + $0x320] ss:$8 sps:$4 sm:$0xff]  }
 0x3c0   :  { %3818 = vmatpush1.bf16.msra.mxu1 %v16457_v28  ;;  %v16552_v28 = vld [vmem:[%s18328_s1 + $0x60] sm:$0xff]  }
 0x3c1   :  { %3819 = vmatprep.subr.bf16.mxu1 %v16462_v17  ;;  %v16507_v17 = vld [vmem:[#allocation17 + $0x334] ss:$8 sps:$4 sm:$0xff]  }
 0x3c4   :  { %3820 = vmatpush1.bf16.msra.mxu1 %v16460_v59  ;;  %v16553_v59 = vld [vmem:[%s18328_s1 + $0x20] sm:$0xff]  }
 0x3c5   :  { %3821 = vmatprep.subr.bf16.mxu1 %v16465_v61  ;;  %v16505_v61 = vld [vmem:[#allocation17 + $0x330] ss:$8 sps:$4 sm:$0xff]  }
 0x3c8   :  { %3822 = vmatpush1.bf16.msra.mxu1 %v16463_v0  ;;  %v2912_v8 = vpop.f32.mrb[24].mxu1  ;;  %v16510_v0 = vld [vmem:[#allocation17 + $0x344] ss:$8 sps:$4 sm:$0xff]  }
 0x3c9   :  { %3823 = vmatprep.subr.bf16.mxu1 %v16468_v4  ;;  %v2913_v10 = vadd.f32 %v2912_v8, %v2410_v5  ;;  %v2914_v11 = vpop.f32.mrb[25].mxu1  ;;  %v16508_v4 = vld [vmem:[#allocation17 + $0x340] ss:$8 sps:$4 sm:$0xff]  }
 0x3ca   :  { %v2915_v12 = vadd.f32 %v2914_v11, %v2414_v6  ;;  %v2916_v13 = vpop.f32.mrb[26].mxu1  ;;  %v16514_v8 = vld [vmem:[#allocation17 + $0x360] ss:$8 sps:$4 sm:$0xff]   ;;  %v16522_v11 = vld [vmem:[#allocation17 + $0x384] ss:$8 sps:$4 sm:$0xff]  }
 0x3cb   :  { %v2927_v14 = vmax.f32 %v2913_v10, 0.0  ;;  %v2917_v15 = vadd.f32 %v2916_v13, %v2410_v5  ;;  %v2918_v16 = vpop.f32.mrb[27].mxu1  ;;  %v16513_v5 = vld [vmem:[#allocation17 + $0x354] ss:$8 sps:$4 sm:$0xff]   ;;  %v16517_v10 = vld [vmem:[#allocation17 + $0x370] ss:$8 sps:$4 sm:$0xff]  }
 0x3cc   :  { %3824 = vmatpush1.bf16.msra.mxu1 %v16466_v7  ;;  %v2928_v19 = vmax.f32 %v2915_v12, 0.0  ;;  %v2919_v20 = vadd.f32 %v2918_v16, %v2414_v6  ;;  %v16511_v6 = vld [vmem:[#allocation17 + $0x350] ss:$8 sps:$4 sm:$0xff]   ;;  %v16516_v7 = vld [vmem:[#allocation17 + $0x364] ss:$8 sps:$4 sm:$0xff]  }
 0x3cd   :  { %3825 = vmatprep.subr.bf16.mxu1 %v16471_v9  ;;  %v2935_v24 = vmax.f32 %v2917_v15, 0.0  ;;  %v16519_v9 = vld [vmem:[#allocation17 + $0x374] ss:$8 sps:$4 sm:$0xff]   ;;  %v16520_v12 = vld [vmem:[#allocation17 + $0x380] ss:$8 sps:$4 sm:$0xff]  }
 0x3ce   :  { %v2936_v58 = vmax.f32 %v2919_v20, 0.0  ;;  %v16525_v13 = vld [vmem:[#allocation17 + $0x394] ss:$8 sps:$4 sm:$0xff]   ;;  %v16528_v15 = vld [vmem:[#allocation17 + $0x3a4] ss:$8 sps:$4 sm:$0xff]  }
 0x3cf   :  { %v17916_v25 = vpack.c.bf16 %v2935_v24, %v2927_v14  ;;  %v16523_v14 = vld [vmem:[#allocation17 + $0x390] ss:$8 sps:$4 sm:$0xff]   ;;  %v16526_v16 = vld [vmem:[#allocation17 + $0x3a0] ss:$8 sps:$4 sm:$0xff]   ;;  %v16534_v20 = vld [vmem:[#allocation17 + $0x3c4] ss:$8 sps:$4 sm:$0xff]  }
 0x3d0   :  { %3826 = vmatpush1.bf16.msra.mxu1 %v16469_v18  ;;  %v2944_v27 = vpack.c.bf16 %v2936_v58, %v2928_v19  ;;  %v16531_v18 = vld [vmem:[#allocation17 + $0x3b4] ss:$8 sps:$4 sm:$0xff]   ;;  %v16529_v19 = vld [vmem:[#allocation17 + $0x3b0] ss:$8 sps:$4 sm:$0xff]  }
 0x3d1   :  { %3827 = vmatprep.subr.bf16.mxu1 %v16474_v21  ;;  %v16532_v21 = vld [vmem:[#allocation17 + $0x3c0] ss:$8 sps:$4 sm:$0xff]   ;;  %v16537_v24 = vld [vmem:[#allocation17 + $0x3d4] ss:$8 sps:$4 sm:$0xff]   ;;  %v16535_v58 = vld [vmem:[#allocation17 + $0x3d0] ss:$8 sps:$4 sm:$0xff]  }
 0x3d4   :  { %3828 = vmatpush1.bf16.msra.mxu1 %v16472_v26  ;;  %v16540_v26 = vld [vmem:[#allocation17 + $0x3e4] ss:$8 sps:$4 sm:$0xff]  }
 0x3d5   :  { %3829 = vmatprep.subr.bf16.mxu1 %v16477_v29  ;;  %v16543_v29 = vld [vmem:[#allocation17 + $0x3f4] ss:$8 sps:$4 sm:$0xff]  }
 0x3d8   :  { %3830 = vmatpush1.bf16.msra.mxu1 %v16475_v44  ;;  %v16541_v44 = vld [vmem:[#allocation17 + $0x3f0] ss:$8 sps:$4 sm:$0xff]  }
 0x3d9   :  { %3831 = vmatprep.subr.bf16.mxu1 %v16480_v31 }
 0x3dc   :  { %3832 = vmatpush1.bf16.msra.mxu1 %v16478_v32 }
 0x3dd   :  { %3833 = vmatprep.subr.bf16.mxu1 %v16483_v33 }
 0x3e0   :  { %3834 = vmatpush1.bf16.msra.mxu1 %v16481_v34 }
 0x3e1   :  { %3835 = vmatprep.subr.bf16.mxu1 %v16486_v35  ;;  %v16554_v35 = vld [vmem:[%s18328_s1 + $0x68] sm:$0xff]  }
 0x3e4   :  { %3836 = vmatpush1.bf16.msra.mxu1 %v16484_v60  ;;  %v16555_v60 = vld [vmem:[%s18328_s1 + $0x28] sm:$0xff]  }
 0x3e5   :  { %3837 = vmatprep.subr.bf16.mxu1 %v16489_v36  ;;  %v16556_v36 = vld [vmem:[%s18328_s1 + $0x70] sm:$0xff]  }
 0x3e8   :  { %3838 = vmatpush1.bf16.msra.mxu1 %v16487_v37  ;;  %v16558_v37 = vld [vmem:[%s18328_s1 + $0x78] sm:$0xff]  }
 0x3e9   :  { %3839 = vmatprep.subr.bf16.mxu1 %v16492_v38  ;;  %v16559_v38 = vld [vmem:[%s18328_s1 + $0x38] sm:$0xff]  }
 0x3ec   :  { %3840 = vmatpush1.bf16.msra.mxu1 %v16490_v39  ;;  %v1487_v39 = vld [vmem:[#allocation11] sm:$0x3] }
 0x3ed   :  { %3841 = vmatprep.subr.bf16.mxu1 %v16495_v40  ;;  %v3073_v40 = vld [vmem:[#allocation19] sm:$0x3]  ;;  %v1496_v42 = vrot.slane %v1487_v39, %v17848_v3 }
 0x3ee   :  { %v3078_v43 = vrot.slane %v3073_v40, %v17845_v2  ;;  %v3082_v1 = vrot.slane %v3073_v40, %v17848_v3  ;;  %v4777_v40 = vld [vmem:[#allocation23 + $0xc8] sm:$0xff] }
 0x3f0   :  { %3842 = vmatpush1.bf16.msra.mxu1 %v16493_v41  ;;  %v1492_v41 = vrot.slane %v1487_v39, %v17845_v2 }
 0x3f1   :  { %3854 = vmatprep.subr.bf16.mxu1 %v16498_v45 }
 0x3f3   :  { %3844 = vmatmul.mubr.bf16.vlgmr.msra.gmra.mrb[28].mxu1 %v17910_v47  ;;  %v16551_v47 = vld [vmem:[%s18328_s1 + $0x18] sm:$0xff]  }
 0x3f4   :  { %3855 = vmatpush1.bf16.msra.mxu1 %v16496_v46  ;;  %3886 = vmatprep.mubr.bf16.mxu1 %v2944_v27  ;;  %v16538_v27 = vld [vmem:[#allocation17 + $0x3e0] ss:$8 sps:$4 sm:$0xff]  }
 0x3f5   :  { %3856 = vmatprep.subr.bf16.mxu1 %v16501_v49  ;;  %15843 = vmatpush3.bf16.msra.mxu0 %v16551_v47 }
 0x3f6   :  { %15844 = vmatprep.subr.bf16.mxu0 %v16552_v28 }
 0x3f8   :  { %3857 = vmatpush1.bf16.msra.mxu1 %v16499_v54 }
 0x3f9   :  { %3858 = vmatprep.subr.bf16.mxu1 %v16504_v56  ;;  %15845 = vmatpush3.bf16.msra.mxu0 %v16553_v59 }
 0x3fa   :  { %15846 = vmatprep.subr.bf16.mxu0 %v16554_v35  ;;  %v4765_v35 = vld [vmem:[#allocation23 + $0x68] sm:$0xff] }
 0x3fc   :  { %3859 = vmatpush1.bf16.msra.mxu1 %v16502_v57 }
 0x3fd   :  { %3860 = vmatprep.subr.bf16.mxu1 %v16507_v17  ;;  %15847 = vmatpush3.bf16.msra.mxu0 %v16555_v60 }
 0x3fe   :  { %15848 = vmatprep.subr.bf16.mxu0 %v16556_v36 }
 0x400   :  { %3861 = vmatpush1.bf16.msra.mxu1 %v16505_v61 }
 0x401   :  { %3862 = vmatprep.subr.bf16.mxu1 %v16510_v0 }
 0x404   :  { %3863 = vmatpush1.bf16.msra.mxu1 %v16508_v4 }
 0x405   :  { %3864 = vmatprep.subr.bf16.mxu1 %v16513_v5 }
 0x408   :  { %3865 = vmatpush1.bf16.msra.mxu1 %v16511_v6 }
 0x409   :  { %3866 = vmatprep.subr.bf16.mxu1 %v16516_v7 }
 0x40c   :  { %3867 = vmatpush1.bf16.msra.mxu1 %v16514_v8 }
 0x40d   :  { %3868 = vmatprep.subr.bf16.mxu1 %v16519_v9 }
 0x410   :  { %3869 = vmatpush1.bf16.msra.mxu1 %v16517_v10 }
 0x411   :  { %3870 = vmatprep.subr.bf16.mxu1 %v16522_v11 }
 0x414   :  { %3871 = vmatpush1.bf16.msra.mxu1 %v16520_v12 }
 0x415   :  { %3872 = vmatprep.subr.bf16.mxu1 %v16525_v13 }
 0x418   :  { %3873 = vmatpush1.bf16.msra.mxu1 %v16523_v14  ;;  %v4089_v14 = vld [vmem:[#allocation20] sm:$0xff] }
 0x419   :  { %3874 = vmatprep.subr.bf16.mxu1 %v16528_v15  ;;  %v4097_v15 = vld [vmem:[#allocation20 + $0x40] sm:$0xff] }
 0x41c   :  { %3875 = vmatpush1.bf16.msra.mxu1 %v16526_v16  ;;  %v14580_v16 = vcombine.high %v4089_v14, %v4097_v15 }
 0x41d   :  { %3876 = vmatprep.subr.bf16.mxu1 %v16531_v18  ;;  %v14579_v18 = vcombine.low %v4089_v14, %v4097_v15  ;;  %v4841_v15 = vld [vmem:[#allocation23 + $0x2c8] sm:$0xff] }
 0x420   :  { %3877 = vmatpush1.bf16.msra.mxu1 %v16529_v19  ;;  %v4105_v19 = vld [vmem:[#allocation20 + $0x80] sm:$0xff] }
 0x421   :  { %3878 = vmatprep.subr.bf16.mxu1 %v16534_v20  ;;  %v4113_v20 = vld [vmem:[#allocation20 + $0xc0] sm:$0xff] }
 0x424   :  { %3879 = vmatpush1.bf16.msra.mxu1 %v16532_v21  ;;  %v14596_v21 = vcombine.high %v4105_v19, %v4113_v20 }
 0x425   :  { %3880 = vmatprep.subr.bf16.mxu1 %v16537_v24  ;;  %v14595_v24 = vcombine.low %v4105_v19, %v4113_v20  ;;  %v4849_v20 = vld [vmem:[#allocation23 + $0x308] sm:$0xff] }
 0x428   :  { %3881 = vmatpush1.bf16.msra.mxu1 %v16535_v58  ;;  %v17973_v58 = vld [vmem:[#allocation20 + $0x8] sm:$0xff] }
 0x429   :  { %3882 = vmatprep.subr.bf16.mxu1 %v16540_v26  ;;  %v17975_v26 = vld [vmem:[#allocation20 + $0x48] sm:$0xff] }
 0x42c   :  { %3883 = vmatpush1.bf16.msra.mxu1 %v16538_v27  ;;  %v14582_v27 = vcombine.high %v17973_v58, %v17975_v26 }
 0x42d   :  { %3884 = vmatprep.subr.bf16.mxu1 %v16543_v29  ;;  %v14581_v29 = vcombine.low %v17973_v58, %v17975_v26  ;;  %v4108_v26 = vld [vmem:[#allocation20 + $0x98] sm:$0xff] }
 0x430   :  { %3885 = vmatpush1.bf16.msra.mxu1 %v16541_v44  ;;  %v4753_v44 = vld [vmem:[#allocation23 + $0x8] sm:$0xff] }
 0x433   :  { %3887 = vmatmul.mubr.bf16.vlgmr.msra.gmra.mrb[28].mxu1 %v17916_v25  ;;  %v16557_v25 = vld [vmem:[%s18328_s1 + $0x30] sm:$0xff]   ;;  %s17403_s1 = smov [#allocation36]  }
 0x434   :  { %15849 = vmatpush3.bf16.msra.mxu0 %v16557_v25  ;;  %v4769_v25 = vld [vmem:[#allocation23 + $0x88] sm:$0xff]  ;;  %s14070_s11 = sshll.u32 %s17403_s1, 4  ;;  %s14071_s11 = int_to_ptr.vmem [resolvable:$true] %s14070_s11 }
 0x435   :  { %15850 = vmatprep.subr.bf16.mxu0 %v16558_v37  ;;  %v4773_v37 = vld [vmem:[#allocation23 + $0xa8] sm:$0xff]  ;;  %s17282_s28 = scalar_lea.vmem %s14071_s11, 512  ;;  %p17287_p1 = scmp.lt.s32.totalorder %s14071_s11, %s14071_s11 }
 0x436   :  { %v14637_v39 = vcombine.low %v4769_v25, %v4773_v37  ;;  %p17283_p0 = scmp.ne.s32.totalorder %s14071_s11, %s17282_s28  ;;  %p17288_p2 = scmp.lt.s32.totalorder %s17282_s28, %s17282_s28 }
 0x438   :  { %15851 = vmatpush3.bf16.msra.mxu0 %v16559_v38  ;;  %v14638_v38 = vcombine.high %v4769_v25, %v4773_v37  ;;  %p17289_p3 = por %p17288_p2, %p17287_p1 }
 0x439   :  { %4368 = vmatprep.subr.bf16.mxu0 %v14580_v16  ;;  %v4845_v16 = vld [vmem:[#allocation23 + $0x2e8] sm:$0xff] }
 0x43a   :  { %v14709_v19 = vcombine.low %v4841_v15, %v4845_v16  ;;  %p17290_p4 = pnand %p17289_p3, %p17283_p0 }
 0x466   :  { %v2302_v31 = vpop.f32.mrb[4].mxu0 }
 0x467   :  { %v2304_v32 = vpop.f32.mrb[5].mxu0  ;;  %v15946_v45 = vadd.f32 %v2302_v31, %v1492_v41  ;;  %v4757_v31 = vld [vmem:[#allocation23 + $0x28] sm:$0xff] }
 0x468   :  { %v2306_v33 = vpop.f32.mrb[6].mxu0  ;;  %v15947_v51 = vadd.f32 %v2304_v32, %v1496_v42  ;;  %v14621_v32 = vcombine.low %v4753_v44, %v4757_v31 }
 0x469   :  { %v2308_v34 = vpop.f32.mrb[7].mxu0  ;;  %v15948_v49 = vadd.f32 %v2306_v33, %v1492_v41  ;;  %v2311_v47 = vmax.f32 %v15946_v45, 0.0  ;;  %v14622_v33 = vcombine.high %v4753_v44, %v4757_v31  ;;  %v4781_v41 = vld [vmem:[#allocation23 + $0xe8] sm:$0xff] }
 0x46a   :  { %v15949_v54 = vadd.f32 %v2308_v34, %v1496_v42  ;;  %v2312_v59 = vmax.f32 %v15947_v51, 0.0  ;;  %v4761_v34 = vld [vmem:[#allocation23 + $0x48] sm:$0xff]  ;;  %v14646_v42 = vcombine.high %v4777_v40, %v4781_v41 }
 0x46b   :  { %v2313_v4 = vmax.f32 %v15948_v49, 0.0  ;;  %v14630_v60 = vcombine.high %v4761_v34, %v4765_v35  ;;  %8038 = vmatprep.subr.bf16.mxu1 %v14622_v33  ;;  %v14629_v36 = vcombine.low %v4761_v34, %v4765_v35  ;;  %v4789_v45 = vld [vmem:[#allocation23 + $0x128] sm:$0xff]  ;;  %v14562_v35 = vld [vmem:[#allocation13] ss:$0 sm:$0xff] }
 0x46c   :  { %v2314_v7 = vmax.f32 %v15949_v54, 0.0  ;;  %8039 = vmatpush1.bf16.msra.mxu1 %v14621_v32  ;;  %v4793_v49 = vld [vmem:[#allocation23 + $0x148] sm:$0xff] }
 0x46d   :  { %8040 = vmatprep.subr.bf16.mxu1 %v14630_v60  ;;  %v4857_v44 = vld [vmem:[#allocation23 + $0x348] sm:$0xff] }
 0x46e   :  { %v4861_v31 = vld [vmem:[#allocation23 + $0x368] sm:$0xff] }
 0x46f   :  { %v14726_v32 = vcombine.high %v4857_v44, %v4861_v31  ;;  %v14725_v33 = vcombine.low %v4857_v44, %v4861_v31  ;;  %v4111_v44 = vld [vmem:[#allocation20 + $0xb0] sm:$0xff] }
 0x470   :  { %8041 = vmatpush1.bf16.msra.mxu1 %v14629_v36  ;;  %v4119_v31 = vld [vmem:[#allocation20 + $0xf0] sm:$0xff] }
 0x471   :  { %8042 = vmatprep.subr.bf16.mxu1 %v14638_v38 }
 0x474   :  { %8043 = vmatpush1.bf16.msra.mxu1 %v14637_v39 }
 0x475   :  { %8044 = vmatprep.subr.bf16.mxu1 %v14646_v42  ;;  %v4106_v42 = vld [vmem:[#allocation20 + $0x88] sm:$0xff] }
 0x506   :  { %v3888_v46 = vpop.f32.mrb[28].mxu1 }
 0x507   :  { %v15950_v30 = vadd.f32 %v3888_v46, %v3078_v43  ;;  %v3890_v52 = vpop.f32.mrb[29].mxu1 }
 0x508   :  { %v15951_v55 = vadd.f32 %v3890_v52, %v3082_v1  ;;  %v3892_v56 = vpop.f32.mrb[30].mxu1 }
 0x509   :  { %v3897_v57 = vmax.f32 %v15950_v30, 0.0  ;;  %v15952_v28 = vadd.f32 %v3892_v56, %v3078_v43  ;;  %v3894_v17 = vpop.f32.mrb[31].mxu1  ;;  %v14645_v43 = vcombine.low %v4777_v40, %v4781_v41  ;;  %v4797_v30 = vld [vmem:[#allocation23 + $0x168] sm:$0xff] }
 0x50a   :  { %v3898_v61 = vmax.f32 %v15951_v55, 0.0  ;;  %v15953_v0 = vadd.f32 %v3894_v17, %v3082_v1  ;;  %v4785_v1 = vld [vmem:[#allocation23 + $0x108] sm:$0xff]  ;;  %v14662_v52 = vcombine.high %v4793_v49, %v4797_v30  ;;  %v14661_v54 = vcombine.low %v4793_v49, %v4797_v30  ;;  %v4099_v49 = vld [vmem:[#allocation20 + $0x50] sm:$0xff] }
 0x50b   :  { %v3901_v5 = vadd.f32 %v3897_v57, %v2311_v47  ;;  %v3899_v6 = vmax.f32 %v15952_v28, 0.0  ;;  %v14654_v51 = vcombine.high %v4785_v1, %v4789_v45  ;;  %8045 = vmatpush1.bf16.msra.mxu1 %v14645_v43  ;;  %v14653_v46 = vcombine.low %v4785_v1, %v4789_v45  ;;  %v4801_v55 = vld [vmem:[#allocation23 + $0x188] sm:$0xff]  ;;  %v4114_v43 = vld [vmem:[#allocation20 + $0xc8] sm:$0xff] }
 0x50c   :  { %v3902_v8 = vadd.f32 %v3898_v61, %v2312_v59  ;;  %v3900_v9 = vmax.f32 %v15953_v0, 0.0  ;;  %v4805_v56 = vld [vmem:[#allocation23 + $0x1a8] sm:$0xff]  ;;  %v14597_v30 = vcombine.low %v4106_v42, %v4114_v43 }
 0x50d   :  { %v3903_v10 = vadd.f32 %v3899_v6, %v2313_v4  ;;  %8046 = vmatprep.subr.bf16.mxu1 %v14654_v51  ;;  %v14670_v47 = vcombine.high %v4801_v55, %v4805_v56  ;;  %v14669_v57 = vcombine.low %v4801_v55, %v4805_v56  ;;  %v4809_v28 = vld [vmem:[#allocation23 + $0x1c8] sm:$0xff]  ;;  %v14598_v51 = vcombine.high %v4106_v42, %v4114_v43  ;;  %v4115_v55 = vld [vmem:[#allocation20 + $0xd0] sm:$0xff] }
 0x50e   :  { %v3904_v11 = vadd.f32 %v3900_v9, %v2314_v7  ;;  %v4813_v17 = vld [vmem:[#allocation23 + $0x1e8] sm:$0xff] }
 0x50f   :  { %v3905_v12 = vpack.c.bf16 %v3903_v10, %v3901_v5  ;;  %8047 = vmatpush1.bf16.msra.mxu1 %v14653_v46  ;;  %v14678_v59 = vcombine.high %v4809_v28, %v4813_v17  ;;  %v14677_v61 = vcombine.low %v4809_v28, %v4813_v17  ;;  %v4817_v0 = vld [vmem:[#allocation23 + $0x208] sm:$0xff]  ;;  %v4091_v46 = vld [vmem:[#allocation20 + $0x10] sm:$0xff] }
 0x510   :  { %v3906_v13 = vpack.c.bf16 %v3904_v11, %v3902_v8  ;;  %8048 = vmatprep.subr.bf16.mxu1 %v14662_v52  ;;  %v4821_v4 = vld [vmem:[#allocation23 + $0x228] sm:$0xff]  ;;  %v14584_v52 = vcombine.high %v4091_v46, %v4099_v49  ;;  %v14583_v56 = vcombine.low %v4091_v46, %v4099_v49 }
 0x511   :  { %v14686_v5 = vcombine.high %v4817_v0, %v4821_v4  ;;  %v14685_v6 = vcombine.low %v4817_v0, %v4821_v4  ;;  %v4825_v7 = vld [vmem:[#allocation23 + $0x248] sm:$0xff]  ;;  %v4093_v0 = vld [vmem:[#allocation20 + $0x20] sm:$0xff] }
 0x512   :  { %4074 = vmatprep.mubr.bf16.mxu0 %v3906_v13  ;;  %v4829_v8 = vld [vmem:[#allocation23 + $0x268] sm:$0xff]  ;;  %v4101_v4 = vld [vmem:[#allocation20 + $0x60] sm:$0xff] }
 0x513   :  { %4075 = vmatmul.mubr.bf16.vlgmr.msra.gmra.mrb[8].mxu0 %v3905_v12  ;;  %8049 = vmatpush1.bf16.msra.mxu1 %v14661_v54  ;;  %v14694_v9 = vcombine.high %v4825_v7, %v4829_v8  ;;  %v14693_v10 = vcombine.low %v4825_v7, %v4829_v8  ;;  %v4833_v11 = vld [vmem:[#allocation23 + $0x288] sm:$0xff]  ;;  %v4107_v54 = vld [vmem:[#allocation20 + $0x90] sm:$0xff]  ;;  %v4109_v7 = vld [vmem:[#allocation20 + $0xa0] sm:$0xff] }
 0x514   :  { %4400 = vmatprep.mubr.bf16.mxu0 %v17402_v48  ;;  %4369 = vmatpush1.bf16.msra.mxu0 %v14579_v18  ;;  %v4837_v12 = vld [vmem:[#allocation23 + $0x2a8] sm:$0xff]  ;;  %v14710_v18 = vcombine.high %v4841_v15, %v4845_v16  ;;  %v14599_v17 = vcombine.low %v4107_v54, %v4115_v55  ;;  %v4117_v8 = vld [vmem:[#allocation20 + $0xe0] sm:$0xff]  ;;  %v4110_v15 = vld [vmem:[#allocation20 + $0xa8] sm:$0xff] }
 0x515   :  { %4370 = vmatprep.subr.bf16.mxu0 %v14596_v21  ;;  %8050 = vmatprep.subr.bf16.mxu1 %v14670_v47  ;;  %v14702_v13 = vcombine.high %v4833_v11, %v4837_v12  ;;  %v14701_v14 = vcombine.low %v4833_v11, %v4837_v12  ;;  %v4853_v21 = vld [vmem:[#allocation23 + $0x328] sm:$0xff]  ;;  %v14600_v47 = vcombine.high %v4107_v54, %v4115_v55  ;;  %v4094_v11 = vld [vmem:[#allocation20 + $0x28] sm:$0xff] }
 0x516   :  { %v4100_v28 = vld [vmem:[#allocation20 + $0x58] sm:$0xff]  ;;  %v4102_v12 = vld [vmem:[#allocation20 + $0x68] sm:$0xff] }
 0x517   :  { %8051 = vmatpush1.bf16.msra.mxu1 %v14669_v57  ;;  %v4092_v57 = vld [vmem:[#allocation20 + $0x18] sm:$0xff]  ;;  %v4118_v16 = vld [vmem:[#allocation20 + $0xe8] sm:$0xff] }
 0x518   :  { %4371 = vmatpush1.bf16.msra.mxu0 %v14595_v24  ;;  %8052 = vmatprep.subr.bf16.mxu1 %v14678_v59  ;;  %v14718_v24 = vcombine.high %v4849_v20, %v4853_v21  ;;  %v14586_v58 = vcombine.high %v4092_v57, %v4100_v28  ;;  %v14585_v59 = vcombine.low %v4092_v57, %v4100_v28  ;;  %v4784_v28 = vld [vmem:[#allocation23 + $0x100] sm:$0xff] }
 0x519   :  { %4411 = vmatprep.subr.bf16.mxu0 %v14582_v27  ;;  %v14717_v27 = vcombine.low %v4849_v20, %v4853_v21  ;;  %v4095_v20 = vld [vmem:[#allocation20 + $0x30] sm:$0xff] }
 0x51a   :  { %v4103_v21 = vld [vmem:[#allocation20 + $0x70] sm:$0xff] }
 0x51b   :  { %8053 = vmatpush1.bf16.msra.mxu1 %v14677_v61 }
 0x51c   :  { %8054 = vmatprep.subr.bf16.mxu1 %v14686_v5 }
 0x51f   :  { %8055 = vmatpush1.bf16.msra.mxu1 %v14685_v6  ;;  %v14588_v6 = vcombine.high %v4093_v0, %v4101_v4 }
 0x520   :  { %8056 = vmatprep.subr.bf16.mxu1 %v14694_v9  ;;  %v14587_v9 = vcombine.low %v4093_v0, %v4101_v4  ;;  %v4800_v0 = vld [vmem:[#allocation23 + $0x180] sm:$0xff] }
 0x521   :  { %v4804_v4 = vld [vmem:[#allocation23 + $0x1a0] sm:$0xff] }
 0x523   :  { %8057 = vmatpush1.bf16.msra.mxu1 %v14693_v10  ;;  %v14604_v10 = vcombine.high %v4109_v7, %v4117_v8 }
 0x524   :  { %8058 = vmatprep.subr.bf16.mxu1 %v14702_v13  ;;  %v14603_v13 = vcombine.low %v4109_v7, %v4117_v8  ;;  %v4808_v7 = vld [vmem:[#allocation23 + $0x1c0] sm:$0xff] }
 0x525   :  { %v4812_v8 = vld [vmem:[#allocation23 + $0x1e0] sm:$0xff] }
 0x527   :  { %8059 = vmatpush1.bf16.msra.mxu1 %v14701_v14  ;;  %v14590_v14 = vcombine.high %v4094_v11, %v4102_v12 }
 0x528   :  { %8060 = vmatprep.subr.bf16.mxu1 %v14710_v18  ;;  %v14589_v18 = vcombine.low %v4094_v11, %v4102_v12  ;;  %v4816_v11 = vld [vmem:[#allocation23 + $0x200] sm:$0xff] }
 0x529   :  { %v4820_v12 = vld [vmem:[#allocation23 + $0x220] sm:$0xff] }
 0x52b   :  { %8061 = vmatpush1.bf16.msra.mxu1 %v14709_v19  ;;  %v14606_v19 = vcombine.high %v4110_v15, %v4118_v16 }
 0x52c   :  { %8062 = vmatprep.subr.bf16.mxu1 %v14718_v24  ;;  %v14605_v24 = vcombine.low %v4110_v15, %v4118_v16  ;;  %v4865_v15 = vld [vmem:[#allocation23 + $0x388] sm:$0xff]  ;;  %v4824_v16 = vld [vmem:[#allocation23 + $0x240] sm:$0xff] }
 0x52f   :  { %8063 = vmatpush1.bf16.msra.mxu1 %v14717_v27  ;;  %v14592_v27 = vcombine.high %v4095_v20, %v4103_v21 }
 0x530   :  { %8064 = vmatprep.subr.bf16.mxu1 %v14726_v32  ;;  %v14591_v32 = vcombine.low %v4095_v20, %v4103_v21 }
 0x533   :  { %8065 = vmatpush1.bf16.msra.mxu1 %v14725_v33  ;;  %v14608_v33 = vcombine.high %v4111_v44, %v4119_v31 }
 0x5e6   :  { %v15852_v34 = vpop.f32.mrb[8].mxu0 }
 0x5e7   :  { %v15853_v60 = vpop.f32.mrb[9].mxu0 }
 0x5e8   :  { %v15854_v36 = vadd.f32 %v15853_v60, %v15852_v34  ;;  %v15855_v25 = vpop.f32.mrb[10].mxu0  ;;  %v4096_v34 = vld [vmem:[#allocation20 + $0x38] sm:$0xff]  ;;  %v14607_v60 = vcombine.low %v4111_v44, %v4119_v31  ;;  %v4832_v31 = vld [vmem:[#allocation23 + $0x280] sm:$0xff] }
 0x5e9   :  { %v15856_v37 = vpop.f32.mrb[11].mxu0  ;;  %v4873_v44 = vld [vmem:[#allocation23 + $0x3c8] sm:$0xff] }
 0x5ea   :  { %v4077_v38 = vadd.f32 %v15854_v36, %v14562_v35  ;;  %v15857_v39 = vadd.f32 %v15856_v37, %v15855_v25  ;;  %v4112_v25 = vld [vmem:[#allocation20 + $0xb8] sm:$0xff] }
 0x5eb   :  { %v4120_v37 = vld [vmem:[#allocation20 + $0xf8] sm:$0xff] }
 0x5ec   :  { %v4083_v40 = vmax.f32 %v4077_v38, 0.0  ;;  %v4080_v41 = vadd.f32 %v15857_v39, %v14562_v35  ;;  %v4104_v35 = vld [vmem:[#allocation20 + $0x78] sm:$0xff]  ;;  %v14610_v39 = vcombine.high %v4112_v25, %v4120_v37  ;;  %v14609_v42 = vcombine.low %v4112_v25, %v4120_v37  ;;  %v18011_v25 = vld [vmem:[#allocation23 + $0x400] sm:$0xff] }
 0x5ed   :  { %v14594_v36 = vcombine.high %v4096_v34, %v4104_v35  ;;  %v14593_v38 = vcombine.low %v4096_v34, %v4104_v35  ;;  %v18013_v37 = vld [vmem:[#allocation23 + $0x420] sm:$0xff] }
 0x5ee   :  { %v4084_v1 = vmax.f32 %v4080_v41, 0.0  ;;  %4086 = vst.msk [vmem:[#allocation35] sm:$0xff] %vm4085_vm0, %v4083_v40  ;;  %v4756_v41 = vld [vmem:[#allocation23 + $0x20] sm:$0xff] }
 0x5f0   :  { %v17982_v45 = vpack.c.bf16 %v4084_v1, %v4083_v40  ;;  %4087 = vst.msk [vmem:[#allocation35 + $0x8] sm:$0xff] %vm4085_vm0, %v4084_v1  ;;  %v4752_v40 = vld [vmem:[#allocation23] sm:$0xff] }
 0x5f1   :  { %v14620_v43 = vcombine.high %v4752_v40, %v4756_v41  ;;  %v4760_v1 = vld [vmem:[#allocation23 + $0x40] sm:$0xff]  ;;  %v14619_v46 = vcombine.low %v4752_v40, %v4756_v41  ;;  %v18017_v41 = vld [vmem:[#allocation23 + $0x428] sm:$0xff] }
 0x5f2   :  { %14611 = vmatmul.mubr.msk.bf16.vlgmr.msra.gmra.mrb[12].mxu0 %vm4085_vm0, %v17982_v45  ;;  %v4844_v40 = vld [vmem:[#allocation23 + $0x2e0] sm:$0xff] }
 0x5f3   :  { %4412 = vmatpush1.bf16.msra.mxu0 %v14581_v29  ;;  %4443 = vmatprep.mubr.bf16.mxu0 %v17402_v48  ;;  %v4116_v29 = vld [vmem:[#allocation20 + $0xd8] sm:$0xff] }
 0x5f4   :  { %4413 = vmatprep.subr.bf16.mxu0 %v14598_v51  ;;  %v14602_v61 = vcombine.high %v4108_v26, %v4116_v29  ;;  %v14601_v5 = vcombine.low %v4108_v26, %v4116_v29  ;;  %v4764_v51 = vld [vmem:[#allocation23 + $0x60] sm:$0xff] }
 0x5f5   :  { %v14628_v49 = vcombine.high %v4760_v1, %v4764_v51  ;;  %v14627_v54 = vcombine.low %v4760_v1, %v4764_v51  ;;  %v4792_v29 = vld [vmem:[#allocation23 + $0x140] sm:$0xff] }
 0x5f7   :  { %4414 = vmatpush1.bf16.msra.mxu0 %v14597_v30  ;;  %v4768_v30 = vld [vmem:[#allocation23 + $0x80] sm:$0xff] }
 0x5f8   :  { %4454 = vmatprep.subr.bf16.mxu0 %v14584_v52  ;;  %v4772_v52 = vld [vmem:[#allocation23 + $0xa0] sm:$0xff] }
 0x5f9   :  { %v14636_v55 = vcombine.high %v4768_v30, %v4772_v52 }
 0x5fa   :  { %14612 = vmatmul.mubr.msk.bf16.vlgmr.msra.gmra.mrb[16].mxu0 %vm4085_vm0, %v17982_v45 }
 0x5fb   :  { %4455 = vmatpush1.bf16.msra.mxu0 %v14583_v56  ;;  %4486 = vmatprep.mubr.bf16.mxu0 %v17402_v48  ;;  %v4776_v56 = vld [vmem:[#allocation23 + $0xc0] sm:$0xff] }
 0x5fc   :  { %4456 = vmatprep.subr.bf16.mxu0 %v14600_v47  ;;  %v4780_v47 = vld [vmem:[#allocation23 + $0xe0] sm:$0xff] }
 0x5fd   :  { %v14644_v57 = vcombine.high %v4776_v56, %v4780_v47 }
 0x5ff   :  { %4457 = vmatpush1.bf16.msra.mxu0 %v14599_v17  ;;  %v4788_v17 = vld [vmem:[#allocation23 + $0x120] sm:$0xff] }
 0x600   :  { %4497 = vmatprep.subr.bf16.mxu0 %v14586_v58  ;;  %v14643_v58 = vcombine.low %v4776_v56, %v4780_v47  ;;  %v14652_v26 = vcombine.high %v4784_v28, %v4788_v17  ;;  %v4860_v56 = vld [vmem:[#allocation23 + $0x360] sm:$0xff] }
 0x602   :  { %14613 = vmatmul.mubr.msk.bf16.vlgmr.msra.gmra.mrb[20].mxu0 %vm4085_vm0, %v17982_v45 }
 0x603   :  { %4498 = vmatpush1.bf16.msra.mxu0 %v14585_v59  ;;  %4529 = vmatprep.mubr.bf16.mxu0 %v17402_v48  ;;  %v4796_v59 = vld [vmem:[#allocation23 + $0x160] sm:$0xff] }
 0x604   :  { %4499 = vmatprep.subr.bf16.mxu0 %v14602_v61  ;;  %v14660_v61 = vcombine.high %v4792_v29, %v4796_v59 }
 0x607   :  { %4500 = vmatpush1.bf16.msra.mxu0 %v14601_v5  ;;  %v14659_v5 = vcombine.low %v4792_v29, %v4796_v59  ;;  %v4876_v29 = vld [vmem:[#allocation23 + $0x3e0] sm:$0xff] }
 0x608   :  { %4540 = vmatprep.subr.bf16.mxu0 %v14588_v6  ;;  %v14668_v6 = vcombine.high %v4800_v0, %v4804_v4 }
 0x60a   :  { %14614 = vmatmul.mubr.msk.bf16.vlgmr.msra.gmra.mrb[24].mxu0 %vm4085_vm0, %v17982_v45 }
 0x60b   :  { %4541 = vmatpush1.bf16.msra.mxu0 %v14587_v9  ;;  %4572 = vmatprep.mubr.bf16.mxu0 %v17402_v48  ;;  %v14667_v9 = vcombine.low %v4800_v0, %v4804_v4  ;;  %v14748_v0 = vcombine.high %v18011_v25, %v18013_v37  ;;  %v18027_v4 = vld [vmem:[#allocation22] sm:$0xff] }
 0x60c   :  { %4542 = vmatprep.subr.bf16.mxu0 %v14604_v10  ;;  %v14676_v10 = vcombine.high %v4808_v7, %v4812_v8 }
 0x60f   :  { %4543 = vmatpush1.bf16.msra.mxu0 %v14603_v13  ;;  %v14675_v13 = vcombine.low %v4808_v7, %v4812_v8 }
 0x610   :  { %4583 = vmatprep.subr.bf16.mxu0 %v14590_v14  ;;  %v14684_v14 = vcombine.high %v4816_v11, %v4820_v12 }
 0x612   :  { %14615 = vmatmul.mubr.msk.bf16.vlgmr.msra.gmra.mrb[28].mxu0 %vm4085_vm0, %v17982_v45 }
 0x613   :  { %4584 = vmatpush1.bf16.msra.mxu0 %v14589_v18  ;;  %4615 = vmatprep.mubr.bf16.mxu0 %v17402_v48  ;;  %v4828_v18 = vld [vmem:[#allocation23 + $0x260] sm:$0xff] }
 0x614   :  { %4585 = vmatprep.subr.bf16.mxu0 %v14606_v19  ;;  %v4869_v19 = vld [vmem:[#allocation23 + $0x3a8] sm:$0xff] }
 0x615   :  { %v14733_v20 = vcombine.low %v4865_v15, %v4869_v19  ;;  %v14734_v21 = vcombine.high %v4865_v15, %v4869_v19  ;;  %v4888_v19 = vld [vmem:[#allocation23 + $0x440] sm:$0xff] }
 0x617   :  { %4586 = vmatpush1.bf16.msra.mxu0 %v14605_v24  ;;  %v14683_v24 = vcombine.low %v4816_v11, %v4820_v12  ;;  %8066 = vmatprep.subr.bf16.mxu1 %v14734_v21 }
 0x618   :  { %4626 = vmatprep.subr.bf16.mxu0 %v14592_v27  ;;  %v14692_v27 = vcombine.high %v4824_v16, %v4828_v18  ;;  %8067 = vmatpush1.bf16.msra.mxu1 %v14733_v20 }
 0x61a   :  { %14616 = vmatmul.mubr.msk.bf16.vlgmr.msra.gmra.mrb[32].mxu0 %vm4085_vm0, %v17982_v45 }
 0x61b   :  { %4627 = vmatpush1.bf16.msra.mxu0 %v14591_v32  ;;  %4658 = vmatprep.mubr.bf16.mxu0 %v17402_v48  ;;  %v4836_v32 = vld [vmem:[#allocation23 + $0x2a0] sm:$0xff] }
 0x61c   :  { %4628 = vmatprep.subr.bf16.mxu0 %v14608_v33  ;;  %v4877_v33 = vld [vmem:[#allocation23 + $0x3e8] sm:$0xff]  ;;  %v14699_v51 = vcombine.low %v4832_v31, %v4836_v32 }
 0x61d   :  { %v14741_v34 = vcombine.low %v4873_v44, %v4877_v33  ;;  %v14742_v35 = vcombine.high %v4873_v44, %v4877_v33  ;;  %v4889_v44 = vld [vmem:[#allocation23 + $0x448] sm:$0xff] }
 0x61f   :  { %4629 = vmatpush1.bf16.msra.mxu0 %v14607_v60  ;;  %v14691_v60 = vcombine.low %v4824_v16, %v4828_v18  ;;  %8068 = vmatprep.subr.bf16.mxu1 %v14742_v35  ;;  %v4136_v18 = vrot.slane %v18027_v4, %v17872_v62 }
 0x620   :  { %4669 = vmatprep.subr.bf16.mxu0 %v14594_v36  ;;  %v14700_v36 = vcombine.high %v4832_v31, %v4836_v32  ;;  %8069 = vmatpush1.bf16.msra.mxu1 %v14741_v34  ;;  %v4893_v31 = vld [vmem:[#allocation23 + $0x468] sm:$0xff] }
 0x622   :  { %14617 = vmatmul.mubr.msk.bf16.vlgmr.msra.gmra.mrb[36].mxu0 %vm4085_vm0, %v17982_v45 }
 0x623   :  { %4670 = vmatpush1.bf16.msra.mxu0 %v14593_v38  ;;  %4701 = vmatprep.mubr.bf16.mxu0 %v17402_v48  ;;  %v14635_v48 = vcombine.low %v4768_v30, %v4772_v52  ;;  %v18015_v38 = vld [vmem:[#allocation23 + $0x408] sm:$0xff]  ;;  %v4852_v30 = vld [vmem:[#allocation23 + $0x320] sm:$0xff] }
 0x624   :  { %4671 = vmatprep.subr.bf16.mxu0 %v14610_v39  ;;  %v4840_v39 = vld [vmem:[#allocation23 + $0x2c0] sm:$0xff]  ;;  %v14750_v1 = vcombine.high %v18015_v38, %v18017_v41 }
 0x625   :  { %v14707_v52 = vcombine.low %v4840_v39, %v4844_v40 }
 0x626   :  { %8081 = vmatprep.subr.bf16.mxu1 %v14750_v1 }
 0x627   :  { %4672 = vmatpush1.bf16.msra.mxu0 %v14609_v42  ;;  %v14747_v42 = vcombine.low %v18011_v25, %v18013_v37  ;;  %v4148_v25 = vrot.slane %v18027_v4, %v17860_v53  ;;  %v4908_v37 = vld [vmem:[#allocation23 + $0x4e0] sm:$0xff] }
 0x628   :  { %7866 = vmatprep.subr.bf16.mxu0 %v14620_v43  ;;  %v14749_v43 = vcombine.low %v18015_v38, %v18017_v41  ;;  %v4909_v38 = vld [vmem:[#allocation23 + $0x4e8] sm:$0xff] }
 0x62a   :  { %14618 = vmatmul.mubr.msk.bf16.vlgmr.msra.gmra.mrb[40].mxu0 %vm4085_vm0, %v17982_v45  ;;  %v14651_v45 = vcombine.low %v4784_v28, %v4788_v17  ;;  %v4868_v28 = vld [vmem:[#allocation23 + $0x3a0] sm:$0xff] }
 0x62b   :  { %7867 = vmatpush1.bf16.msra.mxu0 %v14619_v46  ;;  %v14708_v46 = vcombine.high %v4840_v39, %v4844_v40  ;;  %v14758_v39 = vcombine.high %v4889_v44, %v4893_v31  ;;  %v4896_v40 = vld [vmem:[#allocation23 + $0x480] sm:$0xff] }
 0x62c   :  { %7868 = vmatprep.subr.bf16.mxu0 %v14628_v49  ;;  %v4848_v49 = vld [vmem:[#allocation23 + $0x300] sm:$0xff] }
 0x62d   :  { %v14715_v47 = vcombine.low %v4848_v49, %v4852_v30 }
 0x62f   :  { %7869 = vmatpush1.bf16.msra.mxu0 %v14627_v54  ;;  %v14716_v54 = vcombine.high %v4848_v49, %v4852_v30  ;;  %v4897_v49 = vld [vmem:[#allocation23 + $0x488] sm:$0xff] }
 0x630   :  { %7870 = vmatprep.subr.bf16.mxu0 %v14636_v55  ;;  %v4856_v55 = vld [vmem:[#allocation23 + $0x340] sm:$0xff]  ;;  %v4901_v30 = vld [vmem:[#allocation23 + $0x4a8] sm:$0xff] }
 0x631   :  { %v14723_v17 = vcombine.low %v4856_v55, %v4860_v56 }
 0x633   :  { %7871 = vmatpush1.bf16.msra.mxu0 %v14635_v48  ;;  %v14724_v48 = vcombine.high %v4856_v55, %v4860_v56 }
 0x634   :  { %7872 = vmatprep.subr.bf16.mxu0 %v14644_v57  ;;  %v4864_v57 = vld [vmem:[#allocation23 + $0x380] sm:$0xff] }
 0x635   :  { %v14731_v59 = vcombine.low %v4864_v57, %v4868_v28 }
 0x637   :  { %7873 = vmatpush1.bf16.msra.mxu0 %v14643_v58  ;;  %v14732_v58 = vcombine.high %v4864_v57, %v4868_v28 }
 0x638   :  { %7874 = vmatprep.subr.bf16.mxu0 %v14652_v26  ;;  %v4872_v26 = vld [vmem:[#allocation23 + $0x3c0] sm:$0xff] }
 0x63b   :  { %7875 = vmatpush1.bf16.msra.mxu0 %v14651_v45  ;;  %v14740_v45 = vcombine.high %v4872_v26, %v4876_v29 }
 0x63c   :  { %7876 = vmatprep.subr.bf16.mxu0 %v14660_v61  ;;  %v14739_v61 = vcombine.low %v4872_v26, %v4876_v29  ;;  %v4904_v26 = vld [vmem:[#allocation23 + $0x4c0] sm:$0xff] }
 0x63f   :  { %7877 = vmatpush1.bf16.msra.mxu0 %v14659_v5  ;;  %v4128_v5 = vrot.slane %v18027_v4, %v17845_v2 }
 0x640   :  { %7878 = vmatprep.subr.bf16.mxu0 %v14668_v6  ;;  %v4132_v6 = vrot.slane %v18027_v4, %v17848_v3 }
 0x643   :  { %7879 = vmatpush1.bf16.msra.mxu0 %v14667_v9 }
 0x644   :  { %7880 = vmatprep.subr.bf16.mxu0 %v14676_v10 }
 0x647   :  { %7881 = vmatpush1.bf16.msra.mxu0 %v14675_v13 }
 0x648   :  { %7882 = vmatprep.subr.bf16.mxu0 %v14684_v14 }
 0x64b   :  { %7883 = vmatpush1.bf16.msra.mxu0 %v14683_v24  ;;  %v4140_v24 = vrot.slane %v18027_v4, %v17875_v63 }
 0x64c   :  { %7884 = vmatprep.subr.bf16.mxu0 %v14692_v27  ;;  %v4892_v27 = vld [vmem:[#allocation23 + $0x460] sm:$0xff] }
 0x64d   :  { %v14755_v55 = vcombine.low %v4888_v19, %v4892_v27 }
 0x64f   :  { %7885 = vmatpush1.bf16.msra.mxu0 %v14691_v60 }
 0x650   :  { %7886 = vmatprep.subr.bf16.mxu0 %v14700_v36  ;;  %v14756_v36 = vcombine.high %v4888_v19, %v4892_v27 }
 0x653   :  { %7887 = vmatpush1.bf16.msra.mxu0 %v14699_v51 }
 0x654   :  { %7888 = vmatprep.subr.bf16.mxu0 %v14708_v46  ;;  %v4900_v46 = vld [vmem:[#allocation23 + $0x4a0] sm:$0xff] }
 0x657   :  { %7889 = vmatpush1.bf16.msra.mxu0 %v14707_v52 }
 0x658   :  { %7890 = vmatprep.subr.bf16.mxu0 %v14716_v54 }
 0x65b   :  { %7891 = vmatpush1.bf16.msra.mxu0 %v14715_v47  ;;  %v14757_v47 = vcombine.low %v4889_v44, %v4893_v31 }
 0x65c   :  { %7892 = vmatprep.subr.bf16.mxu0 %v14724_v48  ;;  %v4144_v48 = vrot.slane %v18027_v4, %v17857_v50 }
 0x65f   :  { %7893 = vmatpush1.bf16.msra.mxu0 %v14723_v17  ;;  %v14764_v17 = vcombine.high %v4896_v40, %v4900_v46 }
 0x660   :  { %7894 = vmatprep.subr.bf16.mxu0 %v14732_v58  ;;  %v14766_v58 = vcombine.high %v4897_v49, %v4901_v30 }
 0x663   :  { %7895 = vmatpush1.bf16.msra.mxu0 %v14731_v59 }
 0x664   :  { %7896 = vmatprep.subr.bf16.mxu0 %v14740_v45 }
 0x667   :  { %7897 = vmatpush1.bf16.msra.mxu0 %v14739_v61  ;;  %v14763_v61 = vcombine.low %v4896_v40, %v4900_v46  ;;  %v4921_v40 = vld [vmem:[#allocation23 + $0x548] sm:$0xff] }
 0x668   :  { %7909 = vmatprep.subr.bf16.mxu0 %v14748_v0  ;;  %v14765_v0 = vcombine.low %v4897_v49, %v4901_v30 }
 0x6c5   :  { %v4402_v7 = vpop.f32.mrb[12].mxu0 }
 0x6c6   :  { %v4403_v8 = vadd.f32 %v4402_v7, %v4128_v5  ;;  %v4404_v9 = vpop.f32.mrb[13].mxu0  ;;  %v14772_v7 = vcombine.high %v4904_v26, %v4908_v37 }
 0x6c7   :  { %v4405_v10 = vadd.f32 %v4404_v9, %v4132_v6  ;;  %v4406_v11 = vpop.f32.mrb[14].mxu0  ;;  %v4912_v9 = vld [vmem:[#allocation23 + $0x500] sm:$0xff] }
 0x6c8   :  { %v4407_v12 = vadd.f32 %v4406_v11, %v4128_v5  ;;  %v4408_v13 = vpop.f32.mrb[15].mxu0  ;;  %v4712_v15 = vmax.f32 %v4403_v8, 0.0 }
 0x6c9   :  { %v4409_v14 = vadd.f32 %v4408_v13, %v4132_v6  ;;  %v4713_v20 = vmax.f32 %v4405_v10, 0.0  ;;  %v4913_v13 = vld [vmem:[#allocation23 + $0x508] sm:$0xff] }
 0x6ca   :  { %v4728_v16 = vmax.f32 %v4407_v12, 0.0  ;;  %v4916_v12 = vld [vmem:[#allocation23 + $0x520] sm:$0xff] }
 0x6cb   :  { %v4729_v21 = vmax.f32 %v4409_v14, 0.0  ;;  %v4917_v14 = vld [vmem:[#allocation23 + $0x528] sm:$0xff]  ;;  %v14780_v44 = vcombine.high %v4912_v9, %v4916_v12  ;;  %v14779_v30 = vcombine.low %v4912_v9, %v4916_v12 }
 0x6cc   :  { %v18037_v32 = vpack.c.bf16 %v4728_v16, %v4712_v15  ;;  %v14782_v31 = vcombine.high %v4913_v13, %v4917_v14  ;;  %v4941_v12 = vld [vmem:[#allocation23 + $0x5e8] sm:$0xff] }
 0x6cd   :  { %v18039_v33 = vpack.c.bf16 %v4729_v21, %v4713_v20  ;;  %v4445_v34 = vpop.f32.mrb[16].mxu0  ;;  %v4152_v21 = vrot.slane %v18027_v4, %v17883_v22 }
 0x6ce   :  { %v4446_v35 = vadd.f32 %v4445_v34, %v4136_v18  ;;  %v4447_v60 = vpop.f32.mrb[17].mxu0  ;;  %v4920_v34 = vld [vmem:[#allocation23 + $0x540] sm:$0xff] }
 0x6cf   :  { %v4448_v1 = vadd.f32 %v4447_v60, %v4140_v24  ;;  %v4449_v51 = vpop.f32.mrb[18].mxu0  ;;  %7898 = vmatprep.mubr.bf16.mxu0 %v18039_v33  ;;  %8070 = vmatprep.mubr.bf16.mxu1 %v18039_v33 }
 0x6d0   :  { %v4450_v52 = vadd.f32 %v4449_v51, %v4136_v18  ;;  %v4451_v54 = vpop.f32.mrb[19].mxu0  ;;  %7899 = vmatmul.mubr.bf16.vlgmr.msra.gmra.mrb[44].mxu0 %v18037_v32  ;;  %8071 = vmatmul.mubr.bf16.vlgmr.msra.gmra.mrb[32].mxu1 %v18037_v32  ;;  %v4714_v57 = vmax.f32 %v4446_v35, 0.0  ;;  %v14771_v18 = vcombine.low %v4904_v26, %v4908_v37  ;;  %v4933_v26 = vld [vmem:[#allocation23 + $0x5a8] sm:$0xff] }
 0x6d1   :  { %v4452_v56 = vadd.f32 %v4451_v54, %v4140_v24  ;;  %7910 = vmatpush1.bf16.msra.mxu0 %v14747_v42  ;;  %8082 = vmatpush1.bf16.msra.mxu1 %v14749_v43  ;;  %v4715_v29 = vmax.f32 %v4448_v1, 0.0  ;;  %v4905_v42 = vld [vmem:[#allocation23 + $0x4c8] sm:$0xff] }
 0x6d2   :  { %v4730_v28 = vmax.f32 %v4450_v52, 0.0  ;;  %7911 = vmatprep.subr.bf16.mxu0 %v14756_v36  ;;  %8083 = vmatprep.subr.bf16.mxu1 %v14758_v39  ;;  %v14774_v8 = vcombine.high %v4905_v42, %v4909_v38  ;;  %v14773_v20 = vcombine.low %v4905_v42, %v4909_v38  ;;  %v4156_v36 = vrot.slane %v18027_v4, %v17886_v23  ;;  %v4924_v39 = vld [vmem:[#allocation23 + $0x560] sm:$0xff]  ;;  %v4925_v1 = vld [vmem:[#allocation23 + $0x568] sm:$0xff] }
 0x6d3   :  { %v4731_v59 = vmax.f32 %v4452_v56, 0.0  ;;  %v14781_v52 = vcombine.low %v4913_v13, %v4917_v14  ;;  %v14788_v56 = vcombine.high %v4920_v34, %v4924_v39  ;;  %v4928_v4 = vld [vmem:[#allocation23 + $0x580] sm:$0xff]  ;;  %v14789_v42 = vcombine.low %v4921_v40, %v4925_v1 }
 0x6d4   :  { %v18055_v41 = vpack.c.bf16 %v4730_v28, %v4714_v57 }
 0x6d5   :  { %v18057_v43 = vpack.c.bf16 %v4731_v59, %v4715_v29  ;;  %7912 = vmatpush1.bf16.msra.mxu0 %v14755_v55  ;;  %8084 = vmatpush1.bf16.msra.mxu1 %v14757_v47  ;;  %v4488_v45 = vpop.f32.mrb[20].mxu0  ;;  %v14790_v47 = vcombine.high %v4921_v40, %v4925_v1 }
 0x6d6   :  { %v4489_v5 = vadd.f32 %v4488_v45, %v4144_v48  ;;  %v4490_v6 = vpop.f32.mrb[21].mxu0  ;;  %7913 = vmatprep.subr.bf16.mxu0 %v14764_v17  ;;  %8085 = vmatprep.subr.bf16.mxu1 %v14766_v58  ;;  %v4932_v17 = vld [vmem:[#allocation23 + $0x5a0] sm:$0xff]  ;;  %v4929_v58 = vld [vmem:[#allocation23 + $0x588] sm:$0xff] }
 0x6d7   :  { %v4491_v10 = vadd.f32 %v4490_v6, %v4148_v25  ;;  %v4492_v11 = vpop.f32.mrb[22].mxu0  ;;  %7941 = vmatprep.mubr.bf16.mxu0 %v18057_v43  ;;  %8113 = vmatprep.mubr.bf16.mxu1 %v18057_v43  ;;  %v4936_v6 = vld [vmem:[#allocation23 + $0x5c0] sm:$0xff] }
 0x6d8   :  { %v4493_v15 = vadd.f32 %v4492_v11, %v4144_v48  ;;  %v4494_v16 = vpop.f32.mrb[23].mxu0  ;;  %v4716_v24 = vmax.f32 %v4489_v5, 0.0  ;;  %v18069_v48 = vld [vmem:[#allocation22 + $0x8] sm:$0xff]  ;;  %v14798_v5 = vcombine.high %v4929_v58, %v4933_v26  ;;  %v4937_v11 = vld [vmem:[#allocation23 + $0x5c8] sm:$0xff] }
 0x6d9   :  { %v4495_v19 = vadd.f32 %v4494_v16, %v4148_v25  ;;  %7914 = vmatpush1.bf16.msra.mxu0 %v14763_v61  ;;  %8086 = vmatpush1.bf16.msra.mxu1 %v14765_v0  ;;  %v4717_v35 = vmax.f32 %v4491_v10, 0.0  ;;  %v14787_v25 = vcombine.low %v4920_v34, %v4924_v39  ;;  %v4160_v38 = vrot.slane %v18069_v48, %v17845_v2  ;;  %v4940_v10 = vld [vmem:[#allocation23 + $0x5e0] sm:$0xff] }
 0x6da   :  { %v4732_v27 = vmax.f32 %v4493_v15, 0.0  ;;  %7915 = vmatprep.subr.bf16.mxu0 %v14772_v7  ;;  %8087 = vmatprep.subr.bf16.mxu1 %v14774_v8  ;;  %v14796_v0 = vcombine.high %v4928_v4, %v4932_v17  ;;  %v4164_v9 = vrot.slane %v18069_v48, %v17848_v3  ;;  %v14795_v16 = vcombine.low %v4928_v4, %v4932_v17  ;;  %v4948_v34 = vld [vmem:[#allocation23 + $0x620] sm:$0xff] }
 0x6db   :  { %v4733_v60 = vmax.f32 %v4495_v19, 0.0  ;;  %v14803_v40 = vcombine.low %v4936_v6, %v4940_v10  ;;  %v4956_v17 = vld [vmem:[#allocation23 + $0x660] sm:$0xff] }
 0x6dc   :  { %v18065_v51 = vpack.c.bf16 %v4732_v27, %v4716_v24  ;;  %v14806_v24 = vcombine.high %v4937_v11, %v4941_v12  ;;  %v4944_v27 = vld [vmem:[#allocation23 + $0x600] sm:$0xff] }
 0x6dd   :  { %v18067_v46 = vpack.c.bf16 %v4733_v60, %v4717_v35  ;;  %7916 = vmatpush1.bf16.msra.mxu0 %v14771_v18  ;;  %8088 = vmatpush1.bf16.msra.mxu1 %v14773_v20  ;;  %v4531_v49 = vpop.f32.mrb[24].mxu0  ;;  %v14797_v18 = vcombine.low %v4929_v58, %v4933_v26  ;;  %v4945_v35 = vld [vmem:[#allocation23 + $0x608] sm:$0xff] }
 0x6de   :  { %v4532_v54 = vadd.f32 %v4531_v49, %v4152_v21  ;;  %v4533_v55 = vpop.f32.mrb[25].mxu0  ;;  %7917 = vmatprep.subr.bf16.mxu0 %v14780_v44  ;;  %8089 = vmatprep.subr.bf16.mxu1 %v14782_v31  ;;  %v4949_v60 = vld [vmem:[#allocation23 + $0x628] sm:$0xff]  ;;  %v14805_v49 = vcombine.low %v4937_v11, %v4941_v12 }
 0x6df   :  { %v4534_v57 = vadd.f32 %v4533_v55, %v4156_v36  ;;  %v4535_v28 = vpop.f32.mrb[26].mxu0  ;;  %v14812_v55 = vcombine.high %v4944_v27, %v4948_v34  ;;  %v4953_v58 = vld [vmem:[#allocation23 + $0x648] sm:$0xff] }
 0x6e0   :  { %v4536_v29 = vadd.f32 %v4535_v28, %v4152_v21  ;;  %v4537_v59 = vpop.f32.mrb[27].mxu0  ;;  %v4718_v45 = vmax.f32 %v4532_v54, 0.0  ;;  %v14804_v21 = vcombine.high %v4936_v6, %v4940_v10  ;;  %v4172_v28 = vrot.slane %v18069_v48, %v17875_v63  ;;  %v4957_v26 = vld [vmem:[#allocation23 + $0x668] sm:$0xff] }
 0x6e1   :  { %v4538_v37 = vadd.f32 %v4537_v59, %v4156_v36  ;;  %7918 = vmatpush1.bf16.msra.mxu0 %v14779_v30  ;;  %8090 = vmatpush1.bf16.msra.mxu1 %v14781_v52  ;;  %v4719_v7 = vmax.f32 %v4534_v57, 0.0  ;;  %v4168_v30 = vrot.slane %v18069_v48, %v17872_v62  ;;  %v4965_v10 = vld [vmem:[#allocation23 + $0x6a8] sm:$0xff] }
 0x6e2   :  { %v4734_v61 = vmax.f32 %v4536_v29, 0.0  ;;  %7919 = vmatprep.subr.bf16.mxu0 %v14788_v56  ;;  %8091 = vmatprep.subr.bf16.mxu1 %v14790_v47  ;;  %v14814_v56 = vcombine.high %v4945_v35, %v4949_v60  ;;  %v4952_v47 = vld [vmem:[#allocation23 + $0x640] sm:$0xff] }
 0x6e3   :  { %v4735_v8 = vmax.f32 %v4538_v37, 0.0  ;;  %v14811_v37 = vcombine.low %v4944_v27, %v4948_v34 }
 0x6e4   :  { %v18075_v13 = vpack.c.bf16 %v4734_v61, %v4718_v45  ;;  %v14820_v61 = vcombine.high %v4952_v47, %v4956_v17 }
 0x6e5   :  { %v18077_v14 = vpack.c.bf16 %v4735_v8, %v4719_v7  ;;  %7920 = vmatpush1.bf16.msra.mxu0 %v14787_v25  ;;  %8092 = vmatpush1.bf16.msra.mxu1 %v14789_v42  ;;  %v4574_v15 = vpop.f32.mrb[28].mxu0  ;;  %v14813_v42 = vcombine.low %v4945_v35, %v4949_v60  ;;  %v4964_v8 = vld [vmem:[#allocation23 + $0x6a0] sm:$0xff]  ;;  %v4180_v35 = vrot.slane %v18069_v48, %v17860_v53 }
 0x6e6   :  { %v4575_v19 = vadd.f32 %v4574_v15, %v4160_v38  ;;  %v4576_v20 = vpop.f32.mrb[29].mxu0  ;;  %7921 = vmatprep.subr.bf16.mxu0 %v14796_v0  ;;  %8093 = vmatprep.subr.bf16.mxu1 %v14798_v5  ;;  %v14822_v0 = vcombine.high %v4953_v58, %v4957_v26  ;;  %v4960_v5 = vld [vmem:[#allocation23 + $0x680] sm:$0xff]  ;;  %v14819_v15 = vcombine.low %v4952_v47, %v4956_v17 }
 0x6e7   :  { %v4577_v44 = vadd.f32 %v4576_v20, %v4164_v9  ;;  %v4578_v31 = vpop.f32.mrb[30].mxu0  ;;  %v4972_v60 = vld [vmem:[#allocation23 + $0x6e0] sm:$0xff] }
 0x6e8   :  { %v4579_v36 = vadd.f32 %v4578_v31, %v4160_v38  ;;  %v4580_v39 = vpop.f32.mrb[31].mxu0  ;;  %v4720_v52 = vmax.f32 %v4575_v19, 0.0  ;;  %v4176_v19 = vrot.slane %v18069_v48, %v17857_v50  ;;  %v4980_v17 = vld [vmem:[#allocation23 + $0x720] sm:$0xff] }
 0x6e9   :  { %v4581_v1 = vadd.f32 %v4580_v39, %v4164_v9  ;;  %7922 = vmatpush1.bf16.msra.mxu0 %v14795_v16  ;;  %8094 = vmatpush1.bf16.msra.mxu1 %v14797_v18  ;;  %v4721_v4 = vmax.f32 %v4577_v44, 0.0  ;;  %v4961_v9 = vld [vmem:[#allocation23 + $0x688] sm:$0xff]  ;;  %v14821_v18 = vcombine.low %v4953_v58, %v4957_v26  ;;  %v4968_v44 = vld [vmem:[#allocation23 + $0x6c0] sm:$0xff] }
 0x6ea   :  { %v4736_v54 = vmax.f32 %v4579_v36, 0.0  ;;  %7923 = vmatprep.subr.bf16.mxu0 %v14804_v21  ;;  %8095 = vmatprep.subr.bf16.mxu1 %v14806_v24  ;;  %v14828_v24 = vcombine.high %v4960_v5, %v4964_v8  ;;  %v14830_v27 = vcombine.high %v4961_v9, %v4965_v10  ;;  %v4969_v36 = vld [vmem:[#allocation23 + $0x6c8] sm:$0xff] }
 0x6eb   :  { %v4737_v57 = vmax.f32 %v4581_v1, 0.0  ;;  %v4973_v39 = vld [vmem:[#allocation23 + $0x6e8] sm:$0xff] }
 0x6ec   :  { %v18083_v29 = vpack.c.bf16 %v4736_v54, %v4720_v52  ;;  %v14829_v52 = vcombine.low %v4961_v9, %v4965_v10  ;;  %v14838_v47 = vcombine.high %v4969_v36, %v4973_v39  ;;  %v4977_v58 = vld [vmem:[#allocation23 + $0x708] sm:$0xff] }
 0x6ed   :  { %v18085_v59 = vpack.c.bf16 %v4737_v57, %v4721_v4  ;;  %7924 = vmatpush1.bf16.msra.mxu0 %v14803_v40  ;;  %8096 = vmatpush1.bf16.msra.mxu1 %v14805_v49  ;;  %v4617_v25 = vpop.f32.mrb[32].mxu0  ;;  %v4976_v4 = vld [vmem:[#allocation23 + $0x700] sm:$0xff]  ;;  %v4981_v26 = vld [vmem:[#allocation23 + $0x728] sm:$0xff] }
 0x6ee   :  { %v4618_v38 = vadd.f32 %v4617_v25, %v4168_v30  ;;  %v4619_v45 = vpop.f32.mrb[33].mxu0  ;;  %7925 = vmatprep.subr.bf16.mxu0 %v14812_v55  ;;  %8097 = vmatprep.subr.bf16.mxu1 %v14814_v56  ;;  %v14836_v56 = vcombine.high %v4968_v44, %v4972_v60 }
 0x6ef   :  { %v4620_v6 = vadd.f32 %v4619_v45, %v4172_v28  ;;  %v4621_v7 = vpop.f32.mrb[34].mxu0  ;;  %v14837_v45 = vcombine.low %v4969_v36, %v4973_v39  ;;  %v4996_v36 = vld [vmem:[#allocation23 + $0x7a0] sm:$0xff]  ;;  %v4993_v39 = vld [vmem:[#allocation23 + $0x788] sm:$0xff] }
 0x6f0   :  { %v4622_v11 = vadd.f32 %v4621_v7, %v4168_v30  ;;  %v4623_v12 = vpop.f32.mrb[35].mxu0  ;;  %v4722_v20 = vmax.f32 %v4618_v38, 0.0  ;;  %v14827_v30 = vcombine.low %v4960_v5, %v4964_v8  ;;  %v14846_v7 = vcombine.high %v4977_v58, %v4981_v26  ;;  %v4984_v8 = vld [vmem:[#allocation23 + $0x740] sm:$0xff] }
 0x6f1   :  { %v4624_v16 = vadd.f32 %v4623_v12, %v4172_v28  ;;  %7926 = vmatpush1.bf16.msra.mxu0 %v14811_v37  ;;  %8098 = vmatpush1.bf16.msra.mxu1 %v14813_v42  ;;  %v4723_v31 = vmax.f32 %v4620_v6, 0.0  ;;  %v14835_v42 = vcombine.low %v4968_v44, %v4972_v60  ;;  %v14844_v6 = vcombine.high %v4976_v4, %v4980_v17  ;;  %v4988_v12 = vld [vmem:[#allocation23 + $0x760] sm:$0xff] }
 0x6f2   :  { %v4738_v21 = vmax.f32 %v4622_v11, 0.0  ;;  %7927 = vmatprep.subr.bf16.mxu0 %v14820_v61  ;;  %8099 = vmatprep.subr.bf16.mxu1 %v14822_v0  ;;  %v4184_v61 = vrot.slane %v18069_v48, %v17883_v22  ;;  %v4188_v11 = vrot.slane %v18069_v48, %v17886_v23 }
 0x6f3   :  { %v4739_v34 = vmax.f32 %v4624_v16, 0.0  ;;  %v4989_v16 = vld [vmem:[#allocation23 + $0x768] sm:$0xff] }
 0x6f4   :  { %v18091_v40 = vpack.c.bf16 %v4738_v21, %v4722_v20  ;;  %v14843_v21 = vcombine.low %v4976_v4, %v4980_v17  ;;  %v5000_v17 = vld [vmem:[#allocation23 + $0x7c0] sm:$0xff] }
 0x6f5   :  { %v18093_v1 = vpack.c.bf16 %v4739_v34, %v4723_v31  ;;  %7928 = vmatpush1.bf16.msra.mxu0 %v14819_v15  ;;  %8100 = vmatpush1.bf16.msra.mxu1 %v14821_v18  ;;  %v4660_v49 = vpop.f32.mrb[36].mxu0  ;;  %v4985_v15 = vld [vmem:[#allocation23 + $0x748] sm:$0xff]  ;;  %v14852_v31 = vcombine.high %v4984_v8, %v4988_v12 }
 0x6f6   :  { %v4661_v54 = vadd.f32 %v4660_v49, %v4176_v19  ;;  %v4662_v55 = vpop.f32.mrb[37].mxu0  ;;  %7929 = vmatprep.subr.bf16.mxu0 %v14828_v24  ;;  %8101 = vmatprep.subr.bf16.mxu1 %v14830_v27  ;;  %v14845_v24 = vcombine.low %v4977_v58, %v4981_v26  ;;  %v14854_v34 = vcombine.high %v4985_v15, %v4989_v16  ;;  %v4997_v49 = vld [vmem:[#allocation23 + $0x7a8] sm:$0xff] }
 0x6f7   :  { %v4663_v57 = vadd.f32 %v4662_v55, %v4180_v35  ;;  %v4664_v28 = vpop.f32.mrb[38].mxu0  ;;  %v14851_v55 = vcombine.low %v4984_v8, %v4988_v12  ;;  %v5012_v8 = vld [vmem:[#allocation23 + $0x820] sm:$0xff] }
 0x6f8   :  { %v4665_v25 = vadd.f32 %v4664_v28, %v4176_v19  ;;  %v4666_v37 = vpop.f32.mrb[39].mxu0  ;;  %v4724_v0 = vmax.f32 %v4661_v54, 0.0  ;;  %v14862_v28 = vcombine.high %v4993_v39, %v4997_v49 }
 0x6f9   :  { %v4667_v38 = vadd.f32 %v4666_v37, %v4180_v35  ;;  %7930 = vmatpush1.bf16.msra.mxu0 %v14827_v30  ;;  %8102 = vmatpush1.bf16.msra.mxu1 %v14829_v52  ;;  %v4725_v9 = vmax.f32 %v4663_v57, 0.0  ;;  %v4992_v35 = vld [vmem:[#allocation23 + $0x780] sm:$0xff]  ;;  %v5001_v37 = vld [vmem:[#allocation23 + $0x7c8] sm:$0xff] }
 0x6fa   :  { %v4740_v5 = vmax.f32 %v4665_v25, 0.0  ;;  %7931 = vmatprep.subr.bf16.mxu0 %v14836_v56  ;;  %8103 = vmatprep.subr.bf16.mxu1 %v14838_v47  ;;  %v14853_v56 = vcombine.low %v4985_v15, %v4989_v16  ;;  %v14860_v57 = vcombine.high %v4992_v35, %v4996_v36  ;;  %v5004_v25 = vld [vmem:[#allocation23 + $0x7e0] sm:$0xff] }
 0x6fb   :  { %v4741_v10 = vmax.f32 %v4667_v38, 0.0 }
 0x6fc   :  { %v18099_v18 = vpack.c.bf16 %v4740_v5, %v4724_v0  ;;  %v14861_v0 = vcombine.low %v4993_v39, %v4997_v49  ;;  %v14868_v5 = vcombine.high %v5000_v17, %v5004_v25  ;;  %v5029_v39 = vld [vmem:[#allocation23 + $0x8a8] sm:$0xff] }
 0x6fd   :  { %v18101_v19 = vpack.c.bf16 %v4741_v10, %v4725_v9  ;;  %7932 = vmatpush1.bf16.msra.mxu0 %v14835_v42  ;;  %8104 = vmatpush1.bf16.msra.mxu1 %v14837_v45  ;;  %v4703_v20 = vpop.f32.mrb[40].mxu0  ;;  %v5005_v42 = vld [vmem:[#allocation23 + $0x7e8] sm:$0xff] }
 0x6fe   :  { %v4704_v27 = vadd.f32 %v4703_v20, %v4184_v61  ;;  %v4705_v44 = vpop.f32.mrb[41].mxu0  ;;  %7933 = vmatprep.subr.bf16.mxu0 %v14844_v6  ;;  %8105 = vmatprep.subr.bf16.mxu1 %v14846_v7  ;;  %v14870_v6 = vcombine.high %v5001_v37, %v5005_v42  ;;  %v5008_v7 = vld [vmem:[#allocation23 + $0x800] sm:$0xff]  ;;  %v5009_v9 = vld [vmem:[#allocation23 + $0x808] sm:$0xff]  ;;  %v14869_v12 = vcombine.low %v5001_v37, %v5005_v42 }
 0x6ff   :  { %v4706_v48 = vadd.f32 %v4705_v44, %v4188_v11  ;;  %v4707_v60 = vpop.f32.mrb[42].mxu0  ;;  %v5013_v10 = vld [vmem:[#allocation23 + $0x828] sm:$0xff]  ;;  %v14876_v15 = vcombine.high %v5008_v7, %v5012_v8  ;;  %v5016_v20 = vld [vmem:[#allocation23 + $0x840] sm:$0xff]  ;;  %v14875_v44 = vcombine.low %v5008_v7, %v5012_v8 }
 0x700   :  { %v4708_v30 = vadd.f32 %v4707_v60, %v4184_v61  ;;  %v4709_v52 = vpop.f32.mrb[43].mxu0  ;;  %v4726_v47 = vmax.f32 %v4704_v27, 0.0  ;;  %v14859_v61 = vcombine.low %v4992_v35, %v4996_v36  ;;  %v14878_v16 = vcombine.high %v5009_v9, %v5013_v10  ;;  %v5021_v27 = vld [vmem:[#allocation23 + $0x868] sm:$0xff]  ;;  %v5028_v60 = vld [vmem:[#allocation23 + $0x8a0] sm:$0xff] }
 0x701   :  { %v4710_v54 = vadd.f32 %v4709_v52, %v4188_v11  ;;  %7934 = vmatpush1.bf16.msra.mxu0 %v14843_v21  ;;  %8106 = vmatpush1.bf16.msra.mxu1 %v14845_v24  ;;  %v4727_v58 = vmax.f32 %v4706_v48, 0.0  ;;  %v14867_v11 = vcombine.low %v5000_v17, %v5004_v25  ;;  %v5020_v21 = vld [vmem:[#allocation23 + $0x860] sm:$0xff]  ;;  %v5017_v24 = vld [vmem:[#allocation23 + $0x848] sm:$0xff] }
 0x702   :  { %v4742_v4 = vmax.f32 %v4708_v30, 0.0  ;;  %7935 = vmatprep.subr.bf16.mxu0 %v14852_v31  ;;  %8107 = vmatprep.subr.bf16.mxu1 %v14854_v34  ;;  %v14877_v31 = vcombine.low %v5009_v9, %v5013_v10  ;;  %v14884_v34 = vcombine.high %v5016_v20, %v5020_v21  ;;  %v14886_v35 = vcombine.high %v5017_v24, %v5021_v27  ;;  %v5024_v48 = vld [vmem:[#allocation23 + $0x880] sm:$0xff]  ;;  %v5025_v36 = vld [vmem:[#allocation23 + $0x888] sm:$0xff] }
 0x703   :  { %v4743_v26 = vmax.f32 %v4710_v54, 0.0  ;;  %v14883_v49 = vcombine.low %v5016_v20, %v5020_v21  ;;  %v14885_v30 = vcombine.low %v5017_v24, %v5021_v27  ;;  %v14892_v52 = vcombine.high %v5024_v48, %v5028_v60  ;;  %v5044_v25 = vld [vmem:[#allocation23 + $0x920] sm:$0xff]  ;;  %v5041_v37 = vld [vmem:[#allocation23 + $0x908] sm:$0xff] }
 0x704   :  { %v18103_v38 = vpack.c.bf16 %v4742_v4, %v4726_v47  ;;  %v14894_v54 = vcombine.high %v5025_v36, %v5029_v39  ;;  %v5033_v47 = vld [vmem:[#allocation23 + $0x8c8] sm:$0xff]  ;;  %v5048_v7 = vld [vmem:[#allocation23 + $0x940] sm:$0xff] }
 0x705   :  { %v18105_v45 = vpack.c.bf16 %v4743_v26, %v4727_v58  ;;  %7936 = vmatpush1.bf16.msra.mxu0 %v14851_v55  ;;  %8108 = vmatpush1.bf16.msra.mxu1 %v14853_v56  ;;  %v5032_v55 = vld [vmem:[#allocation23 + $0x8c0] sm:$0xff]  ;;  %v5037_v4 = vld [vmem:[#allocation23 + $0x8e8] sm:$0xff] }
 0x706   :  { %7937 = vmatprep.subr.bf16.mxu0 %v14860_v57  ;;  %8109 = vmatprep.subr.bf16.mxu1 %v14862_v28  ;;  %v5036_v56 = vld [vmem:[#allocation23 + $0x8e0] sm:$0xff]  ;;  %v14891_v57 = vcombine.low %v5024_v48, %v5028_v60  ;;  %v14893_v28 = vcombine.low %v5025_v36, %v5029_v39  ;;  %v14902_v58 = vcombine.high %v5033_v47, %v5037_v4  ;;  %v5045_v42 = vld [vmem:[#allocation23 + $0x928] sm:$0xff] }
 0x707   :  { %v14900_v17 = vcombine.high %v5032_v55, %v5036_v56  ;;  %v5040_v26 = vld [vmem:[#allocation23 + $0x900] sm:$0xff]  ;;  %v5049_v9 = vld [vmem:[#allocation23 + $0x948] sm:$0xff] }
 0x708   :  { %v5052_v8 = vld [vmem:[#allocation23 + $0x960] sm:$0xff]  ;;  %v5053_v10 = vld [vmem:[#allocation23 + $0x968] sm:$0xff] }
 0x709   :  { %7938 = vmatpush1.bf16.msra.mxu0 %v14859_v61  ;;  %8110 = vmatpush1.bf16.msra.mxu1 %v14861_v0  ;;  %v14899_v61 = vcombine.low %v5032_v55, %v5036_v56  ;;  %v14901_v0 = vcombine.low %v5033_v47, %v5037_v4  ;;  %v5056_v20 = vld [vmem:[#allocation23 + $0x980] sm:$0xff]  ;;  %v5057_v24 = vld [vmem:[#allocation23 + $0x988] sm:$0xff] }
 0x70a   :  { %7939 = vmatprep.subr.bf16.mxu0 %v14868_v5  ;;  %8111 = vmatprep.subr.bf16.mxu1 %v14870_v6  ;;  %v14908_v5 = vcombine.high %v5040_v26, %v5044_v25  ;;  %v14910_v6 = vcombine.high %v5041_v37, %v5045_v42  ;;  %v5060_v21 = vld [vmem:[#allocation23 + $0x9a0] sm:$0xff]  ;;  %v5061_v27 = vld [vmem:[#allocation23 + $0x9a8] sm:$0xff] }
 0x70b   :  { %v5064_v48 = vld [vmem:[#allocation23 + $0x9c0] sm:$0xff]  ;;  %v5065_v36 = vld [vmem:[#allocation23 + $0x9c8] sm:$0xff] }
 0x70c   :  { %v5068_v60 = vld [vmem:[#allocation23 + $0x9e0] sm:$0xff]  ;;  %v5069_v39 = vld [vmem:[#allocation23 + $0x9e8] sm:$0xff] }
 0x70d   :  { %7940 = vmatpush1.bf16.msra.mxu0 %v14867_v11  ;;  %8112 = vmatpush1.bf16.msra.mxu1 %v14869_v12  ;;  %v14907_v11 = vcombine.low %v5040_v26, %v5044_v25  ;;  %v14909_v12 = vcombine.low %v5041_v37, %v5045_v42  ;;  %v5072_v55 = vld [vmem:[#allocation23 + $0xa00] sm:$0xff]  ;;  %v5073_v47 = vld [vmem:[#allocation23 + $0xa08] sm:$0xff] }
 0x70e   :  { %7952 = vmatprep.subr.bf16.mxu0 %v14876_v15  ;;  %8124 = vmatprep.subr.bf16.mxu1 %v14878_v16  ;;  %v14916_v15 = vcombine.high %v5048_v7, %v5052_v8  ;;  %v14918_v16 = vcombine.high %v5049_v9, %v5053_v10  ;;  %v5076_v56 = vld [vmem:[#allocation23 + $0xa20] sm:$0xff]  ;;  %v5077_v4 = vld [vmem:[#allocation23 + $0xa28] sm:$0xff] }
 0x70f   :  { %v5080_v26 = vld [vmem:[#allocation23 + $0xa40] sm:$0xff]  ;;  %v5081_v37 = vld [vmem:[#allocation23 + $0xa48] sm:$0xff] }
 0x710   :  { %7942 = vmatmul.mubr.bf16.vlgmr.msra.gmra.mrb[44].mxu0 %v18055_v41  ;;  %8114 = vmatmul.mubr.bf16.vlgmr.msra.gmra.mrb[32].mxu1 %v18055_v41  ;;  %v5084_v25 = vld [vmem:[#allocation23 + $0xa60] sm:$0xff]  ;;  %v5085_v42 = vld [vmem:[#allocation23 + $0xa68] sm:$0xff] }
 0x711   :  { %7953 = vmatpush1.bf16.msra.mxu0 %v14875_v44  ;;  %7984 = vmatprep.mubr.bf16.mxu0 %v18067_v46  ;;  %v14915_v44 = vcombine.low %v5048_v7, %v5052_v8  ;;  %v5088_v7 = vld [vmem:[#allocation23 + $0xa80] sm:$0xff] }
 0x712   :  { %8125 = vmatpush1.bf16.msra.mxu1 %v14877_v31  ;;  %8156 = vmatprep.mubr.bf16.mxu1 %v18067_v46  ;;  %v14917_v31 = vcombine.low %v5049_v9, %v5053_v10  ;;  %v5092_v8 = vld [vmem:[#allocation23 + $0xaa0] sm:$0xff]  ;;  %v5089_v9 = vld [vmem:[#allocation23 + $0xa88] sm:$0xff] }
 0x713   :  { %7954 = vmatprep.subr.bf16.mxu0 %v14884_v34  ;;  %8126 = vmatprep.subr.bf16.mxu1 %v14886_v35  ;;  %v14924_v34 = vcombine.high %v5056_v20, %v5060_v21  ;;  %v14926_v35 = vcombine.high %v5057_v24, %v5061_v27  ;;  %v5093_v10 = vld [vmem:[#allocation23 + $0xaa8] sm:$0xff] }
 0x715   :  { %7955 = vmatpush1.bf16.msra.mxu0 %v14883_v49  ;;  %v14923_v49 = vcombine.low %v5056_v20, %v5060_v21  ;;  %v5096_v20 = vld [vmem:[#allocation23 + $0xac0] sm:$0xff] }
 0x716   :  { %8127 = vmatpush1.bf16.msra.mxu1 %v14885_v30  ;;  %7956 = vmatprep.subr.bf16.mxu0 %v14892_v52  ;;  %v14925_v30 = vcombine.low %v5057_v24, %v5061_v27  ;;  %v14932_v52 = vcombine.high %v5064_v48, %v5068_v60  ;;  %v5100_v21 = vld [vmem:[#allocation23 + $0xae0] sm:$0xff]  ;;  %v5097_v24 = vld [vmem:[#allocation23 + $0xac8] sm:$0xff] }
 0x717   :  { %8128 = vmatprep.subr.bf16.mxu1 %v14894_v54  ;;  %v14934_v54 = vcombine.high %v5065_v36, %v5069_v39  ;;  %v5101_v27 = vld [vmem:[#allocation23 + $0xae8] sm:$0xff] }
 0x719   :  { %7957 = vmatpush1.bf16.msra.mxu0 %v14891_v57  ;;  %v14931_v57 = vcombine.low %v5064_v48, %v5068_v60  ;;  %v5104_v48 = vld [vmem:[#allocation23 + $0xb00] sm:$0xff] }
 0x71a   :  { %8129 = vmatpush1.bf16.msra.mxu1 %v14893_v28  ;;  %7958 = vmatprep.subr.bf16.mxu0 %v14900_v17  ;;  %v14933_v28 = vcombine.low %v5065_v36, %v5069_v39  ;;  %v14940_v17 = vcombine.high %v5072_v55, %v5076_v56  ;;  %v5108_v60 = vld [vmem:[#allocation23 + $0xb20] sm:$0xff]  ;;  %v5105_v36 = vld [vmem:[#allocation23 + $0xb08] sm:$0xff] }
 0x71b   :  { %8130 = vmatprep.subr.bf16.mxu1 %v14902_v58  ;;  %v14942_v58 = vcombine.high %v5073_v47, %v5077_v4  ;;  %v5109_v39 = vld [vmem:[#allocation23 + $0xb28] sm:$0xff] }
 0x71d   :  { %7959 = vmatpush1.bf16.msra.mxu0 %v14899_v61  ;;  %v14939_v61 = vcombine.low %v5072_v55, %v5076_v56  ;;  %v5112_v55 = vld [vmem:[#allocation23 + $0xb40] sm:$0xff] }
 0x71e   :  { %8131 = vmatpush1.bf16.msra.mxu1 %v14901_v0  ;;  %7960 = vmatprep.subr.bf16.mxu0 %v14908_v5  ;;  %v14941_v0 = vcombine.low %v5073_v47, %v5077_v4  ;;  %v14948_v5 = vcombine.high %v5080_v26, %v5084_v25  ;;  %v5116_v56 = vld [vmem:[#allocation23 + $0xb60] sm:$0xff]  ;;  %v5113_v47 = vld [vmem:[#allocation23 + $0xb48] sm:$0xff] }
 0x71f   :  { %8132 = vmatprep.subr.bf16.mxu1 %v14910_v6  ;;  %v14950_v6 = vcombine.high %v5081_v37, %v5085_v42  ;;  %v5117_v4 = vld [vmem:[#allocation23 + $0xb68] sm:$0xff] }
 0x721   :  { %7961 = vmatpush1.bf16.msra.mxu0 %v14907_v11  ;;  %v14947_v11 = vcombine.low %v5080_v26, %v5084_v25  ;;  %v5120_v26 = vld [vmem:[#allocation23 + $0xb80] sm:$0xff] }
 0x722   :  { %8133 = vmatpush1.bf16.msra.mxu1 %v14909_v12  ;;  %7962 = vmatprep.subr.bf16.mxu0 %v14916_v15  ;;  %v14949_v12 = vcombine.low %v5081_v37, %v5085_v42  ;;  %v14956_v15 = vcombine.high %v5088_v7, %v5092_v8  ;;  %v5124_v25 = vld [vmem:[#allocation23 + $0xba0] sm:$0xff]  ;;  %v5121_v37 = vld [vmem:[#allocation23 + $0xb88] sm:$0xff] }
 0x723   :  { %8134 = vmatprep.subr.bf16.mxu1 %v14918_v16  ;;  %v14958_v16 = vcombine.high %v5089_v9, %v5093_v10  ;;  %v5125_v42 = vld [vmem:[#allocation23 + $0xba8] sm:$0xff] }
 0x725   :  { %7963 = vmatpush1.bf16.msra.mxu0 %v14915_v44  ;;  %v14955_v44 = vcombine.low %v5088_v7, %v5092_v8  ;;  %v5128_v7 = vld [vmem:[#allocation23 + $0xbc0] sm:$0xff] }
 0x726   :  { %8135 = vmatpush1.bf16.msra.mxu1 %v14917_v31  ;;  %7964 = vmatprep.subr.bf16.mxu0 %v14924_v34  ;;  %v14957_v31 = vcombine.low %v5089_v9, %v5093_v10  ;;  %v14964_v34 = vcombine.high %v5096_v20, %v5100_v21  ;;  %v5132_v8 = vld [vmem:[#allocation23 + $0xbe0] sm:$0xff]  ;;  %v5129_v9 = vld [vmem:[#allocation23 + $0xbc8] sm:$0xff] }
 0x727   :  { %8136 = vmatprep.subr.bf16.mxu1 %v14926_v35  ;;  %v14966_v35 = vcombine.high %v5097_v24, %v5101_v27  ;;  %v5133_v10 = vld [vmem:[#allocation23 + $0xbe8] sm:$0xff] }
 0x729   :  { %7965 = vmatpush1.bf16.msra.mxu0 %v14923_v49  ;;  %v14963_v49 = vcombine.low %v5096_v20, %v5100_v21  ;;  %v5136_v20 = vld [vmem:[#allocation23 + $0xc00] sm:$0xff] }
 0x72a   :  { %8137 = vmatpush1.bf16.msra.mxu1 %v14925_v30  ;;  %7966 = vmatprep.subr.bf16.mxu0 %v14932_v52  ;;  %v14965_v30 = vcombine.low %v5097_v24, %v5101_v27  ;;  %v14972_v52 = vcombine.high %v5104_v48, %v5108_v60  ;;  %v5140_v21 = vld [vmem:[#allocation23 + $0xc20] sm:$0xff]  ;;  %v5137_v24 = vld [vmem:[#allocation23 + $0xc08] sm:$0xff] }
 0x72b   :  { %8138 = vmatprep.subr.bf16.mxu1 %v14934_v54  ;;  %v14974_v54 = vcombine.high %v5105_v36, %v5109_v39  ;;  %v5141_v27 = vld [vmem:[#allocation23 + $0xc28] sm:$0xff] }
 0x72d   :  { %7967 = vmatpush1.bf16.msra.mxu0 %v14931_v57  ;;  %v14971_v57 = vcombine.low %v5104_v48, %v5108_v60  ;;  %v5144_v48 = vld [vmem:[#allocation23 + $0xc40] sm:$0xff] }
 0x72e   :  { %8139 = vmatpush1.bf16.msra.mxu1 %v14933_v28  ;;  %7968 = vmatprep.subr.bf16.mxu0 %v14940_v17  ;;  %v14973_v28 = vcombine.low %v5105_v36, %v5109_v39  ;;  %v14980_v17 = vcombine.high %v5112_v55, %v5116_v56  ;;  %v5148_v60 = vld [vmem:[#allocation23 + $0xc60] sm:$0xff]  ;;  %v15003_v36 = vcombine.low %v5136_v20, %v5140_v21  ;;  %v5145_v39 = vld [vmem:[#allocation23 + $0xc48] sm:$0xff] }
 0x72f   :  { %8140 = vmatprep.subr.bf16.mxu1 %v14942_v58  ;;  %v14982_v58 = vcombine.high %v5113_v47, %v5117_v4 }
 0x731   :  { %7969 = vmatpush1.bf16.msra.mxu0 %v14939_v61  ;;  %v14979_v61 = vcombine.low %v5112_v55, %v5116_v56  ;;  %v5156_v55 = vld [vmem:[#allocation23 + $0xca0] sm:$0xff] }
 0x732   :  { %8141 = vmatpush1.bf16.msra.mxu1 %v14941_v0  ;;  %7970 = vmatprep.subr.bf16.mxu0 %v14948_v5  ;;  %v14981_v0 = vcombine.low %v5113_v47, %v5117_v4  ;;  %v14988_v5 = vcombine.high %v5120_v26, %v5124_v25  ;;  %v5153_v47 = vld [vmem:[#allocation23 + $0xc88] sm:$0xff] }
 0x733   :  { %8142 = vmatprep.subr.bf16.mxu1 %v14950_v6  ;;  %v14990_v6 = vcombine.high %v5121_v37, %v5125_v42  ;;  %v5157_v4 = vld [vmem:[#allocation23 + $0xca8] sm:$0xff] }
 0x735   :  { %7971 = vmatpush1.bf16.msra.mxu0 %v14947_v11  ;;  %v14987_v11 = vcombine.low %v5120_v26, %v5124_v25  ;;  %v5160_v26 = vld [vmem:[#allocation23 + $0xcc0] sm:$0xff] }
 0x736   :  { %8143 = vmatpush1.bf16.msra.mxu1 %v14949_v12  ;;  %7972 = vmatprep.subr.bf16.mxu0 %v14956_v15  ;;  %v14989_v12 = vcombine.low %v5121_v37, %v5125_v42  ;;  %v14996_v15 = vcombine.high %v5128_v7, %v5132_v8  ;;  %v5164_v25 = vld [vmem:[#allocation23 + $0xce0] sm:$0xff]  ;;  %v5161_v37 = vld [vmem:[#allocation23 + $0xcc8] sm:$0xff] }
 0x737   :  { %8144 = vmatprep.subr.bf16.mxu1 %v14958_v16  ;;  %v14998_v16 = vcombine.high %v5129_v9, %v5133_v10  ;;  %v5165_v42 = vld [vmem:[#allocation23 + $0xce8] sm:$0xff] }
 0x739   :  { %7973 = vmatpush1.bf16.msra.mxu0 %v14955_v44  ;;  %v14995_v44 = vcombine.low %v5128_v7, %v5132_v8  ;;  %v5168_v7 = vld [vmem:[#allocation23 + $0xd00] sm:$0xff] }
 0x73a   :  { %8145 = vmatpush1.bf16.msra.mxu1 %v14957_v31  ;;  %7974 = vmatprep.subr.bf16.mxu0 %v14964_v34  ;;  %v14997_v31 = vcombine.low %v5129_v9, %v5133_v10  ;;  %v15004_v34 = vcombine.high %v5136_v20, %v5140_v21  ;;  %v5172_v8 = vld [vmem:[#allocation23 + $0xd20] sm:$0xff]  ;;  %v5169_v9 = vld [vmem:[#allocation23 + $0xd08] sm:$0xff] }
 0x73b   :  { %8146 = vmatprep.subr.bf16.mxu1 %v14966_v35  ;;  %v15006_v35 = vcombine.high %v5137_v24, %v5141_v27  ;;  %v5173_v10 = vld [vmem:[#allocation23 + $0xd28] sm:$0xff]  ;;  %v5176_v20 = vld [vmem:[#allocation23 + $0xd40] sm:$0xff] }
 0x73c   :  { %v5180_v21 = vld [vmem:[#allocation23 + $0xd60] sm:$0xff] }
 0x73d   :  { %7975 = vmatpush1.bf16.msra.mxu0 %v14963_v49  ;;  %v5149_v49 = vld [vmem:[#allocation23 + $0xc68] sm:$0xff] }
 0x73e   :  { %8147 = vmatpush1.bf16.msra.mxu1 %v14965_v30  ;;  %7976 = vmatprep.subr.bf16.mxu0 %v14972_v52  ;;  %v15005_v30 = vcombine.low %v5137_v24, %v5141_v27  ;;  %v15012_v52 = vcombine.high %v5144_v48, %v5148_v60  ;;  %v15014_v56 = vcombine.high %v5145_v39, %v5149_v49  ;;  %v5177_v24 = vld [vmem:[#allocation23 + $0xd48] sm:$0xff] }
 0x73f   :  { %8148 = vmatprep.subr.bf16.mxu1 %v14974_v54  ;;  %v5152_v54 = vld [vmem:[#allocation23 + $0xc80] sm:$0xff]  ;;  %v5181_v27 = vld [vmem:[#allocation23 + $0xd68] sm:$0xff] }
 0x741   :  { %7977 = vmatpush1.bf16.msra.mxu0 %v14971_v57  ;;  %v15011_v57 = vcombine.low %v5144_v48, %v5148_v60  ;;  %v5184_v48 = vld [vmem:[#allocation23 + $0xd80] sm:$0xff] }
 0x742   :  { %8149 = vmatpush1.bf16.msra.mxu1 %v14973_v28  ;;  %7978 = vmatprep.subr.bf16.mxu0 %v14980_v17  ;;  %v15013_v28 = vcombine.low %v5145_v39, %v5149_v49  ;;  %v15020_v17 = vcombine.high %v5152_v54, %v5156_v55  ;;  %v5188_v60 = vld [vmem:[#allocation23 + $0xda0] sm:$0xff]  ;;  %v5189_v39 = vld [vmem:[#allocation23 + $0xda8] sm:$0xff]  ;;  %v15043_v49 = vcombine.low %v5176_v20, %v5180_v21 }
 0x743   :  { %8150 = vmatprep.subr.bf16.mxu1 %v14982_v58  ;;  %v15022_v58 = vcombine.high %v5153_v47, %v5157_v4 }
 0x745   :  { %7979 = vmatpush1.bf16.msra.mxu0 %v14979_v61  ;;  %v15019_v61 = vcombine.low %v5152_v54, %v5156_v55  ;;  %v5192_v55 = vld [vmem:[#allocation23 + $0xdc0] sm:$0xff] }
 0x746   :  { %8151 = vmatpush1.bf16.msra.mxu1 %v14981_v0  ;;  %7980 = vmatprep.subr.bf16.mxu0 %v14988_v5  ;;  %v15021_v0 = vcombine.low %v5153_v47, %v5157_v4  ;;  %v15028_v5 = vcombine.high %v5160_v26, %v5164_v25  ;;  %v5193_v47 = vld [vmem:[#allocation23 + $0xdc8] sm:$0xff] }
 0x747   :  { %8152 = vmatprep.subr.bf16.mxu1 %v14990_v6  ;;  %v15030_v6 = vcombine.high %v5161_v37, %v5165_v42  ;;  %v5197_v4 = vld [vmem:[#allocation23 + $0xde8] sm:$0xff] }
 0x749   :  { %7981 = vmatpush1.bf16.msra.mxu0 %v14987_v11  ;;  %v15027_v11 = vcombine.low %v5160_v26, %v5164_v25  ;;  %v5200_v26 = vld [vmem:[#allocation23 + $0xe00] sm:$0xff] }
 0x74a   :  { %8153 = vmatpush1.bf16.msra.mxu1 %v14989_v12  ;;  %7982 = vmatprep.subr.bf16.mxu0 %v14996_v15  ;;  %v15029_v12 = vcombine.low %v5161_v37, %v5165_v42  ;;  %v15036_v15 = vcombine.high %v5168_v7, %v5172_v8  ;;  %v5204_v25 = vld [vmem:[#allocation23 + $0xe20] sm:$0xff]  ;;  %v5201_v37 = vld [vmem:[#allocation23 + $0xe08] sm:$0xff] }
 0x74b   :  { %8154 = vmatprep.subr.bf16.mxu1 %v14998_v16  ;;  %v15038_v16 = vcombine.high %v5169_v9, %v5173_v10  ;;  %v5205_v42 = vld [vmem:[#allocation23 + $0xe28] sm:$0xff] }
 0x74d   :  { %7983 = vmatpush1.bf16.msra.mxu0 %v14995_v44  ;;  %v15035_v44 = vcombine.low %v5168_v7, %v5172_v8  ;;  %v5208_v7 = vld [vmem:[#allocation23 + $0xe40] sm:$0xff] }
 0x74e   :  { %8155 = vmatpush1.bf16.msra.mxu1 %v14997_v31  ;;  %7995 = vmatprep.subr.bf16.mxu0 %v15004_v34  ;;  %v15037_v31 = vcombine.low %v5169_v9, %v5173_v10  ;;  %v15044_v34 = vcombine.high %v5176_v20, %v5180_v21  ;;  %v5212_v8 = vld [vmem:[#allocation23 + $0xe60] sm:$0xff]  ;;  %v5209_v9 = vld [vmem:[#allocation23 + $0xe48] sm:$0xff] }
 0x74f   :  { %8167 = vmatprep.subr.bf16.mxu1 %v15006_v35  ;;  %v15046_v35 = vcombine.high %v5177_v24, %v5181_v27  ;;  %v5213_v10 = vld [vmem:[#allocation23 + $0xe68] sm:$0xff]  ;;  %v5216_v20 = vld [vmem:[#allocation23 + $0xe80] sm:$0xff] }
 0x750   :  { %7985 = vmatmul.mubr.bf16.vlgmr.msra.gmra.mrb[44].mxu0 %v18065_v51  ;;  %v5220_v21 = vld [vmem:[#allocation23 + $0xea0] sm:$0xff] }
 0x751   :  { %8157 = vmatmul.mubr.bf16.vlgmr.msra.gmra.mrb[32].mxu1 %v18065_v51  ;;  %7996 = vmatpush1.bf16.msra.mxu0 %v15003_v36  ;;  %v5185_v36 = vld [vmem:[#allocation23 + $0xd88] sm:$0xff] }
 0x752   :  { %8027 = vmatprep.mubr.bf16.mxu0 %v18077_v14  ;;  %8168 = vmatpush1.bf16.msra.mxu1 %v15005_v30  ;;  %v15045_v30 = vcombine.low %v5177_v24, %v5181_v27  ;;  %v15054_v54 = vcombine.high %v5185_v36, %v5189_v39  ;;  %v5217_v24 = vld [vmem:[#allocation23 + $0xe88] sm:$0xff] }
 0x753   :  { %8199 = vmatprep.mubr.bf16.mxu1 %v18077_v14  ;;  %7997 = vmatprep.subr.bf16.mxu0 %v15012_v52  ;;  %v15052_v52 = vcombine.high %v5184_v48, %v5188_v60  ;;  %v5221_v27 = vld [vmem:[#allocation23 + $0xea8] sm:$0xff] }
 0x754   :  { %8169 = vmatprep.subr.bf16.mxu1 %v15014_v56  ;;  %v5196_v56 = vld [vmem:[#allocation23 + $0xde0] sm:$0xff] }
 0x755   :  { %7998 = vmatpush1.bf16.msra.mxu0 %v15011_v57  ;;  %v15051_v57 = vcombine.low %v5184_v48, %v5188_v60  ;;  %v5224_v48 = vld [vmem:[#allocation23 + $0xec0] sm:$0xff] }
 0x756   :  { %8170 = vmatpush1.bf16.msra.mxu1 %v15013_v28  ;;  %7999 = vmatprep.subr.bf16.mxu0 %v15020_v17  ;;  %v15053_v28 = vcombine.low %v5185_v36, %v5189_v39  ;;  %v15060_v17 = vcombine.high %v5192_v55, %v5196_v56  ;;  %v5228_v60 = vld [vmem:[#allocation23 + $0xee0] sm:$0xff]  ;;  %v5225_v36 = vld [vmem:[#allocation23 + $0xec8] sm:$0xff] }
 0x757   :  { %8171 = vmatprep.subr.bf16.mxu1 %v15022_v58  ;;  %v15062_v58 = vcombine.high %v5193_v47, %v5197_v4  ;;  %v5229_v39 = vld [vmem:[#allocation23 + $0xee8] sm:$0xff] }
 0x759   :  { %8000 = vmatpush1.bf16.msra.mxu0 %v15019_v61  ;;  %v15059_v61 = vcombine.low %v5192_v55, %v5196_v56  ;;  %v5232_v55 = vld [vmem:[#allocation23 + $0xf00] sm:$0xff] }
 0x75a   :  { %8172 = vmatpush1.bf16.msra.mxu1 %v15021_v0  ;;  %8001 = vmatprep.subr.bf16.mxu0 %v15028_v5  ;;  %v15061_v0 = vcombine.low %v5193_v47, %v5197_v4  ;;  %v15068_v5 = vcombine.high %v5200_v26, %v5204_v25  ;;  %v5236_v56 = vld [vmem:[#allocation23 + $0xf20] sm:$0xff]  ;;  %v5233_v47 = vld [vmem:[#allocation23 + $0xf08] sm:$0xff] }
 0x75b   :  { %8173 = vmatprep.subr.bf16.mxu1 %v15030_v6  ;;  %v15070_v6 = vcombine.high %v5201_v37, %v5205_v42  ;;  %v5237_v4 = vld [vmem:[#allocation23 + $0xf28] sm:$0xff] }
 0x75d   :  { %8002 = vmatpush1.bf16.msra.mxu0 %v15027_v11  ;;  %v15067_v11 = vcombine.low %v5200_v26, %v5204_v25  ;;  %v5240_v26 = vld [vmem:[#allocation23 + $0xf40] sm:$0xff] }
 0x75e   :  { %8174 = vmatpush1.bf16.msra.mxu1 %v15029_v12  ;;  %8003 = vmatprep.subr.bf16.mxu0 %v15036_v15  ;;  %v15069_v12 = vcombine.low %v5201_v37, %v5205_v42  ;;  %v15076_v15 = vcombine.high %v5208_v7, %v5212_v8  ;;  %v5244_v25 = vld [vmem:[#allocation23 + $0xf60] sm:$0xff]  ;;  %v5241_v37 = vld [vmem:[#allocation23 + $0xf48] sm:$0xff] }
 0x75f   :  { %8175 = vmatprep.subr.bf16.mxu1 %v15038_v16  ;;  %v15078_v16 = vcombine.high %v5209_v9, %v5213_v10  ;;  %v5245_v42 = vld [vmem:[#allocation23 + $0xf68] sm:$0xff] }
 0x761   :  { %8004 = vmatpush1.bf16.msra.mxu0 %v15035_v44  ;;  %v15075_v44 = vcombine.low %v5208_v7, %v5212_v8  ;;  %v5248_v7 = vld [vmem:[#allocation23 + $0xf80] sm:$0xff] }
 0x762   :  { %8176 = vmatpush1.bf16.msra.mxu1 %v15037_v31  ;;  %8005 = vmatprep.subr.bf16.mxu0 %v15044_v34  ;;  %v15077_v31 = vcombine.low %v5209_v9, %v5213_v10  ;;  %v15084_v34 = vcombine.high %v5216_v20, %v5220_v21  ;;  %v5252_v8 = vld [vmem:[#allocation23 + $0xfa0] sm:$0xff]  ;;  %v5249_v9 = vld [vmem:[#allocation23 + $0xf88] sm:$0xff] }
 0x763   :  { %8177 = vmatprep.subr.bf16.mxu1 %v15046_v35  ;;  %v15086_v35 = vcombine.high %v5217_v24, %v5221_v27  ;;  %v5253_v10 = vld [vmem:[#allocation23 + $0xfa8] sm:$0xff] }
 0x765   :  { %8006 = vmatpush1.bf16.msra.mxu0 %v15043_v49  ;;  %v15083_v49 = vcombine.low %v5216_v20, %v5220_v21  ;;  %v5256_v20 = vld [vmem:[#allocation23 + $0xfc0] sm:$0xff] }
 0x766   :  { %8178 = vmatpush1.bf16.msra.mxu1 %v15045_v30  ;;  %8007 = vmatprep.subr.bf16.mxu0 %v15052_v52  ;;  %v15085_v30 = vcombine.low %v5217_v24, %v5221_v27  ;;  %v15092_v52 = vcombine.high %v5224_v48, %v5228_v60  ;;  %v5260_v21 = vld [vmem:[#allocation23 + $0xfe0] sm:$0xff]  ;;  %v5257_v24 = vld [vmem:[#allocation23 + $0xfc8] sm:$0xff] }
 0x767   :  { %8179 = vmatprep.subr.bf16.mxu1 %v15054_v54  ;;  %v15094_v54 = vcombine.high %v5225_v36, %v5229_v39  ;;  %v5261_v27 = vld [vmem:[#allocation23 + $0xfe8] sm:$0xff] }
 0x769   :  { %8008 = vmatpush1.bf16.msra.mxu0 %v15051_v57  ;;  %v15091_v57 = vcombine.low %v5224_v48, %v5228_v60  ;;  %v4754_v48 = vld [vmem:[#allocation23 + $0x10] sm:$0xff] }
 0x76a   :  { %8180 = vmatpush1.bf16.msra.mxu1 %v15053_v28  ;;  %8009 = vmatprep.subr.bf16.mxu0 %v15060_v17  ;;  %v15093_v28 = vcombine.low %v5225_v36, %v5229_v39  ;;  %v15100_v17 = vcombine.high %v5232_v55, %v5236_v56  ;;  %v4758_v60 = vld [vmem:[#allocation23 + $0x30] sm:$0xff]  ;;  %v4755_v36 = vld [vmem:[#allocation23 + $0x18] sm:$0xff] }
 0x76b   :  { %8181 = vmatprep.subr.bf16.mxu1 %v15062_v58  ;;  %v15102_v58 = vcombine.high %v5233_v47, %v5237_v4  ;;  %v4759_v39 = vld [vmem:[#allocation23 + $0x38] sm:$0xff] }
 0x76d   :  { %8010 = vmatpush1.bf16.msra.mxu0 %v15059_v61  ;;  %v15099_v61 = vcombine.low %v5232_v55, %v5236_v56  ;;  %v4762_v55 = vld [vmem:[#allocation23 + $0x50] sm:$0xff] }
 0x76e   :  { %8182 = vmatpush1.bf16.msra.mxu1 %v15061_v0  ;;  %8011 = vmatprep.subr.bf16.mxu0 %v15068_v5  ;;  %v15101_v0 = vcombine.low %v5233_v47, %v5237_v4  ;;  %v15108_v5 = vcombine.high %v5240_v26, %v5244_v25  ;;  %v4766_v56 = vld [vmem:[#allocation23 + $0x70] sm:$0xff]  ;;  %v14623_v47 = vcombine.low %v4754_v48, %v4758_v60  ;;  %v4763_v4 = vld [vmem:[#allocation23 + $0x58] sm:$0xff] }
 0x76f   :  { %8183 = vmatprep.subr.bf16.mxu1 %v15070_v6  ;;  %v15110_v6 = vcombine.high %v5241_v37, %v5245_v42 }
 0x771   :  { %8012 = vmatpush1.bf16.msra.mxu0 %v15067_v11  ;;  %v15107_v11 = vcombine.low %v5240_v26, %v5244_v25  ;;  %v4774_v26 = vld [vmem:[#allocation23 + $0xb0] sm:$0xff] }
 0x772   :  { %8184 = vmatpush1.bf16.msra.mxu1 %v15069_v12  ;;  %8013 = vmatprep.subr.bf16.mxu0 %v15076_v15  ;;  %v15109_v12 = vcombine.low %v5241_v37, %v5245_v42  ;;  %v15116_v15 = vcombine.high %v5248_v7, %v5252_v8  ;;  %v4771_v37 = vld [vmem:[#allocation23 + $0x98] sm:$0xff] }
 0x773   :  { %8185 = vmatprep.subr.bf16.mxu1 %v15078_v16  ;;  %v15118_v16 = vcombine.high %v5249_v9, %v5253_v10  ;;  %v4775_v42 = vld [vmem:[#allocation23 + $0xb8] sm:$0xff] }
 0x775   :  { %8014 = vmatpush1.bf16.msra.mxu0 %v15075_v44  ;;  %v15115_v44 = vcombine.low %v5248_v7, %v5252_v8  ;;  %v4778_v7 = vld [vmem:[#allocation23 + $0xd0] sm:$0xff] }
 0x776   :  { %8186 = vmatpush1.bf16.msra.mxu1 %v15077_v31  ;;  %8015 = vmatprep.subr.bf16.mxu0 %v15084_v34  ;;  %v15117_v31 = vcombine.low %v5249_v9, %v5253_v10  ;;  %v15124_v34 = vcombine.high %v5256_v20, %v5260_v21  ;;  %v4782_v8 = vld [vmem:[#allocation23 + $0xf0] sm:$0xff]  ;;  %v4779_v9 = vld [vmem:[#allocation23 + $0xd8] sm:$0xff] }
 0x777   :  { %8187 = vmatprep.subr.bf16.mxu1 %v15086_v35  ;;  %v15126_v35 = vcombine.high %v5257_v24, %v5261_v27  ;;  %v4783_v10 = vld [vmem:[#allocation23 + $0xf8] sm:$0xff] }
 0x779   :  { %8016 = vmatpush1.bf16.msra.mxu0 %v15083_v49  ;;  %v15123_v49 = vcombine.low %v5256_v20, %v5260_v21  ;;  %v4786_v20 = vld [vmem:[#allocation23 + $0x110] sm:$0xff] }
 0x77a   :  { %8188 = vmatpush1.bf16.msra.mxu1 %v15085_v30  ;;  %8017 = vmatprep.subr.bf16.mxu0 %v15092_v52  ;;  %v15125_v30 = vcombine.low %v5257_v24, %v5261_v27  ;;  %v14624_v52 = vcombine.high %v4754_v48, %v4758_v60  ;;  %v4790_v21 = vld [vmem:[#allocation23 + $0x130] sm:$0xff]  ;;  %v4787_v24 = vld [vmem:[#allocation23 + $0x118] sm:$0xff] }
 0x77b   :  { %8189 = vmatprep.subr.bf16.mxu1 %v15094_v54  ;;  %v14626_v54 = vcombine.high %v4755_v36, %v4759_v39  ;;  %v4791_v27 = vld [vmem:[#allocation23 + $0x138] sm:$0xff]  ;;  %v4798_v48 = vld [vmem:[#allocation23 + $0x170] sm:$0xff] }
 0x77c   :  { %v4795_v60 = vld [vmem:[#allocation23 + $0x158] sm:$0xff] }
 0x77d   :  { %8018 = vmatpush1.bf16.msra.mxu0 %v15091_v57  ;;  %v4767_v57 = vld [vmem:[#allocation23 + $0x78] sm:$0xff] }
 0x77e   :  { %8190 = vmatpush1.bf16.msra.mxu1 %v15093_v28  ;;  %8019 = vmatprep.subr.bf16.mxu0 %v15100_v17  ;;  %v14625_v28 = vcombine.low %v4755_v36, %v4759_v39  ;;  %v14632_v17 = vcombine.high %v4762_v55, %v4766_v56  ;;  %v14634_v25 = vcombine.high %v4763_v4, %v4767_v57  ;;  %v4799_v36 = vld [vmem:[#allocation23 + $0x178] sm:$0xff] }
 0x77f   :  { %8191 = vmatprep.subr.bf16.mxu1 %v15102_v58  ;;  %v4770_v58 = vld [vmem:[#allocation23 + $0x90] sm:$0xff]  ;;  %v14655_v39 = vcombine.low %v4786_v20, %v4790_v21 }
 0x781   :  { %8020 = vmatpush1.bf16.msra.mxu0 %v15099_v61  ;;  %v14631_v61 = vcombine.low %v4762_v55, %v4766_v56  ;;  %v4806_v55 = vld [vmem:[#allocation23 + $0x1b0] sm:$0xff]  ;;  %v4803_v56 = vld [vmem:[#allocation23 + $0x198] sm:$0xff] }
 0x782   :  { %8192 = vmatpush1.bf16.msra.mxu1 %v15101_v0  ;;  %8021 = vmatprep.subr.bf16.mxu0 %v15108_v5  ;;  %v14633_v0 = vcombine.low %v4763_v4, %v4767_v57  ;;  %v14640_v5 = vcombine.high %v4770_v58, %v4774_v26  ;;  %v14665_v57 = vcombine.low %v4795_v60, %v4799_v36 }
 0x783   :  { %8193 = vmatprep.subr.bf16.mxu1 %v15110_v6  ;;  %v14642_v6 = vcombine.high %v4771_v37, %v4775_v42 }
 0x785   :  { %8022 = vmatpush1.bf16.msra.mxu0 %v15107_v11  ;;  %v14639_v11 = vcombine.low %v4770_v58, %v4774_v26  ;;  %v4810_v58 = vld [vmem:[#allocation23 + $0x1d0] sm:$0xff] }
 0x786   :  { %8194 = vmatpush1.bf16.msra.mxu1 %v15109_v12  ;;  %8023 = vmatprep.subr.bf16.mxu0 %v15116_v15  ;;  %v14641_v12 = vcombine.low %v4771_v37, %v4775_v42  ;;  %v14648_v15 = vcombine.high %v4778_v7, %v4782_v8  ;;  %v4814_v26 = vld [vmem:[#allocation23 + $0x1f0] sm:$0xff]  ;;  %v4815_v37 = vld [vmem:[#allocation23 + $0x1f8] sm:$0xff] }
 0x787   :  { %8195 = vmatprep.subr.bf16.mxu1 %v15118_v16  ;;  %v14650_v16 = vcombine.high %v4779_v9, %v4783_v10 }
 0x789   :  { %8024 = vmatpush1.bf16.msra.mxu0 %v15115_v44  ;;  %v14649_v44 = vcombine.low %v4779_v9, %v4783_v10  ;;  %v4823_v9 = vld [vmem:[#allocation23 + $0x238] sm:$0xff]  ;;  %v14679_v10 = vcombine.low %v4810_v58, %v4814_v26 }
 0x78a   :  { %8196 = vmatpush1.bf16.msra.mxu1 %v15117_v31  ;;  %8025 = vmatprep.subr.bf16.mxu0 %v15124_v34  ;;  %v14656_v31 = vcombine.high %v4786_v20, %v4790_v21  ;;  %v14658_v34 = vcombine.high %v4787_v24, %v4791_v27  ;;  %v4830_v20 = vld [vmem:[#allocation23 + $0x270] sm:$0xff]  ;;  %v4827_v21 = vld [vmem:[#allocation23 + $0x258] sm:$0xff] }
 0x78b   :  { %8197 = vmatprep.subr.bf16.mxu1 %v15126_v35  ;;  %v4794_v35 = vld [vmem:[#allocation23 + $0x150] sm:$0xff] }
 0x78c   :  { %v14663_v4 = vcombine.low %v4794_v35, %v4798_v48 }
 0x78d   :  { %8026 = vmatpush1.bf16.msra.mxu0 %v15123_v49  ;;  %v14657_v49 = vcombine.low %v4787_v24, %v4791_v27  ;;  %v4831_v24 = vld [vmem:[#allocation23 + $0x278] sm:$0xff] }
 0x78e   :  { %8198 = vmatpush1.bf16.msra.mxu1 %v15125_v30  ;;  %8210 = vmatprep.subr.bf16.mxu0 %v14624_v52  ;;  %v14664_v30 = vcombine.high %v4794_v35, %v4798_v48  ;;  %v14666_v52 = vcombine.high %v4795_v60, %v4799_v36  ;;  %v4838_v35 = vld [vmem:[#allocation23 + $0x2b0] sm:$0xff]  ;;  %v4835_v48 = vld [vmem:[#allocation23 + $0x298] sm:$0xff] }
 0x78f   :  { %8382 = vmatprep.subr.bf16.mxu1 %v14626_v54  ;;  %v4802_v54 = vld [vmem:[#allocation23 + $0x190] sm:$0xff]  ;;  %v4839_v60 = vld [vmem:[#allocation23 + $0x2b8] sm:$0xff] }
 0x790   :  { %8028 = vmatmul.mubr.bf16.vlgmr.msra.gmra.mrb[44].mxu0 %v18075_v13  ;;  %v14671_v42 = vcombine.low %v4802_v54, %v4806_v55 }
 0x791   :  { %8200 = vmatmul.mubr.bf16.vlgmr.msra.gmra.mrb[32].mxu1 %v18075_v13  ;;  %8211 = vmatpush1.bf16.msra.mxu0 %v14623_v47  ;;  %v4807_v47 = vld [vmem:[#allocation23 + $0x1b8] sm:$0xff] }
 0x792   :  { %8242 = vmatprep.mubr.bf16.mxu0 %v18039_v33  ;;  %8383 = vmatpush1.bf16.msra.mxu1 %v14625_v28  ;;  %v14672_v28 = vcombine.high %v4802_v54, %v4806_v55  ;;  %v4846_v54 = vld [vmem:[#allocation23 + $0x2f0] sm:$0xff]  ;;  %v4843_v55 = vld [vmem:[#allocation23 + $0x2d8] sm:$0xff] }
 0x793   :  { %8414 = vmatprep.mubr.bf16.mxu1 %v18039_v33  ;;  %8212 = vmatprep.subr.bf16.mxu0 %v14632_v17  ;;  %v14647_v33 = vcombine.low %v4778_v7, %v4782_v8  ;;  %v14674_v17 = vcombine.high %v4803_v56, %v4807_v47  ;;  %v4822_v7 = vld [vmem:[#allocation23 + $0x230] sm:$0xff]  ;;  %v4819_v8 = vld [vmem:[#allocation23 + $0x218] sm:$0xff] }
 0x794   :  { %8384 = vmatprep.subr.bf16.mxu1 %v14634_v25  ;;  %v4811_v25 = vld [vmem:[#allocation23 + $0x1d8] sm:$0xff] }
 0x795   :  { %8213 = vmatpush1.bf16.msra.mxu0 %v14631_v61  ;;  %v14673_v61 = vcombine.low %v4803_v56, %v4807_v47  ;;  %v4847_v56 = vld [vmem:[#allocation23 + $0x2f8] sm:$0xff] }
 0x796   :  { %8385 = vmatpush1.bf16.msra.mxu1 %v14633_v0  ;;  %8214 = vmatprep.subr.bf16.mxu0 %v14640_v5  ;;  %v14680_v0 = vcombine.high %v4810_v58, %v4814_v26  ;;  %v14682_v5 = vcombine.high %v4811_v25, %v4815_v37  ;;  %v4854_v58 = vld [vmem:[#allocation23 + $0x330] sm:$0xff]  ;;  %v4851_v26 = vld [vmem:[#allocation23 + $0x318] sm:$0xff] }
 0x797   :  { %8386 = vmatprep.subr.bf16.mxu1 %v14642_v6  ;;  %v4818_v6 = vld [vmem:[#allocation23 + $0x210] sm:$0xff] }
 0x798   :  { %v14687_v27 = vcombine.low %v4818_v6, %v4822_v7 }
 0x799   :  { %8215 = vmatpush1.bf16.msra.mxu0 %v14639_v11  ;;  %v14681_v11 = vcombine.low %v4811_v25, %v4815_v37  ;;  %v4855_v25 = vld [vmem:[#allocation23 + $0x338] sm:$0xff] }
 0x79a   :  { %8387 = vmatpush1.bf16.msra.mxu1 %v14641_v12  ;;  %8216 = vmatprep.subr.bf16.mxu0 %v14648_v15  ;;  %v14688_v12 = vcombine.high %v4818_v6, %v4822_v7  ;;  %v14690_v15 = vcombine.high %v4819_v8, %v4823_v9  ;;  %v4862_v6 = vld [vmem:[#allocation23 + $0x370] sm:$0xff]  ;;  %v4859_v7 = vld [vmem:[#allocation23 + $0x358] sm:$0xff] }
 0x79b   :  { %8388 = vmatprep.subr.bf16.mxu1 %v14650_v16  ;;  %v4826_v16 = vld [vmem:[#allocation23 + $0x250] sm:$0xff] }
 0x79c   :  { %v14695_v36 = vcombine.low %v4826_v16, %v4830_v20 }
 0x79d   :  { %8217 = vmatpush1.bf16.msra.mxu0 %v14647_v33  ;;  %v14689_v33 = vcombine.low %v4819_v8, %v4823_v9  ;;  %v4863_v8 = vld [vmem:[#allocation23 + $0x378] sm:$0xff] }
 0x79e   :  { %8389 = vmatpush1.bf16.msra.mxu1 %v14649_v44  ;;  %8218 = vmatprep.subr.bf16.mxu0 %v14656_v31  ;;  %v14696_v44 = vcombine.high %v4826_v16, %v4830_v20  ;;  %v14698_v31 = vcombine.high %v4827_v21, %v4831_v24  ;;  %v4870_v16 = vld [vmem:[#allocation23 + $0x3b0] sm:$0xff]  ;;  %v4867_v20 = vld [vmem:[#allocation23 + $0x398] sm:$0xff] }
 0x79f   :  { %8390 = vmatprep.subr.bf16.mxu1 %v14658_v34  ;;  %v4834_v34 = vld [vmem:[#allocation23 + $0x290] sm:$0xff] }
 0x7a0   :  { %v14703_v47 = vcombine.low %v4834_v34, %v4838_v35 }
 0x7a1   :  { %8219 = vmatpush1.bf16.msra.mxu0 %v14655_v39  ;;  %v14697_v39 = vcombine.low %v4827_v21, %v4831_v24  ;;  %v4871_v21 = vld [vmem:[#allocation23 + $0x3b8] sm:$0xff] }
 0x7a2   :  { %8391 = vmatpush1.bf16.msra.mxu1 %v14657_v49  ;;  %8220 = vmatprep.subr.bf16.mxu0 %v14664_v30  ;;  %v14704_v49 = vcombine.high %v4834_v34, %v4838_v35  ;;  %v14706_v30 = vcombine.high %v4835_v48, %v4839_v60  ;;  %v4878_v34 = vld [vmem:[#allocation23 + $0x3f0] sm:$0xff]  ;;  %v4875_v35 = vld [vmem:[#allocation23 + $0x3d8] sm:$0xff] }
 0x7a3   :  { %8392 = vmatprep.subr.bf16.mxu1 %v14666_v52  ;;  %v4842_v52 = vld [vmem:[#allocation23 + $0x2d0] sm:$0xff] }
 0x7a4   :  { %v14711_v37 = vcombine.low %v4842_v52, %v4846_v54 }
 0x7a5   :  { %8221 = vmatpush1.bf16.msra.mxu0 %v14663_v4  ;;  %v14705_v4 = vcombine.low %v4835_v48, %v4839_v60  ;;  %v4879_v48 = vld [vmem:[#allocation23 + $0x3f8] sm:$0xff] }
 0x7a6   :  { %8393 = vmatpush1.bf16.msra.mxu1 %v14665_v57  ;;  %8222 = vmatprep.subr.bf16.mxu0 %v14672_v28  ;;  %v14712_v57 = vcombine.high %v4842_v52, %v4846_v54  ;;  %v14714_v28 = vcombine.high %v4843_v55, %v4847_v56  ;;  %v4886_v52 = vld [vmem:[#allocation23 + $0x430] sm:$0xff]  ;;  %v4883_v54 = vld [vmem:[#allocation23 + $0x418] sm:$0xff] }
 0x7a7   :  { %8394 = vmatprep.subr.bf16.mxu1 %v14674_v17  ;;  %v4850_v17 = vld [vmem:[#allocation23 + $0x310] sm:$0xff] }
 0x7a8   :  { %v14719_v9 = vcombine.low %v4850_v17, %v4854_v58 }
 0x7a9   :  { %8223 = vmatpush1.bf16.msra.mxu0 %v14671_v42  ;;  %v14713_v42 = vcombine.low %v4843_v55, %v4847_v56  ;;  %v4887_v55 = vld [vmem:[#allocation23 + $0x438] sm:$0xff] }
 0x7aa   :  { %8395 = vmatpush1.bf16.msra.mxu1 %v14673_v61  ;;  %8224 = vmatprep.subr.bf16.mxu0 %v14680_v0  ;;  %v14720_v61 = vcombine.high %v4850_v17, %v4854_v58  ;;  %v14722_v0 = vcombine.high %v4851_v26, %v4855_v25  ;;  %v4894_v17 = vld [vmem:[#allocation23 + $0x470] sm:$0xff] }
 0x7ab   :  { %8396 = vmatprep.subr.bf16.mxu1 %v14682_v5  ;;  %v4858_v5 = vld [vmem:[#allocation23 + $0x350] sm:$0xff] }
 0x7ac   :  { %v14727_v24 = vcombine.low %v4858_v5, %v4862_v6 }
 0x7ad   :  { %8225 = vmatpush1.bf16.msra.mxu0 %v14679_v10  ;;  %v14721_v10 = vcombine.low %v4851_v26, %v4855_v25  ;;  %v4891_v26 = vld [vmem:[#allocation23 + $0x458] sm:$0xff] }
 0x7ae   :  { %8397 = vmatpush1.bf16.msra.mxu1 %v14681_v11  ;;  %8226 = vmatprep.subr.bf16.mxu0 %v14688_v12  ;;  %v14728_v11 = vcombine.high %v4858_v5, %v4862_v6  ;;  %v14730_v12 = vcombine.high %v4859_v7, %v4863_v8  ;;  %v4895_v25 = vld [vmem:[#allocation23 + $0x478] sm:$0xff] }
 0x7af   :  { %8398 = vmatprep.subr.bf16.mxu1 %v14690_v15  ;;  %v4866_v15 = vld [vmem:[#allocation23 + $0x390] sm:$0xff]  ;;  %v14762_v5 = vcombine.high %v4891_v26, %v4895_v25  ;;  %v4899_v6 = vld [vmem:[#allocation23 + $0x498] sm:$0xff] }
 0x7b0   :  { %v14735_v60 = vcombine.low %v4866_v15, %v4870_v16 }
 0x7b1   :  { %8227 = vmatpush1.bf16.msra.mxu0 %v14687_v27  ;;  %v14729_v27 = vcombine.low %v4859_v7, %v4863_v8  ;;  %v4903_v7 = vld [vmem:[#allocation23 + $0x4b8] sm:$0xff] }
 0x7b2   :  { %8399 = vmatpush1.bf16.msra.mxu1 %v14689_v33  ;;  %8228 = vmatprep.subr.bf16.mxu0 %v14696_v44  ;;  %v14736_v33 = vcombine.high %v4866_v15, %v4870_v16  ;;  %v14738_v44 = vcombine.high %v4867_v20, %v4871_v21  ;;  %v4910_v15 = vld [vmem:[#allocation23 + $0x4f0] sm:$0xff]  ;;  %v4907_v16 = vld [vmem:[#allocation23 + $0x4d8] sm:$0xff] }
 0x7b3   :  { %8400 = vmatprep.subr.bf16.mxu1 %v14698_v31  ;;  %v4874_v31 = vld [vmem:[#allocation23 + $0x3d0] sm:$0xff] }
 0x7b4   :  { %v14743_v56 = vcombine.low %v4874_v31, %v4878_v34 }
 0x7b5   :  { %8229 = vmatpush1.bf16.msra.mxu0 %v14695_v36  ;;  %v14737_v36 = vcombine.low %v4867_v20, %v4871_v21  ;;  %v4911_v20 = vld [vmem:[#allocation23 + $0x4f8] sm:$0xff] }
 0x7b6   :  { %8401 = vmatpush1.bf16.msra.mxu1 %v14697_v39  ;;  %8230 = vmatprep.subr.bf16.mxu0 %v14704_v49  ;;  %v14744_v39 = vcombine.high %v4874_v31, %v4878_v34  ;;  %v14746_v49 = vcombine.high %v4875_v35, %v4879_v48  ;;  %v4915_v31 = vld [vmem:[#allocation23 + $0x518] sm:$0xff] }
 0x7b7   :  { %8402 = vmatprep.subr.bf16.mxu1 %v14706_v30  ;;  %v4882_v30 = vld [vmem:[#allocation23 + $0x410] sm:$0xff]  ;;  %v4919_v34 = vld [vmem:[#allocation23 + $0x538] sm:$0xff] }
 0x7b8   :  { %v14751_v58 = vcombine.low %v4882_v30, %v4886_v52 }
 0x7b9   :  { %8231 = vmatpush1.bf16.msra.mxu0 %v14703_v47  ;;  %v14745_v47 = vcombine.low %v4875_v35, %v4879_v48  ;;  %v14777_v35 = vcombine.low %v4907_v16, %v4911_v20 }
 0x7ba   :  { %8403 = vmatpush1.bf16.msra.mxu1 %v14705_v4  ;;  %8232 = vmatprep.subr.bf16.mxu0 %v14712_v57  ;;  %v14752_v4 = vcombine.high %v4882_v30, %v4886_v52  ;;  %v14754_v57 = vcombine.high %v4883_v54, %v4887_v55  ;;  %v4927_v30 = vld [vmem:[#allocation23 + $0x578] sm:$0xff] }
 0x7bb   :  { %8404 = vmatprep.subr.bf16.mxu1 %v14714_v28  ;;  %v4890_v28 = vld [vmem:[#allocation23 + $0x450] sm:$0xff] }
 0x7bc   :  { %v14759_v8 = vcombine.low %v4890_v28, %v4894_v17 }
 0x7bd   :  { %8233 = vmatpush1.bf16.msra.mxu0 %v14711_v37  ;;  %v14753_v37 = vcombine.low %v4883_v54, %v4887_v55  ;;  %v14785_v54 = vcombine.low %v4915_v31, %v4919_v34 }
 0x7be   :  { %8405 = vmatpush1.bf16.msra.mxu1 %v14713_v42  ;;  %8234 = vmatprep.subr.bf16.mxu0 %v14720_v61  ;;  %v14760_v42 = vcombine.high %v4890_v28, %v4894_v17  ;;  %v4898_v61 = vld [vmem:[#allocation23 + $0x490] sm:$0xff]  ;;  %v4935_v28 = vld [vmem:[#allocation23 + $0x5b8] sm:$0xff] }
 0x7bf   :  { %8406 = vmatprep.subr.bf16.mxu1 %v14722_v0  ;;  %v4902_v0 = vld [vmem:[#allocation23 + $0x4b0] sm:$0xff] }
 0x7c0   :  { %v14767_v21 = vcombine.low %v4898_v61, %v4902_v0 }
 0x7c1   :  { %8235 = vmatpush1.bf16.msra.mxu0 %v14719_v9  ;;  %v14761_v9 = vcombine.low %v4891_v26, %v4895_v25 }
 0x7c2   :  { %8407 = vmatpush1.bf16.msra.mxu1 %v14721_v10  ;;  %8236 = vmatprep.subr.bf16.mxu0 %v14728_v11  ;;  %v14768_v10 = vcombine.high %v4898_v61, %v4902_v0  ;;  %v14770_v11 = vcombine.high %v4899_v6, %v4903_v7  ;;  %v4939_v61 = vld [vmem:[#allocation23 + $0x5d8] sm:$0xff] }
 0x7c3   :  { %8408 = vmatprep.subr.bf16.mxu1 %v14730_v12  ;;  %v4906_v12 = vld [vmem:[#allocation23 + $0x4d0] sm:$0xff]  ;;  %v4943_v0 = vld [vmem:[#allocation23 + $0x5f8] sm:$0xff] }
 0x7c5   :  { %8237 = vmatpush1.bf16.msra.mxu0 %v14727_v24  ;;  %v14776_v24 = vcombine.high %v4906_v12, %v4910_v15 }
 0x7c6   :  { %8409 = vmatpush1.bf16.msra.mxu1 %v14729_v27  ;;  %8238 = vmatprep.subr.bf16.mxu0 %v14736_v33  ;;  %v14778_v27 = vcombine.high %v4907_v16, %v4911_v20  ;;  %v4914_v33 = vld [vmem:[#allocation23 + $0x510] sm:$0xff]  ;;  %v14809_v16 = vcombine.low %v4939_v61, %v4943_v0 }
 0x7c7   :  { %8410 = vmatprep.subr.bf16.mxu1 %v14738_v44  ;;  %v4918_v44 = vld [vmem:[#allocation23 + $0x530] sm:$0xff] }
 0x7c8   :  { %v14784_v48 = vcombine.high %v4914_v33, %v4918_v44  ;;  %v14783_v52 = vcombine.low %v4914_v33, %v4918_v44  ;;  %v4959_v33 = vld [vmem:[#allocation23 + $0x678] sm:$0xff] }
 0x7c9   :  { %8239 = vmatpush1.bf16.msra.mxu0 %v14735_v60  ;;  %v14786_v60 = vcombine.high %v4915_v31, %v4919_v34 }
 0x7ca   :  { %8411 = vmatpush1.bf16.msra.mxu1 %v14737_v36  ;;  %8240 = vmatprep.subr.bf16.mxu0 %v14744_v39  ;;  %v4922_v36 = vld [vmem:[#allocation23 + $0x550] sm:$0xff] }
 0x7cb   :  { %8412 = vmatprep.subr.bf16.mxu1 %v14746_v49  ;;  %v4926_v39 = vld [vmem:[#allocation23 + $0x570] sm:$0xff]  ;;  %v4923_v49 = vld [vmem:[#allocation23 + $0x558] sm:$0xff] }
 0x7cc   :  { %v14792_v55 = vcombine.high %v4922_v36, %v4926_v39  ;;  %v14791_v17 = vcombine.low %v4922_v36, %v4926_v39  ;;  %v4967_v36 = vld [vmem:[#allocation23 + $0x6b8] sm:$0xff] }
 0x7cd   :  { %8241 = vmatpush1.bf16.msra.mxu0 %v14743_v56  ;;  %v14794_v56 = vcombine.high %v4923_v49, %v4927_v30 }
 0x7ce   :  { %8413 = vmatpush1.bf16.msra.mxu1 %v14745_v47  ;;  %8253 = vmatprep.subr.bf16.mxu0 %v14752_v4  ;;  %v4930_v47 = vld [vmem:[#allocation23 + $0x590] sm:$0xff] }
 0x7cf   :  { %8425 = vmatprep.subr.bf16.mxu1 %v14754_v57  ;;  %v4934_v4 = vld [vmem:[#allocation23 + $0x5b0] sm:$0xff]  ;;  %v4931_v57 = vld [vmem:[#allocation23 + $0x598] sm:$0xff] }
 0x7d0   :  { %8243 = vmatmul.mubr.bf16.vlgmr.msra.gmra.mrb[48].mxu0 %v18037_v32  ;;  %v14800_v26 = vcombine.high %v4930_v47, %v4934_v4  ;;  %v14802_v25 = vcombine.high %v4931_v57, %v4935_v28 }
 0x7d1   :  { %8415 = vmatmul.mubr.bf16.vlgmr.msra.gmra.mrb[36].mxu1 %v18037_v32  ;;  %8254 = vmatpush1.bf16.msra.mxu0 %v14751_v58  ;;  %v14769_v32 = vcombine.low %v4899_v6, %v4903_v7  ;;  %v14793_v58 = vcombine.low %v4923_v49, %v4927_v30  ;;  %v14801_v6 = vcombine.low %v4931_v57, %v4935_v28 }
 0x7d2   :  { %8285 = vmatprep.mubr.bf16.mxu0 %v18057_v43  ;;  %8426 = vmatpush1.bf16.msra.mxu1 %v14753_v37  ;;  %v4938_v37 = vld [vmem:[#allocation23 + $0x5d0] sm:$0xff] }
 0x7d3   :  { %8457 = vmatprep.mubr.bf16.mxu1 %v18057_v43  ;;  %8255 = vmatprep.subr.bf16.mxu0 %v14760_v42  ;;  %v14775_v43 = vcombine.low %v4906_v12, %v4910_v15  ;;  %v4942_v42 = vld [vmem:[#allocation23 + $0x5f0] sm:$0xff]  ;;  %v4951_v12 = vld [vmem:[#allocation23 + $0x638] sm:$0xff] }
 0x7d4   :  { %8427 = vmatprep.subr.bf16.mxu1 %v14762_v5  ;;  %v14799_v5 = vcombine.low %v4930_v47, %v4934_v4  ;;  %v14808_v7 = vcombine.high %v4938_v37, %v4942_v42  ;;  %v14807_v15 = vcombine.low %v4938_v37, %v4942_v42  ;;  %v4975_v47 = vld [vmem:[#allocation23 + $0x6f8] sm:$0xff] }
 0x7d5   :  { %8256 = vmatpush1.bf16.msra.mxu0 %v14759_v8  ;;  %v14810_v8 = vcombine.high %v4939_v61, %v4943_v0  ;;  %v4983_v37 = vld [vmem:[#allocation23 + $0x738] sm:$0xff] }
 0x7d6   :  { %8428 = vmatpush1.bf16.msra.mxu1 %v14761_v9  ;;  %8257 = vmatprep.subr.bf16.mxu0 %v14768_v10  ;;  %v4946_v9 = vld [vmem:[#allocation23 + $0x610] sm:$0xff] }
 0x7d7   :  { %8429 = vmatprep.subr.bf16.mxu1 %v14770_v11  ;;  %v4950_v10 = vld [vmem:[#allocation23 + $0x630] sm:$0xff]  ;;  %v4947_v11 = vld [vmem:[#allocation23 + $0x618] sm:$0xff] }
 0x7d8   :  { %v14816_v20 = vcombine.high %v4946_v9, %v4950_v10  ;;  %v14815_v44 = vcombine.low %v4946_v9, %v4950_v10  ;;  %v14817_v31 = vcombine.low %v4947_v11, %v4951_v12  ;;  %v4991_v9 = vld [vmem:[#allocation23 + $0x778] sm:$0xff] }
 0x7d9   :  { %8258 = vmatpush1.bf16.msra.mxu0 %v14767_v21  ;;  %v14818_v21 = vcombine.high %v4947_v11, %v4951_v12 }
 0x7da   :  { %8430 = vmatpush1.bf16.msra.mxu1 %v14769_v32  ;;  %8259 = vmatprep.subr.bf16.mxu0 %v14776_v24  ;;  %v4954_v32 = vld [vmem:[#allocation23 + $0x650] sm:$0xff] }
 0x7db   :  { %8431 = vmatprep.subr.bf16.mxu1 %v14778_v27  ;;  %v4958_v24 = vld [vmem:[#allocation23 + $0x670] sm:$0xff]  ;;  %v4955_v27 = vld [vmem:[#allocation23 + $0x658] sm:$0xff] }
 0x7dc   :  { %v14824_v34 = vcombine.high %v4954_v32, %v4958_v24  ;;  %v14823_v39 = vcombine.low %v4954_v32, %v4958_v24  ;;  %v14825_v49 = vcombine.low %v4955_v27, %v4959_v33  ;;  %v4999_v32 = vld [vmem:[#allocation23 + $0x7b8] sm:$0xff] }
 0x7dd   :  { %8260 = vmatpush1.bf16.msra.mxu0 %v14775_v43  ;;  %v14826_v43 = vcombine.high %v4955_v27, %v4959_v33 }
 0x7de   :  { %8432 = vmatpush1.bf16.msra.mxu1 %v14777_v35  ;;  %8261 = vmatprep.subr.bf16.mxu0 %v14784_v48  ;;  %v4962_v35 = vld [vmem:[#allocation23 + $0x690] sm:$0xff] }
 0x7df   :  { %8433 = vmatprep.subr.bf16.mxu1 %v14786_v60  ;;  %v4966_v48 = vld [vmem:[#allocation23 + $0x6b0] sm:$0xff]  ;;  %v4963_v60 = vld [vmem:[#allocation23 + $0x698] sm:$0xff] }
 0x7e0   :  { %v14832_v30 = vcombine.high %v4962_v35, %v4966_v48  ;;  %v14831_v4 = vcombine.low %v4962_v35, %v4966_v48  ;;  %v14833_v57 = vcombine.low %v4963_v60, %v4967_v36  ;;  %v5007_v35 = vld [vmem:[#allocation23 + $0x7f8] sm:$0xff] }
 0x7e1   :  { %8262 = vmatpush1.bf16.msra.mxu0 %v14783_v52  ;;  %v14834_v52 = vcombine.high %v4963_v60, %v4967_v36 }
 0x7e2   :  { %8434 = vmatpush1.bf16.msra.mxu1 %v14785_v54  ;;  %8263 = vmatprep.subr.bf16.mxu0 %v14792_v55  ;;  %v4970_v54 = vld [vmem:[#allocation23 + $0x6d0] sm:$0xff] }
 0x7e3   :  { %8435 = vmatprep.subr.bf16.mxu1 %v14794_v56  ;;  %v4974_v55 = vld [vmem:[#allocation23 + $0x6f0] sm:$0xff]  ;;  %v4971_v56 = vld [vmem:[#allocation23 + $0x6d8] sm:$0xff] }
 0x7e4   :  { %v14840_v28 = vcombine.high %v4970_v54, %v4974_v55  ;;  %v14839_v42 = vcombine.low %v4970_v54, %v4974_v55  ;;  %v14841_v61 = vcombine.low %v4971_v56, %v4975_v47  ;;  %v5015_v54 = vld [vmem:[#allocation23 + $0x838] sm:$0xff] }
 0x7e5   :  { %8264 = vmatpush1.bf16.msra.mxu0 %v14791_v17  ;;  %v14842_v17 = vcombine.high %v4971_v56, %v4975_v47 }
 0x7e6   :  { %8436 = vmatpush1.bf16.msra.mxu1 %v14793_v58  ;;  %8265 = vmatprep.subr.bf16.mxu0 %v14800_v26  ;;  %v4978_v58 = vld [vmem:[#allocation23 + $0x710] sm:$0xff] }
 0x7e7   :  { %8437 = vmatprep.subr.bf16.mxu1 %v14802_v25  ;;  %v4982_v26 = vld [vmem:[#allocation23 + $0x730] sm:$0xff]  ;;  %v4979_v25 = vld [vmem:[#allocation23 + $0x718] sm:$0xff] }
 0x7e8   :  { %v14848_v0 = vcombine.high %v4978_v58, %v4982_v26  ;;  %v14847_v10 = vcombine.low %v4978_v58, %v4982_v26  ;;  %v14849_v11 = vcombine.low %v4979_v25, %v4983_v37  ;;  %v5019_v58 = vld [vmem:[#allocation23 + $0x858] sm:$0xff] }
 0x7e9   :  { %8266 = vmatpush1.bf16.msra.mxu0 %v14799_v5  ;;  %v14850_v5 = vcombine.high %v4979_v25, %v4983_v37  ;;  %v5023_v26 = vld [vmem:[#allocation23 + $0x878] sm:$0xff] }
 0x7ea   :  { %8438 = vmatpush1.bf16.msra.mxu1 %v14801_v6  ;;  %8267 = vmatprep.subr.bf16.mxu0 %v14808_v7  ;;  %v4986_v6 = vld [vmem:[#allocation23 + $0x750] sm:$0xff] }
 0x7eb   :  { %8439 = vmatprep.subr.bf16.mxu1 %v14810_v8  ;;  %v4990_v7 = vld [vmem:[#allocation23 + $0x770] sm:$0xff]  ;;  %v4987_v8 = vld [vmem:[#allocation23 + $0x758] sm:$0xff] }
 0x7ec   :  { %v14856_v12 = vcombine.high %v4986_v6, %v4990_v7  ;;  %v14855_v24 = vcombine.low %v4986_v6, %v4990_v7  ;;  %v14857_v27 = vcombine.low %v4987_v8, %v4991_v9  ;;  %v5031_v6 = vld [vmem:[#allocation23 + $0x8b8] sm:$0xff] }
 0x7ed   :  { %8268 = vmatpush1.bf16.msra.mxu0 %v14807_v15  ;;  %v14858_v15 = vcombine.high %v4987_v8, %v4991_v9  ;;  %v14889_v8 = vcombine.low %v5019_v58, %v5023_v26 }
 0x7ee   :  { %8440 = vmatpush1.bf16.msra.mxu1 %v14809_v16  ;;  %8269 = vmatprep.subr.bf16.mxu0 %v14816_v20  ;;  %v4994_v16 = vld [vmem:[#allocation23 + $0x790] sm:$0xff] }
 0x7ef   :  { %8441 = vmatprep.subr.bf16.mxu1 %v14818_v21  ;;  %v4998_v20 = vld [vmem:[#allocation23 + $0x7b0] sm:$0xff]  ;;  %v4995_v21 = vld [vmem:[#allocation23 + $0x798] sm:$0xff] }
 0x7f0   :  { %v14864_v33 = vcombine.high %v4994_v16, %v4998_v20  ;;  %v14863_v48 = vcombine.low %v4994_v16, %v4998_v20  ;;  %v14865_v60 = vcombine.low %v4995_v21, %v4999_v32  ;;  %v5039_v16 = vld [vmem:[#allocation23 + $0x8f8] sm:$0xff] }
 0x7f1   :  { %8270 = vmatpush1.bf16.msra.mxu0 %v14815_v44  ;;  %v14866_v44 = vcombine.high %v4995_v21, %v4999_v32 }
 0x7f2   :  { %8442 = vmatpush1.bf16.msra.mxu1 %v14817_v31  ;;  %8271 = vmatprep.subr.bf16.mxu0 %v14824_v34  ;;  %v5002_v31 = vld [vmem:[#allocation23 + $0x7d0] sm:$0xff] }
 0x7f3   :  { %8443 = vmatprep.subr.bf16.mxu1 %v14826_v43  ;;  %v5006_v34 = vld [vmem:[#allocation23 + $0x7f0] sm:$0xff]  ;;  %v5003_v43 = vld [vmem:[#allocation23 + $0x7d8] sm:$0xff] }
 0x7f4   :  { %v14872_v36 = vcombine.high %v5002_v31, %v5006_v34  ;;  %v14871_v55 = vcombine.low %v5002_v31, %v5006_v34  ;;  %v14873_v56 = vcombine.low %v5003_v43, %v5007_v35 }
 0x7f5   :  { %8272 = vmatpush1.bf16.msra.mxu0 %v14823_v39  ;;  %v14874_v39 = vcombine.high %v5003_v43, %v5007_v35  ;;  %v5050_v35 = vld [vmem:[#allocation23 + $0x950] sm:$0xff] }
 0x7f6   :  { %8444 = vmatpush1.bf16.msra.mxu1 %v14825_v49  ;;  %8273 = vmatprep.subr.bf16.mxu0 %v14832_v30  ;;  %v5010_v49 = vld [vmem:[#allocation23 + $0x810] sm:$0xff] }
 0x7f7   :  { %8445 = vmatprep.subr.bf16.mxu1 %v14834_v52  ;;  %v5014_v30 = vld [vmem:[#allocation23 + $0x830] sm:$0xff]  ;;  %v5011_v52 = vld [vmem:[#allocation23 + $0x818] sm:$0xff] }
 0x7f8   :  { %v14880_v47 = vcombine.high %v5010_v49, %v5014_v30  ;;  %v14881_v25 = vcombine.low %v5011_v52, %v5015_v54 }
 0x7f9   :  { %8274 = vmatpush1.bf16.msra.mxu0 %v14831_v4  ;;  %v14882_v4 = vcombine.high %v5011_v52, %v5015_v54  ;;  %v5058_v54 = vld [vmem:[#allocation23 + $0x990] sm:$0xff] }
 0x7fa   :  { %8446 = vmatpush1.bf16.msra.mxu1 %v14833_v57  ;;  %8275 = vmatprep.subr.bf16.mxu0 %v14840_v28  ;;  %v5018_v57 = vld [vmem:[#allocation23 + $0x850] sm:$0xff] }
 0x7fb   :  { %8447 = vmatprep.subr.bf16.mxu1 %v14842_v17  ;;  %v5022_v28 = vld [vmem:[#allocation23 + $0x870] sm:$0xff]  ;;  %v14879_v17 = vcombine.low %v5010_v49, %v5014_v30 }
 0x7fc   :  { %v14888_v37 = vcombine.high %v5018_v57, %v5022_v28  ;;  %v14887_v7 = vcombine.low %v5018_v57, %v5022_v28 }
 0x7fd   :  { %8276 = vmatpush1.bf16.msra.mxu0 %v14839_v42  ;;  %v5026_v42 = vld [vmem:[#allocation23 + $0x890] sm:$0xff] }
 0x7fe   :  { %8448 = vmatpush1.bf16.msra.mxu1 %v14841_v61  ;;  %8277 = vmatprep.subr.bf16.mxu0 %v14848_v0  ;;  %v5030_v61 = vld [vmem:[#allocation23 + $0x8b0] sm:$0xff]  ;;  %v14890_v0 = vcombine.high %v5019_v58, %v5023_v26 }
 0x7ff   :  { %8449 = vmatprep.subr.bf16.mxu1 %v14850_v5  ;;  %v5027_v5 = vld [vmem:[#allocation23 + $0x898] sm:$0xff]  ;;  %v14896_v9 = vcombine.high %v5026_v42, %v5030_v61  ;;  %v14895_v20 = vcombine.low %v5026_v42, %v5030_v61  ;;  %v5066_v58 = vld [vmem:[#allocation23 + $0x9d0] sm:$0xff] }
 0x800   :  { %v5070_v26 = vld [vmem:[#allocation23 + $0x9f0] sm:$0xff] }
 0x801   :  { %8278 = vmatpush1.bf16.msra.mxu0 %v14847_v10  ;;  %v14898_v10 = vcombine.high %v5027_v5, %v5031_v6 }
 0x802   :  { %8450 = vmatpush1.bf16.msra.mxu1 %v14849_v11  ;;  %8279 = vmatprep.subr.bf16.mxu0 %v14856_v12  ;;  %v5034_v11 = vld [vmem:[#allocation23 + $0x8d0] sm:$0xff] }
 0x803   :  { %8451 = vmatprep.subr.bf16.mxu1 %v14858_v15  ;;  %v5038_v12 = vld [vmem:[#allocation23 + $0x8f0] sm:$0xff]  ;;  %v5035_v15 = vld [vmem:[#allocation23 + $0x8d8] sm:$0xff] }
 0x804   :  { %v14904_v21 = vcombine.high %v5034_v11, %v5038_v12  ;;  %v14906_v32 = vcombine.high %v5035_v15, %v5039_v16  ;;  %v14905_v31 = vcombine.low %v5035_v15, %v5039_v16  ;;  %v5082_v16 = vld [vmem:[#allocation23 + $0xa50] sm:$0xff] }
 0x805   :  { %8280 = vmatpush1.bf16.msra.mxu0 %v14855_v24  ;;  %v5042_v24 = vld [vmem:[#allocation23 + $0x910] sm:$0xff] }
 0x806   :  { %8452 = vmatpush1.bf16.msra.mxu1 %v14857_v27  ;;  %8281 = vmatprep.subr.bf16.mxu0 %v14864_v33  ;;  %v5046_v27 = vld [vmem:[#allocation23 + $0x930] sm:$0xff]  ;;  %v5043_v33 = vld [vmem:[#allocation23 + $0x918] sm:$0xff] }
 0x807   :  { %8453 = vmatprep.subr.bf16.mxu1 %v14866_v44  ;;  %v5047_v44 = vld [vmem:[#allocation23 + $0x938] sm:$0xff]  ;;  %v14912_v34 = vcombine.high %v5042_v24, %v5046_v27 }
 0x808   :  { %v14914_v43 = vcombine.high %v5043_v33, %v5047_v44  ;;  %v14913_v49 = vcombine.low %v5043_v33, %v5047_v44  ;;  %v5090_v44 = vld [vmem:[#allocation23 + $0xa90] sm:$0xff] }
 0x809   :  { %8282 = vmatpush1.bf16.msra.mxu0 %v14863_v48  ;;  %v5054_v48 = vld [vmem:[#allocation23 + $0x970] sm:$0xff] }
 0x80a   :  { %8454 = vmatpush1.bf16.msra.mxu1 %v14865_v60  ;;  %8283 = vmatprep.subr.bf16.mxu0 %v14872_v36  ;;  %v5051_v60 = vld [vmem:[#allocation23 + $0x958] sm:$0xff]  ;;  %v14920_v30 = vcombine.high %v5050_v35, %v5054_v48 }
 0x80b   :  { %8455 = vmatprep.subr.bf16.mxu1 %v14874_v39  ;;  %v5055_v36 = vld [vmem:[#allocation23 + $0x978] sm:$0xff]  ;;  %v14911_v39 = vcombine.low %v5042_v24, %v5046_v27 }
 0x80c   :  { %v14922_v52 = vcombine.high %v5051_v60, %v5055_v36  ;;  %v14921_v57 = vcombine.low %v5051_v60, %v5055_v36  ;;  %v5098_v36 = vld [vmem:[#allocation23 + $0xad0] sm:$0xff] }
 0x80d   :  { %8284 = vmatpush1.bf16.msra.mxu0 %v14871_v55  ;;  %v5062_v55 = vld [vmem:[#allocation23 + $0x9b0] sm:$0xff] }
 0x80e   :  { %8456 = vmatpush1.bf16.msra.mxu1 %v14873_v56  ;;  %8296 = vmatprep.subr.bf16.mxu0 %v14880_v47  ;;  %v5059_v56 = vld [vmem:[#allocation23 + $0x998] sm:$0xff]  ;;  %v14928_v28 = vcombine.high %v5058_v54, %v5062_v55  ;;  %v14927_v42 = vcombine.low %v5058_v54, %v5062_v55 }
 0x80f   :  { %8468 = vmatprep.subr.bf16.mxu1 %v14882_v4  ;;  %v5063_v47 = vld [vmem:[#allocation23 + $0x9b8] sm:$0xff]  ;;  %v14919_v4 = vcombine.low %v5050_v35, %v5054_v48 }
 0x810   :  { %8286 = vmatmul.mubr.bf16.vlgmr.msra.gmra.mrb[48].mxu0 %v18055_v41  ;;  %v14929_v61 = vcombine.low %v5059_v56, %v5063_v47 }
 0x811   :  { %8458 = vmatmul.mubr.bf16.vlgmr.msra.gmra.mrb[36].mxu1 %v18055_v41  ;;  %8297 = vmatpush1.bf16.msra.mxu0 %v14879_v17  ;;  %v14897_v41 = vcombine.low %v5027_v5, %v5031_v6  ;;  %v14930_v17 = vcombine.high %v5059_v56, %v5063_v47  ;;  %v5074_v6 = vld [vmem:[#allocation23 + $0xa10] sm:$0xff] }
 0x812   :  { %8328 = vmatprep.mubr.bf16.mxu0 %v18067_v46  ;;  %8469 = vmatpush1.bf16.msra.mxu1 %v14881_v25  ;;  %v5067_v25 = vld [vmem:[#allocation23 + $0x9d8] sm:$0xff]  ;;  %v5106_v47 = vld [vmem:[#allocation23 + $0xb10] sm:$0xff] }
 0x813   :  { %8500 = vmatprep.mubr.bf16.mxu1 %v18067_v46  ;;  %8298 = vmatprep.subr.bf16.mxu0 %v14888_v37  ;;  %v14903_v46 = vcombine.low %v5034_v11, %v5038_v12  ;;  %v5071_v37 = vld [vmem:[#allocation23 + $0x9f8] sm:$0xff] }
 0x814   :  { %8470 = vmatprep.subr.bf16.mxu1 %v14890_v0  ;;  %v14936_v0 = vcombine.high %v5066_v58, %v5070_v26  ;;  %v14938_v5 = vcombine.high %v5067_v25, %v5071_v37  ;;  %v14937_v11 = vcombine.low %v5067_v25, %v5071_v37  ;;  %v5114_v37 = vld [vmem:[#allocation23 + $0xb50] sm:$0xff] }
 0x815   :  { %8299 = vmatpush1.bf16.msra.mxu0 %v14887_v7  ;;  %v5078_v7 = vld [vmem:[#allocation23 + $0xa30] sm:$0xff] }
 0x816   :  { %8471 = vmatpush1.bf16.msra.mxu1 %v14889_v8  ;;  %8300 = vmatprep.subr.bf16.mxu0 %v14896_v9  ;;  %v5075_v8 = vld [vmem:[#allocation23 + $0xa18] sm:$0xff]  ;;  %v14944_v12 = vcombine.high %v5074_v6, %v5078_v7 }
 0x817   :  { %8472 = vmatprep.subr.bf16.mxu1 %v14898_v10  ;;  %v5079_v9 = vld [vmem:[#allocation23 + $0xa38] sm:$0xff]  ;;  %v14935_v10 = vcombine.low %v5066_v58, %v5070_v26 }
 0x818   :  { %v14946_v15 = vcombine.high %v5075_v8, %v5079_v9  ;;  %v14945_v24 = vcombine.low %v5075_v8, %v5079_v9  ;;  %v5122_v9 = vld [vmem:[#allocation23 + $0xb90] sm:$0xff] }
 0x819   :  { %8301 = vmatpush1.bf16.msra.mxu0 %v14895_v20  ;;  %v5086_v20 = vld [vmem:[#allocation23 + $0xa70] sm:$0xff] }
 0x81a   :  { %8473 = vmatpush1.bf16.msra.mxu1 %v14897_v41  ;;  %8302 = vmatprep.subr.bf16.mxu0 %v14904_v21  ;;  %v5083_v41 = vld [vmem:[#allocation23 + $0xa58] sm:$0xff]  ;;  %v14952_v27 = vcombine.high %v5082_v16, %v5086_v20 }
 0x81b   :  { %8474 = vmatprep.subr.bf16.mxu1 %v14906_v32  ;;  %v5087_v21 = vld [vmem:[#allocation23 + $0xa78] sm:$0xff]  ;;  %v14943_v32 = vcombine.low %v5074_v6, %v5078_v7 }
 0x81c   :  { %v14954_v33 = vcombine.high %v5083_v41, %v5087_v21  ;;  %v14953_v35 = vcombine.low %v5083_v41, %v5087_v21  ;;  %v5130_v21 = vld [vmem:[#allocation23 + $0xbd0] sm:$0xff] }
 0x81d   :  { %8303 = vmatpush1.bf16.msra.mxu0 %v14903_v46  ;;  %v5094_v46 = vld [vmem:[#allocation23 + $0xab0] sm:$0xff] }
 0x81e   :  { %8475 = vmatpush1.bf16.msra.mxu1 %v14905_v31  ;;  %8304 = vmatprep.subr.bf16.mxu0 %v14912_v34  ;;  %v5091_v31 = vld [vmem:[#allocation23 + $0xa98] sm:$0xff]  ;;  %v14960_v48 = vcombine.high %v5090_v44, %v5094_v46 }
 0x81f   :  { %8476 = vmatprep.subr.bf16.mxu1 %v14914_v43  ;;  %v5095_v34 = vld [vmem:[#allocation23 + $0xab8] sm:$0xff]  ;;  %v14951_v43 = vcombine.low %v5082_v16, %v5086_v20 }
 0x820   :  { %v14962_v60 = vcombine.high %v5091_v31, %v5095_v34  ;;  %v14961_v54 = vcombine.low %v5091_v31, %v5095_v34  ;;  %v5138_v34 = vld [vmem:[#allocation23 + $0xc10] sm:$0xff] }
 0x821   :  { %8305 = vmatpush1.bf16.msra.mxu0 %v14911_v39  ;;  %v5102_v39 = vld [vmem:[#allocation23 + $0xaf0] sm:$0xff] }
 0x822   :  { %8477 = vmatpush1.bf16.msra.mxu1 %v14913_v49  ;;  %8306 = vmatprep.subr.bf16.mxu0 %v14920_v30  ;;  %v5099_v49 = vld [vmem:[#allocation23 + $0xad8] sm:$0xff]  ;;  %v14968_v55 = vcombine.high %v5098_v36, %v5102_v39 }
 0x823   :  { %8478 = vmatprep.subr.bf16.mxu1 %v14922_v52  ;;  %v5103_v30 = vld [vmem:[#allocation23 + $0xaf8] sm:$0xff]  ;;  %v14959_v52 = vcombine.low %v5090_v44, %v5094_v46 }
 0x824   :  { %v14970_v56 = vcombine.high %v5099_v49, %v5103_v30  ;;  %v14969_v58 = vcombine.low %v5099_v49, %v5103_v30  ;;  %v5146_v30 = vld [vmem:[#allocation23 + $0xc50] sm:$0xff] }
 0x825   :  { %8307 = vmatpush1.bf16.msra.mxu0 %v14919_v4  ;;  %v5110_v4 = vld [vmem:[#allocation23 + $0xb30] sm:$0xff] }
 0x826   :  { %8479 = vmatpush1.bf16.msra.mxu1 %v14921_v57  ;;  %8308 = vmatprep.subr.bf16.mxu0 %v14928_v28  ;;  %v5107_v57 = vld [vmem:[#allocation23 + $0xb18] sm:$0xff]  ;;  %v14976_v26 = vcombine.high %v5106_v47, %v5110_v4 }
 0x827   :  { %8480 = vmatprep.subr.bf16.mxu1 %v14930_v17  ;;  %v5111_v28 = vld [vmem:[#allocation23 + $0xb38] sm:$0xff]  ;;  %v14967_v17 = vcombine.low %v5098_v36, %v5102_v39 }
 0x828   :  { %v14978_v25 = vcombine.high %v5107_v57, %v5111_v28  ;;  %v14977_v6 = vcombine.low %v5107_v57, %v5111_v28  ;;  %v5154_v57 = vld [vmem:[#allocation23 + $0xc90] sm:$0xff] }
 0x829   :  { %8309 = vmatpush1.bf16.msra.mxu0 %v14927_v42  ;;  %v5118_v42 = vld [vmem:[#allocation23 + $0xb70] sm:$0xff] }
 0x82a   :  { %8481 = vmatpush1.bf16.msra.mxu1 %v14929_v61  ;;  %8310 = vmatprep.subr.bf16.mxu0 %v14936_v0  ;;  %v5115_v61 = vld [vmem:[#allocation23 + $0xb58] sm:$0xff]  ;;  %v14984_v7 = vcombine.high %v5114_v37, %v5118_v42  ;;  %v5158_v28 = vld [vmem:[#allocation23 + $0xcb0] sm:$0xff] }
 0x82b   :  { %8482 = vmatprep.subr.bf16.mxu1 %v14938_v5  ;;  %v5119_v0 = vld [vmem:[#allocation23 + $0xb78] sm:$0xff]  ;;  %v14975_v5 = vcombine.low %v5106_v47, %v5110_v4 }
 0x82c   :  { %v14986_v8 = vcombine.high %v5115_v61, %v5119_v0  ;;  %v14985_v16 = vcombine.low %v5115_v61, %v5119_v0  ;;  %v5162_v0 = vld [vmem:[#allocation23 + $0xcd0] sm:$0xff] }
 0x82d   :  { %8311 = vmatpush1.bf16.msra.mxu0 %v14935_v10  ;;  %v5126_v10 = vld [vmem:[#allocation23 + $0xbb0] sm:$0xff] }
 0x82e   :  { %8483 = vmatpush1.bf16.msra.mxu1 %v14937_v11  ;;  %8312 = vmatprep.subr.bf16.mxu0 %v14944_v12  ;;  %v5123_v11 = vld [vmem:[#allocation23 + $0xb98] sm:$0xff]  ;;  %v14992_v20 = vcombine.high %v5122_v9, %v5126_v10 }
 0x82f   :  { %8484 = vmatprep.subr.bf16.mxu1 %v14946_v15  ;;  %v5127_v12 = vld [vmem:[#allocation23 + $0xbb8] sm:$0xff]  ;;  %v14983_v15 = vcombine.low %v5114_v37, %v5118_v42  ;;  %v15024_v42 = vcombine.high %v5154_v57, %v5158_v28 }
 0x830   :  { %v14994_v41 = vcombine.high %v5123_v11, %v5127_v12  ;;  %v14993_v44 = vcombine.low %v5123_v11, %v5127_v12  ;;  %v5170_v11 = vld [vmem:[#allocation23 + $0xd10] sm:$0xff] }
 0x831   :  { %8313 = vmatpush1.bf16.msra.mxu0 %v14943_v32  ;;  %v5134_v32 = vld [vmem:[#allocation23 + $0xbf0] sm:$0xff] }
 0x832   :  { %8485 = vmatpush1.bf16.msra.mxu1 %v14945_v24  ;;  %8314 = vmatprep.subr.bf16.mxu0 %v14952_v27  ;;  %v5131_v24 = vld [vmem:[#allocation23 + $0xbd8] sm:$0xff]  ;;  %v15000_v46 = vcombine.high %v5130_v21, %v5134_v32  ;;  %v5174_v12 = vld [vmem:[#allocation23 + $0xd30] sm:$0xff] }
 0x833   :  { %8486 = vmatprep.subr.bf16.mxu1 %v14954_v33  ;;  %v5135_v27 = vld [vmem:[#allocation23 + $0xbf8] sm:$0xff]  ;;  %v14991_v33 = vcombine.low %v5122_v9, %v5126_v10 }
 0x834   :  { %v15002_v31 = vcombine.high %v5131_v24, %v5135_v27  ;;  %v15001_v36 = vcombine.low %v5131_v24, %v5135_v27  ;;  %v5182_v24 = vld [vmem:[#allocation23 + $0xd70] sm:$0xff]  ;;  %v5179_v27 = vld [vmem:[#allocation23 + $0xd58] sm:$0xff] }
 0x835   :  { %8315 = vmatpush1.bf16.msra.mxu0 %v14951_v43  ;;  %v5142_v43 = vld [vmem:[#allocation23 + $0xc30] sm:$0xff] }
 0x836   :  { %8487 = vmatpush1.bf16.msra.mxu1 %v14953_v35  ;;  %8316 = vmatprep.subr.bf16.mxu0 %v14960_v48  ;;  %v5139_v35 = vld [vmem:[#allocation23 + $0xc18] sm:$0xff]  ;;  %v15008_v39 = vcombine.high %v5138_v34, %v5142_v43 }
 0x837   :  { %8488 = vmatprep.subr.bf16.mxu1 %v14962_v60  ;;  %v5143_v48 = vld [vmem:[#allocation23 + $0xc38] sm:$0xff]  ;;  %v14999_v60 = vcombine.low %v5130_v21, %v5134_v32  ;;  %v5178_v32 = vld [vmem:[#allocation23 + $0xd50] sm:$0xff] }
 0x838   :  { %v15010_v49 = vcombine.high %v5139_v35, %v5143_v48  ;;  %v15009_v47 = vcombine.low %v5139_v35, %v5143_v48  ;;  %v5186_v35 = vld [vmem:[#allocation23 + $0xd90] sm:$0xff] }
 0x839   :  { %8317 = vmatpush1.bf16.msra.mxu0 %v14959_v52  ;;  %v5150_v52 = vld [vmem:[#allocation23 + $0xc70] sm:$0xff] }
 0x83a   :  { %8489 = vmatpush1.bf16.msra.mxu1 %v14961_v54  ;;  %8318 = vmatprep.subr.bf16.mxu0 %v14968_v55  ;;  %v15007_v54 = vcombine.low %v5138_v34, %v5142_v43  ;;  %v5147_v55 = vld [vmem:[#allocation23 + $0xc58] sm:$0xff]  ;;  %v15016_v4 = vcombine.high %v5146_v30, %v5150_v52  ;;  %v15048_v34 = vcombine.high %v5178_v32, %v5182_v24  ;;  %v5190_v48 = vld [vmem:[#allocation23 + $0xdb0] sm:$0xff] }
 0x83b   :  { %8490 = vmatprep.subr.bf16.mxu1 %v14970_v56  ;;  %v5151_v56 = vld [vmem:[#allocation23 + $0xc78] sm:$0xff] }
 0x83c   :  { %v15017_v37 = vcombine.low %v5147_v55, %v5151_v56 }
 0x83d   :  { %8319 = vmatpush1.bf16.msra.mxu0 %v14967_v17  ;;  %v15018_v17 = vcombine.high %v5147_v55, %v5151_v56  ;;  %v15056_v56 = vcombine.high %v5186_v35, %v5190_v48 }
 0x83e   :  { %8491 = vmatpush1.bf16.msra.mxu1 %v14969_v58  ;;  %8320 = vmatprep.subr.bf16.mxu0 %v14976_v26  ;;  %v5155_v58 = vld [vmem:[#allocation23 + $0xc98] sm:$0xff] }
 0x83f   :  { %8492 = vmatprep.subr.bf16.mxu1 %v14978_v25  ;;  %v5159_v26 = vld [vmem:[#allocation23 + $0xcb8] sm:$0xff]  ;;  %v15015_v25 = vcombine.low %v5146_v30, %v5150_v52  ;;  %v15047_v52 = vcombine.low %v5178_v32, %v5182_v24 }
 0x840   :  { %v15026_v61 = vcombine.high %v5155_v58, %v5159_v26 }
 0x841   :  { %8321 = vmatpush1.bf16.msra.mxu0 %v14975_v5  ;;  %v5166_v5 = vld [vmem:[#allocation23 + $0xcf0] sm:$0xff] }
 0x842   :  { %8493 = vmatpush1.bf16.msra.mxu1 %v14977_v6  ;;  %8322 = vmatprep.subr.bf16.mxu0 %v14984_v7  ;;  %v5163_v6 = vld [vmem:[#allocation23 + $0xcd8] sm:$0xff]  ;;  %v15032_v9 = vcombine.high %v5162_v0, %v5166_v5 }
 0x843   :  { %8494 = vmatprep.subr.bf16.mxu1 %v14986_v8  ;;  %v5167_v7 = vld [vmem:[#allocation23 + $0xcf8] sm:$0xff]  ;;  %v15023_v8 = vcombine.low %v5154_v57, %v5158_v28  ;;  %v5194_v57 = vld [vmem:[#allocation23 + $0xdd0] sm:$0xff] }
 0x844   :  { %v15034_v10 = vcombine.high %v5163_v6, %v5167_v7  ;;  %v5198_v28 = vld [vmem:[#allocation23 + $0xdf0] sm:$0xff] }
 0x845   :  { %8323 = vmatpush1.bf16.msra.mxu0 %v14983_v15  ;;  %v5171_v15 = vld [vmem:[#allocation23 + $0xd18] sm:$0xff] }
 0x846   :  { %8495 = vmatpush1.bf16.msra.mxu1 %v14985_v16  ;;  %8324 = vmatprep.subr.bf16.mxu0 %v14992_v20  ;;  %v5175_v16 = vld [vmem:[#allocation23 + $0xd38] sm:$0xff]  ;;  %v15033_v20 = vcombine.low %v5163_v6, %v5167_v7  ;;  %v15055_v6 = vcombine.low %v5186_v35, %v5190_v48 }
 0x847   :  { %8496 = vmatprep.subr.bf16.mxu1 %v14994_v41  ;;  %v15040_v41 = vcombine.high %v5170_v11, %v5174_v12  ;;  %v15042_v21 = vcombine.high %v5171_v15, %v5175_v16 }
 0x849   :  { %8325 = vmatpush1.bf16.msra.mxu0 %v14991_v33  ;;  %v5183_v33 = vld [vmem:[#allocation23 + $0xd78] sm:$0xff] }
 0x84a   :  { %8497 = vmatpush1.bf16.msra.mxu1 %v14993_v44  ;;  %8326 = vmatprep.subr.bf16.mxu0 %v15000_v46  ;;  %v15039_v44 = vcombine.low %v5170_v11, %v5174_v12  ;;  %v5264_v46 = vld [vmem:[#allocation25] sm:$0xff]  ;;  %v15050_v43 = vcombine.high %v5179_v27, %v5183_v33  ;;  %v15049_v55 = vcombine.low %v5179_v27, %v5183_v33 }
 0x84b   :  { %8498 = vmatprep.subr.bf16.mxu1 %v15002_v31  ;;  %v15041_v31 = vcombine.low %v5171_v15, %v5175_v16  ;;  %v5273_v30 = vrot.slane %v5264_v46, %v17848_v3  ;;  %v15064_v11 = vcombine.high %v5194_v57, %v5198_v28 }
 0x84d   :  { %8327 = vmatpush1.bf16.msra.mxu0 %v14999_v60  ;;  %v5269_v60 = vrot.slane %v5264_v46, %v17845_v2 }
 0x84e   :  { %8499 = vmatpush1.bf16.msra.mxu1 %v15001_v36  ;;  %8339 = vmatprep.subr.bf16.mxu0 %v15008_v39  ;;  %v5187_v36 = vld [vmem:[#allocation23 + $0xd98] sm:$0xff] }
 0x84f   :  { %8511 = vmatprep.subr.bf16.mxu1 %v15010_v49  ;;  %v5191_v39 = vld [vmem:[#allocation23 + $0xdb8] sm:$0xff]  ;;  %v5277_v49 = vrot.slane %v5264_v46, %v17872_v62 }
 0x850   :  { %8329 = vmatmul.mubr.bf16.vlgmr.msra.gmra.mrb[48].mxu0 %v18065_v51  ;;  %v15057_v7 = vcombine.low %v5187_v36, %v5191_v39 }
 0x851   :  { %8501 = vmatmul.mubr.bf16.vlgmr.msra.gmra.mrb[36].mxu1 %v18065_v51  ;;  %8340 = vmatpush1.bf16.msra.mxu0 %v15007_v54  ;;  %v15025_v51 = vcombine.low %v5155_v58, %v5159_v26  ;;  %v5281_v54 = vrot.slane %v5264_v46, %v17875_v63  ;;  %v5207_v46 = vld [vmem:[#allocation23 + $0xe38] sm:$0xff] }
 0x852   :  { %8371 = vmatprep.mubr.bf16.mxu0 %v18077_v14  ;;  %8512 = vmatpush1.bf16.msra.mxu1 %v15009_v47 }
 0x853   :  { %8543 = vmatprep.mubr.bf16.mxu1 %v18077_v14  ;;  %8341 = vmatprep.subr.bf16.mxu0 %v15016_v4  ;;  %v15031_v14 = vcombine.low %v5162_v0, %v5166_v5  ;;  %v15058_v4 = vcombine.high %v5187_v36, %v5191_v39 }
 0x854   :  { %8513 = vmatprep.subr.bf16.mxu1 %v15018_v17 }
 0x855   :  { %8342 = vmatpush1.bf16.msra.mxu0 %v15015_v25  ;;  %v5195_v25 = vld [vmem:[#allocation23 + $0xdd8] sm:$0xff] }
 0x856   :  { %8514 = vmatpush1.bf16.msra.mxu1 %v15017_v37  ;;  %8343 = vmatprep.subr.bf16.mxu0 %v15024_v42  ;;  %v5199_v37 = vld [vmem:[#allocation23 + $0xdf8] sm:$0xff] }
 0x857   :  { %8515 = vmatprep.subr.bf16.mxu1 %v15026_v61  ;;  %v15065_v33 = vcombine.low %v5195_v25, %v5199_v37 }
 0x859   :  { %8344 = vmatpush1.bf16.msra.mxu0 %v15023_v8 }
 0x85a   :  { %8516 = vmatpush1.bf16.msra.mxu1 %v15025_v51  ;;  %8345 = vmatprep.subr.bf16.mxu0 %v15032_v9 }
 0x85b   :  { %8517 = vmatprep.subr.bf16.mxu1 %v15034_v10 }
 0x85d   :  { %8346 = vmatpush1.bf16.msra.mxu0 %v15031_v14  ;;  %v15063_v14 = vcombine.low %v5194_v57, %v5198_v28 }
 0x85e   :  { %8518 = vmatpush1.bf16.msra.mxu1 %v15033_v20  ;;  %8347 = vmatprep.subr.bf16.mxu0 %v15040_v41  ;;  %v15066_v20 = vcombine.high %v5195_v25, %v5199_v37  ;;  %v5202_v41 = vld [vmem:[#allocation23 + $0xe10] sm:$0xff]  ;;  %v5219_v37 = vld [vmem:[#allocation23 + $0xe98] sm:$0xff] }
 0x85f   :  { %8519 = vmatprep.subr.bf16.mxu1 %v15042_v21  ;;  %v5206_v21 = vld [vmem:[#allocation23 + $0xe30] sm:$0xff] }
 0x860   :  { %v15072_v39 = vcombine.high %v5202_v41, %v5206_v21  ;;  %v15071_v57 = vcombine.low %v5202_v41, %v5206_v21  ;;  %v5222_v25 = vld [vmem:[#allocation23 + $0xeb0] sm:$0xff]  ;;  %v5239_v41 = vld [vmem:[#allocation23 + $0xf38] sm:$0xff] }
 0x861   :  { %8348 = vmatpush1.bf16.msra.mxu0 %v15039_v44  ;;  %v5203_v44 = vld [vmem:[#allocation23 + $0xe18] sm:$0xff] }
 0x862   :  { %8520 = vmatpush1.bf16.msra.mxu1 %v15041_v31  ;;  %8349 = vmatprep.subr.bf16.mxu0 %v15048_v34  ;;  %v15073_v28 = vcombine.low %v5203_v44, %v5207_v46 }
 0x863   :  { %v8029_v47 = vpop.f32.mrb[44].mxu0  ;;  %8521 = vmatprep.subr.bf16.mxu1 %v15050_v43 }
 0x864   :  { %v15954_v17 = vadd.f32 %v8029_v47, %v5269_v60  ;;  %v8201_v58 = vpop.f32.mrb[32].mxu1  ;;  %v8031_v26 = vpop.f32.mrb[45].mxu0  ;;  %v5211_v47 = vld [vmem:[#allocation23 + $0xe58] sm:$0xff] }
 0x865   :  { %v15958_v42 = vadd.f32 %v8201_v58, %v5277_v49  ;;  %v15955_v61 = vadd.f32 %v8031_v26, %v5273_v30  ;;  %v8203_v0 = vpop.f32.mrb[33].mxu1  ;;  %v8033_v5 = vpop.f32.mrb[46].mxu0  ;;  %8350 = vmatpush1.bf16.msra.mxu0 %v15047_v52  ;;  %v15074_v52 = vcombine.high %v5203_v44, %v5207_v46  ;;  %v5218_v26 = vld [vmem:[#allocation23 + $0xe90] sm:$0xff]  ;;  %v5243_v46 = vld [vmem:[#allocation23 + $0xf58] sm:$0xff] }
 0x866   :  { %v15959_v8 = vadd.f32 %v8203_v0, %v5281_v54  ;;  %v15956_v51 = vadd.f32 %v8033_v5, %v5269_v60  ;;  %v8205_v9 = vpop.f32.mrb[34].mxu1  ;;  %8522 = vmatpush1.bf16.msra.mxu1 %v15049_v55  ;;  %v8035_v10 = vpop.f32.mrb[47].mxu0  ;;  %8351 = vmatprep.subr.bf16.mxu0 %v15056_v56  ;;  %v8554_v32 = vmax.f32 %v15954_v17, 0.0  ;;  %v5214_v55 = vld [vmem:[#allocation23 + $0xe70] sm:$0xff]  ;;  %v15088_v5 = vcombine.high %v5218_v26, %v5222_v25 }
 0x867   :  { %v15960_v12 = vadd.f32 %v8205_v9, %v5277_v49  ;;  %v15957_v15 = vadd.f32 %v8035_v10, %v5273_v30  ;;  %v8207_v16 = vpop.f32.mrb[35].mxu1  ;;  %8523 = vmatprep.subr.bf16.mxu1 %v15058_v4  ;;  %v8556_v31 = vmax.f32 %v15958_v42, 0.0  ;;  %v8555_v34 = vmax.f32 %v15955_v61, 0.0  ;;  %v5215_v4 = vld [vmem:[#allocation23 + $0xe78] sm:$0xff]  ;;  %v5246_v44 = vld [vmem:[#allocation23 + $0xf70] sm:$0xff] }
 0x868   :  { %v8562_v24 = vmax.f32 %v15956_v51, 0.0  ;;  %v15961_v27 = vadd.f32 %v8207_v16, %v5281_v54  ;;  %v8557_v48 = vmax.f32 %v15959_v8, 0.0  ;;  %v5210_v54 = vld [vmem:[#allocation23 + $0xe50] sm:$0xff]  ;;  %v15082_v58 = vcombine.high %v5211_v47, %v5215_v4  ;;  %v5223_v42 = vld [vmem:[#allocation23 + $0xeb8] sm:$0xff] }
 0x869   :  { %v8564_v43 = vmax.f32 %v15960_v12, 0.0  ;;  %v8563_v35 = vmax.f32 %v15957_v15, 0.0  ;;  %8352 = vmatpush1.bf16.msra.mxu0 %v15055_v6  ;;  %v15080_v17 = vcombine.high %v5210_v54, %v5214_v55  ;;  %v15079_v61 = vcombine.low %v5210_v54, %v5214_v55  ;;  %v5230_v8 = vld [vmem:[#allocation23 + $0xef0] sm:$0xff]  ;;  %v5227_v51 = vld [vmem:[#allocation23 + $0xed8] sm:$0xff] }
 0x86a   :  { %v18135_v60 = vpack.c.bf16 %v8562_v24, %v8554_v32  ;;  %v8565_v36 = vmax.f32 %v15961_v27, 0.0  ;;  %8524 = vmatpush1.bf16.msra.mxu1 %v15057_v7  ;;  %8353 = vmatprep.subr.bf16.mxu0 %v15064_v11  ;;  %v15081_v0 = vcombine.low %v5211_v47, %v5215_v4  ;;  %v15090_v6 = vcombine.high %v5219_v37, %v5223_v42  ;;  %v5226_v7 = vld [vmem:[#allocation23 + $0xed0] sm:$0xff]  ;;  %v5231_v9 = vld [vmem:[#allocation23 + $0xef8] sm:$0xff] }
 0x86b   :  { %v18137_v49 = vpack.c.bf16 %v8564_v43, %v8556_v31  ;;  %v18139_v30 = vpack.c.bf16 %v8563_v35, %v8555_v34  ;;  %8525 = vmatprep.subr.bf16.mxu1 %v15066_v20  ;;  %v15087_v10 = vcombine.low %v5218_v26, %v5222_v25  ;;  %v15089_v11 = vcombine.low %v5219_v37, %v5223_v42  ;;  %v5234_v16 = vld [vmem:[#allocation23 + $0xf10] sm:$0xff]  ;;  %v5235_v20 = vld [vmem:[#allocation23 + $0xf18] sm:$0xff] }
 0x86c   :  { %v18141_v56 = vpack.c.bf16 %v8565_v36, %v8557_v48  ;;  %v15096_v12 = vcombine.high %v5226_v7, %v5230_v8  ;;  %v15098_v15 = vcombine.high %v5227_v51, %v5231_v9  ;;  %v15095_v21 = vcombine.low %v5226_v7, %v5230_v8  ;;  %v5247_v31 = vld [vmem:[#allocation23 + $0xf78] sm:$0xff]  ;;  %v5250_v36 = vld [vmem:[#allocation23 + $0xf90] sm:$0xff] }
 0x86d   :  { %8354 = vmatpush1.bf16.msra.mxu0 %v15063_v14  ;;  %v5238_v14 = vld [vmem:[#allocation23 + $0xf30] sm:$0xff]  ;;  %v15097_v32 = vcombine.low %v5227_v51, %v5231_v9  ;;  %v15106_v27 = vcombine.high %v5235_v20, %v5239_v41  ;;  %v15105_v43 = vcombine.low %v5235_v20, %v5239_v41  ;;  %v15114_v48 = vcombine.high %v5243_v46, %v5247_v31  ;;  %v5255_v54 = vld [vmem:[#allocation23 + $0xfb8] sm:$0xff] }
 0x86e   :  { %8526 = vmatpush1.bf16.msra.mxu1 %v15065_v33  ;;  %8355 = vmatprep.subr.bf16.mxu0 %v15072_v39  ;;  %v15104_v24 = vcombine.high %v5234_v16, %v5238_v14  ;;  %v5242_v33 = vld [vmem:[#allocation23 + $0xf50] sm:$0xff]  ;;  %v15103_v34 = vcombine.low %v5234_v16, %v5238_v14  ;;  %v15113_v47 = vcombine.low %v5243_v46, %v5247_v31  ;;  %v5263_v26 = vld [vmem:[#allocation23 + $0xff8] sm:$0xff] }
 0x86f   :  { %8527 = vmatprep.subr.bf16.mxu1 %v15074_v52  ;;  %v15112_v35 = vcombine.high %v5242_v33, %v5246_v44  ;;  %v5254_v39 = vld [vmem:[#allocation23 + $0xfb0] sm:$0xff]  ;;  %v5251_v52 = vld [vmem:[#allocation23 + $0xf98] sm:$0xff]  ;;  %v15111_v55 = vcombine.low %v5242_v33, %v5246_v44 }
 0x870   :  { %v15120_v4 = vcombine.high %v5250_v36, %v5254_v39  ;;  %v15119_v25 = vcombine.low %v5250_v36, %v5254_v39  ;;  %v15121_v37 = vcombine.low %v5251_v52, %v5255_v54  ;;  %v16562_v8 = vld [vmem:[#allocation26 + $0x4] ss:$8 sps:$4 sm:$0xff]   ;;  %v16560_v9 = vld [vmem:[#allocation26] ss:$8 sps:$4 sm:$0xff]   ;;  %v16563_v41 = vld [vmem:[#allocation26 + $0x10] ss:$8 sps:$4 sm:$0xff]  }
 0x871   :  { %8356 = vmatpush1.bf16.msra.mxu0 %v15071_v57  ;;  %v15122_v57 = vcombine.high %v5251_v52, %v5255_v54  ;;  %v9558_v14 = vld [vmem:[#allocation29 + $0x80] sm:$0xff] }
 0x872   :  { %8528 = vmatpush1.bf16.msra.mxu1 %v15073_v28  ;;  %8357 = vmatprep.subr.bf16.mxu0 %v15080_v17  ;;  %v5258_v28 = vld [vmem:[#allocation23 + $0xfd0] sm:$0xff] }
 0x873   :  { %8529 = vmatprep.subr.bf16.mxu1 %v15082_v58  ;;  %v5262_v17 = vld [vmem:[#allocation23 + $0xff0] sm:$0xff]  ;;  %v5259_v58 = vld [vmem:[#allocation23 + $0xfd8] sm:$0xff] }
 0x874   :  { %v15128_v42 = vcombine.high %v5258_v28, %v5262_v17  ;;  %v15129_v7 = vcombine.low %v5259_v58, %v5263_v26  ;;  %v9562_v20 = vld [vmem:[#allocation29 + $0xa0] sm:$0xff] }
 0x875   :  { %8358 = vmatpush1.bf16.msra.mxu0 %v15079_v61  ;;  %v15130_v61 = vcombine.high %v5259_v58, %v5263_v26  ;;  %v9570_v33 = vld [vmem:[#allocation29 + $0xe0] sm:$0xff]  ;;  %v15275_v46 = vcombine.low %v9558_v14, %v9562_v20 }
 0x876   :  { %8530 = vmatpush1.bf16.msra.mxu1 %v15081_v0  ;;  %8359 = vmatprep.subr.bf16.mxu0 %v15088_v5  ;;  %v9542_v0 = vld [vmem:[#allocation29] sm:$0xff] }
 0x877   :  { %8531 = vmatprep.subr.bf16.mxu1 %v15090_v6  ;;  %v9546_v5 = vld [vmem:[#allocation29 + $0x20] sm:$0xff]  ;;  %v15127_v6 = vcombine.low %v5258_v28, %v5262_v17  ;;  %v16575_v17 = vld [vmem:[#allocation26 + $0x50] ss:$8 sps:$4 sm:$0xff]  }
 0x878   :  { %v15260_v51 = vcombine.high %v9542_v0, %v9546_v5  ;;  %v16566_v44 = vld [vmem:[#allocation26 + $0x20] ss:$8 sps:$4 sm:$0xff]   ;;  %v16580_v26 = vld [vmem:[#allocation26 + $0x64] ss:$8 sps:$4 sm:$0xff]  }
 0x879   :  { %8360 = vmatpush1.bf16.msra.mxu0 %v15087_v10  ;;  %v9550_v10 = vld [vmem:[#allocation29 + $0x40] sm:$0xff] }
 0x87a   :  { %8532 = vmatpush1.bf16.msra.mxu1 %v15089_v11  ;;  %8361 = vmatprep.subr.bf16.mxu0 %v15096_v12  ;;  %v9554_v11 = vld [vmem:[#allocation29 + $0x60] sm:$0xff]  ;;  %v15259_v12 = vcombine.low %v9542_v0, %v9546_v5  ;;  %v16583_v5 = vld [vmem:[#allocation26 + $0x74] ss:$8 sps:$4 sm:$0xff]  }
 0x87b   :  { %8533 = vmatprep.subr.bf16.mxu1 %v15098_v15  ;;  %v16565_v15 = vld [vmem:[#allocation26 + $0x14] ss:$8 sps:$4 sm:$0xff]   ;;  %v15268_v16 = vcombine.high %v9550_v10, %v9554_v11  ;;  %v9582_v39 = vld [vmem:[#allocation29 + $0x140] sm:$0xff] }
 0x87c   :  { %v9586_v52 = vld [vmem:[#allocation29 + $0x160] sm:$0xff] }
 0x87d   :  { %8362 = vmatpush1.bf16.msra.mxu0 %v15095_v21  ;;  %v15267_v21 = vcombine.low %v9550_v10, %v9554_v11  ;;  %v16572_v54 = vld [vmem:[#allocation26 + $0x40] ss:$8 sps:$4 sm:$0xff]   ;;  %v15299_v58 = vcombine.low %v9582_v39, %v9586_v52  ;;  %v16586_v10 = vld [vmem:[#allocation26 + $0x84] ss:$8 sps:$4 sm:$0xff]  }
 0x87e   :  { %8534 = vmatpush1.bf16.msra.mxu1 %v15097_v32  ;;  %8363 = vmatprep.subr.bf16.mxu0 %v15104_v24  ;;  %v16568_v32 = vld [vmem:[#allocation26 + $0x24] ss:$8 sps:$4 sm:$0xff]   ;;  %v15276_v24 = vcombine.high %v9558_v14, %v9562_v20  ;;  %v16589_v20 = vld [vmem:[#allocation26 + $0x94] ss:$8 sps:$4 sm:$0xff]  }
 0x87f   :  { %8535 = vmatprep.subr.bf16.mxu1 %v15106_v27  ;;  %v9566_v27 = vld [vmem:[#allocation29 + $0xc0] sm:$0xff] }
 0x880   :  { %v15284_v31 = vcombine.high %v9566_v27, %v9570_v33  ;;  %v9594_v28 = vld [vmem:[#allocation29 + $0x1a0] sm:$0xff] }
 0x881   :  { %8364 = vmatpush1.bf16.msra.mxu0 %v15103_v34  ;;  %v9574_v34 = vld [vmem:[#allocation29 + $0x100] sm:$0xff] }
 0x882   :  { %8536 = vmatpush1.bf16.msra.mxu1 %v15105_v43  ;;  %8365 = vmatprep.subr.bf16.mxu0 %v15112_v35  ;;  %v16569_v43 = vld [vmem:[#allocation26 + $0x30] ss:$8 sps:$4 sm:$0xff]   ;;  %v15283_v35 = vcombine.low %v9566_v27, %v9570_v33  ;;  %v16592_v33 = vld [vmem:[#allocation26 + $0xa4] ss:$8 sps:$4 sm:$0xff]  }
 0x883   :  { %8537 = vmatprep.subr.bf16.mxu1 %v15114_v48  ;;  %v16574_v48 = vld [vmem:[#allocation26 + $0x44] ss:$8 sps:$4 sm:$0xff]  }
 0x885   :  { %8366 = vmatpush1.bf16.msra.mxu0 %v15111_v55 }
 0x886   :  { %8538 = vmatpush1.bf16.msra.mxu1 %v15113_v47  ;;  %8367 = vmatprep.subr.bf16.mxu0 %v15120_v4  ;;  %v16577_v47 = vld [vmem:[#allocation26 + $0x54] ss:$8 sps:$4 sm:$0xff]   ;;  %v15300_v4 = vcombine.high %v9582_v39, %v9586_v52  ;;  %v16598_v52 = vld [vmem:[#allocation26 + $0xc4] ss:$8 sps:$4 sm:$0xff]  }
 0x887   :  { %8539 = vmatprep.subr.bf16.mxu1 %v15122_v57  ;;  %v9590_v57 = vld [vmem:[#allocation29 + $0x180] sm:$0xff] }
 0x888   :  { %v15307_v0 = vcombine.low %v9590_v57, %v9594_v28 }
 0x889   :  { %8368 = vmatpush1.bf16.msra.mxu0 %v15119_v25  ;;  %v15308_v25 = vcombine.high %v9590_v57, %v9594_v28  ;;  %v16601_v28 = vld [vmem:[#allocation26 + $0xd4] ss:$8 sps:$4 sm:$0xff]  }
 0x88a   :  { %8540 = vmatpush1.bf16.msra.mxu1 %v15121_v37  ;;  %8369 = vmatprep.subr.bf16.mxu0 %v15128_v42  ;;  %v9598_v37 = vld [vmem:[#allocation29 + $0x1c0] sm:$0xff] }
 0x88b   :  { %8541 = vmatprep.subr.bf16.mxu1 %v15130_v61  ;;  %v9602_v42 = vld [vmem:[#allocation29 + $0x1e0] sm:$0xff] }
 0x88c   :  { %v16578_v61 = vld [vmem:[#allocation26 + $0x60] ss:$8 sps:$4 sm:$0xff]  }
 0x88d   :  { %8370 = vmatpush1.bf16.msra.mxu0 %v15127_v6  ;;  %v15316_v6 = vcombine.high %v9598_v37, %v9602_v42 }
 0x88e   :  { %8542 = vmatpush1.bf16.msra.mxu1 %v15129_v7  ;;  %9358 = vmatprep.subr.bf16.mxu0 %v16562_v8  ;;  %v9606_v7 = vld [vmem:[#allocation29 + $0x200] sm:$0xff] }
 0x88f   :  { %12656 = vmatprep.subr.bf16.mxu1 %v15260_v51  ;;  %v9610_v8 = vld [vmem:[#allocation29 + $0x220] sm:$0xff]  ;;  %v16581_v51 = vld [vmem:[#allocation26 + $0x70] ss:$8 sps:$4 sm:$0xff]  }
 0x890   :  { %8372 = vmatmul.mubr.bf16.vlgmr.msra.gmra.mrb[48].mxu0 %v18075_v13  ;;  %v15324_v11 = vcombine.high %v9606_v7, %v9610_v8  ;;  %v15323_v14 = vcombine.low %v9606_v7, %v9610_v8  ;;  %v16607_v8 = vld [vmem:[#allocation26 + $0xf4] ss:$8 sps:$4 sm:$0xff]  }
 0x891   :  { %8544 = vmatmul.mubr.bf16.vlgmr.msra.gmra.mrb[36].mxu1 %v18075_v13  ;;  %9359 = vmatpush1.bf16.msra.mxu0 %v16560_v9  ;;  %v16571_v13 = vld [vmem:[#allocation26 + $0x34] ss:$8 sps:$4 sm:$0xff]   ;;  %v15315_v9 = vcombine.low %v9598_v37, %v9602_v42  ;;  %v16604_v42 = vld [vmem:[#allocation26 + $0xe4] ss:$8 sps:$4 sm:$0xff]  }
 0x892   :  { %9390 = vmatprep.mubr.bf16.mxu0 %v18139_v30  ;;  %12657 = vmatpush1.bf16.msra.mxu1 %v15259_v12  ;;  %v9578_v30 = vld [vmem:[#allocation29 + $0x120] sm:$0xff] }
 0x893   :  { %12688 = vmatprep.mubr.bf16.mxu1 %v18085_v59  ;;  %9360 = vmatprep.subr.bf16.mxu0 %v16565_v15  ;;  %v15292_v36 = vcombine.high %v9574_v34, %v9578_v30  ;;  %v15291_v55 = vcombine.low %v9574_v34, %v9578_v30  ;;  %v9614_v12 = vld [vmem:[#allocation29 + $0x240] sm:$0xff]  ;;  %v16595_v30 = vld [vmem:[#allocation26 + $0xb4] ss:$8 sps:$4 sm:$0xff]  }
 0x894   :  { %12658 = vmatprep.subr.bf16.mxu1 %v15268_v16  ;;  %v9618_v15 = vld [vmem:[#allocation29 + $0x260] sm:$0xff] }
 0x895   :  { %9361 = vmatpush1.bf16.msra.mxu0 %v16563_v41  ;;  %v16584_v16 = vld [vmem:[#allocation26 + $0x80] ss:$8 sps:$4 sm:$0xff]   ;;  %v15332_v41 = vcombine.high %v9614_v12, %v9618_v15  ;;  %v15331_v27 = vcombine.low %v9614_v12, %v9618_v15  ;;  %v16610_v15 = vld [vmem:[#allocation26 + $0x104] ss:$8 sps:$4 sm:$0xff]  }
 0x896   :  { %12659 = vmatpush1.bf16.msra.mxu1 %v15267_v21  ;;  %9362 = vmatprep.subr.bf16.mxu0 %v16568_v32  ;;  %v9622_v21 = vld [vmem:[#allocation29 + $0x280] sm:$0xff] }
 0x897   :  { %12660 = vmatprep.subr.bf16.mxu1 %v15276_v24  ;;  %v9626_v32 = vld [vmem:[#allocation29 + $0x2a0] sm:$0xff]  ;;  %v16587_v24 = vld [vmem:[#allocation26 + $0x90] ss:$8 sps:$4 sm:$0xff]  }
 0x898   :  { %v15339_v34 = vcombine.low %v9622_v21, %v9626_v32 }
 0x899   :  { %9363 = vmatpush1.bf16.msra.mxu0 %v16566_v44  ;;  %v15340_v44 = vcombine.high %v9622_v21, %v9626_v32  ;;  %v16613_v32 = vld [vmem:[#allocation26 + $0x114] ss:$8 sps:$4 sm:$0xff]  }
 0x89a   :  { %12661 = vmatpush1.bf16.msra.mxu1 %v15275_v46  ;;  %9364 = vmatprep.subr.bf16.mxu0 %v16571_v13  ;;  %v9630_v46 = vld [vmem:[#allocation29 + $0x2c0] sm:$0xff] }
 0x89b   :  { %12662 = vmatprep.subr.bf16.mxu1 %v15284_v31  ;;  %v9634_v13 = vld [vmem:[#allocation29 + $0x2e0] sm:$0xff] }
 0x89c   :  { %v16590_v31 = vld [vmem:[#allocation26 + $0xa0] ss:$8 sps:$4 sm:$0xff]   ;;  %v15347_v39 = vcombine.low %v9630_v46, %v9634_v13 }
 0x89d   :  { %9365 = vmatpush1.bf16.msra.mxu0 %v16569_v43  ;;  %v15348_v43 = vcombine.high %v9630_v46, %v9634_v13  ;;  %v16616_v13 = vld [vmem:[#allocation26 + $0x124] ss:$8 sps:$4 sm:$0xff]  }
 0x89e   :  { %12663 = vmatpush1.bf16.msra.mxu1 %v15283_v35  ;;  %9366 = vmatprep.subr.bf16.mxu0 %v16574_v48  ;;  %v9638_v35 = vld [vmem:[#allocation29 + $0x300] sm:$0xff] }
 0x89f   :  { %12664 = vmatprep.subr.bf16.mxu1 %v15292_v36  ;;  %v9642_v48 = vld [vmem:[#allocation29 + $0x320] sm:$0xff]  ;;  %v16593_v36 = vld [vmem:[#allocation26 + $0xb0] ss:$8 sps:$4 sm:$0xff]  }
 0x8a0   :  { %v15355_v57 = vcombine.low %v9638_v35, %v9642_v48 }
 0x8a1   :  { %9367 = vmatpush1.bf16.msra.mxu0 %v16572_v54  ;;  %v15356_v54 = vcombine.high %v9638_v35, %v9642_v48  ;;  %v16619_v35 = vld [vmem:[#allocation26 + $0x134] ss:$8 sps:$4 sm:$0xff]  }
 0x8a2   :  { %12665 = vmatpush1.bf16.msra.mxu1 %v15291_v55  ;;  %9368 = vmatprep.subr.bf16.mxu0 %v16577_v47  ;;  %v9646_v55 = vld [vmem:[#allocation29 + $0x340] sm:$0xff] }
 0x8a3   :  { %12666 = vmatprep.subr.bf16.mxu1 %v15300_v4  ;;  %v9650_v47 = vld [vmem:[#allocation29 + $0x360] sm:$0xff] }
 0x8a4   :  { %v16596_v4 = vld [vmem:[#allocation26 + $0xc0] ss:$8 sps:$4 sm:$0xff]   ;;  %v15363_v37 = vcombine.low %v9646_v55, %v9650_v47 }
 0x8a5   :  { %9369 = vmatpush1.bf16.msra.mxu0 %v16575_v17  ;;  %v15364_v17 = vcombine.high %v9646_v55, %v9650_v47  ;;  %v9710_v47 = vld [vmem:[#allocation29 + $0x540] sm:$0xff] }
 0x8a6   :  { %12667 = vmatpush1.bf16.msra.mxu1 %v15299_v58  ;;  %9370 = vmatprep.subr.bf16.mxu0 %v16580_v26  ;;  %v9654_v58 = vld [vmem:[#allocation29 + $0x380] sm:$0xff] }
 0x8a7   :  { %12668 = vmatprep.subr.bf16.mxu1 %v15308_v25  ;;  %v9658_v26 = vld [vmem:[#allocation29 + $0x3a0] sm:$0xff]  ;;  %v16599_v25 = vld [vmem:[#allocation26 + $0xd0] ss:$8 sps:$4 sm:$0xff]  }
 0x8a8   :  { %v15371_v7 = vcombine.low %v9654_v58, %v9658_v26 }
 0x8a9   :  { %9371 = vmatpush1.bf16.msra.mxu0 %v16578_v61  ;;  %v15372_v61 = vcombine.high %v9654_v58, %v9658_v26  ;;  %v9718_v26 = vld [vmem:[#allocation29 + $0x580] sm:$0xff] }
 0x8aa   :  { %12669 = vmatpush1.bf16.msra.mxu1 %v15307_v0  ;;  %9372 = vmatprep.subr.bf16.mxu0 %v16583_v5  ;;  %v9662_v0 = vld [vmem:[#allocation29 + $0x3c0] sm:$0xff] }
 0x8ab   :  { %12670 = vmatprep.subr.bf16.mxu1 %v15316_v6  ;;  %v9666_v5 = vld [vmem:[#allocation29 + $0x3e0] sm:$0xff] }
 0x8ac   :  { %v16602_v6 = vld [vmem:[#allocation26 + $0xe0] ss:$8 sps:$4 sm:$0xff]   ;;  %v15379_v12 = vcombine.low %v9662_v0, %v9666_v5 }
 0x8ad   :  { %9373 = vmatpush1.bf16.msra.mxu0 %v16581_v51  ;;  %v15380_v51 = vcombine.high %v9662_v0, %v9666_v5  ;;  %v9726_v5 = vld [vmem:[#allocation29 + $0x5c0] sm:$0xff] }
 0x8ae   :  { %12671 = vmatpush1.bf16.msra.mxu1 %v15315_v9  ;;  %9374 = vmatprep.subr.bf16.mxu0 %v16586_v10  ;;  %v9670_v9 = vld [vmem:[#allocation29 + $0x400] sm:$0xff] }
 0x8af   :  { %12672 = vmatprep.subr.bf16.mxu1 %v15324_v11  ;;  %v9674_v10 = vld [vmem:[#allocation29 + $0x420] sm:$0xff]  ;;  %v16605_v11 = vld [vmem:[#allocation26 + $0xf0] ss:$8 sps:$4 sm:$0xff]  }
 0x8b0   :  { %v15387_v21 = vcombine.low %v9670_v9, %v9674_v10 }
 0x8b1   :  { %9375 = vmatpush1.bf16.msra.mxu0 %v16584_v16  ;;  %v15388_v16 = vcombine.high %v9670_v9, %v9674_v10  ;;  %v9734_v10 = vld [vmem:[#allocation29 + $0x600] sm:$0xff] }
 0x8b2   :  { %12673 = vmatpush1.bf16.msra.mxu1 %v15323_v14  ;;  %9376 = vmatprep.subr.bf16.mxu0 %v16589_v20  ;;  %v16608_v14 = vld [vmem:[#allocation26 + $0x100] ss:$8 sps:$4 sm:$0xff]  }
 0x8b3   :  { %12674 = vmatprep.subr.bf16.mxu1 %v15332_v41  ;;  %v9678_v20 = vld [vmem:[#allocation29 + $0x440] sm:$0xff] }
 0x8b4   :  { %v9682_v41 = vld [vmem:[#allocation29 + $0x460] sm:$0xff] }
 0x8b5   :  { %9377 = vmatpush1.bf16.msra.mxu0 %v16587_v24  ;;  %v15396_v24 = vcombine.high %v9678_v20, %v9682_v41  ;;  %v15395_v46 = vcombine.low %v9678_v20, %v9682_v41  ;;  %v9742_v20 = vld [vmem:[#allocation29 + $0x640] sm:$0xff] }
 0x8b6   :  { %12675 = vmatpush1.bf16.msra.mxu1 %v15331_v27  ;;  %9378 = vmatprep.subr.bf16.mxu0 %v16592_v33  ;;  %v9686_v27 = vld [vmem:[#allocation29 + $0x480] sm:$0xff] }
 0x8b7   :  { %12676 = vmatprep.subr.bf16.mxu1 %v15340_v44  ;;  %v9690_v33 = vld [vmem:[#allocation29 + $0x4a0] sm:$0xff]  ;;  %v16611_v44 = vld [vmem:[#allocation26 + $0x110] ss:$8 sps:$4 sm:$0xff]  }
 0x8b8   :  { %v9746_v41 = vld [vmem:[#allocation29 + $0x660] sm:$0xff] }
 0x8b9   :  { %9379 = vmatpush1.bf16.msra.mxu0 %v16590_v31  ;;  %v15404_v31 = vcombine.high %v9686_v27, %v9690_v33 }
 0x8ba   :  { %12677 = vmatpush1.bf16.msra.mxu1 %v15339_v34  ;;  %9380 = vmatprep.subr.bf16.mxu0 %v16595_v30  ;;  %v9694_v34 = vld [vmem:[#allocation29 + $0x4c0] sm:$0xff] }
 0x8bb   :  { %12678 = vmatprep.subr.bf16.mxu1 %v15348_v43  ;;  %v9698_v30 = vld [vmem:[#allocation29 + $0x4e0] sm:$0xff]  ;;  %v15403_v43 = vcombine.low %v9686_v27, %v9690_v33  ;;  %v15460_v27 = vcombine.high %v9742_v20, %v9746_v41 }
 0x8bc   :  { %v15412_v48 = vcombine.high %v9694_v34, %v9698_v30  ;;  %v9750_v33 = vld [vmem:[#allocation29 + $0x680] sm:$0xff] }
 0x8bd   :  { %9381 = vmatpush1.bf16.msra.mxu0 %v16593_v36  ;;  %v9702_v36 = vld [vmem:[#allocation29 + $0x500] sm:$0xff] }
 0x8be   :  { %12679 = vmatpush1.bf16.msra.mxu1 %v15347_v39  ;;  %9382 = vmatprep.subr.bf16.mxu0 %v16598_v52  ;;  %v16617_v39 = vld [vmem:[#allocation26 + $0x130] ss:$8 sps:$4 sm:$0xff]   ;;  %v15411_v52 = vcombine.low %v9694_v34, %v9698_v30  ;;  %v9758_v30 = vld [vmem:[#allocation29 + $0x6c0] sm:$0xff] }
 0x8bf   :  { %12680 = vmatprep.subr.bf16.mxu1 %v15356_v54  ;;  %v16622_v54 = vld [vmem:[#allocation26 + $0x144] ss:$8 sps:$4 sm:$0xff]  }
 0x8c1   :  { %9383 = vmatpush1.bf16.msra.mxu0 %v16596_v4  ;;  %v9714_v4 = vld [vmem:[#allocation29 + $0x560] sm:$0xff] }
 0x8c2   :  { %12681 = vmatpush1.bf16.msra.mxu1 %v15355_v57  ;;  %9384 = vmatprep.subr.bf16.mxu0 %v16601_v28  ;;  %v16620_v57 = vld [vmem:[#allocation26 + $0x140] ss:$8 sps:$4 sm:$0xff]   ;;  %v15428_v58 = vcombine.high %v9710_v47, %v9714_v4 }
 0x8c3   :  { %12682 = vmatprep.subr.bf16.mxu1 %v15364_v17  ;;  %v16625_v17 = vld [vmem:[#allocation26 + $0x154] ss:$8 sps:$4 sm:$0xff]  }
 0x8c5   :  { %9385 = vmatpush1.bf16.msra.mxu0 %v16599_v25  ;;  %v9722_v25 = vld [vmem:[#allocation29 + $0x5a0] sm:$0xff] }
 0x8c6   :  { %12683 = vmatpush1.bf16.msra.mxu1 %v15363_v37  ;;  %9386 = vmatprep.subr.bf16.mxu0 %v16604_v42  ;;  %v16623_v37 = vld [vmem:[#allocation26 + $0x150] ss:$8 sps:$4 sm:$0xff]   ;;  %v15427_v42 = vcombine.low %v9710_v47, %v9714_v4  ;;  %v15436_v0 = vcombine.high %v9718_v26, %v9722_v25  ;;  %v9774_v4 = vld [vmem:[#allocation29 + $0x740] sm:$0xff] }
 0x8c7   :  { %12684 = vmatprep.subr.bf16.mxu1 %v15372_v61  ;;  %v16628_v61 = vld [vmem:[#allocation26 + $0x164] ss:$8 sps:$4 sm:$0xff]  }
 0x8c9   :  { %9387 = vmatpush1.bf16.msra.mxu0 %v16602_v6  ;;  %v9730_v6 = vld [vmem:[#allocation29 + $0x5e0] sm:$0xff] }
 0x8ca   :  { %12685 = vmatpush1.bf16.msra.mxu1 %v15371_v7  ;;  %9388 = vmatprep.subr.bf16.mxu0 %v16607_v8  ;;  %v16626_v7 = vld [vmem:[#allocation26 + $0x160] ss:$8 sps:$4 sm:$0xff]   ;;  %v15435_v8 = vcombine.low %v9718_v26, %v9722_v25  ;;  %v15444_v9 = vcombine.high %v9726_v5, %v9730_v6 }
 0x8cb   :  { %12686 = vmatprep.subr.bf16.mxu1 %v15380_v51  ;;  %v16631_v51 = vld [vmem:[#allocation26 + $0x174] ss:$8 sps:$4 sm:$0xff]   ;;  %v9782_v25 = vld [vmem:[#allocation29 + $0x780] sm:$0xff] }
 0x8cd   :  { %9389 = vmatpush1.bf16.msra.mxu0 %v16605_v11  ;;  %v9738_v11 = vld [vmem:[#allocation29 + $0x620] sm:$0xff] }
 0x8ce   :  { %12687 = vmatpush1.bf16.msra.mxu1 %v15379_v12  ;;  %9401 = vmatprep.subr.bf16.mxu0 %v16610_v15  ;;  %v16629_v12 = vld [vmem:[#allocation26 + $0x170] ss:$8 sps:$4 sm:$0xff]   ;;  %v15443_v15 = vcombine.low %v9726_v5, %v9730_v6  ;;  %v9790_v6 = vld [vmem:[#allocation29 + $0x7c0] sm:$0xff] }
 0x8cf   :  { %12699 = vmatprep.subr.bf16.mxu1 %v15388_v16  ;;  %v16634_v16 = vld [vmem:[#allocation26 + $0x184] ss:$8 sps:$4 sm:$0xff]  }
 0x8d0   :  { %9391 = vmatmul.mubr.bf16.vlgmr.msra.gmra.mrb[52].mxu0 %v18135_v60  ;;  %v16614_v60 = vld [vmem:[#allocation26 + $0x120] ss:$8 sps:$4 sm:$0xff]  }
 0x8d1   :  { %12689 = vmatmul.mubr.bf16.vlgmr.msra.gmra.mrb[40].mxu1 %v18083_v29  ;;  %9402 = vmatpush1.bf16.msra.mxu0 %v16608_v14  ;;  %v15452_v14 = vcombine.high %v9734_v10, %v9738_v11 }
 0x8d2   :  { %9433 = vmatprep.mubr.bf16.mxu0 %v18141_v56  ;;  %12700 = vmatpush1.bf16.msra.mxu1 %v15387_v21  ;;  %v9706_v56 = vld [vmem:[#allocation29 + $0x520] sm:$0xff] }
 0x8d3   :  { %12731 = vmatprep.mubr.bf16.mxu1 %v18093_v1  ;;  %9403 = vmatprep.subr.bf16.mxu0 %v16613_v32  ;;  %v15420_v55 = vcombine.high %v9702_v36, %v9706_v56  ;;  %v15419_v28 = vcombine.low %v9702_v36, %v9706_v56  ;;  %v16632_v21 = vld [vmem:[#allocation26 + $0x180] ss:$8 sps:$4 sm:$0xff]   ;;  %v15451_v32 = vcombine.low %v9734_v10, %v9738_v11 }
 0x8d4   :  { %12701 = vmatprep.subr.bf16.mxu1 %v15396_v24  ;;  %v16637_v24 = vld [vmem:[#allocation26 + $0x194] ss:$8 sps:$4 sm:$0xff]   ;;  %v9766_v56 = vld [vmem:[#allocation29 + $0x700] sm:$0xff] }
 0x8d5   :  { %9404 = vmatpush1.bf16.msra.mxu0 %v16611_v44  ;;  %v9754_v44 = vld [vmem:[#allocation29 + $0x6a0] sm:$0xff] }
 0x8d6   :  { %12702 = vmatpush1.bf16.msra.mxu1 %v15395_v46  ;;  %9405 = vmatprep.subr.bf16.mxu0 %v16616_v13  ;;  %v16635_v46 = vld [vmem:[#allocation26 + $0x190] ss:$8 sps:$4 sm:$0xff]   ;;  %v15459_v13 = vcombine.low %v9742_v20, %v9746_v41  ;;  %v15468_v34 = vcombine.high %v9750_v33, %v9754_v44  ;;  %v9798_v11 = vld [vmem:[#allocation29 + $0x800] sm:$0xff] }
 0x8d7   :  { %12703 = vmatprep.subr.bf16.mxu1 %v15404_v31  ;;  %v16640_v31 = vld [vmem:[#allocation26 + $0x1a4] ss:$8 sps:$4 sm:$0xff]  }
 0x8d8   :  { %v9806_v41 = vld [vmem:[#allocation29 + $0x840] sm:$0xff] }
 0x8d9   :  { %9406 = vmatpush1.bf16.msra.mxu0 %v16614_v60  ;;  %v9762_v60 = vld [vmem:[#allocation29 + $0x6e0] sm:$0xff] }
 0x8da   :  { %12704 = vmatpush1.bf16.msra.mxu1 %v15403_v43  ;;  %9407 = vmatprep.subr.bf16.mxu0 %v16619_v35  ;;  %v16638_v43 = vld [vmem:[#allocation26 + $0x1a0] ss:$8 sps:$4 sm:$0xff]   ;;  %v15467_v35 = vcombine.low %v9750_v33, %v9754_v44  ;;  %v15476_v36 = vcombine.high %v9758_v30, %v9762_v60  ;;  %v16661_v33 = vld [vmem:[#allocation26 + $0x214] ss:$8 sps:$4 sm:$0xff]  }
 0x8db   :  { %12705 = vmatprep.subr.bf16.mxu1 %v15412_v48  ;;  %v16643_v48 = vld [vmem:[#allocation26 + $0x1b4] ss:$8 sps:$4 sm:$0xff]   ;;  %v9814_v44 = vld [vmem:[#allocation29 + $0x880] sm:$0xff] }
 0x8dd   :  { %9408 = vmatpush1.bf16.msra.mxu0 %v16617_v39  ;;  %v9770_v39 = vld [vmem:[#allocation29 + $0x720] sm:$0xff] }
 0x8de   :  { %12706 = vmatpush1.bf16.msra.mxu1 %v15411_v52  ;;  %9409 = vmatprep.subr.bf16.mxu0 %v16622_v54  ;;  %v16641_v52 = vld [vmem:[#allocation26 + $0x1b0] ss:$8 sps:$4 sm:$0xff]   ;;  %v15475_v54 = vcombine.low %v9758_v30, %v9762_v60  ;;  %v15484_v47 = vcombine.high %v9766_v56, %v9770_v39  ;;  %v9822_v60 = vld [vmem:[#allocation29 + $0x8c0] sm:$0xff] }
 0x8df   :  { %12707 = vmatprep.subr.bf16.mxu1 %v15420_v55  ;;  %v16646_v55 = vld [vmem:[#allocation26 + $0x1c4] ss:$8 sps:$4 sm:$0xff]  }
 0x8e1   :  { %9410 = vmatpush1.bf16.msra.mxu0 %v16620_v57  ;;  %v9778_v57 = vld [vmem:[#allocation29 + $0x760] sm:$0xff] }
 0x8e2   :  { %12708 = vmatpush1.bf16.msra.mxu1 %v15419_v28  ;;  %9411 = vmatprep.subr.bf16.mxu0 %v16625_v17  ;;  %v16644_v28 = vld [vmem:[#allocation26 + $0x1c0] ss:$8 sps:$4 sm:$0xff]   ;;  %v15483_v17 = vcombine.low %v9766_v56, %v9770_v39  ;;  %v15492_v26 = vcombine.high %v9774_v4, %v9778_v57 }
 0x8e3   :  { %12709 = vmatprep.subr.bf16.mxu1 %v15428_v58  ;;  %v16649_v58 = vld [vmem:[#allocation26 + $0x1d4] ss:$8 sps:$4 sm:$0xff]   ;;  %v9830_v56 = vld [vmem:[#allocation29 + $0x900] sm:$0xff] }
 0x8e4   :  { %v9834_v39 = vld [vmem:[#allocation29 + $0x920] sm:$0xff] }
 0x8e5   :  { %9412 = vmatpush1.bf16.msra.mxu0 %v16623_v37  ;;  %v9786_v37 = vld [vmem:[#allocation29 + $0x7a0] sm:$0xff] }
 0x8e6   :  { %12710 = vmatpush1.bf16.msra.mxu1 %v15427_v42  ;;  %9413 = vmatprep.subr.bf16.mxu0 %v16628_v61  ;;  %v16647_v42 = vld [vmem:[#allocation26 + $0x1d0] ss:$8 sps:$4 sm:$0xff]   ;;  %v15491_v61 = vcombine.low %v9774_v4, %v9778_v57  ;;  %v15500_v5 = vcombine.high %v9782_v25, %v9786_v37  ;;  %v9838_v4 = vld [vmem:[#allocation29 + $0x940] sm:$0xff] }
 0x8e7   :  { %12711 = vmatprep.subr.bf16.mxu1 %v15436_v0  ;;  %v16652_v0 = vld [vmem:[#allocation26 + $0x1e4] ss:$8 sps:$4 sm:$0xff]  }
 0x8e8   :  { %v9842_v57 = vld [vmem:[#allocation29 + $0x960] sm:$0xff] }
 0x8e9   :  { %9414 = vmatpush1.bf16.msra.mxu0 %v16626_v7  ;;  %v9794_v7 = vld [vmem:[#allocation29 + $0x7e0] sm:$0xff] }
 0x8ea   :  { %12712 = vmatpush1.bf16.msra.mxu1 %v15435_v8  ;;  %9415 = vmatprep.subr.bf16.mxu0 %v16631_v51  ;;  %v16650_v8 = vld [vmem:[#allocation26 + $0x1e0] ss:$8 sps:$4 sm:$0xff]   ;;  %v15499_v51 = vcombine.low %v9782_v25, %v9786_v37  ;;  %v15508_v10 = vcombine.high %v9790_v6, %v9794_v7 }
 0x8eb   :  { %12713 = vmatprep.subr.bf16.mxu1 %v15444_v9  ;;  %v16655_v9 = vld [vmem:[#allocation26 + $0x1f4] ss:$8 sps:$4 sm:$0xff]   ;;  %v9846_v25 = vld [vmem:[#allocation29 + $0x980] sm:$0xff] }
 0x8ec   :  { %v9850_v37 = vld [vmem:[#allocation29 + $0x9a0] sm:$0xff] }
 0x8ed   :  { %9416 = vmatpush1.bf16.msra.mxu0 %v16629_v12  ;;  %v9802_v12 = vld [vmem:[#allocation29 + $0x820] sm:$0xff] }
 0x8ee   :  { %12714 = vmatpush1.bf16.msra.mxu1 %v15443_v15  ;;  %9417 = vmatprep.subr.bf16.mxu0 %v16634_v16  ;;  %v16653_v15 = vld [vmem:[#allocation26 + $0x1f0] ss:$8 sps:$4 sm:$0xff]   ;;  %v15507_v16 = vcombine.low %v9790_v6, %v9794_v7  ;;  %v15516_v20 = vcombine.high %v9798_v11, %v9802_v12  ;;  %v9854_v6 = vld [vmem:[#allocation29 + $0x9c0] sm:$0xff] }
 0x8ef   :  { %12715 = vmatprep.subr.bf16.mxu1 %v15452_v14  ;;  %v16658_v14 = vld [vmem:[#allocation26 + $0x204] ss:$8 sps:$4 sm:$0xff]  }
 0x8f0   :  { %v9858_v7 = vld [vmem:[#allocation29 + $0x9e0] sm:$0xff] }
 0x8f1   :  { %9418 = vmatpush1.bf16.msra.mxu0 %v16632_v21  ;;  %v9810_v21 = vld [vmem:[#allocation29 + $0x860] sm:$0xff] }
 0x8f2   :  { %12716 = vmatpush1.bf16.msra.mxu1 %v15451_v32  ;;  %9419 = vmatprep.subr.bf16.mxu0 %v16637_v24  ;;  %v16656_v32 = vld [vmem:[#allocation26 + $0x200] ss:$8 sps:$4 sm:$0xff]   ;;  %v15515_v24 = vcombine.low %v9798_v11, %v9802_v12 }
 0x8f3   :  { %12717 = vmatprep.subr.bf16.mxu1 %v15460_v27  ;;  %v15524_v27 = vcombine.high %v9806_v41, %v9810_v21  ;;  %v9862_v11 = vld [vmem:[#allocation29 + $0xa00] sm:$0xff] }
 0x8f4   :  { %v9866_v12 = vld [vmem:[#allocation29 + $0xa20] sm:$0xff] }
 0x8f5   :  { %9420 = vmatpush1.bf16.msra.mxu0 %v16635_v46  ;;  %v9818_v46 = vld [vmem:[#allocation29 + $0x8a0] sm:$0xff] }
 0x8f6   :  { %12718 = vmatpush1.bf16.msra.mxu1 %v15459_v13  ;;  %9421 = vmatprep.subr.bf16.mxu0 %v16640_v31  ;;  %v16659_v13 = vld [vmem:[#allocation26 + $0x210] ss:$8 sps:$4 sm:$0xff]   ;;  %v15523_v31 = vcombine.low %v9806_v41, %v9810_v21  ;;  %v15532_v30 = vcombine.high %v9814_v44, %v9818_v46  ;;  %v9870_v41 = vld [vmem:[#allocation29 + $0xa40] sm:$0xff] }
 0x8f7   :  { %12719 = vmatprep.subr.bf16.mxu1 %v15468_v34  ;;  %v16664_v34 = vld [vmem:[#allocation26 + $0x224] ss:$8 sps:$4 sm:$0xff]  }
 0x8f8   :  { %v9874_v21 = vld [vmem:[#allocation29 + $0xa60] sm:$0xff] }
 0x8f9   :  { %9422 = vmatpush1.bf16.msra.mxu0 %v16638_v43  ;;  %v9826_v43 = vld [vmem:[#allocation29 + $0x8e0] sm:$0xff] }
 0x8fa   :  { %12720 = vmatpush1.bf16.msra.mxu1 %v15467_v35  ;;  %9423 = vmatprep.subr.bf16.mxu0 %v16643_v48  ;;  %v16662_v35 = vld [vmem:[#allocation26 + $0x220] ss:$8 sps:$4 sm:$0xff]   ;;  %v16667_v48 = vld [vmem:[#allocation26 + $0x234] ss:$8 sps:$4 sm:$0xff]  }
 0x8fb   :  { %12721 = vmatprep.subr.bf16.mxu1 %v15476_v36  ;;  %v15540_v36 = vcombine.high %v9822_v60, %v9826_v43 }
 0x8fd   :  { %9424 = vmatpush1.bf16.msra.mxu0 %v16641_v52  ;;  %v16665_v52 = vld [vmem:[#allocation26 + $0x230] ss:$8 sps:$4 sm:$0xff]  }
 0x8fe   :  { %12722 = vmatpush1.bf16.msra.mxu1 %v15475_v54  ;;  %9425 = vmatprep.subr.bf16.mxu0 %v16646_v55  ;;  %v15539_v54 = vcombine.low %v9822_v60, %v9826_v43  ;;  %v16670_v55 = vld [vmem:[#allocation26 + $0x244] ss:$8 sps:$4 sm:$0xff]  }
 0x8ff   :  { %12723 = vmatprep.subr.bf16.mxu1 %v15484_v47  ;;  %v15548_v47 = vcombine.high %v9830_v56, %v9834_v39  ;;  %v9886_v60 = vld [vmem:[#allocation29 + $0xac0] sm:$0xff] }
 0x900   :  { %v9890_v43 = vld [vmem:[#allocation29 + $0xae0] sm:$0xff] }
 0x901   :  { %9426 = vmatpush1.bf16.msra.mxu0 %v16644_v28  ;;  %v16668_v28 = vld [vmem:[#allocation26 + $0x240] ss:$8 sps:$4 sm:$0xff]  }
 0x902   :  { %12724 = vmatpush1.bf16.msra.mxu1 %v15483_v17  ;;  %9427 = vmatprep.subr.bf16.mxu0 %v16649_v58  ;;  %v15547_v17 = vcombine.low %v9830_v56, %v9834_v39  ;;  %v16673_v58 = vld [vmem:[#allocation26 + $0x254] ss:$8 sps:$4 sm:$0xff]   ;;  %v9894_v56 = vld [vmem:[#allocation29 + $0xb00] sm:$0xff] }
 0x903   :  { %12725 = vmatprep.subr.bf16.mxu1 %v15492_v26  ;;  %v15556_v26 = vcombine.high %v9838_v4, %v9842_v57  ;;  %v9898_v39 = vld [vmem:[#allocation29 + $0xb20] sm:$0xff] }
 0x905   :  { %9428 = vmatpush1.bf16.msra.mxu0 %v16647_v42  ;;  %v16671_v42 = vld [vmem:[#allocation26 + $0x250] ss:$8 sps:$4 sm:$0xff]  }
 0x906   :  { %12726 = vmatpush1.bf16.msra.mxu1 %v15491_v61  ;;  %9429 = vmatprep.subr.bf16.mxu0 %v16652_v0  ;;  %v15555_v61 = vcombine.low %v9838_v4, %v9842_v57  ;;  %v16676_v0 = vld [vmem:[#allocation26 + $0x264] ss:$8 sps:$4 sm:$0xff]  }
 0x907   :  { %12727 = vmatprep.subr.bf16.mxu1 %v15500_v5  ;;  %v15564_v5 = vcombine.high %v9846_v25, %v9850_v37  ;;  %v9902_v4 = vld [vmem:[#allocation29 + $0xb40] sm:$0xff] }
 0x908   :  { %v9906_v57 = vld [vmem:[#allocation29 + $0xb60] sm:$0xff] }
 0x909   :  { %9430 = vmatpush1.bf16.msra.mxu0 %v16650_v8  ;;  %v16674_v8 = vld [vmem:[#allocation26 + $0x260] ss:$8 sps:$4 sm:$0xff]  }
 0x90a   :  { %12728 = vmatpush1.bf16.msra.mxu1 %v15499_v51  ;;  %9431 = vmatprep.subr.bf16.mxu0 %v16655_v9  ;;  %v15563_v51 = vcombine.low %v9846_v25, %v9850_v37  ;;  %v16679_v9 = vld [vmem:[#allocation26 + $0x274] ss:$8 sps:$4 sm:$0xff]   ;;  %v9910_v25 = vld [vmem:[#allocation29 + $0xb80] sm:$0xff] }
 0x90b   :  { %12729 = vmatprep.subr.bf16.mxu1 %v15508_v10  ;;  %v15572_v10 = vcombine.high %v9854_v6, %v9858_v7  ;;  %v9914_v37 = vld [vmem:[#allocation29 + $0xba0] sm:$0xff] }
 0x90d   :  { %9432 = vmatpush1.bf16.msra.mxu0 %v16653_v15  ;;  %v16677_v15 = vld [vmem:[#allocation26 + $0x270] ss:$8 sps:$4 sm:$0xff]  }
 0x90e   :  { %12730 = vmatpush1.bf16.msra.mxu1 %v15507_v16  ;;  %9444 = vmatprep.subr.bf16.mxu0 %v16658_v14  ;;  %v15571_v16 = vcombine.low %v9854_v6, %v9858_v7  ;;  %v16682_v14 = vld [vmem:[#allocation26 + $0x284] ss:$8 sps:$4 sm:$0xff]  }
 0x90f   :  { %12742 = vmatprep.subr.bf16.mxu1 %v15516_v20  ;;  %v15580_v20 = vcombine.high %v9862_v11, %v9866_v12  ;;  %v9918_v6 = vld [vmem:[#allocation29 + $0xbc0] sm:$0xff] }
 0x910   :  { %9434 = vmatmul.mubr.bf16.vlgmr.msra.gmra.mrb[52].mxu0 %v18137_v49  ;;  %v15531_v49 = vcombine.low %v9814_v44, %v9818_v46  ;;  %v9878_v44 = vld [vmem:[#allocation29 + $0xa80] sm:$0xff] }
 0x911   :  { %12732 = vmatmul.mubr.bf16.vlgmr.msra.gmra.mrb[40].mxu1 %v18091_v40  ;;  %9445 = vmatpush1.bf16.msra.mxu0 %v16656_v32  ;;  %v16680_v32 = vld [vmem:[#allocation26 + $0x280] ss:$8 sps:$4 sm:$0xff]  }
 0x912   :  { %12743 = vmatpush1.bf16.msra.mxu1 %v15515_v24  ;;  %12774 = vmatprep.mubr.bf16.mxu1 %v18101_v19  ;;  %v15579_v24 = vcombine.low %v9862_v11, %v9866_v12  ;;  %v9882_v46 = vld [vmem:[#allocation29 + $0xaa0] sm:$0xff] }
 0x913   :  { %12744 = vmatprep.subr.bf16.mxu1 %v15524_v27  ;;  %9446 = vmatprep.subr.bf16.mxu0 %v16661_v33  ;;  %v16685_v27 = vld [vmem:[#allocation26 + $0x294] ss:$8 sps:$4 sm:$0xff]   ;;  %v15588_v33 = vcombine.high %v9870_v41, %v9874_v21  ;;  %v9922_v7 = vld [vmem:[#allocation29 + $0xbe0] sm:$0xff] }
 0x914   :  { %v9926_v11 = vld [vmem:[#allocation29 + $0xc00] sm:$0xff] }
 0x915   :  { %9447 = vmatpush1.bf16.msra.mxu0 %v16659_v13  ;;  %v16683_v13 = vld [vmem:[#allocation26 + $0x290] ss:$8 sps:$4 sm:$0xff]   ;;  %v9930_v12 = vld [vmem:[#allocation29 + $0xc20] sm:$0xff] }
 0x916   :  { %12745 = vmatpush1.bf16.msra.mxu1 %v15523_v31  ;;  %9448 = vmatprep.subr.bf16.mxu0 %v16664_v34  ;;  %v15587_v31 = vcombine.low %v9870_v41, %v9874_v21  ;;  %v16688_v34 = vld [vmem:[#allocation26 + $0x2a4] ss:$8 sps:$4 sm:$0xff]  }
 0x917   :  { %12746 = vmatprep.subr.bf16.mxu1 %v15532_v30  ;;  %v15596_v30 = vcombine.high %v9878_v44, %v9882_v46  ;;  %v9934_v41 = vld [vmem:[#allocation29 + $0xc40] sm:$0xff] }
 0x918   :  { %v9938_v21 = vld [vmem:[#allocation29 + $0xc60] sm:$0xff] }
 0x919   :  { %9449 = vmatpush1.bf16.msra.mxu0 %v16662_v35  ;;  %v16686_v35 = vld [vmem:[#allocation26 + $0x2a0] ss:$8 sps:$4 sm:$0xff]  }
 0x91a   :  { %12747 = vmatpush1.bf16.msra.mxu1 %v15531_v49  ;;  %9450 = vmatprep.subr.bf16.mxu0 %v16667_v48  ;;  %v15595_v49 = vcombine.low %v9878_v44, %v9882_v46  ;;  %v16691_v48 = vld [vmem:[#allocation26 + $0x2b4] ss:$8 sps:$4 sm:$0xff]   ;;  %v15651_v44 = vcombine.low %v9934_v41, %v9938_v21 }
 0x91b   :  { %12748 = vmatprep.subr.bf16.mxu1 %v15540_v36  ;;  %v15604_v36 = vcombine.high %v9886_v60, %v9890_v43 }
 0x91d   :  { %9451 = vmatpush1.bf16.msra.mxu0 %v16665_v52  ;;  %v16689_v52 = vld [vmem:[#allocation26 + $0x2b0] ss:$8 sps:$4 sm:$0xff]  }
 0x91e   :  { %12749 = vmatpush1.bf16.msra.mxu1 %v15539_v54  ;;  %9452 = vmatprep.subr.bf16.mxu0 %v16670_v55  ;;  %v15603_v54 = vcombine.low %v9886_v60, %v9890_v43  ;;  %v16694_v55 = vld [vmem:[#allocation26 + $0x2c4] ss:$8 sps:$4 sm:$0xff]  }
 0x91f   :  { %12750 = vmatprep.subr.bf16.mxu1 %v15548_v47  ;;  %v15612_v47 = vcombine.high %v9894_v56, %v9898_v39  ;;  %v9958_v60 = vld [vmem:[#allocation29 + $0xd00] sm:$0xff] }
 0x920   :  { %v9962_v43 = vld [vmem:[#allocation29 + $0xd20] sm:$0xff] }
 0x921   :  { %9453 = vmatpush1.bf16.msra.mxu0 %v16668_v28  ;;  %v16692_v28 = vld [vmem:[#allocation26 + $0x2c0] ss:$8 sps:$4 sm:$0xff]  }
 0x922   :  { %12751 = vmatpush1.bf16.msra.mxu1 %v15547_v17  ;;  %9454 = vmatprep.subr.bf16.mxu0 %v16673_v58  ;;  %v15611_v17 = vcombine.low %v9894_v56, %v9898_v39  ;;  %v16697_v58 = vld [vmem:[#allocation26 + $0x2d4] ss:$8 sps:$4 sm:$0xff]   ;;  %v15675_v56 = vcombine.low %v9958_v60, %v9962_v43 }
 0x923   :  { %12752 = vmatprep.subr.bf16.mxu1 %v15556_v26  ;;  %v15620_v26 = vcombine.high %v9902_v4, %v9906_v57 }
 0x925   :  { %9455 = vmatpush1.bf16.msra.mxu0 %v16671_v42  ;;  %v16695_v42 = vld [vmem:[#allocation26 + $0x2d0] ss:$8 sps:$4 sm:$0xff]  }
 0x926   :  { %12753 = vmatpush1.bf16.msra.mxu1 %v15555_v61  ;;  %9456 = vmatprep.subr.bf16.mxu0 %v16676_v0  ;;  %v15619_v61 = vcombine.low %v9902_v4, %v9906_v57  ;;  %v16700_v0 = vld [vmem:[#allocation26 + $0x2e4] ss:$8 sps:$4 sm:$0xff]  }
 0x927   :  { %12754 = vmatprep.subr.bf16.mxu1 %v15564_v5  ;;  %v15628_v5 = vcombine.high %v9910_v25, %v9914_v37 }
 0x929   :  { %9457 = vmatpush1.bf16.msra.mxu0 %v16674_v8  ;;  %v16698_v8 = vld [vmem:[#allocation26 + $0x2e0] ss:$8 sps:$4 sm:$0xff]  }
 0x92a   :  { %12755 = vmatpush1.bf16.msra.mxu1 %v15563_v51  ;;  %9458 = vmatprep.subr.bf16.mxu0 %v16679_v9  ;;  %v15627_v51 = vcombine.low %v9910_v25, %v9914_v37  ;;  %v16703_v9 = vld [vmem:[#allocation26 + $0x2f4] ss:$8 sps:$4 sm:$0xff]  }
 0x92b   :  { %12756 = vmatprep.subr.bf16.mxu1 %v15572_v10  ;;  %v15636_v10 = vcombine.high %v9918_v6, %v9922_v7 }
 0x92d   :  { %9459 = vmatpush1.bf16.msra.mxu0 %v16677_v15  ;;  %v16701_v15 = vld [vmem:[#allocation26 + $0x2f0] ss:$8 sps:$4 sm:$0xff]  }
 0x92e   :  { %12757 = vmatpush1.bf16.msra.mxu1 %v15571_v16  ;;  %9460 = vmatprep.subr.bf16.mxu0 %v16682_v14  ;;  %v15635_v16 = vcombine.low %v9918_v6, %v9922_v7  ;;  %v16706_v14 = vld [vmem:[#allocation26 + $0x304] ss:$8 sps:$4 sm:$0xff]  }
 0x92f   :  { %12758 = vmatprep.subr.bf16.mxu1 %v15580_v20  ;;  %v15644_v20 = vcombine.high %v9926_v11, %v9930_v12 }
 0x931   :  { %9461 = vmatpush1.bf16.msra.mxu0 %v16680_v32  ;;  %v15643_v32 = vcombine.low %v9926_v11, %v9930_v12 }
 0x932   :  { %12759 = vmatpush1.bf16.msra.mxu1 %v15579_v24  ;;  %9462 = vmatprep.subr.bf16.mxu0 %v16685_v27  ;;  %v15652_v24 = vcombine.high %v9934_v41, %v9938_v21  ;;  %v9942_v27 = vld [vmem:[#allocation29 + $0xc80] sm:$0xff] }
 0x933   :  { %12760 = vmatprep.subr.bf16.mxu1 %v15588_v33  ;;  %v9946_v33 = vld [vmem:[#allocation29 + $0xca0] sm:$0xff] }
 0x934   :  { %v15660_v46 = vcombine.high %v9942_v27, %v9946_v33 }
 0x935   :  { %9463 = vmatpush1.bf16.msra.mxu0 %v16683_v13  ;;  %v9950_v13 = vld [vmem:[#allocation29 + $0xcc0] sm:$0xff] }
 0x936   :  { %12761 = vmatpush1.bf16.msra.mxu1 %v15587_v31  ;;  %9464 = vmatprep.subr.bf16.mxu0 %v16688_v34  ;;  %v9954_v31 = vld [vmem:[#allocation29 + $0xce0] sm:$0xff]  ;;  %v15659_v34 = vcombine.low %v9942_v27, %v9946_v33 }
 0x937   :  { %12762 = vmatprep.subr.bf16.mxu1 %v15596_v30  ;;  %v15668_v30 = vcombine.high %v9950_v13, %v9954_v31 }
 0x939   :  { %9465 = vmatpush1.bf16.msra.mxu0 %v16686_v35  ;;  %v15667_v35 = vcombine.low %v9950_v13, %v9954_v31  ;;  %v9994_v13 = vld [vmem:[#allocation29 + $0xe20] sm:$0xff] }
 0x93a   :  { %12763 = vmatpush1.bf16.msra.mxu1 %v15595_v49  ;;  %9466 = vmatprep.subr.bf16.mxu0 %v16691_v48  ;;  %v15676_v49 = vcombine.high %v9958_v60, %v9962_v43  ;;  %v9966_v48 = vld [vmem:[#allocation29 + $0xd40] sm:$0xff] }
 0x93b   :  { %12764 = vmatprep.subr.bf16.mxu1 %v15604_v36  ;;  %v9970_v36 = vld [vmem:[#allocation29 + $0xd60] sm:$0xff] }
 0x93c   :  { %v15684_v39 = vcombine.high %v9966_v48, %v9970_v36 }
 0x93d   :  { %9467 = vmatpush1.bf16.msra.mxu0 %v16689_v52  ;;  %v16818_v52 = vld [vmem:[#allocation25] sm:$0xff] }
 0x93e   :  { %12765 = vmatpush1.bf16.msra.mxu1 %v15603_v54  ;;  %9468 = vmatprep.subr.bf16.mxu0 %v16694_v55  ;;  %v5285_v54 = vrot.slane %v16818_v52, %v17857_v50  ;;  %v9974_v55 = vld [vmem:[#allocation29 + $0xd80] sm:$0xff]  ;;  %v5293_v4 = vrot.slane %v16818_v52, %v17883_v22  ;;  %v5289_v57 = vrot.slane %v16818_v52, %v17860_v53 }
 0x93f   :  { %12766 = vmatprep.subr.bf16.mxu1 %v15612_v47  ;;  %v9978_v47 = vld [vmem:[#allocation29 + $0xda0] sm:$0xff] }
 0x940   :  { %v15691_v12 = vcombine.low %v9974_v55, %v9978_v47 }
 0x941   :  { %9469 = vmatpush1.bf16.msra.mxu0 %v16692_v28  ;;  %v5297_v28 = vrot.slane %v16818_v52, %v17886_v23  ;;  %v10002_v52 = vld [vmem:[#allocation29 + $0xe60] sm:$0xff] }
 0x942   :  { %12767 = vmatpush1.bf16.msra.mxu1 %v15611_v17  ;;  %9470 = vmatprep.subr.bf16.mxu0 %v16697_v58  ;;  %v15683_v17 = vcombine.low %v9966_v48, %v9970_v36 }
 0x943   :  { %12768 = vmatprep.subr.bf16.mxu1 %v15620_v26  ;;  %v15692_v26 = vcombine.high %v9974_v55, %v9978_v47  ;;  %v16707_v55 = vld [vmem:[#allocation26 + $0x310] ss:$8 sps:$4 sm:$0xff]  }
 0x945   :  { %9471 = vmatpush1.bf16.msra.mxu0 %v16695_v42 }
 0x946   :  { %12769 = vmatpush1.bf16.msra.mxu1 %v15619_v61  ;;  %9472 = vmatprep.subr.bf16.mxu0 %v16700_v0  ;;  %v9982_v61 = vld [vmem:[#allocation29 + $0xdc0] sm:$0xff] }
 0x947   :  { %12770 = vmatprep.subr.bf16.mxu1 %v15628_v5  ;;  %v9986_v0 = vld [vmem:[#allocation29 + $0xde0] sm:$0xff] }
 0x948   :  { %v15699_v60 = vcombine.low %v9982_v61, %v9986_v0 }
 0x949   :  { %9473 = vmatpush1.bf16.msra.mxu0 %v16698_v8 }
 0x94a   :  { %12771 = vmatpush1.bf16.msra.mxu1 %v15627_v51  ;;  %9474 = vmatprep.subr.bf16.mxu0 %v16703_v9 }
 0x94b   :  { %12772 = vmatprep.subr.bf16.mxu1 %v15636_v10 }
 0x94d   :  { %9475 = vmatpush1.bf16.msra.mxu0 %v16701_v15 }
 0x94e   :  { %12773 = vmatpush1.bf16.msra.mxu1 %v15635_v16  ;;  %9487 = vmatprep.subr.bf16.mxu0 %v16706_v14 }
 0x94f   :  { %12785 = vmatprep.subr.bf16.mxu1 %v15644_v20  ;;  %v15700_v20 = vcombine.high %v9982_v61, %v9986_v0  ;;  %v16713_v0 = vld [vmem:[#allocation26 + $0x330] ss:$8 sps:$4 sm:$0xff]  }
 0x951   :  { %12775 = vmatmul.mubr.bf16.vlgmr.msra.gmra.mrb[40].mxu1 %v18099_v18 }
 0x952   :  { %12786 = vmatpush1.bf16.msra.mxu1 %v15643_v32  ;;  %12817 = vmatprep.mubr.bf16.mxu1 %v18105_v45 }
 0x953   :  { %12787 = vmatprep.subr.bf16.mxu1 %v15652_v24 }
 0x956   :  { %12788 = vmatpush1.bf16.msra.mxu1 %v15651_v44 }
 0x957   :  { %12789 = vmatprep.subr.bf16.mxu1 %v15660_v46  ;;  %v9990_v46 = vld [vmem:[#allocation29 + $0xe00] sm:$0xff] }
 0x958   :  { %v15708_v36 = vcombine.high %v9990_v46, %v9994_v13 }
 0x95a   :  { %12790 = vmatpush1.bf16.msra.mxu1 %v15659_v34 }
 0x95b   :  { %12791 = vmatprep.subr.bf16.mxu1 %v15668_v30 }
 0x95e   :  { %12792 = vmatpush1.bf16.msra.mxu1 %v15667_v35 }
 0x95f   :  { %12793 = vmatprep.subr.bf16.mxu1 %v15676_v49  ;;  %v16704_v49 = vld [vmem:[#allocation26 + $0x300] ss:$8 sps:$4 sm:$0xff]  }
 0x962   :  { %12794 = vmatpush1.bf16.msra.mxu1 %v15675_v56  ;;  %v16709_v56 = vld [vmem:[#allocation26 + $0x314] ss:$8 sps:$4 sm:$0xff]  }
 0x963   :  { %v8373_v58 = vpop.f32.mrb[48].mxu0  ;;  %12795 = vmatprep.subr.bf16.mxu1 %v15684_v39  ;;  %v9998_v39 = vld [vmem:[#allocation29 + $0xe40] sm:$0xff] }
 0x964   :  { %v15962_v25 = vadd.f32 %v8373_v58, %v5285_v54  ;;  %v8545_v37 = vpop.f32.mrb[36].mxu1  ;;  %v8375_v42 = vpop.f32.mrb[49].mxu0  ;;  %v15716_v47 = vcombine.high %v9998_v39, %v10002_v52  ;;  %v16710_v58 = vld [vmem:[#allocation26 + $0x320] ss:$8 sps:$4 sm:$0xff]  }
 0x965   :  { %v15966_v5 = vadd.f32 %v8545_v37, %v5293_v4  ;;  %v15963_v6 = vadd.f32 %v8375_v42, %v5289_v57  ;;  %v8547_v7 = vpop.f32.mrb[37].mxu1  ;;  %v8377_v8 = vpop.f32.mrb[50].mxu0  ;;  %v10014_v37 = vld [vmem:[#allocation29 + $0xec0] sm:$0xff] }
 0x966   :  { %v15967_v51 = vadd.f32 %v8547_v7, %v5297_v28  ;;  %v15964_v9 = vadd.f32 %v8377_v8, %v5285_v54  ;;  %v8549_v10 = vpop.f32.mrb[38].mxu1  ;;  %12796 = vmatpush1.bf16.msra.mxu1 %v15683_v17  ;;  %v8379_v11 = vpop.f32.mrb[51].mxu0  ;;  %v8558_v41 = vmax.f32 %v15962_v25, 0.0  ;;  %v15707_v54 = vcombine.low %v9990_v46, %v9994_v13  ;;  %v16715_v25 = vld [vmem:[#allocation26 + $0x334] ss:$8 sps:$4 sm:$0xff]   ;;  %v10018_v42 = vld [vmem:[#allocation29 + $0xee0] sm:$0xff] }
 0x967   :  { %v15968_v15 = vadd.f32 %v8549_v10, %v5293_v4  ;;  %v15965_v16 = vadd.f32 %v8379_v11, %v5289_v57  ;;  %v8551_v14 = vpop.f32.mrb[39].mxu1  ;;  %12797 = vmatprep.subr.bf16.mxu1 %v15692_v26  ;;  %v8560_v24 = vmax.f32 %v15966_v5, 0.0  ;;  %v8559_v27 = vmax.f32 %v15963_v6, 0.0  ;;  %v16712_v4 = vld [vmem:[#allocation26 + $0x324] ss:$8 sps:$4 sm:$0xff]  }
 0x968   :  { %v8566_v21 = vmax.f32 %v15964_v9, 0.0  ;;  %v15969_v32 = vadd.f32 %v8551_v14, %v5297_v28  ;;  %v8561_v31 = vmax.f32 %v15967_v51, 0.0  ;;  %v10006_v57 = vld [vmem:[#allocation29 + $0xe80] sm:$0xff]  ;;  %v15715_v17 = vcombine.low %v9998_v39, %v10002_v52  ;;  %v16721_v11 = vld [vmem:[#allocation26 + $0x354] ss:$8 sps:$4 sm:$0xff]  }
 0x969   :  { %v8568_v33 = vmax.f32 %v15968_v15, 0.0  ;;  %v8567_v44 = vmax.f32 %v15965_v16, 0.0  ;;  %v10010_v28 = vld [vmem:[#allocation29 + $0xea0] sm:$0xff]  ;;  %v15732_v5 = vcombine.high %v10014_v37, %v10018_v42  ;;  %v15731_v51 = vcombine.low %v10014_v37, %v10018_v42  ;;  %v16719_v14 = vld [vmem:[#allocation26 + $0x350] ss:$8 sps:$4 sm:$0xff]  }
 0x96a   :  { %v8574_v34 = vpack.c.bf16 %v8566_v21, %v8558_v41  ;;  %v8569_v30 = vmax.f32 %v15969_v32, 0.0  ;;  %12798 = vmatpush1.bf16.msra.mxu1 %v15691_v12  ;;  %v15724_v26 = vcombine.high %v10006_v57, %v10010_v28  ;;  %v15723_v61 = vcombine.low %v10006_v57, %v10010_v28  ;;  %v16718_v6 = vld [vmem:[#allocation26 + $0x344] ss:$8 sps:$4 sm:$0xff]   ;;  %v16716_v9 = vld [vmem:[#allocation26 + $0x340] ss:$8 sps:$4 sm:$0xff]   ;;  %v9552_v52 = vld [vmem:[#allocation29 + $0x50] sm:$0xff] }
 0x96b   :  { %v18160_v43 = vpack.c.bf16 %v8568_v33, %v8560_v24  ;;  %v8575_v35 = vpack.c.bf16 %v8567_v44, %v8559_v27  ;;  %12799 = vmatprep.subr.bf16.mxu1 %v15700_v20  ;;  %v10022_v7 = vld [vmem:[#allocation29 + $0xf00] sm:$0xff]  ;;  %v16727_v44 = vld [vmem:[#allocation26 + $0x374] ss:$8 sps:$4 sm:$0xff]  }
 0x96c   :  { %v8577_v48 = vpack.c.bf16 %v8569_v30, %v8561_v31  ;;  %v10026_v8 = vld [vmem:[#allocation29 + $0xf20] sm:$0xff]  ;;  %v16733_v39 = vld [vmem:[#allocation26 + $0x394] ss:$8 sps:$4 sm:$0xff]  }
 0x96d   :  { %9476 = vmatprep.mubr.bf16.mxu0 %v8575_v35  ;;  %v15740_v10 = vcombine.high %v10022_v7, %v10026_v8  ;;  %v10030_v12 = vld [vmem:[#allocation29 + $0xf40] sm:$0xff]  ;;  %v15739_v16 = vcombine.low %v10022_v7, %v10026_v8  ;;  %v9544_v35 = vld [vmem:[#allocation29 + $0x10] sm:$0xff] }
 0x96e   :  { %12800 = vmatpush1.bf16.msra.mxu1 %v15699_v60  ;;  %9477 = vmatmul.mubr.bf16.vlgmr.msra.gmra.mrb[52].mxu0 %v8574_v34  ;;  %v10034_v15 = vld [vmem:[#allocation29 + $0xf60] sm:$0xff]  ;;  %v16725_v34 = vld [vmem:[#allocation26 + $0x370] ss:$8 sps:$4 sm:$0xff]   ;;  %v16739_v37 = vld [vmem:[#allocation26 + $0x3b4] ss:$8 sps:$4 sm:$0xff]  }
 0x96f   :  { %9488 = vmatpush1.bf16.msra.mxu0 %v16704_v49  ;;  %9519 = vmatprep.mubr.bf16.mxu0 %v8577_v48  ;;  %v15748_v20 = vcombine.high %v10030_v12, %v10034_v15  ;;  %v16724_v41 = vld [vmem:[#allocation26 + $0x364] ss:$8 sps:$4 sm:$0xff]   ;;  %v15747_v24 = vcombine.low %v10030_v12, %v10034_v15  ;;  %v16722_v27 = vld [vmem:[#allocation26 + $0x360] ss:$8 sps:$4 sm:$0xff]   ;;  %v9548_v49 = vld [vmem:[#allocation29 + $0x30] sm:$0xff] }
 0x970   :  { %12801 = vmatprep.subr.bf16.mxu1 %v15708_v36  ;;  %9489 = vmatprep.subr.bf16.mxu0 %v16709_v56  ;;  %v10038_v21 = vld [vmem:[#allocation29 + $0xf80] sm:$0xff]  ;;  %v15264_v56 = vcombine.high %v9544_v35, %v9548_v49  ;;  %v9560_v28 = vld [vmem:[#allocation29 + $0x90] sm:$0xff] }
 0x971   :  { %v10042_v32 = vld [vmem:[#allocation29 + $0xfa0] sm:$0xff]  ;;  %v9568_v42 = vld [vmem:[#allocation29 + $0xd0] sm:$0xff] }
 0x972   :  { %12802 = vmatpush1.bf16.msra.mxu1 %v15707_v54  ;;  %v15756_v33 = vcombine.high %v10038_v21, %v10042_v32  ;;  %v10046_v46 = vld [vmem:[#allocation29 + $0xfc0] sm:$0xff]  ;;  %v15755_v31 = vcombine.low %v10038_v21, %v10042_v32  ;;  %v9556_v54 = vld [vmem:[#allocation29 + $0x70] sm:$0xff] }
 0x973   :  { %9490 = vmatpush1.bf16.msra.mxu0 %v16707_v55  ;;  %12803 = vmatprep.subr.bf16.mxu1 %v15716_v47  ;;  %v10050_v13 = vld [vmem:[#allocation29 + $0xfe0] sm:$0xff]  ;;  %v15263_v55 = vcombine.low %v9544_v35, %v9548_v49  ;;  %v16731_v47 = vld [vmem:[#allocation26 + $0x390] ss:$8 sps:$4 sm:$0xff]   ;;  %v16745_v12 = vld [vmem:[#allocation26 + $0x3d4] ss:$8 sps:$4 sm:$0xff]  }
 0x974   :  { %9491 = vmatprep.subr.bf16.mxu0 %v16712_v4  ;;  %v15764_v30 = vcombine.high %v10046_v46, %v10050_v13  ;;  %v16730_v60 = vld [vmem:[#allocation26 + $0x384] ss:$8 sps:$4 sm:$0xff]   ;;  %v15763_v48 = vcombine.low %v10046_v46, %v10050_v13  ;;  %v16728_v36 = vld [vmem:[#allocation26 + $0x380] ss:$8 sps:$4 sm:$0xff]   ;;  %v15272_v4 = vcombine.high %v9552_v52, %v9556_v54  ;;  %v9576_v8 = vld [vmem:[#allocation29 + $0x110] sm:$0xff] }
 0x975   :  { %v16736_v57 = vld [vmem:[#allocation26 + $0x3a4] ss:$8 sps:$4 sm:$0xff]   ;;  %v9584_v15 = vld [vmem:[#allocation29 + $0x150] sm:$0xff] }
 0x976   :  { %12804 = vmatpush1.bf16.msra.mxu1 %v15715_v17  ;;  %v9564_v17 = vld [vmem:[#allocation29 + $0xb0] sm:$0xff]  ;;  %v16742_v7 = vld [vmem:[#allocation26 + $0x3c4] ss:$8 sps:$4 sm:$0xff]  }
 0x977   :  { %9492 = vmatpush1.bf16.msra.mxu0 %v16710_v58  ;;  %12805 = vmatprep.subr.bf16.mxu1 %v15724_v26  ;;  %v15271_v58 = vcombine.low %v9552_v52, %v9556_v54  ;;  %v16734_v26 = vld [vmem:[#allocation26 + $0x3a0] ss:$8 sps:$4 sm:$0xff]   ;;  %v16748_v21 = vld [vmem:[#allocation26 + $0x3e4] ss:$8 sps:$4 sm:$0xff]   ;;  %v9592_v32 = vld [vmem:[#allocation29 + $0x190] sm:$0xff] }
 0x978   :  { %9493 = vmatprep.subr.bf16.mxu0 %v16715_v25  ;;  %v15280_v25 = vcombine.high %v9560_v28, %v9564_v17  ;;  %v16751_v46 = vld [vmem:[#allocation26 + $0x3f4] ss:$8 sps:$4 sm:$0xff]   ;;  %v16749_v35 = vld [vmem:[#allocation26 + $0x3f0] ss:$8 sps:$4 sm:$0xff]  }
 0x979   :  { %v9600_v13 = vld [vmem:[#allocation29 + $0x1d0] sm:$0xff]  ;;  %v9555_v52 = vld [vmem:[#allocation29 + $0x68] sm:$0xff] }
 0x97a   :  { %12806 = vmatpush1.bf16.msra.mxu1 %v15723_v61  ;;  %v9572_v61 = vld [vmem:[#allocation29 + $0xf0] sm:$0xff] }
 0x97b   :  { %9494 = vmatpush1.bf16.msra.mxu0 %v16713_v0  ;;  %12807 = vmatprep.subr.bf16.mxu1 %v15732_v5  ;;  %v15279_v0 = vcombine.low %v9560_v28, %v9564_v17  ;;  %v16737_v5 = vld [vmem:[#allocation26 + $0x3b0] ss:$8 sps:$4 sm:$0xff]  }
 0x97c   :  { %9495 = vmatprep.subr.bf16.mxu0 %v16718_v6  ;;  %v15288_v6 = vcombine.high %v9568_v42, %v9572_v61  ;;  %v9620_v28 = vld [vmem:[#allocation29 + $0x270] sm:$0xff]  ;;  %v9559_v17 = vld [vmem:[#allocation29 + $0x88] sm:$0xff] }
 0x97e   :  { %12808 = vmatpush1.bf16.msra.mxu1 %v15731_v51  ;;  %v9580_v51 = vld [vmem:[#allocation29 + $0x130] sm:$0xff] }
 0x97f   :  { %9496 = vmatpush1.bf16.msra.mxu0 %v16716_v9  ;;  %12809 = vmatprep.subr.bf16.mxu1 %v15740_v10  ;;  %v15287_v9 = vcombine.low %v9568_v42, %v9572_v61  ;;  %v16740_v10 = vld [vmem:[#allocation26 + $0x3c0] ss:$8 sps:$4 sm:$0xff]   ;;  %v9624_v61 = vld [vmem:[#allocation29 + $0x290] sm:$0xff] }
 0x980   :  { %9497 = vmatprep.subr.bf16.mxu0 %v16721_v11  ;;  %v15296_v11 = vcombine.high %v9576_v8, %v9580_v51 }
 0x982   :  { %12810 = vmatpush1.bf16.msra.mxu1 %v15739_v16  ;;  %v9588_v16 = vld [vmem:[#allocation29 + $0x170] sm:$0xff] }
 0x983   :  { %9498 = vmatpush1.bf16.msra.mxu0 %v16719_v14  ;;  %12811 = vmatprep.subr.bf16.mxu1 %v15748_v20  ;;  %v15295_v14 = vcombine.low %v9576_v8, %v9580_v51  ;;  %v16743_v20 = vld [vmem:[#allocation26 + $0x3d0] ss:$8 sps:$4 sm:$0xff]  }
 0x984   :  { %9499 = vmatprep.subr.bf16.mxu0 %v16724_v41  ;;  %v15304_v41 = vcombine.high %v9584_v15, %v9588_v16 }
 0x986   :  { %12812 = vmatpush1.bf16.msra.mxu1 %v15747_v24  ;;  %v9596_v24 = vld [vmem:[#allocation29 + $0x1b0] sm:$0xff] }
 0x987   :  { %9500 = vmatpush1.bf16.msra.mxu0 %v16722_v27  ;;  %12813 = vmatprep.subr.bf16.mxu1 %v15756_v33  ;;  %v15303_v27 = vcombine.low %v9584_v15, %v9588_v16  ;;  %v16746_v33 = vld [vmem:[#allocation26 + $0x3e0] ss:$8 sps:$4 sm:$0xff]  }
 0x988   :  { %9501 = vmatprep.subr.bf16.mxu0 %v16727_v44  ;;  %v15312_v44 = vcombine.high %v9592_v32, %v9596_v24 }
 0x98a   :  { %12814 = vmatpush1.bf16.msra.mxu1 %v15755_v31  ;;  %v9604_v31 = vld [vmem:[#allocation29 + $0x1f0] sm:$0xff] }
 0x98b   :  { %9502 = vmatpush1.bf16.msra.mxu0 %v16725_v34  ;;  %12815 = vmatprep.subr.bf16.mxu1 %v15764_v30  ;;  %v9543_v34 = vld [vmem:[#allocation29 + $0x8] sm:$0xff]  ;;  %v15320_v49 = vcombine.high %v9600_v13, %v9604_v31  ;;  %v15319_v54 = vcombine.low %v9600_v13, %v9604_v31  ;;  %v9648_v13 = vld [vmem:[#allocation29 + $0x350] sm:$0xff] }
 0x98c   :  { %9503 = vmatprep.subr.bf16.mxu0 %v16730_v60  ;;  %v9547_v30 = vld [vmem:[#allocation29 + $0x28] sm:$0xff]  ;;  %v15311_v60 = vcombine.low %v9592_v32, %v9596_v24  ;;  %v9652_v31 = vld [vmem:[#allocation29 + $0x370] sm:$0xff] }
 0x98d   :  { %v9583_v32 = vld [vmem:[#allocation29 + $0x148] sm:$0xff] }
 0x98e   :  { %12816 = vmatpush1.bf16.msra.mxu1 %v15763_v48  ;;  %v15262_v48 = vcombine.high %v9543_v34, %v9547_v30  ;;  %v9587_v24 = vld [vmem:[#allocation29 + $0x168] sm:$0xff] }
 0x98f   :  { %9504 = vmatpush1.bf16.msra.mxu0 %v16728_v36  ;;  %13000 = vmatprep.subr.bf16.mxu1 %v15264_v56  ;;  %v9608_v36 = vld [vmem:[#allocation29 + $0x210] sm:$0xff] }
 0x990   :  { %9505 = vmatprep.subr.bf16.mxu0 %v16733_v39  ;;  %v9612_v56 = vld [vmem:[#allocation29 + $0x230] sm:$0xff]  ;;  %v9551_v39 = vld [vmem:[#allocation29 + $0x48] sm:$0xff] }
 0x991   :  { %12818 = vmatmul.mubr.bf16.vlgmr.msra.gmra.mrb[40].mxu1 %v18103_v38 }
 0x992   :  { %13001 = vmatpush1.bf16.msra.mxu1 %v15263_v55  ;;  %13032 = vmatprep.mubr.bf16.mxu1 %v18085_v59  ;;  %v15261_v55 = vcombine.low %v9543_v34, %v9547_v30  ;;  %v9591_v34 = vld [vmem:[#allocation29 + $0x188] sm:$0xff] }
 0x993   :  { %9506 = vmatpush1.bf16.msra.mxu0 %v16731_v47  ;;  %13002 = vmatprep.subr.bf16.mxu1 %v15272_v4  ;;  %v15328_v47 = vcombine.high %v9608_v36, %v9612_v56  ;;  %v15270_v4 = vcombine.high %v9551_v39, %v9555_v52  ;;  %v9595_v30 = vld [vmem:[#allocation29 + $0x1a8] sm:$0xff] }
 0x994   :  { %9507 = vmatprep.subr.bf16.mxu0 %v16736_v57  ;;  %v9616_v57 = vld [vmem:[#allocation29 + $0x250] sm:$0xff] }
 0x996   :  { %13003 = vmatpush1.bf16.msra.mxu1 %v15271_v58  ;;  %v9563_v58 = vld [vmem:[#allocation29 + $0xa8] sm:$0xff] }
 0x997   :  { %9508 = vmatpush1.bf16.msra.mxu0 %v16734_v26  ;;  %13004 = vmatprep.subr.bf16.mxu1 %v15280_v25  ;;  %v15327_v26 = vcombine.low %v9608_v36, %v9612_v56  ;;  %v15269_v25 = vcombine.low %v9551_v39, %v9555_v52  ;;  %v15278_v42 = vcombine.high %v9559_v17, %v9563_v58  ;;  %v9656_v36 = vld [vmem:[#allocation29 + $0x390] sm:$0xff]  ;;  %v9599_v39 = vld [vmem:[#allocation29 + $0x1c8] sm:$0xff] }
 0x998   :  { %9509 = vmatprep.subr.bf16.mxu0 %v16739_v37  ;;  %v15336_v37 = vcombine.high %v9616_v57, %v9620_v28  ;;  %v15277_v8 = vcombine.low %v9559_v17, %v9563_v58  ;;  %v9660_v56 = vld [vmem:[#allocation29 + $0x3b0] sm:$0xff]  ;;  %v9603_v52 = vld [vmem:[#allocation29 + $0x1e8] sm:$0xff] }
 0x999   :  { %v9607_v17 = vld [vmem:[#allocation29 + $0x208] sm:$0xff] }
 0x99a   :  { %13005 = vmatpush1.bf16.msra.mxu1 %v15279_v0  ;;  %v9628_v0 = vld [vmem:[#allocation29 + $0x2b0] sm:$0xff]  ;;  %v9611_v58 = vld [vmem:[#allocation29 + $0x228] sm:$0xff] }
 0x99b   :  { %9510 = vmatpush1.bf16.msra.mxu0 %v16737_v5  ;;  %13006 = vmatprep.subr.bf16.mxu1 %v15288_v6  ;;  %v9567_v5 = vld [vmem:[#allocation29 + $0xc8] sm:$0xff]  ;;  %v15343_v15 = vcombine.low %v9624_v61, %v9628_v0 }
 0x99c   :  { %9511 = vmatprep.subr.bf16.mxu0 %v16742_v7  ;;  %v9571_v6 = vld [vmem:[#allocation29 + $0xe8] sm:$0xff]  ;;  %v15335_v7 = vcombine.low %v9616_v57, %v9620_v28  ;;  %v9664_v57 = vld [vmem:[#allocation29 + $0x3d0] sm:$0xff] }
 0x99d   :  { %v15286_v51 = vcombine.high %v9567_v5, %v9571_v6  ;;  %v15285_v16 = vcombine.low %v9567_v5, %v9571_v6  ;;  %v9668_v28 = vld [vmem:[#allocation29 + $0x3f0] sm:$0xff]  ;;  %v9615_v5 = vld [vmem:[#allocation29 + $0x248] sm:$0xff] }
 0x99e   :  { %13007 = vmatpush1.bf16.msra.mxu1 %v15287_v9  ;;  %v9632_v9 = vld [vmem:[#allocation29 + $0x2d0] sm:$0xff]  ;;  %v9619_v6 = vld [vmem:[#allocation29 + $0x268] sm:$0xff] }
 0x99f   :  { %9512 = vmatpush1.bf16.msra.mxu0 %v16740_v10  ;;  %13008 = vmatprep.subr.bf16.mxu1 %v15296_v11  ;;  %v9636_v10 = vld [vmem:[#allocation29 + $0x2f0] sm:$0xff]  ;;  %v9575_v11 = vld [vmem:[#allocation29 + $0x108] sm:$0xff] }
 0x9a0   :  { %9513 = vmatprep.subr.bf16.mxu0 %v16745_v12  ;;  %v9579_v12 = vld [vmem:[#allocation29 + $0x128] sm:$0xff] }
 0x9a2   :  { %13009 = vmatpush1.bf16.msra.mxu1 %v15295_v14  ;;  %v15352_v14 = vcombine.high %v9632_v9, %v9636_v10 }
 0x9a3   :  { %9514 = vmatpush1.bf16.msra.mxu0 %v16743_v20  ;;  %13010 = vmatprep.subr.bf16.mxu1 %v15304_v41  ;;  %v15294_v20 = vcombine.high %v9575_v11, %v9579_v12  ;;  %v9640_v41 = vld [vmem:[#allocation29 + $0x310] sm:$0xff] }
 0x9a4   :  { %9515 = vmatprep.subr.bf16.mxu0 %v16748_v21  ;;  %v9644_v21 = vld [vmem:[#allocation29 + $0x330] sm:$0xff] }
 0x9a6   :  { %13011 = vmatpush1.bf16.msra.mxu1 %v15303_v27  ;;  %v15351_v27 = vcombine.low %v9632_v9, %v9636_v10  ;;  %v9680_v9 = vld [vmem:[#allocation29 + $0x450] sm:$0xff] }
 0x9a7   :  { %9516 = vmatpush1.bf16.msra.mxu0 %v16746_v33  ;;  %13012 = vmatprep.subr.bf16.mxu1 %v15312_v44  ;;  %v15293_v33 = vcombine.low %v9575_v11, %v9579_v12  ;;  %v15360_v44 = vcombine.high %v9640_v41, %v9644_v21  ;;  %v9684_v10 = vld [vmem:[#allocation29 + $0x470] sm:$0xff]  ;;  %v9623_v11 = vld [vmem:[#allocation29 + $0x288] sm:$0xff] }
 0x9a8   :  { %9517 = vmatprep.subr.bf16.mxu0 %v16751_v46  ;;  %v15302_v46 = vcombine.high %v9583_v32, %v9587_v24  ;;  %v9627_v12 = vld [vmem:[#allocation29 + $0x2a8] sm:$0xff] }
 0x9aa   :  { %13013 = vmatpush1.bf16.msra.mxu1 %v15311_v60  ;;  %v15359_v60 = vcombine.low %v9640_v41, %v9644_v21  ;;  %v9688_v41 = vld [vmem:[#allocation29 + $0x490] sm:$0xff] }
 0x9ab   :  { %9518 = vmatpush1.bf16.msra.mxu0 %v16749_v35  ;;  %13014 = vmatprep.subr.bf16.mxu1 %v15320_v49  ;;  %v15301_v35 = vcombine.low %v9583_v32, %v9587_v24  ;;  %v15368_v49 = vcombine.high %v9648_v13, %v9652_v31  ;;  %v9692_v21 = vld [vmem:[#allocation29 + $0x4b0] sm:$0xff]  ;;  %v9631_v32 = vld [vmem:[#allocation29 + $0x2c8] sm:$0xff] }
 0x9ac   :  { %12828 = vmatprep.subr.bf16.mxu0 %v15262_v48  ;;  %v15310_v48 = vcombine.high %v9591_v34, %v9595_v30  ;;  %v9635_v24 = vld [vmem:[#allocation29 + $0x2e8] sm:$0xff] }
 0x9ae   :  { %9520 = vmatmul.mubr.bf16.vlgmr.msra.gmra.mrb[52].mxu0 %v18160_v43  ;;  %13015 = vmatpush1.bf16.msra.mxu1 %v15319_v54  ;;  %v15344_v43 = vcombine.high %v9624_v61, %v9628_v0  ;;  %v15367_v54 = vcombine.low %v9648_v13, %v9652_v31  ;;  %v9672_v61 = vld [vmem:[#allocation29 + $0x410] sm:$0xff] }
 0x9af   :  { %12829 = vmatpush1.bf16.msra.mxu0 %v15261_v55  ;;  %12860 = vmatprep.mubr.bf16.mxu0 %v18085_v59  ;;  %v15309_v55 = vcombine.low %v9591_v34, %v9595_v30  ;;  %v9676_v0 = vld [vmem:[#allocation29 + $0x430] sm:$0xff]  ;;  %v9639_v34 = vld [vmem:[#allocation29 + $0x308] sm:$0xff] }
 0x9b0   :  { %13016 = vmatprep.subr.bf16.mxu1 %v15328_v47  ;;  %12830 = vmatprep.subr.bf16.mxu0 %v15270_v4  ;;  %v15376_v47 = vcombine.high %v9656_v36, %v9660_v56  ;;  %v15318_v4 = vcombine.high %v9599_v39, %v9603_v52  ;;  %v9696_v13 = vld [vmem:[#allocation29 + $0x4d0] sm:$0xff]  ;;  %v9643_v30 = vld [vmem:[#allocation29 + $0x328] sm:$0xff] }
 0x9b1   :  { %v9700_v31 = vld [vmem:[#allocation29 + $0x4f0] sm:$0xff] }
 0x9b2   :  { %13017 = vmatpush1.bf16.msra.mxu1 %v15327_v26  ;;  %v15375_v26 = vcombine.low %v9656_v36, %v9660_v56  ;;  %v9704_v36 = vld [vmem:[#allocation29 + $0x510] sm:$0xff] }
 0x9b3   :  { %12831 = vmatpush1.bf16.msra.mxu0 %v15269_v25  ;;  %13018 = vmatprep.subr.bf16.mxu1 %v15336_v37  ;;  %v15317_v25 = vcombine.low %v9599_v39, %v9603_v52  ;;  %v15384_v37 = vcombine.high %v9664_v57, %v9668_v28  ;;  %v9708_v56 = vld [vmem:[#allocation29 + $0x530] sm:$0xff]  ;;  %v9647_v39 = vld [vmem:[#allocation29 + $0x348] sm:$0xff] }
 0x9b4   :  { %12832 = vmatprep.subr.bf16.mxu0 %v15278_v42  ;;  %v15326_v42 = vcombine.high %v9607_v17, %v9611_v58  ;;  %v9651_v52 = vld [vmem:[#allocation29 + $0x368] sm:$0xff] }
 0x9b6   :  { %13019 = vmatpush1.bf16.msra.mxu1 %v15335_v7  ;;  %v15383_v7 = vcombine.low %v9664_v57, %v9668_v28  ;;  %v9712_v57 = vld [vmem:[#allocation29 + $0x550] sm:$0xff] }
 0x9b7   :  { %12833 = vmatpush1.bf16.msra.mxu0 %v15277_v8  ;;  %13020 = vmatprep.subr.bf16.mxu1 %v15344_v43  ;;  %v15325_v8 = vcombine.low %v9607_v17, %v9611_v58  ;;  %v15392_v43 = vcombine.high %v9672_v61, %v9676_v0  ;;  %v9716_v28 = vld [vmem:[#allocation29 + $0x570] sm:$0xff]  ;;  %v9655_v17 = vld [vmem:[#allocation29 + $0x388] sm:$0xff] }
 0x9b8   :  { %12834 = vmatprep.subr.bf16.mxu0 %v15286_v51  ;;  %v15334_v51 = vcombine.high %v9615_v5, %v9619_v6  ;;  %v9659_v58 = vld [vmem:[#allocation29 + $0x3a8] sm:$0xff] }
 0x9ba   :  { %13021 = vmatpush1.bf16.msra.mxu1 %v15343_v15  ;;  %v15391_v15 = vcombine.low %v9672_v61, %v9676_v0  ;;  %v9720_v61 = vld [vmem:[#allocation29 + $0x590] sm:$0xff] }
 0x9bb   :  { %12835 = vmatpush1.bf16.msra.mxu0 %v15285_v16  ;;  %13022 = vmatprep.subr.bf16.mxu1 %v15352_v14  ;;  %v15333_v16 = vcombine.low %v9615_v5, %v9619_v6  ;;  %v15400_v14 = vcombine.high %v9680_v9, %v9684_v10  ;;  %v9724_v0 = vld [vmem:[#allocation29 + $0x5b0] sm:$0xff]  ;;  %v9663_v5 = vld [vmem:[#allocation29 + $0x3c8] sm:$0xff] }
 0x9bc   :  { %12836 = vmatprep.subr.bf16.mxu0 %v15294_v20  ;;  %v15342_v20 = vcombine.high %v9623_v11, %v9627_v12  ;;  %v9667_v6 = vld [vmem:[#allocation29 + $0x3e8] sm:$0xff] }
 0x9be   :  { %13023 = vmatpush1.bf16.msra.mxu1 %v15351_v27  ;;  %v15399_v27 = vcombine.low %v9680_v9, %v9684_v10  ;;  %v9728_v9 = vld [vmem:[#allocation29 + $0x5d0] sm:$0xff] }
 0x9bf   :  { %12837 = vmatpush1.bf16.msra.mxu0 %v15293_v33  ;;  %13024 = vmatprep.subr.bf16.mxu1 %v15360_v44  ;;  %v15341_v33 = vcombine.low %v9623_v11, %v9627_v12  ;;  %v15408_v44 = vcombine.high %v9688_v41, %v9692_v21  ;;  %v9732_v10 = vld [vmem:[#allocation29 + $0x5f0] sm:$0xff]  ;;  %v9671_v11 = vld [vmem:[#allocation29 + $0x408] sm:$0xff] }
 0x9c0   :  { %12838 = vmatprep.subr.bf16.mxu0 %v15302_v46  ;;  %v15350_v46 = vcombine.high %v9631_v32, %v9635_v24  ;;  %v9675_v12 = vld [vmem:[#allocation29 + $0x428] sm:$0xff] }
 0x9c2   :  { %13025 = vmatpush1.bf16.msra.mxu1 %v15359_v60  ;;  %v15407_v60 = vcombine.low %v9688_v41, %v9692_v21  ;;  %v9736_v41 = vld [vmem:[#allocation29 + $0x610] sm:$0xff] }
 0x9c3   :  { %12839 = vmatpush1.bf16.msra.mxu0 %v15301_v35  ;;  %13026 = vmatprep.subr.bf16.mxu1 %v15368_v49  ;;  %v15349_v35 = vcombine.low %v9631_v32, %v9635_v24  ;;  %v15416_v49 = vcombine.high %v9696_v13, %v9700_v31  ;;  %v9740_v21 = vld [vmem:[#allocation29 + $0x630] sm:$0xff]  ;;  %v9679_v32 = vld [vmem:[#allocation29 + $0x448] sm:$0xff] }
 0x9c4   :  { %12840 = vmatprep.subr.bf16.mxu0 %v15310_v48  ;;  %v15358_v48 = vcombine.high %v9639_v34, %v9643_v30  ;;  %v9683_v24 = vld [vmem:[#allocation29 + $0x468] sm:$0xff] }
 0x9c6   :  { %13027 = vmatpush1.bf16.msra.mxu1 %v15367_v54  ;;  %v15415_v54 = vcombine.low %v9696_v13, %v9700_v31  ;;  %v9744_v13 = vld [vmem:[#allocation29 + $0x650] sm:$0xff] }
 0x9c7   :  { %12841 = vmatpush1.bf16.msra.mxu0 %v15309_v55  ;;  %13028 = vmatprep.subr.bf16.mxu1 %v15376_v47  ;;  %v15357_v55 = vcombine.low %v9639_v34, %v9643_v30  ;;  %v15424_v47 = vcombine.high %v9704_v36, %v9708_v56  ;;  %v9748_v31 = vld [vmem:[#allocation29 + $0x670] sm:$0xff]  ;;  %v9687_v34 = vld [vmem:[#allocation29 + $0x488] sm:$0xff] }
 0x9c8   :  { %12842 = vmatprep.subr.bf16.mxu0 %v15318_v4  ;;  %v15366_v4 = vcombine.high %v9647_v39, %v9651_v52  ;;  %v9691_v30 = vld [vmem:[#allocation29 + $0x4a8] sm:$0xff] }
 0x9ca   :  { %13029 = vmatpush1.bf16.msra.mxu1 %v15375_v26  ;;  %v15423_v26 = vcombine.low %v9704_v36, %v9708_v56  ;;  %v9752_v36 = vld [vmem:[#allocation29 + $0x690] sm:$0xff] }
 0x9cb   :  { %12843 = vmatpush1.bf16.msra.mxu0 %v15317_v25  ;;  %13030 = vmatprep.subr.bf16.mxu1 %v15384_v37  ;;  %v15365_v25 = vcombine.low %v9647_v39, %v9651_v52  ;;  %v15432_v37 = vcombine.high %v9712_v57, %v9716_v28  ;;  %v9756_v56 = vld [vmem:[#allocation29 + $0x6b0] sm:$0xff]  ;;  %v9695_v39 = vld [vmem:[#allocation29 + $0x4c8] sm:$0xff] }
 0x9cc   :  { %12844 = vmatprep.subr.bf16.mxu0 %v15326_v42  ;;  %v15374_v42 = vcombine.high %v9655_v17, %v9659_v58  ;;  %v9699_v52 = vld [vmem:[#allocation29 + $0x4e8] sm:$0xff] }
 0x9ce   :  { %13031 = vmatpush1.bf16.msra.mxu1 %v15383_v7  ;;  %v15431_v7 = vcombine.low %v9712_v57, %v9716_v28  ;;  %v9760_v57 = vld [vmem:[#allocation29 + $0x6d0] sm:$0xff] }
 0x9cf   :  { %12845 = vmatpush1.bf16.msra.mxu0 %v15325_v8  ;;  %13043 = vmatprep.subr.bf16.mxu1 %v15392_v43  ;;  %v15373_v8 = vcombine.low %v9655_v17, %v9659_v58  ;;  %v15440_v43 = vcombine.high %v9720_v61, %v9724_v0  ;;  %v9764_v28 = vld [vmem:[#allocation29 + $0x6f0] sm:$0xff]  ;;  %v9703_v17 = vld [vmem:[#allocation29 + $0x508] sm:$0xff] }
 0x9d0   :  { %12846 = vmatprep.subr.bf16.mxu0 %v15334_v51  ;;  %v15382_v51 = vcombine.high %v9663_v5, %v9667_v6  ;;  %v9707_v58 = vld [vmem:[#allocation29 + $0x528] sm:$0xff] }
 0x9d1   :  { %13033 = vmatmul.mubr.bf16.vlgmr.msra.gmra.mrb[44].mxu1 %v18083_v29 }
 0x9d2   :  { %13044 = vmatpush1.bf16.msra.mxu1 %v15391_v15  ;;  %13075 = vmatprep.mubr.bf16.mxu1 %v18093_v1  ;;  %v15439_v15 = vcombine.low %v9720_v61, %v9724_v0  ;;  %v9768_v61 = vld [vmem:[#allocation29 + $0x710] sm:$0xff] }
 0x9d3   :  { %12847 = vmatpush1.bf16.msra.mxu0 %v15333_v16  ;;  %13045 = vmatprep.subr.bf16.mxu1 %v15400_v14  ;;  %v15381_v16 = vcombine.low %v9663_v5, %v9667_v6  ;;  %v15448_v14 = vcombine.high %v9728_v9, %v9732_v10  ;;  %v9772_v0 = vld [vmem:[#allocation29 + $0x730] sm:$0xff]  ;;  %v9711_v5 = vld [vmem:[#allocation29 + $0x548] sm:$0xff] }
 0x9d4   :  { %12848 = vmatprep.subr.bf16.mxu0 %v15342_v20  ;;  %v15390_v20 = vcombine.high %v9671_v11, %v9675_v12  ;;  %v9715_v6 = vld [vmem:[#allocation29 + $0x568] sm:$0xff] }
 0x9d6   :  { %13046 = vmatpush1.bf16.msra.mxu1 %v15399_v27  ;;  %v15447_v27 = vcombine.low %v9728_v9, %v9732_v10  ;;  %v9776_v9 = vld [vmem:[#allocation29 + $0x750] sm:$0xff] }
 0x9d7   :  { %12849 = vmatpush1.bf16.msra.mxu0 %v15341_v33  ;;  %13047 = vmatprep.subr.bf16.mxu1 %v15408_v44  ;;  %v15389_v33 = vcombine.low %v9671_v11, %v9675_v12  ;;  %v15456_v44 = vcombine.high %v9736_v41, %v9740_v21  ;;  %v9780_v10 = vld [vmem:[#allocation29 + $0x770] sm:$0xff]  ;;  %v9719_v11 = vld [vmem:[#allocation29 + $0x588] sm:$0xff] }
 0x9d8   :  { %12850 = vmatprep.subr.bf16.mxu0 %v15350_v46  ;;  %v15398_v46 = vcombine.high %v9679_v32, %v9683_v24  ;;  %v9723_v12 = vld [vmem:[#allocation29 + $0x5a8] sm:$0xff] }
 0x9da   :  { %13048 = vmatpush1.bf16.msra.mxu1 %v15407_v60  ;;  %v15455_v60 = vcombine.low %v9736_v41, %v9740_v21  ;;  %v9784_v41 = vld [vmem:[#allocation29 + $0x790] sm:$0xff] }
 0x9db   :  { %12851 = vmatpush1.bf16.msra.mxu0 %v15349_v35  ;;  %13049 = vmatprep.subr.bf16.mxu1 %v15416_v49  ;;  %v15397_v35 = vcombine.low %v9679_v32, %v9683_v24  ;;  %v15464_v49 = vcombine.high %v9744_v13, %v9748_v31  ;;  %v9788_v21 = vld [vmem:[#allocation29 + $0x7b0] sm:$0xff]  ;;  %v9727_v32 = vld [vmem:[#allocation29 + $0x5c8] sm:$0xff] }
 0x9dc   :  { %12852 = vmatprep.subr.bf16.mxu0 %v15358_v48  ;;  %v15406_v48 = vcombine.high %v9687_v34, %v9691_v30  ;;  %v9731_v24 = vld [vmem:[#allocation29 + $0x5e8] sm:$0xff] }
 0x9de   :  { %13050 = vmatpush1.bf16.msra.mxu1 %v15415_v54  ;;  %v15463_v54 = vcombine.low %v9744_v13, %v9748_v31  ;;  %v9792_v13 = vld [vmem:[#allocation29 + $0x7d0] sm:$0xff] }
 0x9df   :  { %12853 = vmatpush1.bf16.msra.mxu0 %v15357_v55  ;;  %13051 = vmatprep.subr.bf16.mxu1 %v15424_v47  ;;  %v15405_v55 = vcombine.low %v9687_v34, %v9691_v30  ;;  %v15472_v47 = vcombine.high %v9752_v36, %v9756_v56  ;;  %v9796_v31 = vld [vmem:[#allocation29 + $0x7f0] sm:$0xff]  ;;  %v9735_v34 = vld [vmem:[#allocation29 + $0x608] sm:$0xff] }
 0x9e0   :  { %12854 = vmatprep.subr.bf16.mxu0 %v15366_v4  ;;  %v15414_v4 = vcombine.high %v9695_v39, %v9699_v52  ;;  %v9739_v30 = vld [vmem:[#allocation29 + $0x628] sm:$0xff] }
 0x9e2   :  { %13052 = vmatpush1.bf16.msra.mxu1 %v15423_v26  ;;  %v15471_v26 = vcombine.low %v9752_v36, %v9756_v56  ;;  %v9800_v36 = vld [vmem:[#allocation29 + $0x810] sm:$0xff] }
 0x9e3   :  { %12855 = vmatpush1.bf16.msra.mxu0 %v15365_v25  ;;  %13053 = vmatprep.subr.bf16.mxu1 %v15432_v37  ;;  %v15413_v25 = vcombine.low %v9695_v39, %v9699_v52  ;;  %v15480_v37 = vcombine.high %v9760_v57, %v9764_v28  ;;  %v9804_v56 = vld [vmem:[#allocation29 + $0x830] sm:$0xff]  ;;  %v9743_v39 = vld [vmem:[#allocation29 + $0x648] sm:$0xff] }
 0x9e4   :  { %12856 = vmatprep.subr.bf16.mxu0 %v15374_v42  ;;  %v15422_v42 = vcombine.high %v9703_v17, %v9707_v58  ;;  %v9747_v52 = vld [vmem:[#allocation29 + $0x668] sm:$0xff] }
 0x9e6   :  { %13054 = vmatpush1.bf16.msra.mxu1 %v15431_v7  ;;  %v15479_v7 = vcombine.low %v9760_v57, %v9764_v28  ;;  %v9808_v57 = vld [vmem:[#allocation29 + $0x850] sm:$0xff] }
 0x9e7   :  { %12857 = vmatpush1.bf16.msra.mxu0 %v15373_v8  ;;  %13055 = vmatprep.subr.bf16.mxu1 %v15440_v43  ;;  %v15421_v8 = vcombine.low %v9703_v17, %v9707_v58  ;;  %v15488_v43 = vcombine.high %v9768_v61, %v9772_v0  ;;  %v9812_v28 = vld [vmem:[#allocation29 + $0x870] sm:$0xff]  ;;  %v9751_v17 = vld [vmem:[#allocation29 + $0x688] sm:$0xff] }
 0x9e8   :  { %12858 = vmatprep.subr.bf16.mxu0 %v15382_v51  ;;  %v15430_v51 = vcombine.high %v9711_v5, %v9715_v6  ;;  %v9755_v58 = vld [vmem:[#allocation29 + $0x6a8] sm:$0xff] }
 0x9ea   :  { %13056 = vmatpush1.bf16.msra.mxu1 %v15439_v15  ;;  %v15487_v15 = vcombine.low %v9768_v61, %v9772_v0  ;;  %v9816_v61 = vld [vmem:[#allocation29 + $0x890] sm:$0xff] }
 0x9eb   :  { %12859 = vmatpush1.bf16.msra.mxu0 %v15381_v16  ;;  %13057 = vmatprep.subr.bf16.mxu1 %v15448_v14  ;;  %v15429_v16 = vcombine.low %v9711_v5, %v9715_v6  ;;  %v15496_v14 = vcombine.high %v9776_v9, %v9780_v10  ;;  %v9820_v0 = vld [vmem:[#allocation29 + $0x8b0] sm:$0xff]  ;;  %v9759_v5 = vld [vmem:[#allocation29 + $0x6c8] sm:$0xff] }
 0x9ec   :  { %12871 = vmatprep.subr.bf16.mxu0 %v15390_v20  ;;  %v15438_v20 = vcombine.high %v9719_v11, %v9723_v12  ;;  %v9763_v6 = vld [vmem:[#allocation29 + $0x6e8] sm:$0xff] }
 0x9ee   :  { %12861 = vmatmul.mubr.bf16.vlgmr.msra.gmra.mrb[56].mxu0 %v18083_v29  ;;  %13058 = vmatpush1.bf16.msra.mxu1 %v15447_v27  ;;  %v15495_v27 = vcombine.low %v9776_v9, %v9780_v10  ;;  %v9824_v9 = vld [vmem:[#allocation29 + $0x8d0] sm:$0xff] }
 0x9ef   :  { %12872 = vmatpush1.bf16.msra.mxu0 %v15389_v33  ;;  %12903 = vmatprep.mubr.bf16.mxu0 %v18093_v1  ;;  %v15437_v33 = vcombine.low %v9719_v11, %v9723_v12  ;;  %v9828_v10 = vld [vmem:[#allocation29 + $0x8f0] sm:$0xff]  ;;  %v9767_v11 = vld [vmem:[#allocation29 + $0x708] sm:$0xff] }
 0x9f0   :  { %13059 = vmatprep.subr.bf16.mxu1 %v15456_v44  ;;  %12873 = vmatprep.subr.bf16.mxu0 %v15398_v46  ;;  %v15504_v44 = vcombine.high %v9784_v41, %v9788_v21  ;;  %v15446_v46 = vcombine.high %v9727_v32, %v9731_v24  ;;  %v9771_v12 = vld [vmem:[#allocation29 + $0x728] sm:$0xff] }
 0x9f2   :  { %13060 = vmatpush1.bf16.msra.mxu1 %v15455_v60  ;;  %v15503_v60 = vcombine.low %v9784_v41, %v9788_v21  ;;  %v9832_v41 = vld [vmem:[#allocation29 + $0x910] sm:$0xff] }
 0x9f3   :  { %12874 = vmatpush1.bf16.msra.mxu0 %v15397_v35  ;;  %13061 = vmatprep.subr.bf16.mxu1 %v15464_v49  ;;  %v15445_v35 = vcombine.low %v9727_v32, %v9731_v24  ;;  %v15512_v49 = vcombine.high %v9792_v13, %v9796_v31  ;;  %v9836_v21 = vld [vmem:[#allocation29 + $0x930] sm:$0xff]  ;;  %v9775_v32 = vld [vmem:[#allocation29 + $0x748] sm:$0xff] }
 0x9f4   :  { %12875 = vmatprep.subr.bf16.mxu0 %v15406_v48  ;;  %v15454_v48 = vcombine.high %v9735_v34, %v9739_v30  ;;  %v9779_v24 = vld [vmem:[#allocation29 + $0x768] sm:$0xff] }
 0x9f6   :  { %13062 = vmatpush1.bf16.msra.mxu1 %v15463_v54  ;;  %v15511_v54 = vcombine.low %v9792_v13, %v9796_v31  ;;  %v9840_v13 = vld [vmem:[#allocation29 + $0x950] sm:$0xff] }
 0x9f7   :  { %12876 = vmatpush1.bf16.msra.mxu0 %v15405_v55  ;;  %13063 = vmatprep.subr.bf16.mxu1 %v15472_v47  ;;  %v15453_v55 = vcombine.low %v9735_v34, %v9739_v30  ;;  %v15520_v47 = vcombine.high %v9800_v36, %v9804_v56  ;;  %v9844_v31 = vld [vmem:[#allocation29 + $0x970] sm:$0xff]  ;;  %v9783_v34 = vld [vmem:[#allocation29 + $0x788] sm:$0xff] }
 0x9f8   :  { %12877 = vmatprep.subr.bf16.mxu0 %v15414_v4  ;;  %v15462_v4 = vcombine.high %v9743_v39, %v9747_v52  ;;  %v9787_v30 = vld [vmem:[#allocation29 + $0x7a8] sm:$0xff] }
 0x9fa   :  { %13064 = vmatpush1.bf16.msra.mxu1 %v15471_v26  ;;  %v15519_v26 = vcombine.low %v9800_v36, %v9804_v56  ;;  %v9848_v36 = vld [vmem:[#allocation29 + $0x990] sm:$0xff] }
 0x9fb   :  { %12878 = vmatpush1.bf16.msra.mxu0 %v15413_v25  ;;  %13065 = vmatprep.subr.bf16.mxu1 %v15480_v37  ;;  %v15461_v25 = vcombine.low %v9743_v39, %v9747_v52  ;;  %v15528_v37 = vcombine.high %v9808_v57, %v9812_v28  ;;  %v9852_v56 = vld [vmem:[#allocation29 + $0x9b0] sm:$0xff]  ;;  %v9791_v39 = vld [vmem:[#allocation29 + $0x7c8] sm:$0xff] }
 0x9fc   :  { %12879 = vmatprep.subr.bf16.mxu0 %v15422_v42  ;;  %v15470_v42 = vcombine.high %v9751_v17, %v9755_v58  ;;  %v9795_v52 = vld [vmem:[#allocation29 + $0x7e8] sm:$0xff] }
 0x9fe   :  { %13066 = vmatpush1.bf16.msra.mxu1 %v15479_v7  ;;  %v15527_v7 = vcombine.low %v9808_v57, %v9812_v28  ;;  %v9856_v57 = vld [vmem:[#allocation29 + $0x9d0] sm:$0xff] }
 0x9ff   :  { %12880 = vmatpush1.bf16.msra.mxu0 %v15421_v8  ;;  %13067 = vmatprep.subr.bf16.mxu1 %v15488_v43  ;;  %v15469_v8 = vcombine.low %v9751_v17, %v9755_v58  ;;  %v15536_v43 = vcombine.high %v9816_v61, %v9820_v0  ;;  %v9860_v28 = vld [vmem:[#allocation29 + $0x9f0] sm:$0xff]  ;;  %v9799_v17 = vld [vmem:[#allocation29 + $0x808] sm:$0xff] }
 0xa00   :  { %12881 = vmatprep.subr.bf16.mxu0 %v15430_v51  ;;  %v15478_v51 = vcombine.high %v9759_v5, %v9763_v6  ;;  %v9803_v58 = vld [vmem:[#allocation29 + $0x828] sm:$0xff] }
 0xa02   :  { %13068 = vmatpush1.bf16.msra.mxu1 %v15487_v15  ;;  %v15535_v15 = vcombine.low %v9816_v61, %v9820_v0  ;;  %v9864_v61 = vld [vmem:[#allocation29 + $0xa10] sm:$0xff] }
 0xa03   :  { %12882 = vmatpush1.bf16.msra.mxu0 %v15429_v16  ;;  %13069 = vmatprep.subr.bf16.mxu1 %v15496_v14  ;;  %v15477_v16 = vcombine.low %v9759_v5, %v9763_v6  ;;  %v15544_v14 = vcombine.high %v9824_v9, %v9828_v10  ;;  %v9868_v0 = vld [vmem:[#allocation29 + $0xa30] sm:$0xff]  ;;  %v9807_v5 = vld [vmem:[#allocation29 + $0x848] sm:$0xff] }
 0xa04   :  { %12883 = vmatprep.subr.bf16.mxu0 %v15438_v20  ;;  %v15486_v20 = vcombine.high %v9767_v11, %v9771_v12  ;;  %v9811_v6 = vld [vmem:[#allocation29 + $0x868] sm:$0xff] }
 0xa06   :  { %13070 = vmatpush1.bf16.msra.mxu1 %v15495_v27  ;;  %v15543_v27 = vcombine.low %v9824_v9, %v9828_v10  ;;  %v9872_v9 = vld [vmem:[#allocation29 + $0xa50] sm:$0xff] }
 0xa07   :  { %12884 = vmatpush1.bf16.msra.mxu0 %v15437_v33  ;;  %13071 = vmatprep.subr.bf16.mxu1 %v15504_v44  ;;  %v15485_v33 = vcombine.low %v9767_v11, %v9771_v12  ;;  %v15552_v44 = vcombine.high %v9832_v41, %v9836_v21  ;;  %v9876_v10 = vld [vmem:[#allocation29 + $0xa70] sm:$0xff]  ;;  %v9815_v11 = vld [vmem:[#allocation29 + $0x888] sm:$0xff] }
 0xa08   :  { %12885 = vmatprep.subr.bf16.mxu0 %v15446_v46  ;;  %v15494_v46 = vcombine.high %v9775_v32, %v9779_v24  ;;  %v9819_v12 = vld [vmem:[#allocation29 + $0x8a8] sm:$0xff] }
 0xa0a   :  { %13072 = vmatpush1.bf16.msra.mxu1 %v15503_v60  ;;  %v15551_v60 = vcombine.low %v9832_v41, %v9836_v21  ;;  %v9880_v41 = vld [vmem:[#allocation29 + $0xa90] sm:$0xff] }
 0xa0b   :  { %12886 = vmatpush1.bf16.msra.mxu0 %v15445_v35  ;;  %13073 = vmatprep.subr.bf16.mxu1 %v15512_v49  ;;  %v15493_v35 = vcombine.low %v9775_v32, %v9779_v24  ;;  %v15560_v49 = vcombine.high %v9840_v13, %v9844_v31  ;;  %v9884_v21 = vld [vmem:[#allocation29 + $0xab0] sm:$0xff]  ;;  %v9823_v32 = vld [vmem:[#allocation29 + $0x8c8] sm:$0xff] }
 0xa0c   :  { %12887 = vmatprep.subr.bf16.mxu0 %v15454_v48  ;;  %v15502_v48 = vcombine.high %v9783_v34, %v9787_v30  ;;  %v9827_v24 = vld [vmem:[#allocation29 + $0x8e8] sm:$0xff] }
 0xa0e   :  { %13074 = vmatpush1.bf16.msra.mxu1 %v15511_v54  ;;  %v15559_v54 = vcombine.low %v9840_v13, %v9844_v31  ;;  %v9888_v13 = vld [vmem:[#allocation29 + $0xad0] sm:$0xff] }
 0xa0f   :  { %12888 = vmatpush1.bf16.msra.mxu0 %v15453_v55  ;;  %13086 = vmatprep.subr.bf16.mxu1 %v15520_v47  ;;  %v15501_v55 = vcombine.low %v9783_v34, %v9787_v30  ;;  %v15568_v47 = vcombine.high %v9848_v36, %v9852_v56  ;;  %v9892_v31 = vld [vmem:[#allocation29 + $0xaf0] sm:$0xff]  ;;  %v9831_v34 = vld [vmem:[#allocation29 + $0x908] sm:$0xff] }
 0xa10   :  { %12889 = vmatprep.subr.bf16.mxu0 %v15462_v4  ;;  %v15510_v4 = vcombine.high %v9791_v39, %v9795_v52  ;;  %v9835_v30 = vld [vmem:[#allocation29 + $0x928] sm:$0xff] }
 0xa11   :  { %13076 = vmatmul.mubr.bf16.vlgmr.msra.gmra.mrb[44].mxu1 %v18091_v40 }
 0xa12   :  { %13087 = vmatpush1.bf16.msra.mxu1 %v15519_v26  ;;  %13118 = vmatprep.mubr.bf16.mxu1 %v18101_v19  ;;  %v15567_v26 = vcombine.low %v9848_v36, %v9852_v56  ;;  %v9896_v36 = vld [vmem:[#allocation29 + $0xb10] sm:$0xff] }
 0xa13   :  { %12890 = vmatpush1.bf16.msra.mxu0 %v15461_v25  ;;  %13088 = vmatprep.subr.bf16.mxu1 %v15528_v37  ;;  %v15509_v25 = vcombine.low %v9791_v39, %v9795_v52  ;;  %v15576_v37 = vcombine.high %v9856_v57, %v9860_v28  ;;  %v9900_v56 = vld [vmem:[#allocation29 + $0xb30] sm:$0xff]  ;;  %v9839_v39 = vld [vmem:[#allocation29 + $0x948] sm:$0xff] }
 0xa14   :  { %12891 = vmatprep.subr.bf16.mxu0 %v15470_v42  ;;  %v15518_v42 = vcombine.high %v9799_v17, %v9803_v58  ;;  %v9843_v52 = vld [vmem:[#allocation29 + $0x968] sm:$0xff] }
 0xa16   :  { %13089 = vmatpush1.bf16.msra.mxu1 %v15527_v7  ;;  %v15575_v7 = vcombine.low %v9856_v57, %v9860_v28  ;;  %v9904_v57 = vld [vmem:[#allocation29 + $0xb50] sm:$0xff] }
 0xa17   :  { %12892 = vmatpush1.bf16.msra.mxu0 %v15469_v8  ;;  %13090 = vmatprep.subr.bf16.mxu1 %v15536_v43  ;;  %v15517_v8 = vcombine.low %v9799_v17, %v9803_v58  ;;  %v15584_v43 = vcombine.high %v9864_v61, %v9868_v0  ;;  %v9908_v28 = vld [vmem:[#allocation29 + $0xb70] sm:$0xff]  ;;  %v9847_v17 = vld [vmem:[#allocation29 + $0x988] sm:$0xff] }
 0xa18   :  { %12893 = vmatprep.subr.bf16.mxu0 %v15478_v51  ;;  %v15526_v51 = vcombine.high %v9807_v5, %v9811_v6  ;;  %v9851_v58 = vld [vmem:[#allocation29 + $0x9a8] sm:$0xff] }
 0xa1a   :  { %13091 = vmatpush1.bf16.msra.mxu1 %v15535_v15  ;;  %v15583_v15 = vcombine.low %v9864_v61, %v9868_v0  ;;  %v9912_v61 = vld [vmem:[#allocation29 + $0xb90] sm:$0xff] }
 0xa1b   :  { %12894 = vmatpush1.bf16.msra.mxu0 %v15477_v16  ;;  %13092 = vmatprep.subr.bf16.mxu1 %v15544_v14  ;;  %v15525_v16 = vcombine.low %v9807_v5, %v9811_v6  ;;  %v15592_v14 = vcombine.high %v9872_v9, %v9876_v10  ;;  %v9916_v0 = vld [vmem:[#allocation29 + $0xbb0] sm:$0xff]  ;;  %v9855_v5 = vld [vmem:[#allocation29 + $0x9c8] sm:$0xff] }
 0xa1c   :  { %12895 = vmatprep.subr.bf16.mxu0 %v15486_v20  ;;  %v15534_v20 = vcombine.high %v9815_v11, %v9819_v12  ;;  %v9859_v6 = vld [vmem:[#allocation29 + $0x9e8] sm:$0xff] }
 0xa1e   :  { %13093 = vmatpush1.bf16.msra.mxu1 %v15543_v27  ;;  %v15591_v27 = vcombine.low %v9872_v9, %v9876_v10  ;;  %v9920_v9 = vld [vmem:[#allocation29 + $0xbd0] sm:$0xff] }
 0xa1f   :  { %12896 = vmatpush1.bf16.msra.mxu0 %v15485_v33  ;;  %13094 = vmatprep.subr.bf16.mxu1 %v15552_v44  ;;  %v15533_v33 = vcombine.low %v9815_v11, %v9819_v12  ;;  %v15600_v44 = vcombine.high %v9880_v41, %v9884_v21  ;;  %v9924_v10 = vld [vmem:[#allocation29 + $0xbf0] sm:$0xff]  ;;  %v9863_v11 = vld [vmem:[#allocation29 + $0xa08] sm:$0xff] }
 0xa20   :  { %12897 = vmatprep.subr.bf16.mxu0 %v15494_v46  ;;  %v15542_v46 = vcombine.high %v9823_v32, %v9827_v24  ;;  %v9867_v12 = vld [vmem:[#allocation29 + $0xa28] sm:$0xff] }
 0xa22   :  { %13095 = vmatpush1.bf16.msra.mxu1 %v15551_v60  ;;  %v15599_v60 = vcombine.low %v9880_v41, %v9884_v21  ;;  %v9928_v41 = vld [vmem:[#allocation29 + $0xc10] sm:$0xff] }
 0xa23   :  { %12898 = vmatpush1.bf16.msra.mxu0 %v15493_v35  ;;  %13096 = vmatprep.subr.bf16.mxu1 %v15560_v49  ;;  %v15541_v35 = vcombine.low %v9823_v32, %v9827_v24  ;;  %v15608_v49 = vcombine.high %v9888_v13, %v9892_v31  ;;  %v9932_v21 = vld [vmem:[#allocation29 + $0xc30] sm:$0xff]  ;;  %v9871_v32 = vld [vmem:[#allocation29 + $0xa48] sm:$0xff] }
 0xa24   :  { %12899 = vmatprep.subr.bf16.mxu0 %v15502_v48  ;;  %v15550_v48 = vcombine.high %v9831_v34, %v9835_v30  ;;  %v9875_v24 = vld [vmem:[#allocation29 + $0xa68] sm:$0xff] }
 0xa26   :  { %13097 = vmatpush1.bf16.msra.mxu1 %v15559_v54  ;;  %v15607_v54 = vcombine.low %v9888_v13, %v9892_v31  ;;  %v9936_v13 = vld [vmem:[#allocation29 + $0xc50] sm:$0xff] }
 0xa27   :  { %12900 = vmatpush1.bf16.msra.mxu0 %v15501_v55  ;;  %13098 = vmatprep.subr.bf16.mxu1 %v15568_v47  ;;  %v15549_v55 = vcombine.low %v9831_v34, %v9835_v30  ;;  %v15616_v47 = vcombine.high %v9896_v36, %v9900_v56  ;;  %v9940_v31 = vld [vmem:[#allocation29 + $0xc70] sm:$0xff]  ;;  %v9879_v34 = vld [vmem:[#allocation29 + $0xa88] sm:$0xff] }
 0xa28   :  { %12901 = vmatprep.subr.bf16.mxu0 %v15510_v4  ;;  %v15558_v4 = vcombine.high %v9839_v39, %v9843_v52  ;;  %v9883_v30 = vld [vmem:[#allocation29 + $0xaa8] sm:$0xff] }
 0xa2a   :  { %13099 = vmatpush1.bf16.msra.mxu1 %v15567_v26  ;;  %v15615_v26 = vcombine.low %v9896_v36, %v9900_v56  ;;  %v9944_v36 = vld [vmem:[#allocation29 + $0xc90] sm:$0xff] }
 0xa2b   :  { %12902 = vmatpush1.bf16.msra.mxu0 %v15509_v25  ;;  %13100 = vmatprep.subr.bf16.mxu1 %v15576_v37  ;;  %v15557_v25 = vcombine.low %v9839_v39, %v9843_v52  ;;  %v15624_v37 = vcombine.high %v9904_v57, %v9908_v28  ;;  %v9948_v56 = vld [vmem:[#allocation29 + $0xcb0] sm:$0xff]  ;;  %v9887_v39 = vld [vmem:[#allocation29 + $0xac8] sm:$0xff] }
 0xa2c   :  { %12914 = vmatprep.subr.bf16.mxu0 %v15518_v42  ;;  %v15566_v42 = vcombine.high %v9847_v17, %v9851_v58  ;;  %v9891_v52 = vld [vmem:[#allocation29 + $0xae8] sm:$0xff] }
 0xa2e   :  { %12904 = vmatmul.mubr.bf16.vlgmr.msra.gmra.mrb[56].mxu0 %v18091_v40  ;;  %13101 = vmatpush1.bf16.msra.mxu1 %v15575_v7  ;;  %v15623_v7 = vcombine.low %v9904_v57, %v9908_v28  ;;  %v9952_v57 = vld [vmem:[#allocation29 + $0xcd0] sm:$0xff] }
 0xa2f   :  { %12915 = vmatpush1.bf16.msra.mxu0 %v15517_v8  ;;  %12946 = vmatprep.mubr.bf16.mxu0 %v18101_v19  ;;  %v15565_v8 = vcombine.low %v9847_v17, %v9851_v58  ;;  %v9956_v28 = vld [vmem:[#allocation29 + $0xcf0] sm:$0xff]  ;;  %v9895_v17 = vld [vmem:[#allocation29 + $0xb08] sm:$0xff] }
 0xa30   :  { %13102 = vmatprep.subr.bf16.mxu1 %v15584_v43  ;;  %12916 = vmatprep.subr.bf16.mxu0 %v15526_v51  ;;  %v15632_v43 = vcombine.high %v9912_v61, %v9916_v0  ;;  %v15574_v51 = vcombine.high %v9855_v5, %v9859_v6  ;;  %v9899_v58 = vld [vmem:[#allocation29 + $0xb28] sm:$0xff] }
 0xa32   :  { %13103 = vmatpush1.bf16.msra.mxu1 %v15583_v15  ;;  %v15631_v15 = vcombine.low %v9912_v61, %v9916_v0  ;;  %v9960_v61 = vld [vmem:[#allocation29 + $0xd10] sm:$0xff] }
 0xa33   :  { %12917 = vmatpush1.bf16.msra.mxu0 %v15525_v16  ;;  %13104 = vmatprep.subr.bf16.mxu1 %v15592_v14  ;;  %v15573_v16 = vcombine.low %v9855_v5, %v9859_v6  ;;  %v15640_v14 = vcombine.high %v9920_v9, %v9924_v10  ;;  %v9964_v0 = vld [vmem:[#allocation29 + $0xd30] sm:$0xff]  ;;  %v9903_v5 = vld [vmem:[#allocation29 + $0xb48] sm:$0xff] }
 0xa34   :  { %12918 = vmatprep.subr.bf16.mxu0 %v15534_v20  ;;  %v15582_v20 = vcombine.high %v9863_v11, %v9867_v12  ;;  %v9907_v6 = vld [vmem:[#allocation29 + $0xb68] sm:$0xff] }
 0xa36   :  { %13105 = vmatpush1.bf16.msra.mxu1 %v15591_v27  ;;  %v15639_v27 = vcombine.low %v9920_v9, %v9924_v10  ;;  %v9968_v9 = vld [vmem:[#allocation29 + $0xd50] sm:$0xff] }
 0xa37   :  { %12919 = vmatpush1.bf16.msra.mxu0 %v15533_v33  ;;  %13106 = vmatprep.subr.bf16.mxu1 %v15600_v44  ;;  %v15581_v33 = vcombine.low %v9863_v11, %v9867_v12  ;;  %v15648_v44 = vcombine.high %v9928_v41, %v9932_v21  ;;  %v9972_v10 = vld [vmem:[#allocation29 + $0xd70] sm:$0xff]  ;;  %v9911_v11 = vld [vmem:[#allocation29 + $0xb88] sm:$0xff] }
 0xa38   :  { %12920 = vmatprep.subr.bf16.mxu0 %v15542_v46  ;;  %v15590_v46 = vcombine.high %v9871_v32, %v9875_v24  ;;  %v9915_v12 = vld [vmem:[#allocation29 + $0xba8] sm:$0xff] }
 0xa3a   :  { %13107 = vmatpush1.bf16.msra.mxu1 %v15599_v60  ;;  %v15647_v60 = vcombine.low %v9928_v41, %v9932_v21  ;;  %v15630_v41 = vcombine.high %v9911_v11, %v9915_v12  ;;  %v9976_v21 = vld [vmem:[#allocation29 + $0xd90] sm:$0xff] }
 0xa3b   :  { %12921 = vmatpush1.bf16.msra.mxu0 %v15541_v35  ;;  %13108 = vmatprep.subr.bf16.mxu1 %v15608_v49  ;;  %v15589_v35 = vcombine.low %v9871_v32, %v9875_v24  ;;  %v15656_v49 = vcombine.high %v9936_v13, %v9940_v31  ;;  %v9980_v32 = vld [vmem:[#allocation29 + $0xdb0] sm:$0xff] }
 0xa3c   :  { %12922 = vmatprep.subr.bf16.mxu0 %v15550_v48  ;;  %v15598_v48 = vcombine.high %v9879_v34, %v9883_v30 }
 0xa3e   :  { %13109 = vmatpush1.bf16.msra.mxu1 %v15607_v54  ;;  %v15655_v54 = vcombine.low %v9936_v13, %v9940_v31  ;;  %v15629_v13 = vcombine.low %v9911_v11, %v9915_v12  ;;  %v15696_v31 = vcombine.high %v9976_v21, %v9980_v32  ;;  %v10004_v11 = vld [vmem:[#allocation29 + $0xe70] sm:$0xff]  ;;  %v9943_v12 = vld [vmem:[#allocation29 + $0xc88] sm:$0xff] }
 0xa3f   :  { %12923 = vmatpush1.bf16.msra.mxu0 %v15549_v55  ;;  %13110 = vmatprep.subr.bf16.mxu1 %v15616_v47  ;;  %v15597_v55 = vcombine.low %v9879_v34, %v9883_v30  ;;  %v15664_v47 = vcombine.high %v9944_v36, %v9948_v56 }
 0xa40   :  { %12924 = vmatprep.subr.bf16.mxu0 %v15558_v4  ;;  %v15606_v4 = vcombine.high %v9887_v39, %v9891_v52 }
 0xa42   :  { %13111 = vmatpush1.bf16.msra.mxu1 %v15615_v26  ;;  %v15663_v26 = vcombine.low %v9944_v36, %v9948_v56  ;;  %v9927_v36 = vld [vmem:[#allocation29 + $0xc08] sm:$0xff] }
 0xa43   :  { %12925 = vmatpush1.bf16.msra.mxu0 %v15557_v25  ;;  %13112 = vmatprep.subr.bf16.mxu1 %v15624_v37  ;;  %v15605_v25 = vcombine.low %v9887_v39, %v9891_v52  ;;  %v15672_v37 = vcombine.high %v9952_v57, %v9956_v28  ;;  %v9931_v56 = vld [vmem:[#allocation29 + $0xc28] sm:$0xff] }
 0xa44   :  { %12926 = vmatprep.subr.bf16.mxu0 %v15566_v42  ;;  %v15614_v42 = vcombine.high %v9895_v17, %v9899_v58 }
 0xa46   :  { %13113 = vmatpush1.bf16.msra.mxu1 %v15623_v7  ;;  %v15671_v7 = vcombine.low %v9952_v57, %v9956_v28 }
 0xa47   :  { %12927 = vmatpush1.bf16.msra.mxu0 %v15565_v8  ;;  %13114 = vmatprep.subr.bf16.mxu1 %v15632_v43  ;;  %v15613_v8 = vcombine.low %v9895_v17, %v9899_v58  ;;  %v15680_v43 = vcombine.high %v9960_v61, %v9964_v0  ;;  %v15646_v17 = vcombine.high %v9927_v36, %v9931_v56  ;;  %v9992_v58 = vld [vmem:[#allocation29 + $0xe10] sm:$0xff] }
 0xa48   :  { %12928 = vmatprep.subr.bf16.mxu0 %v15574_v51  ;;  %v15622_v51 = vcombine.high %v9903_v5, %v9907_v6 }
 0xa4a   :  { %13115 = vmatpush1.bf16.msra.mxu1 %v15631_v15  ;;  %v15679_v15 = vcombine.low %v9960_v61, %v9964_v0  ;;  %v9939_v61 = vld [vmem:[#allocation29 + $0xc68] sm:$0xff] }
 0xa4b   :  { %12929 = vmatpush1.bf16.msra.mxu0 %v15573_v16  ;;  %13116 = vmatprep.subr.bf16.mxu1 %v15640_v14  ;;  %v10054_v16 = vld [vmem:[#allocation31] sm:$0xff]  ;;  %v15621_v14 = vcombine.low %v9903_v5, %v9907_v6 }
 0xa4c   :  { %12930 = vmatprep.subr.bf16.mxu0 %v15582_v20  ;;  %v15688_v20 = vcombine.high %v9968_v9, %v9972_v10  ;;  %v10059_v24 = vrot.slane %v10054_v16, %v17845_v2 }
 0xa4e   :  { %13117 = vmatpush1.bf16.msra.mxu1 %v15639_v27  ;;  %v9919_v27 = vld [vmem:[#allocation29 + $0xbc8] sm:$0xff] }
 0xa4f   :  { %12931 = vmatpush1.bf16.msra.mxu0 %v15581_v33  ;;  %13129 = vmatprep.subr.bf16.mxu1 %v15648_v44  ;;  %v9923_v33 = vld [vmem:[#allocation29 + $0xbe8] sm:$0xff]  ;;  %v10063_v44 = vrot.slane %v10054_v16, %v17848_v3 }
 0xa50   :  { %12932 = vmatprep.subr.bf16.mxu0 %v15590_v46  ;;  %v15687_v46 = vcombine.low %v9968_v9, %v9972_v10  ;;  %v15638_v30 = vcombine.high %v9919_v27, %v9923_v33  ;;  %v10000_v10 = vld [vmem:[#allocation29 + $0xe50] sm:$0xff] }
 0xa51   :  { %13119 = vmatmul.mubr.bf16.vlgmr.msra.gmra.mrb[44].mxu1 %v18099_v18 }
 0xa52   :  { %13130 = vmatpush1.bf16.msra.mxu1 %v15647_v60  ;;  %13161 = vmatprep.mubr.bf16.mxu1 %v18105_v45  ;;  %v9984_v60 = vld [vmem:[#allocation29 + $0xdd0] sm:$0xff] }
 0xa53   :  { %12933 = vmatpush1.bf16.msra.mxu0 %v15589_v35  ;;  %13131 = vmatprep.subr.bf16.mxu1 %v15656_v49  ;;  %v9988_v35 = vld [vmem:[#allocation29 + $0xdf0] sm:$0xff] }
 0xa54   :  { %12934 = vmatprep.subr.bf16.mxu0 %v15598_v48  ;;  %v15704_v57 = vcombine.high %v9984_v60, %v9988_v35  ;;  %v15703_v6 = vcombine.low %v9984_v60, %v9988_v35  ;;  %v9963_v60 = vld [vmem:[#allocation29 + $0xd28] sm:$0xff] }
 0xa56   :  { %13132 = vmatpush1.bf16.msra.mxu1 %v15655_v54  ;;  %v15695_v54 = vcombine.low %v9976_v21, %v9980_v32  ;;  %v10008_v21 = vld [vmem:[#allocation29 + $0xe90] sm:$0xff] }
 0xa57   :  { %12935 = vmatpush1.bf16.msra.mxu0 %v15597_v55  ;;  %13133 = vmatprep.subr.bf16.mxu1 %v15664_v47  ;;  %v10012_v32 = vld [vmem:[#allocation29 + $0xeb0] sm:$0xff] }
 0xa58   :  { %12936 = vmatprep.subr.bf16.mxu0 %v15606_v4  ;;  %v15637_v4 = vcombine.low %v9919_v27, %v9923_v33  ;;  %v9955_v27 = vld [vmem:[#allocation29 + $0xce8] sm:$0xff]  ;;  %v15719_v33 = vcombine.low %v10000_v10, %v10004_v11  ;;  %v15727_v35 = vcombine.low %v10008_v21, %v10012_v32 }
 0xa5a   :  { %13134 = vmatpush1.bf16.msra.mxu1 %v15663_v26 }
 0xa5b   :  { %12937 = vmatpush1.bf16.msra.mxu0 %v15605_v25  ;;  %13135 = vmatprep.subr.bf16.mxu1 %v15672_v37  ;;  %v9996_v37 = vld [vmem:[#allocation29 + $0xe30] sm:$0xff] }
 0xa5c   :  { %12938 = vmatprep.subr.bf16.mxu0 %v15614_v42  ;;  %v9935_v42 = vld [vmem:[#allocation29 + $0xc48] sm:$0xff]  ;;  %v15711_v16 = vcombine.low %v9992_v58, %v9996_v37 }
 0xa5d   :  { %v15654_v9 = vcombine.high %v9935_v42, %v9939_v61 }
 0xa5e   :  { %13136 = vmatpush1.bf16.msra.mxu1 %v15671_v7 }
 0xa5f   :  { %12939 = vmatpush1.bf16.msra.mxu0 %v15613_v8  ;;  %13137 = vmatprep.subr.bf16.mxu1 %v15680_v43  ;;  %v15645_v8 = vcombine.low %v9927_v36, %v9931_v56  ;;  %v10024_v56 = vld [vmem:[#allocation29 + $0xf10] sm:$0xff] }
 0xa60   :  { %12940 = vmatprep.subr.bf16.mxu0 %v15622_v51  ;;  %v15712_v51 = vcombine.high %v9992_v58, %v9996_v37  ;;  %v10036_v58 = vld [vmem:[#allocation29 + $0xf70] sm:$0xff] }
 0xa62   :  { %13138 = vmatpush1.bf16.msra.mxu1 %v15679_v15  ;;  %v9947_v15 = vld [vmem:[#allocation29 + $0xca8] sm:$0xff] }
 0xa63   :  { %12941 = vmatpush1.bf16.msra.mxu0 %v15621_v14  ;;  %13139 = vmatprep.subr.bf16.mxu1 %v15688_v20  ;;  %v15653_v14 = vcombine.low %v9935_v42, %v9939_v61  ;;  %v15720_v20 = vcombine.high %v10000_v10, %v10004_v11  ;;  %v9983_v10 = vld [vmem:[#allocation29 + $0xdc8] sm:$0xff] }
 0xa64   :  { %v12819_v34 = vpop.f32.mrb[40].mxu1  ;;  %12942 = vmatprep.subr.bf16.mxu0 %v15630_v41  ;;  %v15662_v41 = vcombine.high %v9943_v12, %v9947_v15  ;;  %v9987_v11 = vld [vmem:[#allocation29 + $0xde8] sm:$0xff] }
 0xa65   :  { %v15974_v49 = vadd.f32 %v12819_v34, %v10059_v24  ;;  %v12821_v48 = vpop.f32.mrb[41].mxu1  ;;  %v10020_v34 = vld [vmem:[#allocation29 + $0xef0] sm:$0xff] }
 0xa66   :  { %v15975_v39 = vadd.f32 %v12821_v48, %v10063_v44  ;;  %v12823_v52 = vpop.f32.mrb[42].mxu1  ;;  %13140 = vmatpush1.bf16.msra.mxu1 %v15687_v46  ;;  %v15728_v46 = vcombine.high %v10008_v21, %v10012_v32  ;;  %v15702_v32 = vcombine.high %v9983_v10, %v9987_v11 }
 0xa67   :  { %v15976_v55 = vadd.f32 %v12823_v52, %v10059_v24  ;;  %v12825_v47 = vpop.f32.mrb[43].mxu1  ;;  %12943 = vmatpush1.bf16.msra.mxu0 %v15629_v13  ;;  %13141 = vmatprep.subr.bf16.mxu1 %v15696_v31  ;;  %v13344_v26 = vmax.f32 %v15974_v49, 0.0  ;;  %v9951_v24 = vld [vmem:[#allocation29 + $0xcc8] sm:$0xff]  ;;  %v10016_v31 = vld [vmem:[#allocation29 + $0xed0] sm:$0xff] }
 0xa68   :  { %v15977_v28 = vadd.f32 %v12825_v47, %v10063_v44  ;;  %12944 = vmatprep.subr.bf16.mxu0 %v15638_v30  ;;  %v13345_v0 = vmax.f32 %v15975_v39, 0.0  ;;  %v15661_v44 = vcombine.low %v9943_v12, %v9947_v15  ;;  %v15670_v13 = vcombine.high %v9951_v24, %v9955_v27  ;;  %v9959_v30 = vld [vmem:[#allocation29 + $0xd08] sm:$0xff]  ;;  %v10028_v39 = vld [vmem:[#allocation29 + $0xf30] sm:$0xff] }
 0xa69   :  { %v13352_v25 = vmax.f32 %v15976_v55, 0.0  ;;  %v15669_v49 = vcombine.low %v9951_v24, %v9955_v27  ;;  %v15736_v48 = vcombine.high %v10016_v31, %v10020_v34  ;;  %v15678_v36 = vcombine.high %v9959_v30, %v9963_v60  ;;  %v9967_v52 = vld [vmem:[#allocation29 + $0xd48] sm:$0xff]  ;;  %v10048_v24 = vld [vmem:[#allocation29 + $0xfd0] sm:$0xff] }
 0xa6a   :  { %v13353_v5 = vmax.f32 %v15977_v28, 0.0  ;;  %13142 = vmatpush1.bf16.msra.mxu1 %v15695_v54  ;;  %v9971_v54 = vld [vmem:[#allocation29 + $0xd68] sm:$0xff]  ;;  %v15735_v55 = vcombine.low %v10016_v31, %v10020_v34  ;;  %v15677_v47 = vcombine.low %v9959_v30, %v9963_v60  ;;  %v15743_v42 = vcombine.low %v10024_v56, %v10028_v39  ;;  %v10052_v27 = vld [vmem:[#allocation29 + $0xff0] sm:$0xff] }
 0xa6b   :  { %v18178_v7 = vpack.c.bf16 %v13352_v25, %v13344_v26  ;;  %12945 = vmatpush1.bf16.msra.mxu0 %v15637_v4  ;;  %13143 = vmatprep.subr.bf16.mxu1 %v15704_v57  ;;  %v8706_v4 = vld [vmem:[#allocation28] sm:$0x3]  ;;  %v15744_v57 = vcombine.high %v10024_v56, %v10028_v39  ;;  %v15686_v28 = vcombine.high %v9967_v52, %v9971_v54  ;;  %v9975_v26 = vld [vmem:[#allocation29 + $0xd88] sm:$0xff] }
 0xa6c   :  { %v18180_v43 = vpack.c.bf16 %v13353_v5, %v13345_v0  ;;  %12957 = vmatprep.subr.bf16.mxu0 %v15646_v17  ;;  %v10032_v17 = vld [vmem:[#allocation29 + $0xf50] sm:$0xff]  ;;  %v9979_v25 = vld [vmem:[#allocation29 + $0xda8] sm:$0xff]  ;;  %v8711_v37 = vrot.slane %v8706_v4, %v17845_v2  ;;  %v8715_v61 = vrot.slane %v8706_v4, %v17848_v3  ;;  %v15685_v0 = vcombine.low %v9967_v52, %v9971_v54 }
 0xa6d   :  { %v15752_v5 = vcombine.high %v10032_v17, %v10036_v58  ;;  %v15701_v31 = vcombine.low %v9983_v10, %v9987_v11  ;;  %v15768_v34 = vcombine.high %v10048_v24, %v10052_v27  ;;  %v9999_v60 = vld [vmem:[#allocation29 + $0xe48] sm:$0xff] }
 0xa6e   :  { %12947 = vmatmul.mubr.bf16.vlgmr.msra.gmra.mrb[56].mxu0 %v18099_v18  ;;  %13144 = vmatpush1.bf16.msra.mxu1 %v15703_v6  ;;  %v15694_v6 = vcombine.high %v9975_v26, %v9979_v25  ;;  %v10007_v39 = vld [vmem:[#allocation29 + $0xe88] sm:$0xff] }
 0xa6f   :  { %12958 = vmatpush1.bf16.msra.mxu0 %v15645_v8  ;;  %12989 = vmatprep.mubr.bf16.mxu0 %v18105_v45  ;;  %v10040_v8 = vld [vmem:[#allocation29 + $0xf90] sm:$0xff]  ;;  %v10011_v52 = vld [vmem:[#allocation29 + $0xea8] sm:$0xff] }
 0xa70   :  { %13145 = vmatprep.subr.bf16.mxu1 %v15712_v51  ;;  %12959 = vmatprep.subr.bf16.mxu0 %v15654_v9  ;;  %v10044_v51 = vld [vmem:[#allocation29 + $0xfb0] sm:$0xff]  ;;  %v16753_v54 = vld [vmem:[#allocation32] sm:$0xff]   ;;  %v15726_v4 = vcombine.high %v10007_v39, %v10011_v52 }
 0xa71   :  { %v16760_v10 = vld [vmem:[#allocation32 + $0x60] sm:$0xff]  }
 0xa72   :  { %13146 = vmatpush1.bf16.msra.mxu1 %v15711_v16  ;;  %v15751_v16 = vcombine.low %v10032_v17, %v10036_v58  ;;  %v16755_v17 = vld [vmem:[#allocation32 + $0x8] sm:$0xff]   ;;  %v15725_v58 = vcombine.low %v10007_v39, %v10011_v52 }
 0xa73   :  { %12960 = vmatpush1.bf16.msra.mxu0 %v15653_v14  ;;  %13147 = vmatprep.subr.bf16.mxu1 %v15720_v20  ;;  %v15693_v20 = vcombine.low %v9975_v26, %v9979_v25  ;;  %v16756_v26 = vld [vmem:[#allocation32 + $0x50] sm:$0xff]  }
 0xa74   :  { %12961 = vmatprep.subr.bf16.mxu0 %v15662_v41  ;;  %v15760_v41 = vcombine.high %v10040_v8, %v10044_v51 }
 0xa76   :  { %13148 = vmatpush1.bf16.msra.mxu1 %v15719_v33 }
 0xa77   :  { %12962 = vmatpush1.bf16.msra.mxu0 %v15661_v44  ;;  %13149 = vmatprep.subr.bf16.mxu1 %v15728_v46  ;;  %v9991_v44 = vld [vmem:[#allocation29 + $0xe08] sm:$0xff] }
 0xa78   :  { %12963 = vmatprep.subr.bf16.mxu0 %v15670_v13  ;;  %v9995_v46 = vld [vmem:[#allocation29 + $0xe28] sm:$0xff]  ;;  %v15759_v13 = vcombine.low %v10040_v8, %v10044_v51 }
 0xa79   :  { %v15710_v30 = vcombine.high %v9991_v44, %v9995_v46  ;;  %v10031_v8 = vld [vmem:[#allocation29 + $0xf48] sm:$0xff] }
 0xa7a   :  { %13150 = vmatpush1.bf16.msra.mxu1 %v15727_v35  ;;  %v10003_v35 = vld [vmem:[#allocation29 + $0xe68] sm:$0xff] }
 0xa7b   :  { %12964 = vmatpush1.bf16.msra.mxu0 %v15669_v49  ;;  %13151 = vmatprep.subr.bf16.mxu1 %v15736_v48  ;;  %v15767_v49 = vcombine.low %v10048_v24, %v10052_v27  ;;  %v15709_v48 = vcombine.low %v9991_v44, %v9995_v46  ;;  %v15718_v56 = vcombine.high %v9999_v60, %v10003_v35  ;;  %v10035_v51 = vld [vmem:[#allocation29 + $0xf68] sm:$0xff]  ;;  %v16764_v24 = vld [vmem:[#allocation32 + $0x70] sm:$0xff]  }
 0xa7c   :  { %12965 = vmatprep.subr.bf16.mxu0 %v15678_v36  ;;  %v16752_v36 = vld [vmem:[#allocation32 + $0x40] sm:$0xff]   ;;  %v15750_v11 = vcombine.high %v10031_v8, %v10035_v51  ;;  %v9549_v44 = vld [vmem:[#allocation29 + $0x38] sm:$0xff] }
 0xa7d   :  { %v16765_v46 = vld [vmem:[#allocation32 + $0x30] sm:$0xff]  }
 0xa7e   :  { %13152 = vmatpush1.bf16.msra.mxu1 %v15735_v55  ;;  %v15717_v55 = vcombine.low %v9999_v60, %v10003_v35  ;;  %v9557_v60 = vld [vmem:[#allocation29 + $0x78] sm:$0xff]  ;;  %v16767_v35 = vld [vmem:[#allocation32 + $0x38] sm:$0xff]  }
 0xa7f   :  { %12966 = vmatpush1.bf16.msra.mxu0 %v15677_v47  ;;  %13153 = vmatprep.subr.bf16.mxu1 %v15744_v57  ;;  %v16754_v47 = vld [vmem:[#allocation32 + $0x48] sm:$0xff]   ;;  %v10015_v57 = vld [vmem:[#allocation29 + $0xec8] sm:$0xff] }
 0xa80   :  { %12967 = vmatprep.subr.bf16.mxu0 %v15686_v28  ;;  %v10019_v28 = vld [vmem:[#allocation29 + $0xee8] sm:$0xff] }
 0xa81   :  { %v9521_v9 = vpop.f32.mrb[52].mxu0  ;;  %v15734_v25 = vcombine.high %v10015_v57, %v10019_v28 }
 0xa82   :  { %v15970_v12 = vadd.f32 %v9521_v9, %v8711_v37  ;;  %v9523_v15 = vpop.f32.mrb[53].mxu0  ;;  %13154 = vmatpush1.bf16.msra.mxu1 %v15743_v42  ;;  %v10027_v42 = vld [vmem:[#allocation29 + $0xf28] sm:$0xff] }
 0xa83   :  { %v15971_v14 = vadd.f32 %v9523_v15, %v8715_v61  ;;  %v9525_v2 = vpop.f32.mrb[54].mxu0  ;;  %12968 = vmatpush1.bf16.msra.mxu0 %v15685_v0  ;;  %13155 = vmatprep.subr.bf16.mxu1 %v15752_v5  ;;  %v15733_v0 = vcombine.low %v10015_v57, %v10019_v28  ;;  %v16758_v5 = vld [vmem:[#allocation32 + $0x58] sm:$0xff]   ;;  %v10043_v15 = vld [vmem:[#allocation29 + $0xfa8] sm:$0xff]  ;;  %v9577_v57 = vld [vmem:[#allocation29 + $0x118] sm:$0xff] }
 0xa84   :  { %9530 = vst [vmem:[#allocation36] sm:$0xff] %v15970_v12  ;;  %v15972_v3 = vadd.f32 %v9525_v2, %v8711_v37  ;;  %v9527_v21 = vpop.f32.mrb[55].mxu0  ;;  %12969 = vmatprep.subr.bf16.mxu0 %v15694_v6  ;;  %v10023_v37 = vld [vmem:[#allocation29 + $0xf08] sm:$0xff]  ;;  %v16762_v2 = vld [vmem:[#allocation32 + $0x68] sm:$0xff]   ;;  %v9581_v28 = vld [vmem:[#allocation29 + $0x138] sm:$0xff] }
 0xa85   :  { %9531 = vst [vmem:[#allocation36 + $0x8] sm:$0xff] %v15971_v14  ;;  %v15973_v33 = vadd.f32 %v9527_v21, %v8715_v61  ;;  %v16757_v61 = vld [vmem:[#allocation32 + $0x10] sm:$0xff]   ;;  %v15742_v6 = vcombine.high %v10023_v37, %v10027_v42  ;;  %v15741_v9 = vcombine.low %v10023_v37, %v10027_v42  ;;  %v10039_v12 = vld [vmem:[#allocation29 + $0xf88] sm:$0xff]  ;;  %v15749_v14 = vcombine.low %v10031_v8, %v10035_v51  ;;  %v16763_v21 = vld [vmem:[#allocation32 + $0x28] sm:$0xff]  }
 0xa86   :  { %9532 = vst [vmem:[#allocation36 + $0x10] sm:$0xff] %v15972_v3  ;;  %13156 = vmatpush1.bf16.msra.mxu1 %v15751_v16  ;;  %v16761_v16 = vld [vmem:[#allocation32 + $0x20] sm:$0xff]   ;;  %v9593_v42 = vld [vmem:[#allocation29 + $0x198] sm:$0xff] }
 0xa87   :  { %9533 = vst [vmem:[#allocation36 + $0x18] sm:$0xff] %v15973_v33  ;;  %12970 = vmatpush1.bf16.msra.mxu0 %v15693_v20  ;;  %13157 = vmatprep.subr.bf16.mxu1 %v15760_v41  ;;  %v15758_v20 = vcombine.high %v10039_v12, %v10043_v15  ;;  %v10047_v41 = vld [vmem:[#allocation29 + $0xfc8] sm:$0xff]  ;;  %v9545_v33 = vld [vmem:[#allocation29 + $0x18] sm:$0xff] }
 0xa88   :  { %12971 = vmatprep.subr.bf16.mxu0 %v15702_v32  ;;  %v10051_v3 = vld [vmem:[#allocation29 + $0xfe8] sm:$0xff]  ;;  %v15757_v32 = vcombine.low %v10039_v12, %v10043_v15  ;;  %v9617_v12 = vld [vmem:[#allocation29 + $0x258] sm:$0xff] }
 0xa89   :  { %v15766_v27 = vcombine.high %v10047_v41, %v10051_v3  ;;  %v9621_v15 = vld [vmem:[#allocation29 + $0x278] sm:$0xff] }
 0xa8a   :  { %13158 = vmatpush1.bf16.msra.mxu1 %v15759_v13  ;;  %v15765_v13 = vcombine.low %v10047_v41, %v10051_v3  ;;  %v15337_v41 = vcombine.low %v9617_v12, %v9621_v15 }
 0xa8b   :  { %12972 = vmatpush1.bf16.msra.mxu0 %v15701_v31  ;;  %13159 = vmatprep.subr.bf16.mxu1 %v15768_v34  ;;  %v16766_v31 = vld [vmem:[#allocation32 + $0x78] sm:$0xff]   ;;  %v15266_v34 = vcombine.high %v9545_v33, %v9549_v44 }
 0xa8c   :  { %12973 = vmatprep.subr.bf16.mxu0 %v15710_v30  ;;  %v9553_v30 = vld [vmem:[#allocation29 + $0x58] sm:$0xff] }
 0xa8d   :  { %v15273_v39 = vcombine.low %v9553_v30, %v9557_v60 }
 0xa8e   :  { %13160 = vmatpush1.bf16.msra.mxu1 %v15767_v49  ;;  %v15265_v49 = vcombine.low %v9545_v33, %v9549_v44  ;;  %v9641_v33 = vld [vmem:[#allocation29 + $0x318] sm:$0xff] }
 0xa8f   :  { %12974 = vmatpush1.bf16.msra.mxu0 %v15709_v48  ;;  %15858 = vmatprep.subr.bf16.mxu1 %v16752_v36  ;;  %v15274_v48 = vcombine.high %v9553_v30, %v9557_v60  ;;  %v9561_v36 = vld [vmem:[#allocation29 + $0x98] sm:$0xff] }
 0xa90   :  { %12975 = vmatprep.subr.bf16.mxu0 %v15718_v56  ;;  %v9565_v56 = vld [vmem:[#allocation29 + $0xb8] sm:$0xff] }
 0xa91   :  { %13162 = vmatmul.mubr.bf16.vlgmr.msra.gmra.mrb[44].mxu1 %v18103_v38  ;;  %v15282_v52 = vcombine.high %v9561_v36, %v9565_v56  ;;  %v9645_v44 = vld [vmem:[#allocation29 + $0x338] sm:$0xff] }
 0xa92   :  { %15859 = vmatpush3.bf16.msra.mxu1 %v16753_v54  ;;  %13919 = vmatprep.mubr.bf16.mxu1 %v18180_v43  ;;  %v16759_v43 = vld [vmem:[#allocation32 + $0x18] sm:$0xff]   ;;  %v9569_v54 = vld [vmem:[#allocation29 + $0xd8] sm:$0xff]  ;;  %v15361_v30 = vcombine.low %v9641_v33, %v9645_v44 }
 0xa93   :  { %12976 = vmatpush1.bf16.msra.mxu0 %v15717_v55  ;;  %15860 = vmatprep.subr.bf16.mxu1 %v16754_v47  ;;  %v9573_v55 = vld [vmem:[#allocation29 + $0xf8] sm:$0xff]  ;;  %v15281_v47 = vcombine.low %v9561_v36, %v9565_v56 }
 0xa94   :  { %12977 = vmatprep.subr.bf16.mxu0 %v15726_v4  ;;  %v15290_v4 = vcombine.high %v9569_v54, %v9573_v55  ;;  %v9665_v56 = vld [vmem:[#allocation29 + $0x3d8] sm:$0xff] }
 0xa96   :  { %15861 = vmatpush3.bf16.msra.mxu1 %v16755_v17  ;;  %v15289_v17 = vcombine.low %v9569_v54, %v9573_v55  ;;  %v9673_v55 = vld [vmem:[#allocation29 + $0x418] sm:$0xff] }
 0xa97   :  { %12978 = vmatpush1.bf16.msra.mxu0 %v15725_v58  ;;  %15862 = vmatprep.subr.bf16.mxu1 %v16756_v26  ;;  %v15298_v58 = vcombine.high %v9577_v57, %v9581_v28  ;;  %v9585_v26 = vld [vmem:[#allocation29 + $0x158] sm:$0xff] }
 0xa98   :  { %12979 = vmatprep.subr.bf16.mxu0 %v15734_v25  ;;  %v9589_v25 = vld [vmem:[#allocation29 + $0x178] sm:$0xff] }
 0xa99   :  { %v15306_v37 = vcombine.high %v9585_v26, %v9589_v25 }
 0xa9a   :  { %15863 = vmatpush3.bf16.msra.mxu1 %v16757_v61  ;;  %v15305_v61 = vcombine.low %v9585_v26, %v9589_v25  ;;  %v16769_v25 = vld [vmem:[#allocation32 + $0x80] sm:$0xff]  }
 0xa9b   :  { %12980 = vmatpush1.bf16.msra.mxu0 %v15733_v0  ;;  %15864 = vmatprep.subr.bf16.mxu1 %v16758_v5  ;;  %v9601_v5 = vld [vmem:[#allocation29 + $0x1d8] sm:$0xff] }
 0xa9c   :  { %12981 = vmatprep.subr.bf16.mxu0 %v15742_v6  ;;  %v9605_v6 = vld [vmem:[#allocation29 + $0x1f8] sm:$0xff] }
 0xa9d   :  { %v15322_v51 = vcombine.high %v9601_v5, %v9605_v6 }
 0xa9e   :  { %15865 = vmatpush3.bf16.msra.mxu1 %v16759_v43  ;;  %v9609_v43 = vld [vmem:[#allocation29 + $0x218] sm:$0xff] }
 0xa9f   :  { %12982 = vmatpush1.bf16.msra.mxu0 %v15741_v9  ;;  %15866 = vmatprep.subr.bf16.mxu1 %v16760_v10  ;;  %v9613_v9 = vld [vmem:[#allocation29 + $0x238] sm:$0xff]  ;;  %v15321_v10 = vcombine.low %v9601_v5, %v9605_v6 }
 0xaa0   :  { %12983 = vmatprep.subr.bf16.mxu0 %v15750_v11  ;;  %v15330_v11 = vcombine.high %v9609_v43, %v9613_v9  ;;  %v9697_v6 = vld [vmem:[#allocation29 + $0x4d8] sm:$0xff] }
 0xaa2   :  { %15867 = vmatpush3.bf16.msra.mxu1 %v16761_v16  ;;  %v15329_v16 = vcombine.low %v9609_v43, %v9613_v9  ;;  %v16773_v9 = vld [vmem:[#allocation32 + $0x90] sm:$0xff]  }
 0xaa3   :  { %12984 = vmatpush1.bf16.msra.mxu0 %v15749_v14  ;;  %15868 = vmatprep.subr.bf16.mxu1 %v16762_v2  ;;  %v15338_v14 = vcombine.high %v9617_v12, %v9621_v15  ;;  %v9625_v2 = vld [vmem:[#allocation29 + $0x298] sm:$0xff]  ;;  %v16774_v12 = vld [vmem:[#allocation32 + $0xd8] sm:$0xff]  }
 0xaa4   :  { %12985 = vmatprep.subr.bf16.mxu0 %v15758_v20  ;;  %v9629_v20 = vld [vmem:[#allocation29 + $0x2b8] sm:$0xff]  ;;  %v16775_v15 = vld [vmem:[#allocation32 + $0x98] sm:$0xff]  }
 0xaa5   :  { %v15346_v3 = vcombine.high %v9625_v2, %v9629_v20 }
 0xaa6   :  { %15869 = vmatpush3.bf16.msra.mxu1 %v16763_v21  ;;  %v9633_v21 = vld [vmem:[#allocation29 + $0x2d8] sm:$0xff] }
 0xaa7   :  { %12986 = vmatpush1.bf16.msra.mxu0 %v15757_v32  ;;  %15870 = vmatprep.subr.bf16.mxu1 %v16764_v24  ;;  %v9637_v32 = vld [vmem:[#allocation29 + $0x2f8] sm:$0xff]  ;;  %v15345_v24 = vcombine.low %v9625_v2, %v9629_v20  ;;  %v16776_v20 = vld [vmem:[#allocation32 + $0xe0] sm:$0xff]  }
 0xaa8   :  { %12987 = vmatprep.subr.bf16.mxu0 %v15766_v27  ;;  %v15354_v27 = vcombine.high %v9633_v21, %v9637_v32  ;;  %v9717_v2 = vld [vmem:[#allocation29 + $0x578] sm:$0xff] }
 0xaaa   :  { %15871 = vmatpush3.bf16.msra.mxu1 %v16765_v46  ;;  %v15353_v46 = vcombine.low %v9633_v21, %v9637_v32  ;;  %v9721_v32 = vld [vmem:[#allocation29 + $0x598] sm:$0xff] }
 0xaab   :  { %12988 = vmatpush1.bf16.msra.mxu0 %v15765_v13  ;;  %15872 = vmatprep.subr.bf16.mxu1 %v16766_v31  ;;  %v15362_v13 = vcombine.high %v9641_v33, %v9645_v44  ;;  %v9649_v31 = vld [vmem:[#allocation29 + $0x358] sm:$0xff]  ;;  %v16779_v44 = vld [vmem:[#allocation32 + $0xa8] sm:$0xff]  }
 0xaac   :  { %13172 = vmatprep.subr.bf16.mxu0 %v15266_v34  ;;  %v9653_v34 = vld [vmem:[#allocation29 + $0x378] sm:$0xff] }
 0xaad   :  { %v15370_v60 = vcombine.high %v9649_v31, %v9653_v34 }
 0xaae   :  { %12990 = vmatmul.mubr.bf16.vlgmr.msra.gmra.mrb[56].mxu0 %v18103_v38  ;;  %15873 = vmatpush3.bf16.msra.mxu1 %v16767_v35  ;;  %v9657_v35 = vld [vmem:[#allocation29 + $0x398] sm:$0xff] }
 0xaaf   :  { %13173 = vmatpush1.bf16.msra.mxu0 %v15265_v49  ;;  %13204 = vmatprep.mubr.bf16.mxu0 %v18085_v59  ;;  %v15297_v59 = vcombine.low %v9577_v57, %v9581_v28  ;;  %v9661_v49 = vld [vmem:[#allocation29 + $0x3b8] sm:$0xff] }
 0xab0   :  { %13174 = vmatprep.subr.bf16.mxu0 %v15274_v48  ;;  %v15369_v48 = vcombine.low %v9649_v31, %v9653_v34  ;;  %v15378_v36 = vcombine.high %v9657_v35, %v9661_v49  ;;  %v9681_v28 = vld [vmem:[#allocation29 + $0x458] sm:$0xff] }
 0xab1   :  { %13920 = vmatmul.mubr.bf16.vlgmr.msra.gmra.mrb[48].mxu1 %v18178_v7  ;;  %v9597_v7 = vld [vmem:[#allocation29 + $0x1b8] sm:$0xff] }
 0xab2   :  { %v15314_v0 = vcombine.high %v9593_v42, %v9597_v7  ;;  %v15313_v8 = vcombine.low %v9593_v42, %v9597_v7  ;;  %v9693_v42 = vld [vmem:[#allocation29 + $0x4b8] sm:$0xff]  ;;  %v16770_v7 = vld [vmem:[#allocation32 + $0xc8] sm:$0xff]  }
 0xab3   :  { %13175 = vmatpush1.bf16.msra.mxu0 %v15273_v39  ;;  %v9669_v39 = vld [vmem:[#allocation29 + $0x3f8] sm:$0xff] }
 0xab4   :  { %13176 = vmatprep.subr.bf16.mxu0 %v15282_v52  ;;  %v15377_v52 = vcombine.low %v9657_v35, %v9661_v49  ;;  %v15386_v54 = vcombine.high %v9665_v56, %v9669_v39  ;;  %v9733_v31 = vld [vmem:[#allocation29 + $0x5f8] sm:$0xff] }
 0xab5   :  { %v16780_v34 = vld [vmem:[#allocation32 + $0xf0] sm:$0xff]  }
 0xab6   :  { %v9737_v49 = vld [vmem:[#allocation29 + $0x618] sm:$0xff] }
 0xab7   :  { %13177 = vmatpush1.bf16.msra.mxu0 %v15281_v47  ;;  %v9677_v47 = vld [vmem:[#allocation29 + $0x438] sm:$0xff] }
 0xab8   :  { %13178 = vmatprep.subr.bf16.mxu0 %v15290_v4  ;;  %v15385_v4 = vcombine.low %v9665_v56, %v9669_v39  ;;  %v15394_v57 = vcombine.high %v9673_v55, %v9677_v47  ;;  %v15393_v26 = vcombine.low %v9673_v55, %v9677_v47  ;;  %v16783_v39 = vld [vmem:[#allocation32 + $0xb8] sm:$0xff]   ;;  %v9749_v55 = vld [vmem:[#allocation29 + $0x678] sm:$0xff]  ;;  %v16784_v47 = vld [vmem:[#allocation32 + $0x140] sm:$0xff]  }
 0xabb   :  { %13179 = vmatpush1.bf16.msra.mxu0 %v15289_v17  ;;  %v9685_v17 = vld [vmem:[#allocation29 + $0x478] sm:$0xff] }
 0xabc   :  { %13180 = vmatprep.subr.bf16.mxu0 %v15298_v58  ;;  %v16768_v58 = vld [vmem:[#allocation32 + $0xc0] sm:$0xff]  }
 0xabd   :  { %15880 = vmatprep.subr.bf16.mxu1 %v16768_v58 }
 0xabe   :  { %15881 = vmatpush3.bf16.msra.mxu1 %v16769_v25  ;;  %v9761_v25 = vld [vmem:[#allocation29 + $0x6d8] sm:$0xff] }
 0xabf   :  { %13181 = vmatpush1.bf16.msra.mxu0 %v15297_v59  ;;  %v15402_v59 = vcombine.high %v9681_v28, %v9685_v17  ;;  %15882 = vmatprep.subr.bf16.mxu1 %v16770_v7  ;;  %v9769_v7 = vld [vmem:[#allocation29 + $0x718] sm:$0xff] }
 0xac0   :  { %13182 = vmatprep.subr.bf16.mxu0 %v15306_v37  ;;  %v9689_v37 = vld [vmem:[#allocation29 + $0x498] sm:$0xff] }
 0xac1   :  { %v15410_v5 = vcombine.high %v9689_v37, %v9693_v42  ;;  %v15409_v43 = vcombine.low %v9689_v37, %v9693_v42 }
 0xac3   :  { %13183 = vmatpush1.bf16.msra.mxu0 %v15305_v61  ;;  %v15401_v61 = vcombine.low %v9681_v28, %v9685_v17  ;;  %v9753_v28 = vld [vmem:[#allocation29 + $0x698] sm:$0xff] }
 0xac4   :  { %13184 = vmatprep.subr.bf16.mxu0 %v15314_v0  ;;  %v16771_v0 = vld [vmem:[#allocation32 + $0x88] sm:$0xff]   ;;  %v9757_v17 = vld [vmem:[#allocation29 + $0x6b8] sm:$0xff] }
 0xac5   :  { %15883 = vmatpush3.bf16.msra.mxu1 %v16771_v0  ;;  %v15473_v37 = vcombine.low %v9753_v28, %v9757_v17 }
 0xac7   :  { %13185 = vmatpush1.bf16.msra.mxu0 %v15313_v8  ;;  %v9701_v8 = vld [vmem:[#allocation29 + $0x4f8] sm:$0xff] }
 0xac8   :  { %13186 = vmatprep.subr.bf16.mxu0 %v15322_v51  ;;  %v16772_v51 = vld [vmem:[#allocation32 + $0xd0] sm:$0xff]  }
 0xac9   :  { %15884 = vmatprep.subr.bf16.mxu1 %v16772_v51 }
 0xaca   :  { %15885 = vmatpush3.bf16.msra.mxu1 %v16773_v9  ;;  %v9785_v9 = vld [vmem:[#allocation29 + $0x798] sm:$0xff] }
 0xacb   :  { %13187 = vmatpush1.bf16.msra.mxu0 %v15321_v10  ;;  %v15418_v10 = vcombine.high %v9697_v6, %v9701_v8  ;;  %15886 = vmatprep.subr.bf16.mxu1 %v16774_v12  ;;  %v9793_v12 = vld [vmem:[#allocation29 + $0x7d8] sm:$0xff] }
 0xacc   :  { %13188 = vmatprep.subr.bf16.mxu0 %v15330_v11  ;;  %v9709_v11 = vld [vmem:[#allocation29 + $0x538] sm:$0xff] }
 0xace   :  { %15887 = vmatpush3.bf16.msra.mxu1 %v16775_v15 }
 0xacf   :  { %13189 = vmatpush1.bf16.msra.mxu0 %v15329_v16  ;;  %15888 = vmatprep.subr.bf16.mxu1 %v16776_v20 }
 0xad0   :  { %13190 = vmatprep.subr.bf16.mxu0 %v15338_v14  ;;  %v9713_v14 = vld [vmem:[#allocation29 + $0x558] sm:$0xff] }
 0xad1   :  { %v15434_v21 = vcombine.high %v9713_v14, %v9717_v2  ;;  %v15433_v33 = vcombine.low %v9713_v14, %v9717_v2  ;;  %v9801_v14 = vld [vmem:[#allocation29 + $0x818] sm:$0xff] }
 0xad2   :  { %v9805_v2 = vld [vmem:[#allocation29 + $0x838] sm:$0xff] }
 0xad3   :  { %13191 = vmatpush1.bf16.msra.mxu0 %v15337_v41 }
 0xad4   :  { %13192 = vmatprep.subr.bf16.mxu0 %v15346_v3  ;;  %v16777_v3 = vld [vmem:[#allocation32 + $0xa0] sm:$0xff]  }
 0xad5   :  { %15889 = vmatpush3.bf16.msra.mxu1 %v16777_v3  ;;  %v9809_v3 = vld [vmem:[#allocation29 + $0x858] sm:$0xff] }
 0xad7   :  { %13193 = vmatpush1.bf16.msra.mxu0 %v15345_v24  ;;  %v9725_v24 = vld [vmem:[#allocation29 + $0x5b8] sm:$0xff] }
 0xad8   :  { %13194 = vmatprep.subr.bf16.mxu0 %v15354_v27  ;;  %v16778_v27 = vld [vmem:[#allocation32 + $0xe8] sm:$0xff]  }
 0xad9   :  { %15890 = vmatprep.subr.bf16.mxu1 %v16778_v27  ;;  %v9817_v27 = vld [vmem:[#allocation29 + $0x898] sm:$0xff] }
 0xada   :  { %15891 = vmatpush3.bf16.msra.mxu1 %v16779_v44 }
 0xadb   :  { %13195 = vmatpush1.bf16.msra.mxu0 %v15353_v46  ;;  %v15442_v46 = vcombine.high %v9721_v32, %v9725_v24  ;;  %15892 = vmatprep.subr.bf16.mxu1 %v16780_v34 }
 0xadc   :  { %13196 = vmatprep.subr.bf16.mxu0 %v15362_v13  ;;  %v9729_v13 = vld [vmem:[#allocation29 + $0x5d8] sm:$0xff] }
 0xadd   :  { %v15450_v35 = vcombine.high %v9729_v13, %v9733_v31  ;;  %v15449_v56 = vcombine.low %v9729_v13, %v9733_v31  ;;  %v9825_v13 = vld [vmem:[#allocation29 + $0x8d8] sm:$0xff] }
 0xade   :  { %v9829_v31 = vld [vmem:[#allocation29 + $0x8f8] sm:$0xff] }
 0xadf   :  { %13197 = vmatpush1.bf16.msra.mxu0 %v15361_v30  ;;  %v15441_v30 = vcombine.low %v9721_v32, %v9725_v24  ;;  %v15521_v32 = vcombine.low %v9801_v14, %v9805_v2 }
 0xae0   :  { %13198 = vmatprep.subr.bf16.mxu0 %v15370_v60  ;;  %v16781_v60 = vld [vmem:[#allocation32 + $0xb0] sm:$0xff]  }
 0xae1   :  { %15893 = vmatpush3.bf16.msra.mxu1 %v16781_v60  ;;  %v9833_v60 = vld [vmem:[#allocation29 + $0x918] sm:$0xff] }
 0xae3   :  { %13199 = vmatpush1.bf16.msra.mxu0 %v15369_v48  ;;  %v9741_v48 = vld [vmem:[#allocation29 + $0x638] sm:$0xff] }
 0xae4   :  { %13200 = vmatprep.subr.bf16.mxu0 %v15378_v36  ;;  %v16782_v36 = vld [vmem:[#allocation32 + $0xf8] sm:$0xff]  }
 0xae5   :  { %15894 = vmatprep.subr.bf16.mxu1 %v16782_v36  ;;  %v9841_v36 = vld [vmem:[#allocation29 + $0x958] sm:$0xff] }
 0xae6   :  { %15895 = vmatpush3.bf16.msra.mxu1 %v16783_v39  ;;  %v9849_v39 = vld [vmem:[#allocation29 + $0x998] sm:$0xff] }
 0xae7   :  { %13201 = vmatpush1.bf16.msra.mxu0 %v15377_v52  ;;  %v15458_v52 = vcombine.high %v9737_v49, %v9741_v48  ;;  %15902 = vmatprep.subr.bf16.mxu1 %v16784_v47  ;;  %v9857_v47 = vld [vmem:[#allocation29 + $0x9d8] sm:$0xff] }
 0xae8   :  { %13202 = vmatprep.subr.bf16.mxu0 %v15386_v54  ;;  %v9745_v54 = vld [vmem:[#allocation29 + $0x658] sm:$0xff] }
 0xae9   :  { %v15465_v58 = vcombine.low %v9745_v54, %v9749_v55 }
 0xaeb   :  { %13203 = vmatpush1.bf16.msra.mxu0 %v15385_v4  ;;  %v15457_v4 = vcombine.low %v9737_v49, %v9741_v48  ;;  %v15545_v49 = vcombine.low %v9825_v13, %v9829_v31 }
 0xaec   :  { %13215 = vmatprep.subr.bf16.mxu0 %v15394_v57  ;;  %v15466_v57 = vcombine.high %v9745_v54, %v9749_v55 }
 0xaee   :  { %13205 = vmatmul.mubr.bf16.vlgmr.msra.gmra.mrb[60].mxu0 %v18083_v29  ;;  %v9705_v29 = vld [vmem:[#allocation29 + $0x518] sm:$0xff] }
 0xaef   :  { %13216 = vmatpush1.bf16.msra.mxu0 %v15393_v26  ;;  %13247 = vmatprep.mubr.bf16.mxu0 %v18093_v1  ;;  %v15417_v1 = vcombine.low %v9697_v6, %v9701_v8  ;;  %v15426_v16 = vcombine.high %v9705_v29, %v9709_v11  ;;  %v15425_v41 = vcombine.low %v9705_v29, %v9709_v11  ;;  %v9777_v6 = vld [vmem:[#allocation29 + $0x758] sm:$0xff] }
 0xaf0   :  { %13217 = vmatprep.subr.bf16.mxu0 %v15402_v59  ;;  %v15474_v26 = vcombine.high %v9753_v28, %v9757_v17  ;;  %v9765_v59 = vld [vmem:[#allocation29 + $0x6f8] sm:$0xff] }
 0xaf1   :  { %v15482_v42 = vcombine.high %v9761_v25, %v9765_v59  ;;  %v15481_v0 = vcombine.low %v9761_v25, %v9765_v59  ;;  %v9781_v8 = vld [vmem:[#allocation29 + $0x778] sm:$0xff] }
 0xaf2   :  { %v15497_v29 = vcombine.low %v9777_v6, %v9781_v8  ;;  %v9865_v17 = vld [vmem:[#allocation29 + $0xa18] sm:$0xff] }
 0xaf3   :  { %13218 = vmatpush1.bf16.msra.mxu0 %v15401_v61  ;;  %v9773_v61 = vld [vmem:[#allocation29 + $0x738] sm:$0xff] }
 0xaf4   :  { %13219 = vmatprep.subr.bf16.mxu0 %v15410_v5  ;;  %v15490_v5 = vcombine.high %v9769_v7, %v9773_v61  ;;  %v15489_v51 = vcombine.low %v9769_v7, %v9773_v61  ;;  %v9873_v59 = vld [vmem:[#allocation29 + $0xa58] sm:$0xff] }
 0xaf5   :  { %v9881_v61 = vld [vmem:[#allocation29 + $0xa98] sm:$0xff] }
 0xaf7   :  { %13220 = vmatpush1.bf16.msra.mxu0 %v15409_v43  ;;  %v15498_v43 = vcombine.high %v9777_v6, %v9781_v8  ;;  %v9889_v8 = vld [vmem:[#allocation29 + $0xad8] sm:$0xff] }
 0xaf8   :  { %13221 = vmatprep.subr.bf16.mxu0 %v15418_v10  ;;  %v9789_v10 = vld [vmem:[#allocation29 + $0x7b8] sm:$0xff] }
 0xaf9   :  { %v15506_v11 = vcombine.high %v9785_v9, %v9789_v10  ;;  %v15505_v15 = vcombine.low %v9785_v9, %v9789_v10  ;;  %v9897_v10 = vld [vmem:[#allocation29 + $0xb18] sm:$0xff] }
 0xafb   :  { %13222 = vmatpush1.bf16.msra.mxu0 %v15417_v1  ;;  %v9797_v1 = vld [vmem:[#allocation29 + $0x7f8] sm:$0xff] }
 0xafc   :  { %13223 = vmatprep.subr.bf16.mxu0 %v15426_v16  ;;  %v15514_v16 = vcombine.high %v9793_v12, %v9797_v1  ;;  %v15513_v20 = vcombine.low %v9793_v12, %v9797_v1  ;;  %v9905_v1 = vld [vmem:[#allocation29 + $0xb58] sm:$0xff] }
 0xaff   :  { %13224 = vmatpush1.bf16.msra.mxu0 %v15425_v41  ;;  %v15522_v41 = vcombine.high %v9801_v14, %v9805_v2  ;;  %v9913_v2 = vld [vmem:[#allocation29 + $0xb98] sm:$0xff] }
 0xb00   :  { %13225 = vmatprep.subr.bf16.mxu0 %v15434_v21  ;;  %v9813_v21 = vld [vmem:[#allocation29 + $0x878] sm:$0xff] }
 0xb01   :  { %v15530_v24 = vcombine.high %v9809_v3, %v9813_v21  ;;  %v15529_v44 = vcombine.low %v9809_v3, %v9813_v21  ;;  %v18195_v21 = vld [vmem:[#allocation31] sm:$0xff] }
 0xb03   :  { %13226 = vmatpush1.bf16.msra.mxu0 %v15433_v33  ;;  %v9821_v33 = vld [vmem:[#allocation29 + $0x8b8] sm:$0xff] }
 0xb04   :  { %13227 = vmatprep.subr.bf16.mxu0 %v15442_v46  ;;  %v15538_v46 = vcombine.high %v9817_v27, %v9821_v33  ;;  %v15537_v34 = vcombine.low %v9817_v27, %v9821_v33  ;;  %v9925_v27 = vld [vmem:[#allocation29 + $0xbf8] sm:$0xff]  ;;  %v10079_v33 = vrot.slane %v18195_v21, %v17860_v53 }
 0xb07   :  { %13228 = vmatpush1.bf16.msra.mxu0 %v15441_v30  ;;  %v15546_v30 = vcombine.high %v9825_v13, %v9829_v31 }
 0xb08   :  { %13229 = vmatprep.subr.bf16.mxu0 %v15450_v35  ;;  %v9837_v35 = vld [vmem:[#allocation29 + $0x938] sm:$0xff] }
 0xb09   :  { %v15554_v48 = vcombine.high %v9833_v60, %v9837_v35 }
 0xb0b   :  { %13230 = vmatpush1.bf16.msra.mxu0 %v15449_v56  ;;  %v15553_v56 = vcombine.low %v9833_v60, %v9837_v35  ;;  %v9933_v60 = vld [vmem:[#allocation29 + $0xc38] sm:$0xff] }
 0xb0c   :  { %13231 = vmatprep.subr.bf16.mxu0 %v15458_v52  ;;  %v9853_v52 = vld [vmem:[#allocation29 + $0x9b8] sm:$0xff] }
 0xb0d   :  { %v15570_v55 = vcombine.high %v9849_v39, %v9853_v52 }
 0xb0f   :  { %13232 = vmatpush1.bf16.msra.mxu0 %v15457_v4  ;;  %v9861_v4 = vld [vmem:[#allocation29 + $0x9f8] sm:$0xff] }
 0xb10   :  { %13233 = vmatprep.subr.bf16.mxu0 %v15466_v57  ;;  %v15569_v57 = vcombine.low %v9849_v39, %v9853_v52  ;;  %v15578_v28 = vcombine.high %v9857_v47, %v9861_v4  ;;  %v9937_v39 = vld [vmem:[#allocation29 + $0xc58] sm:$0xff] }
 0xb11   :  { %v9941_v52 = vld [vmem:[#allocation29 + $0xc78] sm:$0xff] }
 0xb13   :  { %13234 = vmatpush1.bf16.msra.mxu0 %v15465_v58  ;;  %v9869_v58 = vld [vmem:[#allocation29 + $0xa38] sm:$0xff] }
 0xb14   :  { %13235 = vmatprep.subr.bf16.mxu0 %v15474_v26  ;;  %v15577_v26 = vcombine.low %v9857_v47, %v9861_v4  ;;  %v15586_v25 = vcombine.high %v9865_v17, %v9869_v58 }
 0xb17   :  { %13236 = vmatpush1.bf16.msra.mxu0 %v15473_v37  ;;  %v9877_v37 = vld [vmem:[#allocation29 + $0xa78] sm:$0xff] }
 0xb18   :  { %13237 = vmatprep.subr.bf16.mxu0 %v15482_v42  ;;  %v15585_v42 = vcombine.low %v9865_v17, %v9869_v58  ;;  %v15594_v7 = vcombine.high %v9873_v59, %v9877_v37  ;;  %v9945_v17 = vld [vmem:[#allocation29 + $0xc98] sm:$0xff] }
 0xb19   :  { %v9949_v58 = vld [vmem:[#allocation29 + $0xcb8] sm:$0xff] }
 0xb1b   :  { %13238 = vmatpush1.bf16.msra.mxu0 %v15481_v0  ;;  %v9885_v0 = vld [vmem:[#allocation29 + $0xab8] sm:$0xff] }
 0xb1c   :  { %13239 = vmatprep.subr.bf16.mxu0 %v15490_v5  ;;  %v15593_v5 = vcombine.low %v9873_v59, %v9877_v37  ;;  %v15602_v6 = vcombine.high %v9881_v61, %v9885_v0  ;;  %v9953_v59 = vld [vmem:[#allocation29 + $0xcd8] sm:$0xff] }
 0xb1d   :  { %v9957_v37 = vld [vmem:[#allocation29 + $0xcf8] sm:$0xff] }
 0xb1f   :  { %13240 = vmatpush1.bf16.msra.mxu0 %v15489_v51  ;;  %v9893_v51 = vld [vmem:[#allocation29 + $0xaf8] sm:$0xff] }
 0xb20   :  { %13241 = vmatprep.subr.bf16.mxu0 %v15498_v43  ;;  %v15601_v43 = vcombine.low %v9881_v61, %v9885_v0  ;;  %v15610_v9 = vcombine.high %v9889_v8, %v9893_v51  ;;  %v9961_v61 = vld [vmem:[#allocation29 + $0xd18] sm:$0xff] }
 0xb21   :  { %v9965_v0 = vld [vmem:[#allocation29 + $0xd38] sm:$0xff] }
 0xb23   :  { %13242 = vmatpush1.bf16.msra.mxu0 %v15497_v29  ;;  %v9901_v29 = vld [vmem:[#allocation29 + $0xb38] sm:$0xff] }
 0xb24   :  { %13243 = vmatprep.subr.bf16.mxu0 %v15506_v11  ;;  %v15609_v11 = vcombine.low %v9889_v8, %v9893_v51  ;;  %v15618_v12 = vcombine.high %v9897_v10, %v9901_v29  ;;  %v9969_v8 = vld [vmem:[#allocation29 + $0xd58] sm:$0xff]  ;;  %v15681_v51 = vcombine.low %v9961_v61, %v9965_v0 }
 0xb27   :  { %13244 = vmatpush1.bf16.msra.mxu0 %v15505_v15  ;;  %v9909_v15 = vld [vmem:[#allocation29 + $0xb78] sm:$0xff] }
 0xb28   :  { %13245 = vmatprep.subr.bf16.mxu0 %v15514_v16  ;;  %v15617_v16 = vcombine.low %v9897_v10, %v9901_v29  ;;  %v15626_v14 = vcombine.high %v9905_v1, %v9909_v15  ;;  %v10067_v10 = vrot.slane %v18195_v21, %v17872_v62  ;;  %v10071_v29 = vrot.slane %v18195_v21, %v17875_v63  ;;  %v9993_v63 = vld [vmem:[#allocation29 + $0xe18] sm:$0xff] }
 0xb2b   :  { %13246 = vmatpush1.bf16.msra.mxu0 %v15513_v20  ;;  %v9917_v20 = vld [vmem:[#allocation29 + $0xbb8] sm:$0xff] }
 0xb2c   :  { %13258 = vmatprep.subr.bf16.mxu0 %v15522_v41  ;;  %v15625_v41 = vcombine.low %v9905_v1, %v9909_v15  ;;  %v15634_v3 = vcombine.high %v9913_v2, %v9917_v20  ;;  %v9985_v15 = vld [vmem:[#allocation29 + $0xdd8] sm:$0xff] }
 0xb2e   :  { %13248 = vmatmul.mubr.bf16.vlgmr.msra.gmra.mrb[60].mxu0 %v18091_v40  ;;  %v9845_v40 = vld [vmem:[#allocation29 + $0x978] sm:$0xff] }
 0xb2f   :  { %13259 = vmatpush1.bf16.msra.mxu0 %v15521_v32  ;;  %13290 = vmatprep.mubr.bf16.mxu0 %v18101_v19  ;;  %v15562_v19 = vcombine.high %v9841_v36, %v9845_v40  ;;  %v15561_v54 = vcombine.low %v9841_v36, %v9845_v40  ;;  %v10075_v32 = vrot.slane %v18195_v21, %v17857_v50 }
 0xb30   :  { %13260 = vmatprep.subr.bf16.mxu0 %v15530_v24  ;;  %v9921_v24 = vld [vmem:[#allocation29 + $0xbd8] sm:$0xff] }
 0xb31   :  { %v15642_v13 = vcombine.high %v9921_v24, %v9925_v27  ;;  %v15641_v50 = vcombine.low %v9921_v24, %v9925_v27 }
 0xb33   :  { %13261 = vmatpush1.bf16.msra.mxu0 %v15529_v44  ;;  %v15633_v44 = vcombine.low %v9913_v2, %v9917_v20 }
 0xb34   :  { %13262 = vmatprep.subr.bf16.mxu0 %v15538_v46 }
 0xb37   :  { %13263 = vmatpush1.bf16.msra.mxu0 %v15537_v34 }
 0xb38   :  { %13264 = vmatprep.subr.bf16.mxu0 %v15546_v30  ;;  %v9929_v30 = vld [vmem:[#allocation29 + $0xc18] sm:$0xff] }
 0xb39   :  { %v15649_v4 = vcombine.low %v9929_v30, %v9933_v60 }
 0xb3b   :  { %13265 = vmatpush1.bf16.msra.mxu0 %v15545_v49 }
 0xb3c   :  { %13266 = vmatprep.subr.bf16.mxu0 %v15554_v48 }
 0xb3f   :  { %13267 = vmatpush1.bf16.msra.mxu0 %v15553_v56  ;;  %v15650_v56 = vcombine.high %v9929_v30, %v9933_v60 }
 0xb40   :  { %13268 = vmatprep.subr.bf16.mxu0 %v15562_v19 }
 0xb43   :  { %13269 = vmatpush1.bf16.msra.mxu0 %v15561_v54 }
 0xb44   :  { %13270 = vmatprep.subr.bf16.mxu0 %v15570_v55 }
 0xb47   :  { %13271 = vmatpush1.bf16.msra.mxu0 %v15569_v57 }
 0xb48   :  { %13272 = vmatprep.subr.bf16.mxu0 %v15578_v28  ;;  %v15658_v28 = vcombine.high %v9937_v39, %v9941_v52 }
 0xb4b   :  { %13273 = vmatpush1.bf16.msra.mxu0 %v15577_v26  ;;  %v15657_v26 = vcombine.low %v9937_v39, %v9941_v52  ;;  %v10005_v39 = vld [vmem:[#allocation29 + $0xe78] sm:$0xff]  ;;  %v16786_v52 = vld [vmem:[#allocation32 + $0x148] sm:$0xff]  }
 0xb4c   :  { %13274 = vmatprep.subr.bf16.mxu0 %v15586_v25  ;;  %v15666_v25 = vcombine.high %v9945_v17, %v9949_v58 }
 0xb4f   :  { %13275 = vmatpush1.bf16.msra.mxu0 %v15585_v42  ;;  %v15665_v42 = vcombine.low %v9945_v17, %v9949_v58  ;;  %v10013_v17 = vld [vmem:[#allocation29 + $0xeb8] sm:$0xff] }
 0xb50   :  { %13276 = vmatprep.subr.bf16.mxu0 %v15594_v7  ;;  %v15674_v7 = vcombine.high %v9953_v59, %v9957_v37  ;;  %v16788_v58 = vld [vmem:[#allocation32 + $0x150] sm:$0xff]  }
 0xb53   :  { %13277 = vmatpush1.bf16.msra.mxu0 %v15593_v5  ;;  %v15673_v5 = vcombine.low %v9953_v59, %v9957_v37  ;;  %v16789_v59 = vld [vmem:[#allocation32 + $0x110] sm:$0xff]  }
 0xb54   :  { %13278 = vmatprep.subr.bf16.mxu0 %v15602_v6  ;;  %v15682_v6 = vcombine.high %v9961_v61, %v9965_v0  ;;  %v10017_v37 = vld [vmem:[#allocation29 + $0xed8] sm:$0xff] }
 0xb57   :  { %13279 = vmatpush1.bf16.msra.mxu0 %v15601_v43  ;;  %v9977_v43 = vld [vmem:[#allocation29 + $0xd98] sm:$0xff] }
 0xb58   :  { %13280 = vmatprep.subr.bf16.mxu0 %v15610_v9  ;;  %v9981_v9 = vld [vmem:[#allocation29 + $0xdb8] sm:$0xff] }
 0xb5b   :  { %13281 = vmatpush1.bf16.msra.mxu0 %v15609_v11 }
 0xb5c   :  { %13282 = vmatprep.subr.bf16.mxu0 %v15618_v12  ;;  %v15698_v12 = vcombine.high %v9977_v43, %v9981_v9 }
 0xb5f   :  { %13283 = vmatpush1.bf16.msra.mxu0 %v15617_v16  ;;  %v9989_v16 = vld [vmem:[#allocation29 + $0xdf8] sm:$0xff] }
 0xb60   :  { %13284 = vmatprep.subr.bf16.mxu0 %v15626_v14  ;;  %v15706_v62 = vcombine.high %v9985_v15, %v9989_v16 }
 0xb63   :  { %13285 = vmatpush1.bf16.msra.mxu0 %v15625_v41 }
 0xb64   :  { %v13163_v46 = vpop.f32.mrb[44].mxu1  ;;  %13286 = vmatprep.subr.bf16.mxu0 %v15634_v3  ;;  %v15697_v3 = vcombine.low %v9977_v43, %v9981_v9  ;;  %v10033_v43 = vld [vmem:[#allocation29 + $0xf58] sm:$0xff] }
 0xb65   :  { %v15982_v31 = vadd.f32 %v13163_v46, %v10075_v32  ;;  %v13165_v34 = vpop.f32.mrb[45].mxu1  ;;  %v9997_v46 = vld [vmem:[#allocation29 + $0xe38] sm:$0xff] }
 0xb66   :  { %v15983_v35 = vadd.f32 %v13165_v34, %v10079_v33  ;;  %v13167_v49 = vpop.f32.mrb[46].mxu1  ;;  %v10037_v9 = vld [vmem:[#allocation29 + $0xf78] sm:$0xff] }
 0xb67   :  { %v15984_v48 = vadd.f32 %v13167_v49, %v10075_v32  ;;  %v13169_v36 = vpop.f32.mrb[47].mxu1  ;;  %13287 = vmatpush1.bf16.msra.mxu0 %v15633_v44  ;;  %v13348_v19 = vmax.f32 %v15982_v31, 0.0 }
 0xb68   :  { %v15985_v40 = vadd.f32 %v13169_v36, %v10079_v33  ;;  %13288 = vmatprep.subr.bf16.mxu0 %v15642_v13  ;;  %v13349_v54 = vmax.f32 %v15983_v35, 0.0 }
 0xb69   :  { %v13356_v53 = vmax.f32 %v15984_v48, 0.0  ;;  %v15705_v48 = vcombine.low %v9985_v15, %v9989_v16  ;;  %v10045_v15 = vld [vmem:[#allocation29 + $0xfb8] sm:$0xff] }
 0xb6a   :  { %v13357_v55 = vmax.f32 %v15985_v40, 0.0  ;;  %v15714_v40 = vcombine.high %v9993_v63, %v9997_v46  ;;  %v16796_v16 = vld [vmem:[#allocation32 + $0x170] sm:$0xff]  }
 0xb6b   :  { %v18201_v47 = vpack.c.bf16 %v13356_v53, %v13348_v19  ;;  %13289 = vmatpush1.bf16.msra.mxu0 %v15641_v50  ;;  %v16785_v19 = vld [vmem:[#allocation32 + $0x100] sm:$0xff]   ;;  %v10001_v53 = vld [vmem:[#allocation29 + $0xe58] sm:$0xff] }
 0xb6c   :  { %v18203_v57 = vpack.c.bf16 %v13357_v55, %v13349_v54  ;;  %13301 = vmatprep.subr.bf16.mxu0 %v15650_v56  ;;  %v15713_v54 = vcombine.low %v9993_v63, %v9997_v46  ;;  %v15722_v55 = vcombine.high %v10001_v53, %v10005_v39  ;;  %v16801_v63 = vld [vmem:[#allocation32 + $0x180] sm:$0xff]   ;;  %v16802_v46 = vld [vmem:[#allocation32 + $0x1c8] sm:$0xff]  }
 0xb6e   :  { %13291 = vmatmul.mubr.bf16.vlgmr.msra.gmra.mrb[60].mxu0 %v18099_v18  ;;  %v9973_v18 = vld [vmem:[#allocation29 + $0xd78] sm:$0xff] }
 0xb6f   :  { %13302 = vmatpush1.bf16.msra.mxu0 %v15649_v4  ;;  %13333 = vmatprep.mubr.bf16.mxu0 %v18105_v45  ;;  %v15690_v45 = vcombine.high %v9969_v8, %v9973_v18  ;;  %v15689_v11 = vcombine.low %v9969_v8, %v9973_v18  ;;  %v16787_v4 = vld [vmem:[#allocation32 + $0x108] sm:$0xff]   ;;  %v16792_v8 = vld [vmem:[#allocation32 + $0x160] sm:$0xff]  }
 0xb70   :  { %13303 = vmatprep.subr.bf16.mxu0 %v15658_v28  ;;  %v10009_v28 = vld [vmem:[#allocation29 + $0xe98] sm:$0xff] }
 0xb71   :  { %v15729_v61 = vcombine.low %v10009_v28, %v10013_v17 }
 0xb73   :  { %13304 = vmatpush1.bf16.msra.mxu0 %v15657_v26  ;;  %v15721_v26 = vcombine.low %v10001_v53, %v10005_v39  ;;  %v15771_v53 = vld [vmem:[#allocation34] ss:$0 sm:$0xff] }
 0xb74   :  { %13305 = vmatprep.subr.bf16.mxu0 %v15666_v25  ;;  %v15730_v25 = vcombine.high %v10009_v28, %v10013_v17 }
 0xb77   :  { %13306 = vmatpush1.bf16.msra.mxu0 %v15665_v42  ;;  %v10021_v42 = vld [vmem:[#allocation29 + $0xef8] sm:$0xff] }
 0xb78   :  { %13307 = vmatprep.subr.bf16.mxu0 %v15674_v7  ;;  %v16790_v7 = vld [vmem:[#allocation32 + $0x158] sm:$0xff]   ;;  %v15738_v0 = vcombine.high %v10017_v37, %v10021_v42  ;;  %v15737_v18 = vcombine.low %v10017_v37, %v10021_v42  ;;  %v10087_v42 = vrot.slane %v18195_v21, %v17886_v23 }
 0xb7b   :  { %13308 = vmatpush1.bf16.msra.mxu0 %v15673_v5  ;;  %v10025_v5 = vld [vmem:[#allocation29 + $0xf18] sm:$0xff] }
 0xb7c   :  { %13309 = vmatprep.subr.bf16.mxu0 %v15682_v6  ;;  %v10029_v6 = vld [vmem:[#allocation29 + $0xf38] sm:$0xff] }
 0xb7f   :  { %13310 = vmatpush1.bf16.msra.mxu0 %v15681_v51  ;;  %v15746_v51 = vcombine.high %v10025_v5, %v10029_v6 }
 0xb80   :  { %13311 = vmatprep.subr.bf16.mxu0 %v15690_v45  ;;  %v16793_v45 = vld [vmem:[#allocation32 + $0x120] sm:$0xff]  }
 0xb81   :  { %v12991_v1 = vpop.f32.mrb[56].mxu0 }
 0xb82   :  { %v15978_v14 = vadd.f32 %v12991_v1, %v10067_v10  ;;  %v12993_v2 = vpop.f32.mrb[57].mxu0  ;;  %v10041_v1 = vld [vmem:[#allocation29 + $0xf98] sm:$0xff] }
 0xb83   :  { %v15979_v20 = vadd.f32 %v12993_v2, %v10071_v29  ;;  %v12995_v41 = vpop.f32.mrb[58].mxu0  ;;  %13312 = vmatpush1.bf16.msra.mxu0 %v15689_v11  ;;  %v15754_v11 = vcombine.high %v10033_v43, %v10037_v9  ;;  %v15762_v2 = vcombine.high %v10041_v1, %v10045_v15 }
 0xb84   :  { %v15980_v32 = vadd.f32 %v12995_v41, %v10067_v10  ;;  %v12997_v24 = vpop.f32.mrb[59].mxu0  ;;  %v15874_v27 = vpop.f32.mrb[48].mxu1  ;;  %13313 = vmatprep.subr.bf16.mxu0 %v15698_v12  ;;  %v13346_v13 = vmax.f32 %v15978_v14, 0.0  ;;  %v16794_v10 = vld [vmem:[#allocation32 + $0x168] sm:$0xff]   ;;  %v15753_v14 = vcombine.low %v10033_v43, %v10037_v9  ;;  %v10049_v41 = vld [vmem:[#allocation29 + $0xfd8] sm:$0xff] }
 0xb85   :  { %v15981_v33 = vadd.f32 %v12997_v24, %v10071_v29  ;;  %v15875_v44 = vpop.f32.mrb[49].mxu1  ;;  %v13347_v60 = vmax.f32 %v15979_v20, 0.0  ;;  %v15745_v29 = vcombine.low %v10025_v5, %v10029_v6  ;;  %v16795_v12 = vld [vmem:[#allocation32 + $0x128] sm:$0xff]   ;;  %v16797_v20 = vld [vmem:[#allocation32 + $0x130] sm:$0xff]   ;;  %v15761_v24 = vcombine.low %v10041_v1, %v10045_v15 }
 0xb86   :  { %v13354_v31 = vmax.f32 %v15980_v32, 0.0  ;;  %v18211_v34 = vadd.f32 %v15875_v44, %v15874_v27  ;;  %v15877_v30 = vpop.f32.mrb[50].mxu1  ;;  %v16798_v32 = vld [vmem:[#allocation32 + $0x178] sm:$0xff]   ;;  %v16800_v44 = vld [vmem:[#allocation32 + $0x1c0] sm:$0xff]  }
 0xb87   :  { %v13355_v35 = vmax.f32 %v15981_v33, 0.0  ;;  %13314 = vmatpush1.bf16.msra.mxu0 %v15697_v3  ;;  %v15878_v49 = vpop.f32.mrb[51].mxu1  ;;  %v10053_v3 = vld [vmem:[#allocation29 + $0xff8] sm:$0xff] }
 0xb88   :  { %v13362_v36 = vpack.c.bf16 %v13354_v31, %v13346_v13  ;;  %v18213_v50 = vadd.f32 %v15878_v49, %v15877_v30  ;;  %13315 = vmatprep.subr.bf16.mxu0 %v15706_v62  ;;  %v15770_v27 = vcombine.high %v10049_v41, %v10053_v3  ;;  %v16799_v62 = vld [vmem:[#allocation32 + $0x138] sm:$0xff]   ;;  %v15769_v33 = vcombine.low %v10049_v41, %v10053_v3  ;;  %v16803_v13 = vld [vmem:[#allocation32 + $0x188] sm:$0xff]   ;;  %v16804_v31 = vld [vmem:[#allocation32 + $0x1d0] sm:$0xff]  }
 0xb89   :  { %v13363_v56 = vpack.c.bf16 %v13355_v35, %v13347_v60  ;;  %v16805_v30 = vld [vmem:[#allocation32 + $0x190] sm:$0xff]   ;;  %v16806_v60 = vld [vmem:[#allocation32 + $0x1d8] sm:$0xff]   ;;  %v16808_v49 = vld [vmem:[#allocation32 + $0x1e0] sm:$0xff]  }
 0xb8a   :  { %v16807_v35 = vld [vmem:[#allocation32 + $0x198] sm:$0xff]   ;;  %v13925_v17 = vadd.f32 %v18213_v50, %v15771_v53 }
 0xb8b   :  { %13316 = vmatpush1.bf16.msra.mxu0 %v15705_v48  ;;  %13960 = vmatprep.mubr.bf16.mxu1 %v13363_v56  ;;  %v16811_v48 = vld [vmem:[#allocation32 + $0x1a8] sm:$0xff]   ;;  %v16814_v56 = vld [vmem:[#allocation32 + $0x1f8] sm:$0xff]  }
 0xb8c   :  { %13961 = vmatmul.mubr.bf16.vlgmr.msra.gmra.mrb[52].mxu1 %v13362_v36  ;;  %13317 = vmatprep.subr.bf16.mxu0 %v15714_v40  ;;  %v16812_v36 = vld [vmem:[#allocation32 + $0x1f0] sm:$0xff]  }
 0xb8d   :  { %15903 = vmatpush3.bf16.msra.mxu1 %v16785_v19  ;;  %14001 = vmatprep.mubr.bf16.mxu1 %v18203_v57  ;;  %v16791_v57 = vld [vmem:[#allocation32 + $0x118] sm:$0xff]   ;;  %v16813_v40 = vld [vmem:[#allocation32 + $0x1b0] sm:$0xff]  }
 0xb8e   :  { %15904 = vmatprep.subr.bf16.mxu1 %v16786_v52  ;;  %v16815_v19 = vld [vmem:[#allocation32 + $0x1b8] sm:$0xff]  }
 0xb8f   :  { %13318 = vmatpush1.bf16.msra.mxu0 %v15713_v54  ;;  %v13922_v54 = vadd.f32 %v18211_v34, %v15771_v53 }
 0xb90   :  { %13319 = vmatprep.subr.bf16.mxu0 %v15722_v55 }
 0xb91   :  { %15905 = vmatpush3.bf16.msra.mxu1 %v16787_v4 }
 0xb92   :  { %15906 = vmatprep.subr.bf16.mxu1 %v16788_v58 }
 0xb93   :  { %13320 = vmatpush1.bf16.msra.mxu0 %v15721_v26 }
 0xb94   :  { %13321 = vmatprep.subr.bf16.mxu0 %v15730_v25 }
 0xb95   :  { %15907 = vmatpush3.bf16.msra.mxu1 %v16789_v59  ;;  %v10083_v59 = vrot.slane %v18195_v21, %v17883_v22 }
 0xb96   :  { %15908 = vmatprep.subr.bf16.mxu1 %v16790_v7 }
 0xb97   :  { %13322 = vmatpush1.bf16.msra.mxu0 %v15729_v61 }
 0xb98   :  { %13323 = vmatprep.subr.bf16.mxu0 %v15738_v0 }
 0xb99   :  { %15909 = vmatpush3.bf16.msra.mxu1 %v16791_v57 }
 0xb9a   :  { %15910 = vmatprep.subr.bf16.mxu1 %v16792_v8 }
 0xb9b   :  { %13324 = vmatpush1.bf16.msra.mxu0 %v15737_v18 }
 0xb9c   :  { %13325 = vmatprep.subr.bf16.mxu0 %v15746_v51 }
 0xb9d   :  { %15911 = vmatpush3.bf16.msra.mxu1 %v16793_v45 }
 0xb9e   :  { %15912 = vmatprep.subr.bf16.mxu1 %v16794_v10 }
 0xb9f   :  { %13326 = vmatpush1.bf16.msra.mxu0 %v15745_v29 }
 0xba0   :  { %13327 = vmatprep.subr.bf16.mxu0 %v15754_v11 }
 0xba1   :  { %15913 = vmatpush3.bf16.msra.mxu1 %v16795_v12 }
 0xba2   :  { %15914 = vmatprep.subr.bf16.mxu1 %v16796_v16 }
 0xba3   :  { %13328 = vmatpush1.bf16.msra.mxu0 %v15753_v14 }
 0xba4   :  { %13329 = vmatprep.subr.bf16.mxu0 %v15762_v2 }
 0xba5   :  { %15915 = vmatpush3.bf16.msra.mxu1 %v16797_v20 }
 0xba6   :  { %15916 = vmatprep.subr.bf16.mxu1 %v16798_v32 }
 0xba7   :  { %13330 = vmatpush1.bf16.msra.mxu0 %v15761_v24 }
 0xba8   :  { %13331 = vmatprep.subr.bf16.mxu0 %v15770_v27 }
 0xba9   :  { %15917 = vmatpush3.bf16.msra.mxu1 %v16799_v62 }
 0xbaa   :  { %15924 = vmatprep.subr.bf16.mxu1 %v16800_v44 }
 0xbab   :  { %13332 = vmatpush1.bf16.msra.mxu0 %v15769_v33 }
 0xbac   :  { %14002 = vmatmul.mubr.bf16.vlgmr.msra.gmra.mrb[56].mxu1 %v18201_v47  ;;  %v16809_v47 = vld [vmem:[#allocation32 + $0x1a0] sm:$0xff]  }
 0xbad   :  { %15925 = vmatpush3.bf16.msra.mxu1 %v16801_v63 }
 0xbae   :  { %13334 = vmatmul.mubr.bf16.vlgmr.msra.gmra.mrb[60].mxu0 %v18103_v38  ;;  %15926 = vmatprep.subr.bf16.mxu1 %v16802_v46  ;;  %v16810_v38 = vld [vmem:[#allocation32 + $0x1e8] sm:$0xff]  }
 0xbb1   :  { %15927 = vmatpush3.bf16.msra.mxu1 %v16803_v13 }
 0xbb2   :  { %15928 = vmatprep.subr.bf16.mxu1 %v16804_v31 }
 0xbb5   :  { %15929 = vmatpush3.bf16.msra.mxu1 %v16805_v30 }
 0xbb6   :  { %15930 = vmatprep.subr.bf16.mxu1 %v16806_v60 }
 0xbb9   :  { %15931 = vmatpush3.bf16.msra.mxu1 %v16807_v35 }
 0xbba   :  { %15932 = vmatprep.subr.bf16.mxu1 %v16808_v49 }
 0xbbd   :  { %15933 = vmatpush3.bf16.msra.mxu1 %v16809_v47 }
 0xbbe   :  { %15934 = vmatprep.subr.bf16.mxu1 %v16810_v38 }
 0xbc1   :  { %15935 = vmatpush3.bf16.msra.mxu1 %v16811_v48 }
 0xbc2   :  { %15936 = vmatprep.subr.bf16.mxu1 %v16812_v36 }
 0xbc5   :  { %15937 = vmatpush3.bf16.msra.mxu1 %v16813_v40 }
 0xbc6   :  { %15938 = vmatprep.subr.bf16.mxu1 %v16814_v56 }
 0xbc9   :  { %15939 = vmatpush3.bf16.msra.mxu1 %v16815_v19 }
 0xc5f   :  { %v15896_v39 = vpop.f32.mrb[52].mxu1 }
 0xc60   :  { %v15897_v52 = vpop.f32.mrb[53].mxu1 }
 0xc61   :  { %v15898_v55 = vadd.f32 %v15897_v52, %v15896_v39  ;;  %v15899_v4 = vpop.f32.mrb[54].mxu1 }
 0xc62   :  { %v15900_v28 = vpop.f32.mrb[55].mxu1 }
 0xc63   :  { %v13963_v58 = vadd.f32 %v15898_v55, %v13922_v54  ;;  %v15901_v26 = vadd.f32 %v15900_v28, %v15899_v4 }
 0xc65   :  { %v13966_v25 = vadd.f32 %v15901_v26, %v13925_v17 }
 0xc7f   :  { %v15918_v37 = vpop.f32.mrb[56].mxu1 }
 0xc80   :  { %v15919_v7 = vpop.f32.mrb[57].mxu1 }
 0xc81   :  { %v15920_v61 = vadd.f32 %v15919_v7, %v15918_v37  ;;  %v15921_v0 = vpop.f32.mrb[58].mxu1  ;;  %v13335_v57 = vpop.f32.mrb[60].mxu0 }
 0xc82   :  { %v15986_v34 = vadd.f32 %v13335_v57, %v10083_v59  ;;  %v15922_v5 = vpop.f32.mrb[59].mxu1  ;;  %v13337_v6 = vpop.f32.mrb[61].mxu0 }
 0xc83   :  { %v14004_v8 = vadd.f32 %v15920_v61, %v13963_v58  ;;  %v15923_v18 = vadd.f32 %v15922_v5, %v15921_v0  ;;  %v15987_v50 = vadd.f32 %v13337_v6, %v10087_v42  ;;  %v13339_v51 = vpop.f32.mrb[62].mxu0 }
 0xc84   :  { %v15988_v45 = vadd.f32 %v13339_v51, %v10083_v59  ;;  %v13341_v43 = vpop.f32.mrb[63].mxu0  ;;  %v13350_v22 = vmax.f32 %v15986_v34, 0.0 }
 0xc85   :  { %v14007_v9 = vadd.f32 %v15923_v18, %v13966_v25  ;;  %v15989_v10 = vadd.f32 %v13341_v43, %v10087_v42  ;;  %v13351_v11 = vmax.f32 %v15987_v50, 0.0 }
 0xc86   :  { %v13358_v29 = vmax.f32 %v15988_v45, 0.0 }
 0xc87   :  { %v13359_v12 = vmax.f32 %v15989_v10, 0.0 }
 0xc88   :  { %v13366_v23 = vpack.c.bf16 %v13358_v29, %v13350_v22 }
 0xc89   :  { %v13367_v21 = vpack.c.bf16 %v13359_v12, %v13351_v11 }
 0xc8b   :  { %14042 = vmatprep.mubr.bf16.mxu1 %v13367_v21 }
 0xc8c   :  { %14043 = vmatmul.mubr.bf16.vlgmr.msra.gmra.mrb[60].mxu1 %v13366_v23 }
 0xc8d   :  { %17293 = shalt.err (!%p17290_p4)
}
 0xc8e   :  { %s18329_s7 = sld [smem:[#allocation62_spill]] }
 0xc94   :  { %s17294_s29 = scalar_lea.hbm %s18329_s7, 512 }
 0xc95   :  { %p17295_p5 = scmp.ne.s32.totalorder %s18329_s7, %s17294_s29  ;;  %p17298_p6 = scmp.lt.u32.totalorder %s17294_s29, %s18329_s7 }
 0xc97   :  { %p17300_p7 = pnand %p17298_p6, %p17295_p5 }
 0xc99   :  { %17303 = shalt.err (!%p17300_p7)
}
 0xc9a   :  { %s17405_s13 = smov 256   ;;  %s17406_s9 = smov 16  }
 0xc9b   :  { %14076 = dma.vmem_to_hbm [thread:$0]  %s14071_s11, 512, %s18329_s7, [#allocation37], %s17405_s13, %s17405_s13, %s17406_s9  }
 0xc9c   :  { %s17304_s3 = scalar_lea.vmem %s14059_s6, 256  ;;  %p17309_p9 = scmp.lt.s32.totalorder %s14059_s6, %s14059_s6 }
 0xc9d   :  { %p17305_p8 = scmp.ne.s32.totalorder %s14059_s6, %s17304_s3  ;;  %p17310_p10 = scmp.lt.s32.totalorder %s17304_s3, %s17304_s3 }
 0xc9f   :  { %p17311_p11 = por %p17310_p10, %p17309_p9 }
 0xca1   :  { %p17312_p12 = pnand %p17311_p11, %p17305_p8 }
 0xca3   :  { %17315 = shalt.err (!%p17312_p12)
}
 0xca4   :  { %s18330_s16 = sld [smem:[#allocation61_spill]] }
 0xcaa   :  { %s17316_s18 = scalar_lea.hbm %s18330_s16, 256 }
 0xcab   :  { %p17317_p13 = scmp.ne.s32.totalorder %s18330_s16, %s17316_s18  ;;  %p17320_p0 = scmp.lt.u32.totalorder %s17316_s18, %s18330_s16 }
 0xcad   :  { %p17322_p1 = pnand %p17320_p0, %p17317_p13 }
 0xcaf   :  { %17325 = shalt.err (!%p17322_p1)
}
 0xcb0   :  { %14064 = dma.vmem_to_hbm [thread:$0]  %s14059_s6, 256, %s18330_s16, [#allocation4], %s18322_s14, %s18322_s14, %s17385_s30  }
 0xcb1   :  { %s17407_s26 = smov [#allocation38]  }
 0xcb2   :  { %s14082_s1 = sshll.u32 %s17407_s26, 4  ;;  %s14083_s1 = int_to_ptr.vmem [resolvable:$true] %s14082_s1 }
 0xcb3   :  { %s17326_s11 = scalar_lea.vmem %s14083_s1, 256  ;;  %p17331_p3 = scmp.lt.s32.totalorder %s14083_s1, %s14083_s1 }
 0xcb4   :  { %p17327_p2 = scmp.ne.s32.totalorder %s14083_s1, %s17326_s11  ;;  %p17332_p4 = scmp.lt.s32.totalorder %s17326_s11, %s17326_s11 }
 0xcb6   :  { %p17333_p5 = por %p17332_p4, %p17331_p3 }
 0xcb8   :  { %p17334_p6 = pnand %p17333_p5, %p17327_p2 }
 0xd5f   :  { %v15940_v1 = vpop.f32.mrb[60].mxu1 }
 0xd60   :  { %v15941_v15 = vpop.f32.mrb[61].mxu1 }
 0xd61   :  { %v15942_v16 = vadd.f32 %v15941_v15, %v15940_v1  ;;  %v15943_v14 = vpop.f32.mrb[62].mxu1 }
 0xd62   :  { %v15944_v2 = vpop.f32.mrb[63].mxu1 }
 0xd63   :  { %v14045_v20 = vadd.f32 %v15942_v16, %v14004_v8  ;;  %v15945_v41 = vadd.f32 %v15944_v2, %v15943_v14 }
 0xd65   :  { %14051 = vst [vmem:[#allocation38] sm:$0xff] %v14045_v20  ;;  %v14048_v3 = vadd.f32 %v15945_v41, %v14007_v9 }
 0xd67   :  { %14052 = vst [vmem:[#allocation38 + $0x8] sm:$0xff] %v14048_v3 }
 0xd68   :  { %17337 = shalt.err (!%p17334_p6)
}
 0xd69   :  { %s18331_s28 = sld [smem:[#allocation63_spill]] }
 0xd6f   :  { %s17338_s8 = scalar_lea.hbm %s18331_s28, 256 }
 0xd70   :  { %p17339_p7 = scmp.ne.s32.totalorder %s18331_s28, %s17338_s8  ;;  %p17342_p8 = scmp.lt.u32.totalorder %s17338_s8, %s18331_s28 }
 0xd72   :  { %p17344_p9 = pnand %p17342_p8, %p17339_p7 }
 0xd74   :  { %17347 = shalt.err (!%p17344_p9)
}
 0xd75   :  { %14088 = dma.vmem_to_hbm [thread:$0]  %s14083_s1, 256, %s18331_s28, [#allocation37], %s18322_s14, %s18322_s14, %s17385_s30  }
 0xd76   :  { %17370 = dma.done.wait [#allocation4], 256  }
 0xd77   :  { %17371 = vsyncadd [#allocation4], 4294967040 }
 0xd78   :  { %17372 = dma.done.wait [#allocation37], 768  }
 0xd79   :  { %17373 = vsyncadd [#allocation37], 4294966528 }
 0xd7a   :  { %14098 = vsyncpa [#allocation3], 1 }
 0xd7b   :  { %14099 = vsyncpa [#allocation6], 1 }
 0xd7c   :  { %14100 = vsyncpa [#allocation9], 1 }
 0xd7d   :  { %14101 = vsyncpa [#allocation12], 1 }
 0xd7e   :  { %14102 = vsyncpa [#allocation15], 1 }
 0xd7f   :  { %14103 = vsyncpa [#allocation18], 1 }
 0xd80   :  { %14104 = vsyncpa [#allocation21], 1 }
 0xd81   :  { %14105 = vsyncpa [#allocation24], 1 }
 0xd82   :  { %14106 = vsyncpa [#allocation27], 1 }
 0xd83   :  { %14107 = vsyncpa [#allocation30], 1 }
 0xd84   :  { %14108 = vsyncpa [#allocation33], 1 }
 0xd85   :  { %14109 = vsyncpa [#allocation4], 1 }
 0xd86   :  { %14110 = vsyncpa [#allocation37], 1 }

</bundles_post_ra>
